<compile_context>
chip_gen: v7x
topology: tpu7x:2x2x1
jax: 0.10.0
libtpu: 0.0.40
codegen_flags: <defaults>
</compile_context>

<pallas_src>
import numpy as np

import jax
import jax.numpy as jnp
from jax import lax
from jax.experimental import pallas as pl
from jax.experimental.pallas import tpu as pltpu


WIN_SIZE = 8
NUM_HEADS = 12
MLP_RATIO = 2.0
LN_EPS = 1e-6


def _round_up(x, m):
    return (x + m - 1) // m * m


# ---------------------------------------------------------------------------
# 2-D sincos positional embedding table (host-side numpy, identical to the
# get_2d_sincos_pos_embed used by the PyTorch module).
# ---------------------------------------------------------------------------
def _get_1d_sincos_pos_embed(embed_dim, pos):
    omega = np.arange(embed_dim // 2, dtype=np.float64)
    omega /= embed_dim / 2.0
    omega = 1.0 / 10000 ** omega
    out = np.einsum("m,d->md", pos.reshape(-1), omega)
    return np.concatenate([np.sin(out), np.cos(out)], axis=1)


def get_2d_sincos_pos_embed(embed_dim, grid_size, cls_token=False):
    grid_h = np.arange(grid_size, dtype=np.float32)
    grid_w = np.arange(grid_size, dtype=np.float32)
    grid = np.meshgrid(grid_w, grid_h)
    grid = np.stack(grid, axis=0).reshape([2, 1, grid_size, grid_size])
    emb_h = _get_1d_sincos_pos_embed(embed_dim // 2, grid[0])
    emb_w = _get_1d_sincos_pos_embed(embed_dim // 2, grid[1])
    pos = np.concatenate([emb_h, emb_w], axis=1)
    if cls_token:
        pos = np.concatenate([np.zeros([1, embed_dim]), pos], axis=0)
    return pos.astype(np.float32)


# ---------------------------------------------------------------------------
# Fused kernel: Linear(3->C) + mask blend + pos-embed + one ViT block, cls-row
# output only.  Processes nwt windows (nwt*64 tokens) per grid step.
# ---------------------------------------------------------------------------
def _fused_kernel(xyzv_ref, pe_ref, seg_ref,
                  wpe_ref, bpe_ref, inv_ref,
                  ln1w_ref, ln1b_ref, wkv_ref, bkv_ref,
                  q0_ref, scls_ref, vcls_ref, clsx_ref,
                  wp_ref, bp_ref, ln2w_ref, ln2b_ref,
                  w1_ref, b1_ref, w2_ref, b2_ref,
                  o_ref):
    nwt, S, _ = xyzv_ref.shape
    C = o_ref.shape[-1]
    H = scls_ref.shape[-1]
    dh = C // H
    scale = dh ** -0.5
    M = nwt * S

    def layer_norm(t, g, b):
        mu = jnp.mean(t, axis=-1, keepdims=True)
        tc = t - mu
        var = jnp.mean(tc * tc, axis=-1, keepdims=True)
        return tc * lax.rsqrt(var + LN_EPS) * g + b

    # TODO(synk): lax.erf has no Pallas/Mosaic lowering; exact GELU uses the
    # Abramowitz-Stegun 7.1.26 erf approximation (|abs err| < 1.5e-7).
    def erf_approx(t):
        pc = 0.3275911
        a1, a2, a3, a4, a5 = (0.254829592, -0.284496736, 1.421413741,
                              -1.453152027, 1.061405429)
        at = jnp.where(t >= 0.0, t, -t)
        u = 1.0 / (1.0 + pc * at)
        poly = u * (a1 + u * (a2 + u * (a3 + u * (a4 + u * a5))))
        y = 1.0 - poly * jnp.exp(-at * at)
        return jnp.where(t >= 0.0, y, -y)

    def gelu_exact(t):
        return 0.5 * t * (1.0 + erf_approx(t * 0.7071067811865476))

    # ---- fused Linear(3->C) + invalid-token blend + window pos-embed (VPU, K=3) ----
    xyzv = xyzv_ref[...]                                   # (nwt, S, 4) = (x,y,z,valid)
    wpe = wpe_ref[...]                                     # (3, C)
    emb = (xyzv[:, :, 0:1] * wpe[0:1, :]
           + xyzv[:, :, 1:2] * wpe[1:2, :]
           + xyzv[:, :, 2:3] * wpe[2:3, :]
           + bpe_ref[...])                                 # (nwt, S, C)
    valid = xyzv[:, :, 3:4]                                # (nwt, S, 1), exactly 0. / 1.
    # emb is always finite here, so the blend == jnp.where(valid, emb, invalid_token)
    emb = valid * emb + (1.0 - valid) * inv_ref[...]
    x = (emb + pe_ref[...]).reshape(M, C)                  # + 2d sincos pos-embed, flatten

    # ---- LN1 + ONE fused K/V matmul for every token in the tile ----
    h = layer_norm(x, ln1w_ref[...], ln1b_ref[...])        # (M, C)
    kv = jnp.dot(h, wkv_ref[...],
                 preferred_element_type=jnp.float32) + bkv_ref[...]   # (M, 2C)
    k = kv[:, :C]
    v = kv[:, C:]

    # ---- per-head scores of the (constant) cls query vs. every window token ----
    # s[j, h] = scale * sum_{c in head h} q0[c] * k[j, c]   (0/1 head-segment matmul)
    s = lax.dot_general(q0_ref[...] * k, seg_ref[...],
                        (((1,), (0,)), ((), ())),
                        preferred_element_type=jnp.float32) * scale   # (M, H)
    s3 = s.reshape(nwt, S, H)
    s_cls = scls_ref[...]                                  # (1, H), already scaled

    # ---- per-window softmax over the 65 keys (cls + 64 tokens), batched in 3-D ----
    m = jnp.maximum(jnp.max(s3, axis=1, keepdims=True), s_cls[None])  # (nwt, 1, H)
    e_tok = jnp.exp(s3 - m)                                            # (nwt, S, H)
    e_cls = jnp.exp(s_cls[None] - m)                                   # (nwt, 1, H)
    inv = 1.0 / (jnp.sum(e_tok, axis=1, keepdims=True) + e_cls)        # (nwt, 1, H)
    p_tok = (e_tok * inv).reshape(M, H)                                # (M, H)

    # expand head weights back to channels: p_full[j, c] = p_tok[j, head(c)]
    p_full = lax.dot_general(p_tok, seg_ref[...], (((1,), (1,)), ((), ())),
                             preferred_element_type=jnp.float32)       # (M, C)
    # attention output of the cls query; uses the exact identity p_cls = 1 - sum_j p_j:
    #   sum_j p_j v_j + p_cls v_cls = v_cls + sum_j p_j (v_j - v_cls)
    v_cls = vcls_ref[...]                                              # (1, C)
    attn0 = v_cls + jnp.sum((p_full * (v - v_cls)).reshape(nwt, S, C), axis=1)  # (nwt, C)

    # ---- proj + residual + LN2 + MLP + residual, batched over the nwt cls rows ----
    x0 = clsx_ref[...] + (jnp.dot(attn0, wp_ref[...],
                                  preferred_element_type=jnp.float32) + bp_ref[...])
    h2 = layer_norm(x0, ln2w_ref[...], ln2b_ref[...])
    m1 = gelu_exact(jnp.dot(h2, w1_ref[...],
                            preferred_element_type=jnp.float32) + b1_ref[...])
    m2 = jnp.dot(m1, w2_ref[...],
                 preferred_element_type=jnp.float32) + b2_ref[...]
    o_ref[...] = x0 + m2                                               # (nwt, C)


# ---------------------------------------------------------------------------
# Wrapper: full XYZPosEmbed.forward
# ---------------------------------------------------------------------------
def xyz_pos_embed_forward(params, seen_xyz, valid_seen_xyz, *, windows_per_step=32):
    B, H, W, _ = seen_xyz.shape
    C = params["w_pe"].shape[1]
    CH = params["w1"].shape[1]
    ws = WIN_SIZE
    assert H % ws == 0 and W % ws == 0
    assert C % NUM_HEADS == 0
    nh, nw = H // ws, W // ws
    nwin = B * nh * nw
    S = ws * ws
    dh = C // NUM_HEADS
    scale = dh ** -0.5
    f32 = jnp.float32
    HI = jax.lax.Precision.HIGHEST

    # Pack (x, y, z, valid) into one 4-channel tensor and window-partition it (16 B
    # per token, ~24x cheaper than permuting the C-wide embedding like before).
    xyzv = jnp.concatenate(
        [seen_xyz.astype(f32), valid_seen_xyz.astype(f32)[..., None]], axis=-1)
    xyzv = (xyzv.reshape(B, nh, ws, nw, ws, 4)
                 .transpose(0, 1, 3, 2, 4, 5)
                 .reshape(nwin, S, 4))

    # Tile sizing: nwt windows per grid step.  Keep nwt a multiple of 8 so the 2-D
    # (nwt, C) output block satisfies the (8, 128) tiling constraint.
    nwt = max(8, min(_round_up(windows_per_step, 8), _round_up(nwin, 8)))
    nwin_pad = _round_up(nwin, nwt)
    if nwin_pad != nwin:
        xyzv = jnp.pad(xyzv, ((0, nwin_pad - nwin), (0, 0), (0, 0)))

    # The cls row before attention is identical for every window -> constant-fold its
    # LN1 / q / k / v and the cls<->cls score in the wrapper (tiny, weights-only math).
    pe2d = params["pe2d"].astype(f32)                                  # (1, S+1, C)
    cls_x = (params["cls_token"] + pe2d[:, :1, :]).reshape(1, C).astype(f32)
    mu = jnp.mean(cls_x, axis=-1, keepdims=True)
    var = jnp.mean((cls_x - mu) ** 2, axis=-1, keepdims=True)
    h_cls = (cls_x - mu) / jnp.sqrt(var + LN_EPS) * params["ln1_w"] + params["ln1_b"]
    wq = params["w_qkv"][:, :C]
    wk = params["w_qkv"][:, C:2 * C]
    wv = params["w_qkv"][:, 2 * C:]
    bq = params["b_qkv"][:C]
    bk = params["b_qkv"][C:2 * C]
    bv = params["b_qkv"][2 * C:]
    q0 = jnp.matmul(h_cls, wq, precision=HI) + bq                      # (1, C)
    k_cls = jnp.matmul(h_cls, wk, precision=HI) + bk                   # (1, C)
    v_cls = jnp.matmul(h_cls, wv, precision=HI) + bv                   # (1, C)
    s_cls = ((q0 * k_cls).reshape(NUM_HEADS, dh).sum(-1)
             .reshape(1, NUM_HEADS) * scale).astype(f32)               # (1, H)

    # fused K/V weight -> one N=2C matmul in-kernel
    wkv = jnp.concatenate([wk, wv], axis=1).astype(f32)                # (C, 2C)
    bkv = jnp.concatenate([bk, bv]).reshape(1, 2 * C).astype(f32)

    # 0/1 head-segment matrix: seg[c, h] = 1 iff channel c belongs to head h.
    ch = jnp.arange(C)[:, None]
    hd = jnp.arange(NUM_HEADS)[None, :]
    seg = ((ch >= hd * dh) & (ch < (hd + 1) * dh)).astype(f32)         # (C, H)

    def full(shape):
        return pl.BlockSpec(shape, lambda i: (0,) * len(shape))

    out = pl.pallas_call(
        _fused_kernel,
        out_shape=jax.ShapeDtypeStruct((nwin_pad, C), f32),
        grid_spec=pltpu.PrefetchScalarGridSpec(
            num_scalar_prefetch=0,
            grid=(nwin_pad // nwt,),
            in_specs=[
                pl.BlockSpec((nwt, S, 4), lambda i: (i, 0, 0)),   # packed xyz+valid windows
                full((1, S, C)),                                  # window pos-embed (resident)
                full((C, NUM_HEADS)),                             # head-segment matrix
                full((3, C)), full((1, C)), full((1, C)),         # w_pe / b_pe / invalid token
                full((1, C)), full((1, C)),                       # ln1 w / b
                full((C, 2 * C)), full((1, 2 * C)),               # fused k/v weight / bias
                full((1, C)), full((1, NUM_HEADS)),               # cls q / cls-cls score
                full((1, C)), full((1, C)),                       # cls v / cls residual input
                full((C, C)), full((1, C)),                       # attn proj
                full((1, C)), full((1, C)),                       # ln2 w / b
                full((C, CH)), full((1, CH)),                     # mlp fc1
                full((CH, C)), full((1, C)),                      # mlp fc2
            ],
            out_specs=pl.BlockSpec((nwt, C), lambda i: (i, 0)),
        ),
        compiler_params=pltpu.CompilerParams(
            dimension_semantics=("parallel",),
            vmem_limit_bytes=32 * 1024 * 1024),
    )(xyzv, pe2d[:, 1:, :], seg,
      params["w_pe"].astype(f32),
      params["b_pe"].reshape(1, C).astype(f32),
      params["inv_tok"].reshape(1, C).astype(f32),
      params["ln1_w"].reshape(1, C).astype(f32),
      params["ln1_b"].reshape(1, C).astype(f32),
      wkv, bkv,
      q0.astype(f32), s_cls, v_cls.astype(f32), cls_x,
      params["w_proj"].astype(f32), params["b_proj"].reshape(1, C).astype(f32),
      params["ln2_w"].reshape(1, C).astype(f32), params["ln2_b"].reshape(1, C).astype(f32),
      params["w1"].astype(f32), params["b1"].reshape(1, CH).astype(f32),
      params["w2"].astype(f32), params["b2"].reshape(1, C).astype(f32))

    return out[:nwin].reshape(B, nh * nw, C)


# ---------------------------------------------------------------------------
# Pure-JAX reference (mirrors the PyTorch forward literally, all tokens).
# ---------------------------------------------------------------------------
def reference_forward(params, seen_xyz, valid_seen_xyz):
    HI = jax.lax.Precision.HIGHEST
    mm = lambda a, b: jnp.matmul(a, b, precision=HI)
    C = params["w_pe"].shape[1]
    emb = mm(seen_xyz.astype(jnp.float32), params["w_pe"]) + params["b_pe"]
    emb = jnp.where(valid_seen_xyz[..., None], emb, params["inv_tok"])
    B, H, W, _ = emb.shape
    ws = WIN_SIZE
    nh, nw = H // ws, W // ws
    embw = (emb.reshape(B, nh, ws, nw, ws, C)
               .transpose(0, 1, 3, 2, 4, 5)
               .reshape(-1, ws * ws, C))
    embw = embw + params["pe2d"][:, 1:, :]
    cls = params["cls_token"] + params["pe2d"][:, :1, :]
    cls = jnp.broadcast_to(cls, (embw.shape[0], 1, C))
    x = jnp.concatenate([cls, embw], axis=1)

    def ln(t, g, b):
        mu = t.mean(-1, keepdims=True)
        var = ((t - mu) ** 2).mean(-1, keepdims=True)
        return (t - mu) / jnp.sqrt(var + LN_EPS) * g + b

    h = ln(x, params["ln1_w"], params["ln1_b"])
    qkv = mm(h, params["w_qkv"]) + params["b_qkv"]
    q, k, v = jnp.split(qkv, 3, axis=-1)
    dh = C // NUM_HEADS
    heads = lambda t: t.reshape(t.shape[0], t.shape[1], NUM_HEADS, dh).transpose(0, 2, 1, 3)
    qh, kh, vh = heads(q), heads(k), heads(v)
    attn = jnp.einsum("whqd,whkd->whqk", qh, kh, precision=HI) * (dh ** -0.5)
    attn = jax.nn.softmax(attn, axis=-1)
    o = jnp.einsum("whqk,whkd->whqd", attn, vh, precision=HI)
    o = o.transpose(0, 2, 1, 3).reshape(x.shape[0], -1, C)
    x = x + (mm(o, params["w_proj"]) + params["b_proj"])
    h2 = ln(x, params["ln2_w"], params["ln2_b"])
    m = jax.nn.gelu(mm(h2, params["w1"]) + params["b1"], approximate=False)
    x = x + (mm(m, params["w2"]) + params["b2"])
    return x[:, 0].reshape(B, nh * nw, C)


def init_params(key, embed_dim):
    C = embed_dim
    CH = int(C * MLP_RATIO)
    ks = jax.random.split(key, 12)
    std = 0.02
    f32 = jnp.float32
    return {
        "w_pe": std * jax.random.normal(ks[0], (3, C), f32),
        "b_pe": std * jax.random.normal(ks[1], (C,), f32),
        "inv_tok": std * jax.random.normal(ks[2], (C,), f32),
        "cls_token": std * jax.random.normal(ks[3], (1, 1, C), f32),
        "pe2d": jnp.asarray(get_2d_sincos_pos_embed(C, WIN_SIZE, cls_token=True))[None],
        "ln1_w": jnp.ones((C,), f32),
        "ln1_b": jnp.zeros((C,), f32),
        "w_qkv": std * jax.random.normal(ks[4], (C, 3 * C), f32),
        "b_qkv": std * jax.random.normal(ks[5], (3 * C,), f32),
        "w_proj": std * jax.random.normal(ks[6], (C, C), f32),
        "b_proj": std * jax.random.normal(ks[7], (C,), f32),
        "ln2_w": jnp.ones((C,), f32),
        "ln2_b": jnp.zeros((C,), f32),
        "w1": std * jax.random.normal(ks[8], (C, CH), f32),
        "b1": std * jax.random.normal(ks[9], (CH,), f32),
        "w2": std * jax.random.normal(ks[10], (CH, C), f32),
        "b2": std * jax.random.normal(ks[11], (C,), f32),
    }


if __name__ == "__main__":
    embed_dim = 96            # small, but divisible by num_heads=12 and by 4 (sincos)
    B, H, W = 2, 16, 16       # 2x2 = 4 windows of 8x8 per image, 8 windows total

    key = jax.random.PRNGKey(0)
    k_xyz, k_valid, k_params = jax.random.split(key, 3)
    seen_xyz = jax.random.normal(k_xyz, (B, H, W, 3), dtype=jnp.float32)
    valid_seen_xyz = jax.random.uniform(k_valid, (B, H, W)) > 0.3

    params = init_params(k_params, embed_dim)

    fwd = jax.jit(xyz_pos_embed_forward)
    out = jax.block_until_ready(fwd(params, seen_xyz, valid_seen_xyz))

    ref = reference_forward(params, seen_xyz, valid_seen_xyz)

    assert out.shape == (B, (H // WIN_SIZE) * (W // WIN_SIZE), embed_dim)
    assert out.dtype == jnp.float32
    max_err = float(jnp.max(jnp.abs(out - ref)))
    assert jnp.allclose(out, ref, atol=1e-4, rtol=1e-3), max_err

    print("KERNEL_OK")
</pallas_src>

<mosaic_0001>
module attributes {stable_mosaic.version = 11 : i64} {
  func.func @_fused_kernel(%arg0: i32, %arg1: memref<8x64x4xf32, #tpu.memory_space<vmem>>, %arg2: memref<1x64x96xf32, #tpu.memory_space<vmem>>, %arg3: memref<96x12xf32, #tpu.memory_space<vmem>>, %arg4: memref<3x96xf32, #tpu.memory_space<vmem>>, %arg5: memref<1x96xf32, #tpu.memory_space<vmem>>, %arg6: memref<1x96xf32, #tpu.memory_space<vmem>>, %arg7: memref<1x96xf32, #tpu.memory_space<vmem>>, %arg8: memref<1x96xf32, #tpu.memory_space<vmem>>, %arg9: memref<96x192xf32, #tpu.memory_space<vmem>>, %arg10: memref<1x192xf32, #tpu.memory_space<vmem>>, %arg11: memref<1x96xf32, #tpu.memory_space<vmem>>, %arg12: memref<1x12xf32, #tpu.memory_space<vmem>>, %arg13: memref<1x96xf32, #tpu.memory_space<vmem>>, %arg14: memref<1x96xf32, #tpu.memory_space<vmem>>, %arg15: memref<96x96xf32, #tpu.memory_space<vmem>>, %arg16: memref<1x96xf32, #tpu.memory_space<vmem>>, %arg17: memref<1x96xf32, #tpu.memory_space<vmem>>, %arg18: memref<1x96xf32, #tpu.memory_space<vmem>>, %arg19: memref<96x192xf32, #tpu.memory_space<vmem>>, %arg20: memref<1x192xf32, #tpu.memory_space<vmem>>, %arg21: memref<192x96xf32, #tpu.memory_space<vmem>>, %arg22: memref<1x96xf32, #tpu.memory_space<vmem>>, %arg23: memref<8x96xf32, #tpu.memory_space<vmem>>) attributes {dimension_semantics = [#tpu.dimension_semantics<parallel>], iteration_bounds = array<i64: 1>, scalar_prefetch = 0 : i64, scratch_operands = 0 : i64, tpu.core_type = #tpu.core_type<tc>, window_params = [{transform_indices = @transform_0, window_bounds = array<i64: 8, 64, 4>}, {pipeline_mode = #tpu.pipeline_mode<synchronous>, transform_indices = @transform_1, window_bounds = array<i64: 1, 64, 96>}, {pipeline_mode = #tpu.pipeline_mode<synchronous>, transform_indices = @transform_2, window_bounds = array<i64: 96, 12>}, {pipeline_mode = #tpu.pipeline_mode<synchronous>, transform_indices = @transform_3, window_bounds = array<i64: 3, 96>}, {pipeline_mode = #tpu.pipeline_mode<synchronous>, transform_indices = @transform_4, window_bounds = array<i64: 1, 96>}, {pipeline_mode = #tpu.pipeline_mode<synchronous>, transform_indices = @transform_5, window_bounds = array<i64: 1, 96>}, {pipeline_mode = #tpu.pipeline_mode<synchronous>, transform_indices = @transform_6, window_bounds = array<i64: 1, 96>}, {pipeline_mode = #tpu.pipeline_mode<synchronous>, transform_indices = @transform_7, window_bounds = array<i64: 1, 96>}, {pipeline_mode = #tpu.pipeline_mode<synchronous>, transform_indices = @transform_8, window_bounds = array<i64: 96, 192>}, {pipeline_mode = #tpu.pipeline_mode<synchronous>, transform_indices = @transform_9, window_bounds = array<i64: 1, 192>}, {pipeline_mode = #tpu.pipeline_mode<synchronous>, transform_indices = @transform_10, window_bounds = array<i64: 1, 96>}, {pipeline_mode = #tpu.pipeline_mode<synchronous>, transform_indices = @transform_11, window_bounds = array<i64: 1, 12>}, {pipeline_mode = #tpu.pipeline_mode<synchronous>, transform_indices = @transform_12, window_bounds = array<i64: 1, 96>}, {pipeline_mode = #tpu.pipeline_mode<synchronous>, transform_indices = @transform_13, window_bounds = array<i64: 1, 96>}, {pipeline_mode = #tpu.pipeline_mode<synchronous>, transform_indices = @transform_14, window_bounds = array<i64: 96, 96>}, {pipeline_mode = #tpu.pipeline_mode<synchronous>, transform_indices = @transform_15, window_bounds = array<i64: 1, 96>}, {pipeline_mode = #tpu.pipeline_mode<synchronous>, transform_indices = @transform_16, window_bounds = array<i64: 1, 96>}, {pipeline_mode = #tpu.pipeline_mode<synchronous>, transform_indices = @transform_17, window_bounds = array<i64: 1, 96>}, {pipeline_mode = #tpu.pipeline_mode<synchronous>, transform_indices = @transform_18, window_bounds = array<i64: 96, 192>}, {pipeline_mode = #tpu.pipeline_mode<synchronous>, transform_indices = @transform_19, window_bounds = array<i64: 1, 192>}, {pipeline_mode = #tpu.pipeline_mode<synchronous>, transform_indices = @transform_20, window_bounds = array<i64: 192, 96>}, {pipeline_mode = #tpu.pipeline_mode<synchronous>, transform_indices = @transform_21, window_bounds = array<i64: 1, 96>}, {transform_indices = @transform_22, window_bounds = array<i64: 8, 96>}]} {
    %c0 = arith.constant 0 : index
    %c0_0 = arith.constant 0 : index
    %c0_1 = arith.constant 0 : index
    %0 = vector.load %arg1[%c0, %c0_0, %c0_1] : memref<8x64x4xf32, #tpu.memory_space<vmem>>, vector<8x64x4xf32>
    %c0_2 = arith.constant 0 : index
    %c0_3 = arith.constant 0 : index
    %1 = vector.load %arg4[%c0_2, %c0_3] : memref<3x96xf32, #tpu.memory_space<vmem>>, vector<3x96xf32>
    %2 = vector.extract_strided_slice %0 {offsets = [0, 0, 0], sizes = [8, 64, 1], strides = [1, 1, 1]} : vector<8x64x4xf32> to vector<8x64x1xf32>
    %3 = vector.extract_strided_slice %1 {offsets = [0, 0], sizes = [1, 96], strides = [1, 1]} : vector<3x96xf32> to vector<1x96xf32>
    %4 = vector.shape_cast %3 : vector<1x96xf32> to vector<1x1x96xf32>
    %5 = vector.broadcast %2 : vector<8x64x1xf32> to vector<8x64x96xf32>
    %6 = vector.broadcast %4 : vector<1x1x96xf32> to vector<8x64x96xf32>
    %7 = arith.mulf %5, %6 : vector<8x64x96xf32>
    %8 = vector.extract_strided_slice %0 {offsets = [0, 0, 1], sizes = [8, 64, 1], strides = [1, 1, 1]} : vector<8x64x4xf32> to vector<8x64x1xf32>
    %9 = vector.extract_strided_slice %1 {offsets = [1, 0], sizes = [1, 96], strides = [1, 1]} : vector<3x96xf32> to vector<1x96xf32>
    %10 = vector.shape_cast %9 : vector<1x96xf32> to vector<1x1x96xf32>
    %11 = vector.broadcast %8 : vector<8x64x1xf32> to vector<8x64x96xf32>
    %12 = vector.broadcast %10 : vector<1x1x96xf32> to vector<8x64x96xf32>
    %13 = arith.mulf %11, %12 : vector<8x64x96xf32>
    %14 = arith.addf %7, %13 : vector<8x64x96xf32>
    %15 = vector.extract_strided_slice %0 {offsets = [0, 0, 2], sizes = [8, 64, 1], strides = [1, 1, 1]} : vector<8x64x4xf32> to vector<8x64x1xf32>
    %16 = vector.extract_strided_slice %1 {offsets = [2, 0], sizes = [1, 96], strides = [1, 1]} : vector<3x96xf32> to vector<1x96xf32>
    %17 = vector.shape_cast %16 : vector<1x96xf32> to vector<1x1x96xf32>
    %18 = vector.broadcast %15 : vector<8x64x1xf32> to vector<8x64x96xf32>
    %19 = vector.broadcast %17 : vector<1x1x96xf32> to vector<8x64x96xf32>
    %20 = arith.mulf %18, %19 : vector<8x64x96xf32>
    %21 = arith.addf %14, %20 : vector<8x64x96xf32>
    %c0_4 = arith.constant 0 : index
    %c0_5 = arith.constant 0 : index
    %22 = vector.load %arg5[%c0_4, %c0_5] : memref<1x96xf32, #tpu.memory_space<vmem>>, vector<1x96xf32>
    %23 = vector.shape_cast %22 : vector<1x96xf32> to vector<1x1x96xf32>
    %24 = vector.broadcast %23 : vector<1x1x96xf32> to vector<8x64x96xf32>
    %25 = arith.addf %21, %24 : vector<8x64x96xf32>
    %26 = vector.extract_strided_slice %0 {offsets = [0, 0, 3], sizes = [8, 64, 1], strides = [1, 1, 1]} : vector<8x64x4xf32> to vector<8x64x1xf32>
    %27 = vector.broadcast %26 : vector<8x64x1xf32> to vector<8x64x96xf32>
    %28 = arith.mulf %27, %25 : vector<8x64x96xf32>
    %cst = arith.constant 1.000000e+00 : f32
    %29 = vector.broadcast %cst : f32 to vector<8x64x1xf32>
    %30 = arith.subf %29, %26 : vector<8x64x1xf32>
    %c0_6 = arith.constant 0 : index
    %c0_7 = arith.constant 0 : index
    %31 = vector.load %arg6[%c0_6, %c0_7] : memref<1x96xf32, #tpu.memory_space<vmem>>, vector<1x96xf32>
    %32 = vector.shape_cast %31 : vector<1x96xf32> to vector<1x1x96xf32>
    %33 = vector.broadcast %30 : vector<8x64x1xf32> to vector<8x64x96xf32>
    %34 = vector.broadcast %32 : vector<1x1x96xf32> to vector<8x64x96xf32>
    %35 = arith.mulf %33, %34 : vector<8x64x96xf32>
    %36 = arith.addf %28, %35 : vector<8x64x96xf32>
    %c0_8 = arith.constant 0 : index
    %c0_9 = arith.constant 0 : index
    %c0_10 = arith.constant 0 : index
    %37 = vector.load %arg2[%c0_8, %c0_9, %c0_10] : memref<1x64x96xf32, #tpu.memory_space<vmem>>, vector<1x64x96xf32>
    %38 = vector.broadcast %37 : vector<1x64x96xf32> to vector<8x64x96xf32>
    %39 = arith.addf %36, %38 : vector<8x64x96xf32>
    %40 = vector.shape_cast %39 : vector<8x64x96xf32> to vector<512x96xf32>
    %c0_11 = arith.constant 0 : index
    %c0_12 = arith.constant 0 : index
    %41 = vector.load %arg7[%c0_11, %c0_12] : memref<1x96xf32, #tpu.memory_space<vmem>>, vector<1x96xf32>
    %c0_13 = arith.constant 0 : index
    %c0_14 = arith.constant 0 : index
    %42 = vector.load %arg8[%c0_13, %c0_14] : memref<1x96xf32, #tpu.memory_space<vmem>>, vector<1x96xf32>
    %cst_15 = arith.constant dense<0.000000e+00> : vector<512xf32>
    %43 = vector.multi_reduction <add>, %40, %cst_15 [1] : vector<512x96xf32> to vector<512xf32>
    %44 = vector.shape_cast %43 : vector<512xf32> to vector<512x1xf32>
    %cst_16 = arith.constant 9.600000e+01 : f32
    %45 = vector.broadcast %cst_16 : f32 to vector<512x1xf32>
    %46 = arith.divf %44, %45 : vector<512x1xf32>
    %47 = vector.broadcast %46 : vector<512x1xf32> to vector<512x96xf32>
    %48 = arith.subf %40, %47 : vector<512x96xf32>
    %49 = arith.mulf %48, %48 : vector<512x96xf32>
    %cst_17 = arith.constant dense<0.000000e+00> : vector<512xf32>
    %50 = vector.multi_reduction <add>, %49, %cst_17 [1] : vector<512x96xf32> to vector<512xf32>
    %51 = vector.shape_cast %50 : vector<512xf32> to vector<512x1xf32>
    %cst_18 = arith.constant 9.600000e+01 : f32
    %52 = vector.broadcast %cst_18 : f32 to vector<512x1xf32>
    %53 = arith.divf %51, %52 : vector<512x1xf32>
    %cst_19 = arith.constant 9.99999997E-7 : f32
    %54 = vector.broadcast %cst_19 : f32 to vector<512x1xf32>
    %55 = arith.addf %53, %54 : vector<512x1xf32>
    %56 = math.rsqrt %55 : vector<512x1xf32>
    %57 = vector.broadcast %56 : vector<512x1xf32> to vector<512x96xf32>
    %58 = arith.mulf %48, %57 : vector<512x96xf32>
    %59 = vector.broadcast %41 : vector<1x96xf32> to vector<512x96xf32>
    %60 = arith.mulf %58, %59 : vector<512x96xf32>
    %61 = vector.broadcast %42 : vector<1x96xf32> to vector<512x96xf32>
    %62 = arith.addf %60, %61 : vector<512x96xf32>
    %c0_20 = arith.constant 0 : index
    %c0_21 = arith.constant 0 : index
    %63 = vector.load %arg9[%c0_20, %c0_21] : memref<96x192xf32, #tpu.memory_space<vmem>>, vector<96x192xf32>
    %cst_22 = arith.constant dense<0.000000e+00> : vector<512x192xf32>
    %64 = tpu.matmul %62, %63, %cst_22 {dimension_numbers = #tpu.dot_dimension_numbers<[1], [0], [0], [1], [0, 0, 1, 1], [], []>} : vector<512x96xf32>, vector<96x192xf32>, vector<512x192xf32> -> vector<512x192xf32>
    %c0_23 = arith.constant 0 : index
    %c0_24 = arith.constant 0 : index
    %65 = vector.load %arg10[%c0_23, %c0_24] : memref<1x192xf32, #tpu.memory_space<vmem>>, vector<1x192xf32>
    %66 = vector.broadcast %65 : vector<1x192xf32> to vector<512x192xf32>
    %67 = arith.addf %64, %66 : vector<512x192xf32>
    %68 = vector.extract_strided_slice %67 {offsets = [0, 0], sizes = [512, 96], strides = [1, 1]} : vector<512x192xf32> to vector<512x96xf32>
    %69 = vector.extract_strided_slice %67 {offsets = [0, 96], sizes = [512, 96], strides = [1, 1]} : vector<512x192xf32> to vector<512x96xf32>
    %c0_25 = arith.constant 0 : index
    %c0_26 = arith.constant 0 : index
    %70 = vector.load %arg11[%c0_25, %c0_26] : memref<1x96xf32, #tpu.memory_space<vmem>>, vector<1x96xf32>
    %71 = vector.broadcast %70 : vector<1x96xf32> to vector<512x96xf32>
    %72 = arith.mulf %71, %68 : vector<512x96xf32>
    %c0_27 = arith.constant 0 : index
    %c0_28 = arith.constant 0 : index
    %73 = vector.load %arg3[%c0_27, %c0_28] : memref<96x12xf32, #tpu.memory_space<vmem>>, vector<96x12xf32>
    %cst_29 = arith.constant dense<0.000000e+00> : vector<512x12xf32>
    %74 = tpu.matmul %72, %73, %cst_29 {dimension_numbers = #tpu.dot_dimension_numbers<[1], [0], [0], [1], [0, 0, 1, 1], [], []>} : vector<512x96xf32>, vector<96x12xf32>, vector<512x12xf32> -> vector<512x12xf32>
    %cst_30 = arith.constant 0.353553385 : f32
    %75 = vector.broadcast %cst_30 : f32 to vector<512x12xf32>
    %76 = arith.mulf %74, %75 : vector<512x12xf32>
    %77 = vector.shape_cast %76 : vector<512x12xf32> to vector<8x64x12xf32>
    %c0_31 = arith.constant 0 : index
    %c0_32 = arith.constant 0 : index
    %78 = vector.load %arg12[%c0_31, %c0_32] : memref<1x12xf32, #tpu.memory_space<vmem>>, vector<1x12xf32>
    %cst_33 = arith.constant dense<0xFF800000> : vector<8x12xf32>
    %79 = vector.multi_reduction <maximumf>, %77, %cst_33 [1] : vector<8x64x12xf32> to vector<8x12xf32>
    %80 = vector.shape_cast %79 : vector<8x12xf32> to vector<8x1x12xf32>
    %81 = vector.shape_cast %78 : vector<1x12xf32> to vector<1x1x12xf32>
    %82 = vector.broadcast %81 : vector<1x1x12xf32> to vector<8x1x12xf32>
    %83 = arith.maximumf %80, %82 : vector<8x1x12xf32>
    %84 = vector.broadcast %83 : vector<8x1x12xf32> to vector<8x64x12xf32>
    %85 = arith.subf %77, %84 : vector<8x64x12xf32>
    %86 = math.exp %85 : vector<8x64x12xf32>
    %87 = vector.shape_cast %78 : vector<1x12xf32> to vector<1x1x12xf32>
    %88 = vector.broadcast %87 : vector<1x1x12xf32> to vector<8x1x12xf32>
    %89 = arith.subf %88, %83 : vector<8x1x12xf32>
    %90 = math.exp %89 : vector<8x1x12xf32>
    %cst_34 = arith.constant dense<0.000000e+00> : vector<8x12xf32>
    %91 = vector.multi_reduction <add>, %86, %cst_34 [1] : vector<8x64x12xf32> to vector<8x12xf32>
    %92 = vector.shape_cast %91 : vector<8x12xf32> to vector<8x1x12xf32>
    %93 = arith.addf %92, %90 : vector<8x1x12xf32>
    %cst_35 = arith.constant 1.000000e+00 : f32
    %94 = vector.broadcast %cst_35 : f32 to vector<8x1x12xf32>
    %95 = arith.divf %94, %93 : vector<8x1x12xf32>
    %96 = vector.broadcast %95 : vector<8x1x12xf32> to vector<8x64x12xf32>
    %97 = arith.mulf %86, %96 : vector<8x64x12xf32>
    %98 = vector.shape_cast %97 : vector<8x64x12xf32> to vector<512x12xf32>
    %c0_36 = arith.constant 0 : index
    %c0_37 = arith.constant 0 : index
    %99 = vector.load %arg3[%c0_36, %c0_37] : memref<96x12xf32, #tpu.memory_space<vmem>>, vector<96x12xf32>
    %cst_38 = arith.constant dense<0.000000e+00> : vector<512x96xf32>
    %100 = tpu.matmul %98, %99, %cst_38 {dimension_numbers = #tpu.dot_dimension_numbers<[1], [1], [0], [0], [0, 0, 1, 0], [], []>} : vector<512x12xf32>, vector<96x12xf32>, vector<512x96xf32> -> vector<512x96xf32>
    %c0_39 = arith.constant 0 : index
    %c0_40 = arith.constant 0 : index
    %101 = vector.load %arg13[%c0_39, %c0_40] : memref<1x96xf32, #tpu.memory_space<vmem>>, vector<1x96xf32>
    %102 = vector.broadcast %101 : vector<1x96xf32> to vector<512x96xf32>
    %103 = arith.subf %69, %102 : vector<512x96xf32>
    %104 = arith.mulf %100, %103 : vector<512x96xf32>
    %105 = vector.shape_cast %104 : vector<512x96xf32> to vector<8x64x96xf32>
    %cst_41 = arith.constant dense<0.000000e+00> : vector<8x96xf32>
    %106 = vector.multi_reduction <add>, %105, %cst_41 [1] : vector<8x64x96xf32> to vector<8x96xf32>
    %107 = vector.broadcast %101 : vector<1x96xf32> to vector<8x96xf32>
    %108 = arith.addf %107, %106 : vector<8x96xf32>
    %c0_42 = arith.constant 0 : index
    %c0_43 = arith.constant 0 : index
    %109 = vector.load %arg14[%c0_42, %c0_43] : memref<1x96xf32, #tpu.memory_space<vmem>>, vector<1x96xf32>
    %c0_44 = arith.constant 0 : index
    %c0_45 = arith.constant 0 : index
    %110 = vector.load %arg15[%c0_44, %c0_45] : memref<96x96xf32, #tpu.memory_space<vmem>>, vector<96x96xf32>
    %cst_46 = arith.constant dense<0.000000e+00> : vector<8x96xf32>
    %111 = tpu.matmul %108, %110, %cst_46 {dimension_numbers = #tpu.dot_dimension_numbers<[1], [0], [0], [1], [0, 0, 1, 1], [], []>} : vector<8x96xf32>, vector<96x96xf32>, vector<8x96xf32> -> vector<8x96xf32>
    %c0_47 = arith.constant 0 : index
    %c0_48 = arith.constant 0 : index
    %112 = vector.load %arg16[%c0_47, %c0_48] : memref<1x96xf32, #tpu.memory_space<vmem>>, vector<1x96xf32>
    %113 = vector.broadcast %112 : vector<1x96xf32> to vector<8x96xf32>
    %114 = arith.addf %111, %113 : vector<8x96xf32>
    %115 = vector.broadcast %109 : vector<1x96xf32> to vector<8x96xf32>
    %116 = arith.addf %115, %114 : vector<8x96xf32>
    %c0_49 = arith.constant 0 : index
    %c0_50 = arith.constant 0 : index
    %117 = vector.load %arg17[%c0_49, %c0_50] : memref<1x96xf32, #tpu.memory_space<vmem>>, vector<1x96xf32>
    %c0_51 = arith.constant 0 : index
    %c0_52 = arith.constant 0 : index
    %118 = vector.load %arg18[%c0_51, %c0_52] : memref<1x96xf32, #tpu.memory_space<vmem>>, vector<1x96xf32>
    %cst_53 = arith.constant dense<0.000000e+00> : vector<8xf32>
    %119 = vector.multi_reduction <add>, %116, %cst_53 [1] : vector<8x96xf32> to vector<8xf32>
    %120 = vector.shape_cast %119 : vector<8xf32> to vector<8x1xf32>
    %cst_54 = arith.constant 9.600000e+01 : f32
    %121 = vector.broadcast %cst_54 : f32 to vector<8x1xf32>
    %122 = arith.divf %120, %121 : vector<8x1xf32>
    %123 = vector.broadcast %122 : vector<8x1xf32> to vector<8x96xf32>
    %124 = arith.subf %116, %123 : vector<8x96xf32>
    %125 = arith.mulf %124, %124 : vector<8x96xf32>
    %cst_55 = arith.constant dense<0.000000e+00> : vector<8xf32>
    %126 = vector.multi_reduction <add>, %125, %cst_55 [1] : vector<8x96xf32> to vector<8xf32>
    %127 = vector.shape_cast %126 : vector<8xf32> to vector<8x1xf32>
    %cst_56 = arith.constant 9.600000e+01 : f32
    %128 = vector.broadcast %cst_56 : f32 to vector<8x1xf32>
    %129 = arith.divf %127, %128 : vector<8x1xf32>
    %cst_57 = arith.constant 9.99999997E-7 : f32
    %130 = vector.broadcast %cst_57 : f32 to vector<8x1xf32>
    %131 = arith.addf %129, %130 : vector<8x1xf32>
    %132 = math.rsqrt %131 : vector<8x1xf32>
    %133 = vector.broadcast %132 : vector<8x1xf32> to vector<8x96xf32>
    %134 = arith.mulf %124, %133 : vector<8x96xf32>
    %135 = vector.broadcast %117 : vector<1x96xf32> to vector<8x96xf32>
    %136 = arith.mulf %134, %135 : vector<8x96xf32>
    %137 = vector.broadcast %118 : vector<1x96xf32> to vector<8x96xf32>
    %138 = arith.addf %136, %137 : vector<8x96xf32>
    %c0_58 = arith.constant 0 : index
    %c0_59 = arith.constant 0 : index
    %139 = vector.load %arg19[%c0_58, %c0_59] : memref<96x192xf32, #tpu.memory_space<vmem>>, vector<96x192xf32>
    %cst_60 = arith.constant dense<0.000000e+00> : vector<8x192xf32>
    %140 = tpu.matmul %138, %139, %cst_60 {dimension_numbers = #tpu.dot_dimension_numbers<[1], [0], [0], [1], [0, 0, 1, 1], [], []>} : vector<8x96xf32>, vector<96x192xf32>, vector<8x192xf32> -> vector<8x192xf32>
    %c0_61 = arith.constant 0 : index
    %c0_62 = arith.constant 0 : index
    %141 = vector.load %arg20[%c0_61, %c0_62] : memref<1x192xf32, #tpu.memory_space<vmem>>, vector<1x192xf32>
    %142 = vector.broadcast %141 : vector<1x192xf32> to vector<8x192xf32>
    %143 = arith.addf %140, %142 : vector<8x192xf32>
    %cst_63 = arith.constant 5.000000e-01 : f32
    %144 = vector.broadcast %cst_63 : f32 to vector<8x192xf32>
    %145 = arith.mulf %144, %143 : vector<8x192xf32>
    %cst_64 = arith.constant 0.707106769 : f32
    %146 = vector.broadcast %cst_64 : f32 to vector<8x192xf32>
    %147 = arith.mulf %143, %146 : vector<8x192xf32>
    %cst_65 = arith.constant 0.000000e+00 : f32
    %148 = vector.broadcast %cst_65 : f32 to vector<8x192xf32>
    %149 = arith.cmpf oge, %147, %148 : vector<8x192xf32>
    %cst_66 = arith.constant 0.000000e+00 : f32
    %150 = vector.broadcast %cst_66 : f32 to vector<8x192xf32>
    %151 = arith.subf %150, %147 : vector<8x192xf32>
    %152 = arith.select %149, %147, %151 : vector<8x192xi1>, vector<8x192xf32>
    %cst_67 = arith.constant 0.327591091 : f32
    %153 = vector.broadcast %cst_67 : f32 to vector<8x192xf32>
    %154 = arith.mulf %153, %152 : vector<8x192xf32>
    %cst_68 = arith.constant 1.000000e+00 : f32
    %155 = vector.broadcast %cst_68 : f32 to vector<8x192xf32>
    %156 = arith.addf %155, %154 : vector<8x192xf32>
    %cst_69 = arith.constant 1.000000e+00 : f32
    %157 = vector.broadcast %cst_69 : f32 to vector<8x192xf32>
    %158 = arith.divf %157, %156 : vector<8x192xf32>
    %cst_70 = arith.constant 1.06140542 : f32
    %159 = vector.broadcast %cst_70 : f32 to vector<8x192xf32>
    %160 = arith.mulf %158, %159 : vector<8x192xf32>
    %cst_71 = arith.constant -1.45315206 : f32
    %161 = vector.broadcast %cst_71 : f32 to vector<8x192xf32>
    %162 = arith.addf %161, %160 : vector<8x192xf32>
    %163 = arith.mulf %158, %162 : vector<8x192xf32>
    %cst_72 = arith.constant 1.42141378 : f32
    %164 = vector.broadcast %cst_72 : f32 to vector<8x192xf32>
    %165 = arith.addf %164, %163 : vector<8x192xf32>
    %166 = arith.mulf %158, %165 : vector<8x192xf32>
    %cst_73 = arith.constant -0.284496725 : f32
    %167 = vector.broadcast %cst_73 : f32 to vector<8x192xf32>
    %168 = arith.addf %167, %166 : vector<8x192xf32>
    %169 = arith.mulf %158, %168 : vector<8x192xf32>
    %cst_74 = arith.constant 0.254829586 : f32
    %170 = vector.broadcast %cst_74 : f32 to vector<8x192xf32>
    %171 = arith.addf %170, %169 : vector<8x192xf32>
    %172 = arith.mulf %158, %171 : vector<8x192xf32>
    %cst_75 = arith.constant 0.000000e+00 : f32
    %173 = vector.broadcast %cst_75 : f32 to vector<8x192xf32>
    %174 = arith.subf %173, %152 : vector<8x192xf32>
    %175 = arith.mulf %174, %152 : vector<8x192xf32>
    %176 = math.exp %175 : vector<8x192xf32>
    %177 = arith.mulf %172, %176 : vector<8x192xf32>
    %cst_76 = arith.constant 1.000000e+00 : f32
    %178 = vector.broadcast %cst_76 : f32 to vector<8x192xf32>
    %179 = arith.subf %178, %177 : vector<8x192xf32>
    %cst_77 = arith.constant 0.000000e+00 : f32
    %180 = vector.broadcast %cst_77 : f32 to vector<8x192xf32>
    %181 = arith.cmpf oge, %147, %180 : vector<8x192xf32>
    %cst_78 = arith.constant 0.000000e+00 : f32
    %182 = vector.broadcast %cst_78 : f32 to vector<8x192xf32>
    %183 = arith.subf %182, %179 : vector<8x192xf32>
    %184 = arith.select %181, %179, %183 : vector<8x192xi1>, vector<8x192xf32>
    %cst_79 = arith.constant 1.000000e+00 : f32
    %185 = vector.broadcast %cst_79 : f32 to vector<8x192xf32>
    %186 = arith.addf %185, %184 : vector<8x192xf32>
    %187 = arith.mulf %145, %186 : vector<8x192xf32>
    %c0_80 = arith.constant 0 : index
    %c0_81 = arith.constant 0 : index
    %188 = vector.load %arg21[%c0_80, %c0_81] : memref<192x96xf32, #tpu.memory_space<vmem>>, vector<192x96xf32>
    %cst_82 = arith.constant dense<0.000000e+00> : vector<8x96xf32>
    %189 = tpu.matmul %187, %188, %cst_82 {dimension_numbers = #tpu.dot_dimension_numbers<[1], [0], [0], [1], [0, 0, 1, 1], [], []>} : vector<8x192xf32>, vector<192x96xf32>, vector<8x96xf32> -> vector<8x96xf32>
    %c0_83 = arith.constant 0 : index
    %c0_84 = arith.constant 0 : index
    %190 = vector.load %arg22[%c0_83, %c0_84] : memref<1x96xf32, #tpu.memory_space<vmem>>, vector<1x96xf32>
    %191 = vector.broadcast %190 : vector<1x96xf32> to vector<8x96xf32>
    %192 = arith.addf %189, %191 : vector<8x96xf32>
    %193 = arith.addf %116, %192 : vector<8x96xf32>
    %c0_85 = arith.constant 0 : index
    %c0_86 = arith.constant 0 : index
    %194 = vector.load %arg23[%c0_85, %c0_86] : memref<8x96xf32, #tpu.memory_space<vmem>>, vector<8x96xf32>
    tpu.vector_store %arg23[%c0_85, %c0_86], %193 {strides = array<i32>} : memref<8x96xf32, #tpu.memory_space<vmem>>, vector<8x96xf32>,
    return
  }
  func.func @transform_0(%arg0: i32) -> (i32, i32, i32) {
    %c0_i32 = arith.constant 0 : i32
    %c0_i32_0 = arith.constant 0 : i32
    %c0_i32_1 = arith.constant 0 : i32
    return %arg0, %c0_i32, %c0_i32_0 : i32, i32, i32
  }
  func.func @transform_1(%arg0: i32) -> (i32, i32, i32) {
    %c0_i32 = arith.constant 0 : i32
    %c0_i32_0 = arith.constant 0 : i32
    %c0_i32_1 = arith.constant 0 : i32
    %c0_i32_2 = arith.constant 0 : i32
    return %c0_i32, %c0_i32_0, %c0_i32_1 : i32, i32, i32
  }
  func.func @transform_2(%arg0: i32) -> (i32, i32) {
    %c0_i32 = arith.constant 0 : i32
    %c0_i32_0 = arith.constant 0 : i32
    %c0_i32_1 = arith.constant 0 : i32
    return %c0_i32, %c0_i32_0 : i32, i32
  }
  func.func @transform_3(%arg0: i32) -> (i32, i32) {
    %c0_i32 = arith.constant 0 : i32
    %c0_i32_0 = arith.constant 0 : i32
    %c0_i32_1 = arith.constant 0 : i32
    return %c0_i32, %c0_i32_0 : i32, i32
  }
  func.func @transform_4(%arg0: i32) -> (i32, i32) {
    %c0_i32 = arith.constant 0 : i32
    %c0_i32_0 = arith.constant 0 : i32
    %c0_i32_1 = arith.constant 0 : i32
    return %c0_i32, %c0_i32_0 : i32, i32
  }
  func.func @transform_5(%arg0: i32) -> (i32, i32) {
    %c0_i32 = arith.constant 0 : i32
    %c0_i32_0 = arith.constant 0 : i32
    %c0_i32_1 = arith.constant 0 : i32
    return %c0_i32, %c0_i32_0 : i32, i32
  }
  func.func @transform_6(%arg0: i32) -> (i32, i32) {
    %c0_i32 = arith.constant 0 : i32
    %c0_i32_0 = arith.constant 0 : i32
    %c0_i32_1 = arith.constant 0 : i32
    return %c0_i32, %c0_i32_0 : i32, i32
  }
  func.func @transform_7(%arg0: i32) -> (i32, i32) {
    %c0_i32 = arith.constant 0 : i32
    %c0_i32_0 = arith.constant 0 : i32
    %c0_i32_1 = arith.constant 0 : i32
    return %c0_i32, %c0_i32_0 : i32, i32
  }
  func.func @transform_8(%arg0: i32) -> (i32, i32) {
    %c0_i32 = arith.constant 0 : i32
    %c0_i32_0 = arith.constant 0 : i32
    %c0_i32_1 = arith.constant 0 : i32
    return %c0_i32, %c0_i32_0 : i32, i32
  }
  func.func @transform_9(%arg0: i32) -> (i32, i32) {
    %c0_i32 = arith.constant 0 : i32
    %c0_i32_0 = arith.constant 0 : i32
    %c0_i32_1 = arith.constant 0 : i32
    return %c0_i32, %c0_i32_0 : i32, i32
  }
  func.func @transform_10(%arg0: i32) -> (i32, i32) {
    %c0_i32 = arith.constant 0 : i32
    %c0_i32_0 = arith.constant 0 : i32
    %c0_i32_1 = arith.constant 0 : i32
    return %c0_i32, %c0_i32_0 : i32, i32
  }
  func.func @transform_11(%arg0: i32) -> (i32, i32) {
    %c0_i32 = arith.constant 0 : i32
    %c0_i32_0 = arith.constant 0 : i32
    %c0_i32_1 = arith.constant 0 : i32
    return %c0_i32, %c0_i32_0 : i32, i32
  }
  func.func @transform_12(%arg0: i32) -> (i32, i32) {
    %c0_i32 = arith.constant 0 : i32
    %c0_i32_0 = arith.constant 0 : i32
    %c0_i32_1 = arith.constant 0 : i32
    return %c0_i32, %c0_i32_0 : i32, i32
  }
  func.func @transform_13(%arg0: i32) -> (i32, i32) {
    %c0_i32 = arith.constant 0 : i32
    %c0_i32_0 = arith.constant 0 : i32
    %c0_i32_1 = arith.constant 0 : i32
    return %c0_i32, %c0_i32_0 : i32, i32
  }
  func.func @transform_14(%arg0: i32) -> (i32, i32) {
    %c0_i32 = arith.constant 0 : i32
    %c0_i32_0 = arith.constant 0 : i32
    %c0_i32_1 = arith.constant 0 : i32
    return %c0_i32, %c0_i32_0 : i32, i32
  }
  func.func @transform_15(%arg0: i32) -> (i32, i32) {
    %c0_i32 = arith.constant 0 : i32
    %c0_i32_0 = arith.constant 0 : i32
    %c0_i32_1 = arith.constant 0 : i32
    return %c0_i32, %c0_i32_0 : i32, i32
  }
  func.func @transform_16(%arg0: i32) -> (i32, i32) {
    %c0_i32 = arith.constant 0 : i32
    %c0_i32_0 = arith.constant 0 : i32
    %c0_i32_1 = arith.constant 0 : i32
    return %c0_i32, %c0_i32_0 : i32, i32
  }
  func.func @transform_17(%arg0: i32) -> (i32, i32) {
    %c0_i32 = arith.constant 0 : i32
    %c0_i32_0 = arith.constant 0 : i32
    %c0_i32_1 = arith.constant 0 : i32
    return %c0_i32, %c0_i32_0 : i32, i32
  }
  func.func @transform_18(%arg0: i32) -> (i32, i32) {
    %c0_i32 = arith.constant 0 : i32
    %c0_i32_0 = arith.constant 0 : i32
    %c0_i32_1 = arith.constant 0 : i32
    return %c0_i32, %c0_i32_0 : i32, i32
  }
  func.func @transform_19(%arg0: i32) -> (i32, i32) {
    %c0_i32 = arith.constant 0 : i32
    %c0_i32_0 = arith.constant 0 : i32
    %c0_i32_1 = arith.constant 0 : i32
    return %c0_i32, %c0_i32_0 : i32, i32
  }
  func.func @transform_20(%arg0: i32) -> (i32, i32) {
    %c0_i32 = arith.constant 0 : i32
    %c0_i32_0 = arith.constant 0 : i32
    %c0_i32_1 = arith.constant 0 : i32
    return %c0_i32, %c0_i32_0 : i32, i32
  }
  func.func @transform_21(%arg0: i32) -> (i32, i32) {
    %c0_i32 = arith.constant 0 : i32
    %c0_i32_0 = arith.constant 0 : i32
    %c0_i32_1 = arith.constant 0 : i32
    return %c0_i32, %c0_i32_0 : i32, i32
  }
  func.func @transform_22(%arg0: i32) -> (i32, i32) {
    %c0_i32 = arith.constant 0 : i32
    %c0_i32_0 = arith.constant 0 : i32
    return %arg0, %c0_i32 : i32, i32
  }
}

</mosaic_0001>

<bundles_post_ra>
// kernel: xyz_pos_embed_forward.1
= control target key start
LH: loop header
LB: loop body
LE: loop exit
PB: predicated region body
PF: predicated region fallthrough
CT: control target
= control target key end

     0   :  { %s14616_s0 = inlined_call_operand.vmem [shape: f32[8,64,4], index: 0, kind: input, shape index: {}]   ;;  %s14617_s1 = inlined_call_operand.vmem [shape: f32[1,64,96], index: 1, kind: input, shape index: {}]   ;;  %s14618_s2 = inlined_call_operand.vmem [shape: f32[96,12], index: 2, kind: input, shape index: {}]   ;;  %s14619_s3 = inlined_call_operand.vmem [shape: f32[3,96], index: 3, kind: input, shape index: {}]   ;;  %s14620_s4 = inlined_call_operand.vmem [shape: f32[1,96], index: 4, kind: input, shape index: {}]   ;;  %s14621_s5 = inlined_call_operand.vmem [shape: f32[1,96], index: 5, kind: input, shape index: {}]   ;;  %s14622_s6 = inlined_call_operand.vmem [shape: f32[1,96], index: 6, kind: input, shape index: {}]   ;;  %s14623_s7 = inlined_call_operand.vmem [shape: f32[1,96], index: 7, kind: input, shape index: {}]   ;;  %s14624_s8 = inlined_call_operand.vmem [shape: f32[96,192], index: 8, kind: input, shape index: {}]   ;;  %s14625_s9 = inlined_call_operand.vmem [shape: f32[1,192], index: 9, kind: input, shape index: {}]   ;;  %s14626_s10 = inlined_call_operand.vmem [shape: f32[1,96], index: 10, kind: input, shape index: {}]   ;;  %s14627_s11 = inlined_call_operand.vmem [shape: f32[1,12], index: 11, kind: input, shape index: {}]   ;;  %s14628_s12 = inlined_call_operand.vmem [shape: f32[1,96], index: 12, kind: input, shape index: {}]   ;;  %s14629_s13 = inlined_call_operand.vmem [shape: f32[1,96], index: 13, kind: input, shape index: {}]   ;;  %s14630_s14 = inlined_call_operand.vmem [shape: f32[96,96], index: 14, kind: input, shape index: {}]   ;;  %s14631_s15 = inlined_call_operand.vmem [shape: f32[1,96], index: 15, kind: input, shape index: {}]   ;;  %s14632_s16 = inlined_call_operand.vmem [shape: f32[1,96], index: 16, kind: input, shape index: {}]   ;;  %s14633_s17 = inlined_call_operand.vmem [shape: f32[1,96], index: 17, kind: input, shape index: {}]   ;;  %s14634_s18 = inlined_call_operand.vmem [shape: f32[96,192], index: 18, kind: input, shape index: {}]   ;;  %s14635_s19 = inlined_call_operand.vmem [shape: f32[1,192], index: 19, kind: input, shape index: {}]   ;;  %s14636_s20 = inlined_call_operand.vmem [shape: f32[192,96], index: 20, kind: input, shape index: {}]   ;;  %s14637_s21 = inlined_call_operand.vmem [shape: f32[1,96], index: 21, kind: input, shape index: {}]   ;;  %s14638_s22 = inlined_call_operand.hbm [shape: f32[8,96], index: 22, kind: output, shape index: {}]  }
   0x1   :  { %14768 = sst [smem:[#allocation116_spill]] %s14616_s0 }
   0x2   :  { %14769 = sst [smem:[#allocation117_spill]] %s14617_s1 }
   0x3   :  { %14770 = sst [smem:[#allocation118_spill]] %s14618_s2 }
   0x4   :  { %14771 = sst [smem:[#allocation119_spill]] %s14619_s3 }
   0x5   :  { %14772 = sst [smem:[#allocation120_spill]] %s14620_s4 }
   0x6   :  { %14773 = sst [smem:[#allocation121_spill]] %s14621_s5 }
   0x7   :  { %14774 = sst [smem:[#allocation122_spill]] %s14622_s6 }
   0x8   :  { %s14775_s29 = sld [smem:[#allocation116_spill]]  ;;  %v14651_v2 = vmov 2   ;;  %v14647_v4 = vmov 0  }
   0x9   :  { %8147 = vset.pattern.permute.xlu0 %v14651_v2  ;;  %8144 = vset.pattern.permute.xlu1 %v14651_v2 }
   0xe   :  { %v73_v0 = vld [vmem:[%s14775_s29 + $0x8] sm:$0xff]  ;;  %v8692_v1 = vld [vmem:[%s14775_s29] sm:$0xff] }
   0xf   :  { %918 = vperm.xlu0 %8147, %v73_v0   ;;  %914 = vperm.xlu1 %8144, %v8692_v1   ;;  %v8700_v3 = vld [vmem:[%s14775_s29 + $0x20] sm:$0xff] }
  0x13   :  { %930 = vperm.xlu0 %8147, %v8700_v3   ;;  %8145 = vset.pattern.permute.xlu1 %v14647_v4 }
  0x14   :  { %27 = vsyncpa [#allocation3], 0  ;;  %144 = vperm.xlu1 %8145, %v73_v0   ;;  %v8707_v5 = vld [vmem:[%s14775_s29 + $0x38] sm:$0xff]  ;;  %v14649_v6 = vmov 1   ;;  %v8714_v7 = vld [vmem:[%s14775_s29 + $0x50] sm:$0xff]  ;;  %v14645_v9 = vmov 3   ;;  %v457_v50 = vlaneseq }
  0x15   :  { %v8720_v8 = vld [vmem:[%s14775_s29 + $0x10] sm:$0xff]  ;;  %v1693_v10 = vsub.f32 1.0, %v73_v0  ;;  %v1692_v11 = vsub.f32 1.0, %v8692_v1  ;;  %v8732_v12 = vld [vmem:[%s14775_s29 + $0x18] sm:$0xff]  ;;  %v1696_v13 = vsub.f32 1.0, %v8700_v3  ;;  %v1699_v15 = vsub.f32 1.0, %v8707_v5 }
  0x16   :  { %v8742_v14 = vld [vmem:[%s14775_s29 + $0x30] sm:$0xff]  ;;  %v8751_v16 = vld [vmem:[%s14775_s29 + $0x48] sm:$0xff]  ;;  %v1702_v17 = vsub.f32 1.0, %v8714_v7  ;;  %v8761_v18 = vld [vmem:[%s14775_s29 + $0x60] sm:$0xff]  ;;  %v458_v53 = vshrl.u32 %v457_v50, 7  ;;  %s14783_s2 = sld [smem:[#allocation119_spill]] }
  0x17   :  { %942 = vperm.xlu0 %8147, %v8707_v5   ;;  %v8766_v19 = vld [vmem:[%s14775_s29 + $0x68] sm:$0xff]  ;;  %v8781_v22 = vld [vmem:[%s14775_s29 + $0x78] sm:$0xff]  ;;  %v8803_v23 = vld [vmem:[%s14775_s29 + $0x80] sm:$0xff]  ;;  %s14786_s28 = sld [smem:[#allocation120_spill]]  ;;  %s14787_s0 = sld [smem:[#allocation121_spill]]  ;;  %vm2285_vm0 = vcmask 785408  }
  0x18   :  { %8146 = vset.pattern.permute.xlu1 %v14649_v6  ;;  %v1705_v20 = vsub.f32 1.0, %v8766_v19  ;;  %v8775_v21 = vld [vmem:[%s14775_s29 + $0x28] sm:$0xff]  ;;  %14776 = vst [vmem:[#allocation5_spill] sm:$0xff] %v8803_v23  ;;  %v8808_v24 = vld [vmem:[%s14775_s29 + $0x40] sm:$0xff]  ;;  %v8815_v25 = vld [vmem:[%s14775_s29 + $0x98] sm:$0xff]  ;;  %v8900_v55 = vsub.s32 0, %v458_v53 }
  0x19   :  { %530 = vperm.xlu1 %8146, %v73_v0   ;;  %14777 = vst [vmem:[#allocation6_spill] sm:$0xff] %v8815_v25  ;;  %v8835_v26 = vld [vmem:[%s14775_s29 + $0x58] sm:$0xff]  ;;  %v8855_v30 = vld [vmem:[%s14775_s29 + $0x70] sm:$0xff]  ;;  %v8872_v36 = vld [vmem:[%s14775_s29 + $0x88] sm:$0xff]  ;;  %v8902_v56 = vsub.s32 1, %v458_v53  ;;  %v1171_v62 = vsub.s32 2, %v458_v53 }
  0x1a   :  { %14778 = vst [vmem:[#allocation7_spill] sm:$0xff] %v8855_v30  ;;  %14779 = vst [vmem:[#allocation8_spill] sm:$0xff] %v8872_v36  ;;  %s14788_s5 = sld [smem:[#allocation117_spill]]  ;;  %s14895_s1 = sld [smem:[#allocation122_spill]]  ;;  %vm4661_vm1 = vcmask 97280   ;;  %vm6508_vm3 = vcmask 261120  }
  0x1b   :  { %954 = vperm.xlu0 %8147, %v8714_v7   ;;  %14781 = vst [vmem:[#allocation10_spill] sm:$0xff] %v8900_v55  ;;  %14782 = vst [vmem:[#allocation11_spill] sm:$0xff] %v8902_v56  ;;  %s15150_s27 = sld [smem:[#allocation118_spill]]  ;;  %s8566_s23 = smov 96   ;;  %vm6878_vm4 = vcmask 1041409   ;;  %vm6880_vm5 = vcmask 1042434  }
  0x1c   :  { %v136_v59 = vld [vmem:[%s14783_s2] sm:$0x7]  ;;  %vm12586_vm2 = vmpackc.low %vm4661_vm1, %vm4661_vm1  ;;  %vm6882_vm6 = vcmask 1043459   ;;  %vm8569_vm7 = vmmov 0   ;;  %vm6884_vm8 = vcmask 1044484   ;;  %vm6886_vm9 = vcmask 1045509  }
  0x1d   :  { %8148 = vset.pattern.permute.xlu1 %v14647_v4  ;;  %v8910_v60 = vrot.slane %v136_v59, %v8900_v55  ;;  %v8913_v61 = vrot.slane %v136_v59, %v8902_v56  ;;  %vm6888_vm10 = vcmask 1046534   ;;  %vm6890_vm11 = vcmask 1047559  }
  0x1e   :  { %149 = vperm.xlu1 %8148, %v8720_v8   ;;  %vm7220_vm14 = vcmask 523264  }
  0x1f   :  { %8166 = vset.pattern.permute.xlu0 %v14645_v9 }
  0x20   :  { %1373 = vperm.xlu0 %8166, %v8692_v1  }
  0x22   :  { %8149 = vset.pattern.permute.xlu1 %v14649_v6 }
  0x23   :  { %534 = vperm.xlu1 %8149, %v8720_v8  }
  0x24   :  { %1764 = vperm.xlu0 %8166, %v1693_v10  }
  0x27   :  { %8150 = vset.pattern.permute.xlu1 %v14645_v9 }
  0x28   :  { %1385 = vperm.xlu0 %8166, %v8732_v12   ;;  %1759 = vperm.xlu1 %8150, %v1692_v11   ;;  %v8921_v11 = vrot.slane %v136_v59, %v1171_v62 }
  0x2c   :  { %1779 = vperm.xlu0 %8166, %v1696_v13   ;;  %8151 = vset.pattern.permute.xlu1 %v14651_v2 }
  0x2d   :  { %922 = vperm.xlu1 %8151, %v8720_v8  }
  0x30   :  { %1397 = vperm.xlu0 %8166, %v8742_v14  }
  0x31   :  { %8152 = vset.pattern.permute.xlu1 %v14649_v6 }
  0x32   :  { %538 = vperm.xlu1 %8152, %v8732_v12  }
  0x34   :  { %1794 = vperm.xlu0 %8166, %v1699_v15  }
  0x36   :  { %8153 = vset.pattern.permute.xlu1 %v14645_v9 }
  0x37   :  { %1377 = vperm.xlu1 %8153, %v73_v0  }
  0x38   :  { %1409 = vperm.xlu0 %8166, %v8751_v16  }
  0x3b   :  { %8154 = vset.pattern.permute.xlu1 %v14651_v2 }
  0x3c   :  { %1809 = vperm.xlu0 %8166, %v1702_v17   ;;  %926 = vperm.xlu1 %8154, %v8732_v12  }
  0x40   :  { %1421 = vperm.xlu0 %8166, %v8761_v18   ;;  %8155 = vset.pattern.permute.xlu1 %v14647_v4 }
  0x41   :  { %159 = vperm.xlu1 %8155, %v8700_v3  }
  0x44   :  { %1824 = vperm.xlu0 %8166, %v1705_v20  }
  0x45   :  { %164 = vperm.xlu1 %8155, %v8775_v21  }
  0x48   :  { %1433 = vperm.xlu0 %8166, %v8781_v22  }
  0x49   :  { %8156 = vset.pattern.permute.xlu1 %v14649_v6 }
  0x4a   :  { %546 = vperm.xlu1 %8156, %v8775_v21  }
  0x4c   :  { %8174 = vset.pattern.permute.xlu0 %v14649_v6 }
  0x4d   :  { %526 = vperm.xlu0 %8174, %v8692_v1  }
  0x4e   :  { %8157 = vset.pattern.permute.xlu1 %v14651_v2 }
  0x4f   :  { %934 = vperm.xlu1 %8157, %v8775_v21  }
  0x51   :  { %542 = vperm.xlu0 %8174, %v8700_v3  }
  0x53   :  { %8158 = vset.pattern.permute.xlu1 %v14649_v6 }
  0x54   :  { %550 = vperm.xlu1 %8158, %v8742_v14  }
  0x55   :  { %554 = vperm.xlu0 %8174, %v8707_v5  }
  0x58   :  { %8159 = vset.pattern.permute.xlu1 %v14651_v2 }
  0x59   :  { %566 = vperm.xlu0 %8174, %v8714_v7   ;;  %938 = vperm.xlu1 %8159, %v8742_v14  }
  0x5d   :  { %578 = vperm.xlu0 %8174, %v8766_v19   ;;  %8160 = vset.pattern.permute.xlu1 %v14647_v4 }
  0x5e   :  { %174 = vperm.xlu1 %8160, %v8707_v5  }
  0x61   :  { %590 = vperm.xlu0 %8174, %v8803_v23  }
  0x62   :  { %179 = vperm.xlu1 %8160, %v8808_v24  }
  0x65   :  { %602 = vperm.xlu0 %8174, %v8815_v25  }
  0x66   :  { %8161 = vset.pattern.permute.xlu1 %v14649_v6 }
  0x67   :  { %558 = vperm.xlu1 %8161, %v8808_v24  }
  0x69   :  { %8175 = vset.pattern.permute.xlu0 %v14647_v4 }
  0x6a   :  { %139 = vperm.xlu0 %8175, %v8692_v1  }
  0x6b   :  { %8162 = vset.pattern.permute.xlu1 %v14651_v2 }
  0x6c   :  { %946 = vperm.xlu1 %8162, %v8808_v24  }
  0x6e   :  { %154 = vperm.xlu0 %8175, %v8732_v12  }
  0x70   :  { %8163 = vset.pattern.permute.xlu1 %v14649_v6 }
  0x71   :  { %562 = vperm.xlu1 %8163, %v8751_v16  }
  0x72   :  { %169 = vperm.xlu0 %8175, %v8742_v14  }
  0x75   :  { %8164 = vset.pattern.permute.xlu1 %v14651_v2 }
  0x76   :  { %950 = vperm.xlu1 %8164, %v8751_v16  }
  0x7a   :  { %8165 = vset.pattern.permute.xlu1 %v14647_v4 }
  0x7b   :  { %189 = vperm.xlu1 %8165, %v8714_v7  }
  0x7f   :  { %194 = vperm.xlu1 %8165, %v8835_v26  }
  0x83   :  { %8167 = vset.pattern.permute.xlu1 %v14649_v6 }
  0x84   :  { %570 = vperm.xlu1 %8167, %v8835_v26  }
  0x88   :  { %8168 = vset.pattern.permute.xlu1 %v14651_v2 }
  0x89   :  { %958 = vperm.xlu1 %8168, %v8835_v26  }
  0x8d   :  { %8169 = vset.pattern.permute.xlu1 %v14649_v6 }
  0x8e   :  { %v919_v27 = vpop.permute.xlu0 %918  ;;  %574 = vperm.xlu1 %8169, %v8761_v18   ;;  %v915_v41 = vpop.permute.xlu1 %914 }
  0x8f   :  { %v1174_v20 = vmul.f32 %v8921_v11, %v919_v27  ;;  %v8940_v27 = vld [vmem:[%s14787_s0] ss:$0 sm:$0xff] }
  0x92   :  { %v8844_v28 = vpop.permute.xlu0 %930  ;;  %8170 = vset.pattern.permute.xlu1 %v14651_v2 }
  0x93   :  { %962 = vperm.xlu1 %8170, %v8761_v18   ;;  %v145_v44 = vpop.permute.xlu1 %144 }
  0x94   :  { %v462_v1 = vmul.f32 %v8910_v60, %v145_v44  ;;  %v8933_v44 = vld [vmem:[%s14786_s28] ss:$0 sm:$0xff] }
  0x96   :  { %v8848_v29 = vpop.permute.xlu0 %942 }
  0x97   :  { %8171 = vset.pattern.permute.xlu1 %v14647_v4 }
  0x98   :  { %204 = vperm.xlu1 %8171, %v8766_v19   ;;  %v531_v46 = vpop.permute.xlu1 %530 }
  0x99   :  { %v786_v10 = vmul.f32 %v8913_v61, %v531_v46  ;;  %v1173_v46 = vmul.f32 %v8921_v11, %v915_v41 }
  0x9a   :  { %v8857_v31 = vpop.permute.xlu0 %954 }
  0x9b   :  { %v850_v15 = vadd.f32 %v786_v10, %v462_v1 }
  0x9c   :  { %209 = vperm.xlu1 %8171, %v8855_v30  }
  0x9d   :  { %v8890_v48 = vpop.permute.xlu1 %149 }
  0x9f   :  { %v1374_v32 = vpop.permute.xlu0 %1373 }
  0xa0   :  { %8172 = vset.pattern.permute.xlu1 %v14649_v6 }
  0xa1   :  { %582 = vperm.xlu1 %8172, %v8855_v30  }
  0xa2   :  { %v8896_v52 = vpop.permute.xlu1 %534 }
  0xa3   :  { %v1765_v33 = vpop.permute.xlu0 %1764 }
  0xa5   :  { %586 = vperm.xlu1 %8172, %v8781_v22  }
  0xa7   :  { %v8863_v34 = vpop.permute.xlu0 %1385  ;;  %v1760_v57 = vpop.permute.xlu1 %1759 }
  0xa9   :  { %8173 = vset.pattern.permute.xlu1 %v14647_v4 }
  0xaa   :  { %219 = vperm.xlu1 %8173, %v8803_v23  }
  0xab   :  { %v8867_v35 = vpop.permute.xlu0 %1779 }
  0xac   :  { %v8917_v0 = vpop.permute.xlu1 %922 }
  0xae   :  { %224 = vperm.xlu1 %8173, %v8872_v36  }
  0xaf   :  { %v8875_v37 = vpop.permute.xlu0 %1397 }
  0xb1   :  { %v8925_v17 = vpop.permute.xlu1 %538 }
  0xb2   :  { %8176 = vset.pattern.permute.xlu1 %v14645_v9  ;;  %v1238_v9 = vadd.f32 %v1174_v20, %v850_v15  ;;  %v2084_v20 = vmul.f32 %v8940_v27, %v1765_v33 }
  0xb3   :  { %v8878_v38 = vpop.permute.xlu0 %1794 }
  0xb4   :  { %v1309_v1 = vadd.f32 %v8933_v44, %v1238_v9 }
  0xb6   :  { %v1378_v62 = vpop.permute.xlu1 %1377 }
  0xb7   :  { %v8880_v39 = vpop.permute.xlu0 %1409 }
  0xbb   :  { %v8882_v40 = vpop.permute.xlu0 %1809 }
  0xbf   :  { %v8884_v42 = vpop.permute.xlu0 %1421 }
  0xc3   :  { %v8886_v43 = vpop.permute.xlu0 %1824 }
  0xc7   :  { %v8888_v45 = vpop.permute.xlu0 %1433 }
  0xc8   :  { %14780 = vst [vmem:[#allocation9_spill] sm:$0xff] %v8888_v45 }
  0xcc   :  { %v527_v47 = vpop.permute.xlu0 %526 }
  0xcd   :  { %v785_v53 = vmul.f32 %v8913_v61, %v527_v47  ;;  %v1629_v47 = vmul.f32 %v1378_v62, %v1309_v1 }
  0xcf   :  { %v2148_v9 = vadd.f32 %v2084_v20, %v1629_v47 }
  0xd0   :  { %v8892_v49 = vpop.permute.xlu0 %542 }
  0xd4   :  { %v8894_v51 = vpop.permute.xlu0 %554 }
  0xd8   :  { %v8898_v54 = vpop.permute.xlu0 %566 }
  0xdc   :  { %v8904_v58 = vpop.permute.xlu0 %578 }
  0xe0   :  { %v8915_v63 = vpop.permute.xlu0 %590 }
  0xe1   :  { %14784 = vst [vmem:[#allocation12_spill] sm:$0xff] %v8915_v63 }
  0xe4   :  { %v8923_v13 = vpop.permute.xlu0 %602 }
  0xe5   :  { %14785 = vst [vmem:[#allocation13_spill] sm:$0xff] %v8923_v13  ;;  %v14793_v13 = vmov 2  }
  0xe9   :  { %v140_v50 = vpop.permute.xlu0 %139 }
  0xea   :  { %v461_v4 = vmul.f32 %v8910_v60, %v140_v50  ;;  %v2083_v50 = vmul.f32 %v8940_v27, %v1760_v57  ;;  %v8963_v57 = vpop.permute.xlu1 %926 }
  0xec   :  { %v849_v59 = vadd.f32 %v785_v53, %v461_v4  ;;  %v8948_v4 = vld [vmem:[%s14788_s5] sm:$0xff]  ;;  %v8953_v53 = vld [vmem:[%s14788_s5 + $0x8] sm:$0xff] }
  0xee   :  { %v1237_v10 = vadd.f32 %v1173_v46, %v849_v59  ;;  %v8967_v59 = vpop.permute.xlu1 %159 }
  0xf0   :  { %v1308_v15 = vadd.f32 %v8933_v44, %v1237_v10  ;;  %v1694_v10 = vsub.f32 1.0, %v8720_v8 }
  0xf2   :  { %v1628_v6 = vmul.f32 %v1374_v32, %v1308_v15  ;;  %v8961_v32 = vadd.f32 %v8953_v53, %v2148_v9  ;;  %v8969_v62 = vpop.permute.xlu1 %164  ;;  %v1695_v15 = vsub.f32 1.0, %v8732_v12  ;;  %v1697_v9 = vsub.f32 1.0, %v8775_v21 }
  0xf4   :  { %v2147_v41 = vadd.f32 %v2083_v50, %v1628_v6  ;;  %14790 = vst [vmem:[#allocation15_spill] sm:$0xff] %v8961_v32  ;;  %v2289_v6 = vsel %vm2285_vm0, %v8961_v32, 0.0 }
  0xf6   :  { %v8956_v46 = vadd.f32 %v8948_v4, %v2147_v41  ;;  %v8971_v1 = vpop.permute.xlu1 %546  ;;  %v1698_v41 = vsub.f32 1.0, %v8742_v14 }
  0xf8   :  { %14789 = vst [vmem:[#allocation14_spill] sm:$0xff] %v8956_v46  ;;  %v2286_v33 = vsel %vm2285_vm0, %v8956_v46, 0.0 }
  0xf9   :  { %2287 = vadd.xlane.f32.xlu1 %v2286_v33 }
  0xfa   :  { %v8975_v47 = vpop.permute.xlu1 %934 }
  0xfd   :  { %2290 = vadd.xlane.f32.xlu1 %v2289_v6  ;;  %v1701_v6 = vsub.f32 1.0, %v8751_v16 }
  0xfe   :  { %v8978_v20 = vpop.permute.xlu1 %550 }
 0x102   :  { %v8981_v50 = vpop.permute.xlu1 %938 }
 0x10e   :  { %1381 = vperm.xlu1 %8176, %v8720_v8   ;;  %v8986_v8 = vpop.permute.xlu1 %174 }
 0x112   :  { %1769 = vperm.xlu1 %8176, %v1694_v10   ;;  %v8988_v33 = vpop.permute.xlu1 %179 }
 0x116   :  { %1774 = vperm.xlu1 %8176, %v1695_v15   ;;  %v8991_v12 = vpop.permute.xlu1 %558  ;;  %v1704_v15 = vsub.f32 1.0, %v8761_v18 }
 0x11a   :  { %1389 = vperm.xlu1 %8176, %v8700_v3   ;;  %v1700_v3 = vsub.f32 1.0, %v8808_v24 }
 0x11e   :  { %1393 = vperm.xlu1 %8176, %v8775_v21   ;;  %v8996_v21 = vpop.permute.xlu1 %946 }
 0x122   :  { %1784 = vperm.xlu1 %8176, %v1697_v9   ;;  %v8998_v14 = vpop.permute.xlu1 %562 }
 0x126   :  { %1789 = vperm.xlu1 %8176, %v1698_v41   ;;  %v9003_v10 = vpop.permute.xlu1 %950 }
 0x12a   :  { %1401 = vperm.xlu1 %8176, %v8707_v5   ;;  %v1703_v5 = vsub.f32 1.0, %v8835_v26 }
 0x12e   :  { %1405 = vperm.xlu1 %8176, %v8808_v24   ;;  %v9006_v24 = vpop.permute.xlu1 %189 }
 0x132   :  { %1799 = vperm.xlu1 %8176, %v1700_v3   ;;  %v9008_v9 = vpop.permute.xlu1 %194 }
 0x136   :  { %1804 = vperm.xlu1 %8176, %v1701_v6   ;;  %v9013_v41 = vpop.permute.xlu1 %570 }
 0x13a   :  { %1413 = vperm.xlu1 %8176, %v8714_v7   ;;  %v1706_v7 = vsub.f32 1.0, %v8855_v30  ;;  %v9016_v3 = vpop.permute.xlu1 %958 }
 0x13e   :  { %1417 = vperm.xlu1 %8176, %v8835_v26   ;;  %v1707_v26 = vsub.f32 1.0, %v8781_v22  ;;  %v9019_v6 = vpop.permute.xlu1 %574 }
 0x142   :  { %1814 = vperm.xlu1 %8176, %v1703_v5   ;;  %v1709_v5 = vsub.f32 1.0, %v8872_v36  ;;  %v9028_v2 = vpop.permute.xlu1 %962 }
 0x146   :  { %1819 = vperm.xlu1 %8176, %v1704_v15   ;;  %v9026_v15 = vld [vmem:[%s14775_s29 + $0x90] sm:$0xff]  ;;  %v9037_v55 = vpop.permute.xlu1 %204 }
 0x14a   :  { %1425 = vperm.xlu1 %8176, %v8766_v19   ;;  %v9039_v46 = vpop.permute.xlu1 %209 }
 0x14b   :  { %14792 = vst [vmem:[#allocation17_spill] sm:$0xff] %v9039_v46 }
 0x14e   :  { %1429 = vperm.xlu1 %8176, %v8855_v30   ;;  %v9042_v32 = vpop.permute.xlu1 %582 }
 0x14f   :  { %14794 = vst [vmem:[#allocation18_spill] sm:$0xff] %v9042_v32  ;;  %v1175_v32 = vmul.f32 %v8921_v11, %v8917_v0 }
 0x152   :  { %1829 = vperm.xlu1 %8176, %v1706_v7   ;;  %v1710_v7 = vsub.f32 1.0, %v9026_v15 }
 0x156   :  { %1834 = vperm.xlu1 %8176, %v1707_v26   ;;  %v9034_v26 = vld [vmem:[%s14775_s29 + $0xa0] sm:$0xff] }
 0x157   :  { %14791 = vst [vmem:[#allocation16_spill] sm:$0xff] %v9034_v26  ;;  %v1712_v56 = vsub.f32 1.0, %v9034_v26  ;;  %v787_v26 = vmul.f32 %v8913_v61, %v8896_v52  ;;  %v465_v52 = vmul.f32 %v8910_v60, %v8967_v59 }
 0x15a   :  { %1437 = vperm.xlu1 %8176, %v8803_v23   ;;  %v155_v23 = vpop.permute.xlu0 %154 }
 0x15b   :  { %v464_v45 = vmul.f32 %v8910_v60, %v155_v23  ;;  %v789_v23 = vmul.f32 %v8913_v61, %v8892_v49  ;;  %v790_v49 = vmul.f32 %v8913_v61, %v8971_v1 }
 0x15e   :  { %1441 = vperm.xlu1 %8176, %v8872_v36  }
 0x162   :  { %1844 = vperm.xlu1 %8176, %v1709_v5   ;;  %v9044_v5 = vpop.permute.xlu1 %586 }
 0x163   :  { %14795 = vst [vmem:[#allocation19_spill] sm:$0xff] %v9044_v5 }
 0x166   :  { %1849 = vperm.xlu1 %8176, %v1710_v7   ;;  %v9046_v63 = vpop.permute.xlu1 %219  ;;  %v463_v7 = vmul.f32 %v8910_v60, %v8890_v48  ;;  %v1176_v48 = vmul.f32 %v8921_v11, %v8963_v57  ;;  %v170_v57 = vpop.permute.xlu0 %169 }
 0x167   :  { %14796 = vst [vmem:[#allocation20_spill] sm:$0xff] %v9046_v63  ;;  %v788_v63 = vmul.f32 %v8913_v61, %v8925_v17  ;;  %v1177_v17 = vmul.f32 %v8921_v11, %v8844_v28  ;;  %v791_v28 = vmul.f32 %v8913_v61, %v8978_v20 }
 0x168   :  { %v851_v46 = vadd.f32 %v787_v26, %v463_v7 }
 0x16a   :  { %1859 = vperm.xlu1 %8176, %v1712_v56   ;;  %v9048_v25 = vpop.permute.xlu1 %224  ;;  %v1239_v36 = vadd.f32 %v1175_v32, %v851_v46  ;;  %v466_v32 = vmul.f32 %v8910_v60, %v8969_v62 }
 0x16b   :  { %14797 = vst [vmem:[#allocation21_spill] sm:$0xff] %v9048_v25  ;;  %v852_v25 = vadd.f32 %v788_v63, %v464_v45 }
 0x16c   :  { %v1310_v0 = vadd.f32 %v8933_v44, %v1239_v36 }
 0x16d   :  { %v1240_v7 = vadd.f32 %v1176_v48, %v852_v25  ;;  %v9081_v25 = vld [vmem:[%s14788_s5 + $0x10] sm:$0xff]  ;;  %v467_v48 = vmul.f32 %v8910_v60, %v170_v57 }
 0x16e   :  { %8178 = vset.pattern.permute.xlu1 %v14793_v13 }
 0x16f   :  { %v1311_v46 = vadd.f32 %v8933_v44, %v1240_v7 }
 0x186   :  { %v9054_v56 = vpop.xlane.xlu1 %2287 }
 0x187   :  { %14798 = vst [vmem:[#allocation22_spill] sm:$0xff] %v9054_v56  ;;  %v853_v56 = vadd.f32 %v789_v23, %v465_v52  ;;  %v1631_v52 = vmul.f32 %v8863_v34, %v1311_v46  ;;  %v854_v23 = vadd.f32 %v790_v49, %v466_v32  ;;  %v9113_v49 = vld [vmem:[%s14788_s5 + $0x20] sm:$0xff] }
 0x189   :  { %v1241_v59 = vadd.f32 %v1177_v17, %v853_v56  ;;  %v1178_v56 = vmul.f32 %v8921_v11, %v8975_v47  ;;  %v468_v47 = vmul.f32 %v8910_v60, %v8986_v8 }
 0x18a   :  { %v9061_v5 = vpop.xlane.xlu1 %2290 }
 0x18b   :  { %v1312_v34 = vadd.f32 %v8933_v44, %v1241_v59  ;;  %v1242_v57 = vadd.f32 %v1178_v56, %v854_v23 }
 0x18e   :  { %v1382_v26 = vpop.permute.xlu1 %1381 }
 0x18f   :  { %v1630_v45 = vmul.f32 %v1382_v26, %v1310_v0  ;;  %v9094_v26 = vld [vmem:[%s14788_s5 + $0x18] sm:$0xff]  ;;  %v2087_v0 = vmul.f32 %v8940_v27, %v8867_v35 }
 0x192   :  { %v1770_v30 = vpop.permute.xlu1 %1769 }
 0x193   :  { %v2085_v63 = vmul.f32 %v8940_v27, %v1770_v30 }
 0x195   :  { %v2149_v36 = vadd.f32 %v2085_v63, %v1630_v45  ;;  %v1179_v45 = vmul.f32 %v8921_v11, %v8981_v50  ;;  %v855_v63 = vadd.f32 %v791_v28, %v467_v48  ;;  %v792_v50 = vmul.f32 %v8913_v61, %v8894_v51 }
 0x196   :  { %v1775_v30 = vpop.permute.xlu1 %1774  ;;  %v1313_v48 = vadd.f32 %v8933_v44, %v1242_v57 }
 0x197   :  { %v2086_v62 = vmul.f32 %v8940_v27, %v1775_v30  ;;  %v9089_v1 = vadd.f32 %v9081_v25, %v2149_v36  ;;  %v1243_v28 = vadd.f32 %v1179_v45, %v855_v63  ;;  %v856_v8 = vadd.f32 %v792_v50, %v468_v47 }
 0x199   :  { %v2150_v20 = vadd.f32 %v2086_v62, %v1631_v52  ;;  %v2292_v7 = vsel %vm2285_vm0, %v9089_v1, 0.0  ;;  %v1180_v62 = vmul.f32 %v8921_v11, %v8848_v29 }
 0x19a   :  { %2293 = vadd.xlane.f32.xlu1 %v2292_v7  ;;  %v1390_v17 = vpop.permute.xlu1 %1389  ;;  %v9132_v7 = vld [vmem:[%s14788_s5 + $0x28] sm:$0xff] }
 0x19b   :  { %v1632_v46 = vmul.f32 %v1390_v17, %v1312_v34  ;;  %v9106_v32 = vadd.f32 %v9094_v26, %v2150_v20  ;;  %v1314_v20 = vadd.f32 %v8933_v44, %v1243_v28  ;;  %v1244_v34 = vadd.f32 %v1180_v62, %v856_v8 }
 0x19c   :  { %v793_v17 = vmul.f32 %v8913_v61, %v8991_v12  ;;  %v1181_v12 = vmul.f32 %v8921_v11, %v8996_v21 }
 0x19d   :  { %14799 = vst [vmem:[#allocation23_spill] sm:$0xff] %v9106_v32  ;;  %v2151_v35 = vadd.f32 %v2087_v0, %v1632_v46  ;;  %v2295_v36 = vsel %vm2285_vm0, %v9106_v32, 0.0  ;;  %v469_v0 = vmul.f32 %v8910_v60, %v8988_v33  ;;  %v1634_v63 = vmul.f32 %v8875_v37, %v1314_v20 }
 0x19e   :  { %2296 = vadd.xlane.f32.xlu1 %v2295_v36  ;;  %v1394_v59 = vpop.permute.xlu1 %1393  ;;  %v1315_v57 = vadd.f32 %v8933_v44, %v1244_v34 }
 0x19f   :  { %v9120_v30 = vadd.f32 %v9113_v49, %v2151_v35  ;;  %v1633_v56 = vmul.f32 %v1394_v59, %v1313_v48  ;;  %v9147_v35 = vld [vmem:[%s14788_s5 + $0x30] sm:$0xff]  ;;  %v857_v33 = vadd.f32 %v793_v17, %v469_v0  ;;  %v2090_v59 = vmul.f32 %v8940_v27, %v8878_v38  ;;  %v9161_v48 = vld [vmem:[%s14788_s5 + $0x38] sm:$0xff] }
 0x1a1   :  { %14800 = vst [vmem:[#allocation24_spill] sm:$0xff] %v9120_v30  ;;  %v2298_v52 = vsel %vm2285_vm0, %v9120_v30, 0.0 }
 0x1a2   :  { %2299 = vadd.xlane.f32.xlu1 %v2298_v52  ;;  %v1785_v23 = vpop.permute.xlu1 %1784  ;;  %v1245_v52 = vadd.f32 %v1181_v12, %v857_v33  ;;  %v471_v12 = vmul.f32 %v8910_v60, %v9006_v24  ;;  %v794_v24 = vmul.f32 %v8913_v61, %v8998_v14 }
 0x1a3   :  { %v2088_v51 = vmul.f32 %v8940_v27, %v1785_v23 }
 0x1a4   :  { %v1316_v38 = vadd.f32 %v8933_v44, %v1245_v52  ;;  %v796_v52 = vmul.f32 %v8913_v61, %v9013_v41 }
 0x1a5   :  { %v2152_v29 = vadd.f32 %v2088_v51, %v1633_v56 }
 0x1a6   :  { %v1790_v45 = vpop.permute.xlu1 %1789 }
 0x1a7   :  { %v2089_v46 = vmul.f32 %v8940_v27, %v1790_v45  ;;  %v9141_v47 = vadd.f32 %v9132_v7, %v2152_v29 }
 0x1a9   :  { %14801 = vst [vmem:[#allocation25_spill] sm:$0xff] %v9141_v47  ;;  %v2153_v36 = vadd.f32 %v2089_v46, %v1634_v63  ;;  %v2301_v37 = vsel %vm2285_vm0, %v9141_v47, 0.0  ;;  %v9184_v63 = vld [vmem:[%s14775_s29 + $0xa8] sm:$0xff]  ;;  %v9190_v46 = vld [vmem:[%s14775_s29 + $0xb8] sm:$0xff] }
 0x1aa   :  { %2302 = vadd.xlane.f32.xlu1 %v2301_v37  ;;  %v1402_v50 = vpop.permute.xlu1 %1401 }
 0x1ab   :  { %v1635_v28 = vmul.f32 %v1402_v50, %v1315_v57  ;;  %v9156_v8 = vadd.f32 %v9147_v35, %v2153_v36  ;;  %v9208_v57 = vld [vmem:[%s14775_s29 + $0xf8] sm:$0xff]  ;;  %v795_v36 = vmul.f32 %v8913_v61, %v8898_v54 }
 0x1ad   :  { %14802 = vst [vmem:[#allocation26_spill] sm:$0xff] %v9156_v8  ;;  %v2154_v21 = vadd.f32 %v2090_v59, %v1635_v28  ;;  %v2304_v62 = vsel %vm2285_vm0, %v9156_v8, 0.0  ;;  %v859_v59 = vadd.f32 %v795_v36, %v471_v12  ;;  %v472_v28 = vmul.f32 %v8910_v60, %v9008_v9 }
 0x1ae   :  { %2305 = vadd.xlane.f32.xlu1 %v2304_v62  ;;  %v1406_v23 = vpop.permute.xlu1 %1405  ;;  %v1182_v9 = vmul.f32 %v8921_v11, %v9003_v10 }
 0x1af   :  { %v9166_v56 = vadd.f32 %v9161_v48, %v2154_v21  ;;  %v1636_v34 = vmul.f32 %v1406_v23, %v1316_v38  ;;  %v860_v23 = vadd.f32 %v796_v52, %v472_v28  ;;  %v1184_v38 = vmul.f32 %v8921_v11, %v9016_v3 }
 0x1b0   :  { %v2093_v28 = vmul.f32 %v8940_v27, %v8882_v40 }
 0x1b1   :  { %14803 = vst [vmem:[#allocation27_spill] sm:$0xff] %v9166_v56  ;;  %v2307_v51 = vsel %vm2285_vm0, %v9166_v56, 0.0 }
 0x1b2   :  { %2308 = vadd.xlane.f32.xlu1 %v2307_v51  ;;  %v1800_v20 = vpop.permute.xlu1 %1799 }
 0x1b3   :  { %v2091_v0 = vmul.f32 %v8940_v27, %v1800_v20 }
 0x1b5   :  { %v2155_v17 = vadd.f32 %v2091_v0, %v1636_v34 }
 0x1b6   :  { %v1805_v33 = vpop.permute.xlu1 %1804 }
 0x1b7   :  { %v9173_v29 = vadd.f32 %v8948_v4, %v2155_v17  ;;  %v1248_v17 = vadd.f32 %v1184_v38, %v860_v23 }
 0x1b9   :  { %14804 = vst [vmem:[#allocation28_spill] sm:$0xff] %v9173_v29  ;;  %v2310_v45 = vsel %vm2285_vm0, %v9173_v29, 0.0 }
 0x1ba   :  { %2311 = vadd.xlane.f32.xlu0 %v2310_v45  ;;  %v1414_v37 = vpop.permute.xlu1 %1413  ;;  %v1185_v45 = vmul.f32 %v8921_v11, %v9028_v2 }
 0x1be   :  { %v1418_v51 = vpop.permute.xlu1 %1417 }
 0x1d0   :  { %184 = vperm.xlu0 %8175, %v8751_v16   ;;  %v9196_v16 = vld [vmem:[%s14775_s29 + $0xc8] sm:$0xff] }
 0x1d4   :  { %199 = vperm.xlu0 %8175, %v8761_v18   ;;  %v9202_v18 = vld [vmem:[%s14775_s29 + $0xd8] sm:$0xff] }
 0x1d8   :  { %214 = vperm.xlu0 %8175, %v8781_v22  }
 0x1dc   :  { %229 = vperm.xlu0 %8175, %v9026_v15  }
 0x1e0   :  { %244 = vperm.xlu0 %8175, %v9184_v63  }
 0x1e4   :  { %254 = vperm.xlu0 %8175, %v9190_v46  }
 0x1e8   :  { %264 = vperm.xlu0 %8175, %v9196_v16  }
 0x1ec   :  { %274 = vperm.xlu0 %8175, %v9202_v18  }
 0x1f0   :  { %294 = vperm.xlu0 %8175, %v9208_v57  }
 0x1f4   :  { %8177 = vset.pattern.permute.xlu0 %v14793_v13  ;;  %v14826_v13 = vld [vmem:[#allocation17_spill] sm:$0xff] }
 0x1f5   :  { %966 = vperm.xlu0 %8177, %v8766_v19   ;;  %v1183_v19 = vmul.f32 %v8921_v11, %v8857_v31  ;;  %v797_v31 = vmul.f32 %v8913_v61, %v9019_v6  ;;  %v2092_v6 = vmul.f32 %v8940_v27, %v1805_v33 }
 0x1f7   :  { %v1247_v62 = vadd.f32 %v1183_v19, %v859_v59  ;;  %v1815_v59 = vpop.permute.xlu1 %1814 }
 0x1f8   :  { %v2094_v2 = vmul.f32 %v8940_v27, %v1815_v59  ;;  %v474_v59 = vmul.f32 %v8910_v60, %v9037_v55 }
 0x1f9   :  { %v1318_v34 = vadd.f32 %v8933_v44, %v1247_v62 }
 0x1fb   :  { %v1638_v12 = vmul.f32 %v1414_v37, %v1318_v34  ;;  %v1820_v40 = vpop.permute.xlu1 %1819 }
 0x247   :  { %v9217_v50 = vpop.xlane.xlu0 %2311 }
 0x248   :  { %14805 = vst [vmem:[#allocation29_spill] sm:$0xff] %v9217_v50 }
 0x24f   :  { %v185_v21 = vpop.permute.xlu0 %184 }
 0x250   :  { %v470_v54 = vmul.f32 %v8910_v60, %v185_v21  ;;  %v1319_v21 = vadd.f32 %v8933_v44, %v1248_v17 }
 0x252   :  { %v858_v20 = vadd.f32 %v794_v24, %v470_v54  ;;  %v2157_v24 = vadd.f32 %v2093_v28, %v1638_v12  ;;  %v1639_v23 = vmul.f32 %v1418_v51, %v1319_v21  ;;  %v798_v28 = vmul.f32 %v8913_v61, %v8904_v58  ;;  %v14813_v58 = vld [vmem:[#allocation7_spill] sm:$0xff] }
 0x253   :  { %v200_v41 = vpop.permute.xlu0 %199 }
 0x254   :  { %v1246_v0 = vadd.f32 %v1182_v9, %v858_v20  ;;  %v473_v14 = vmul.f32 %v8910_v60, %v200_v41  ;;  %v2158_v9 = vadd.f32 %v2094_v2, %v1639_v23  ;;  %v1426_v2 = vpop.permute.xlu1 %1425 }
 0x256   :  { %v1317_v3 = vadd.f32 %v8933_v44, %v1246_v0  ;;  %v861_v36 = vadd.f32 %v797_v31, %v473_v14  ;;  %v2095_v31 = vmul.f32 %v8940_v27, %v1820_v40  ;;  %v9265_v34 = vadd.f32 %v9094_v26, %v2158_v9  ;;  %v14814_v9 = vld [vmem:[#allocation8_spill] sm:$0xff] }
 0x257   :  { %v9239_v10 = vpop.permute.xlu0 %214 }
 0x258   :  { %v1249_v52 = vadd.f32 %v1185_v45, %v861_v36  ;;  %v1637_v19 = vmul.f32 %v8880_v39, %v1317_v3  ;;  %v9256_v39 = vadd.f32 %v9081_v25, %v2157_v24  ;;  %14808 = vst [vmem:[#allocation32_spill] sm:$0xff] %v9265_v34  ;;  %v2319_v17 = vsel %vm2285_vm0, %v9265_v34, 0.0 }
 0x25a   :  { %v1320_v37 = vadd.f32 %v8933_v44, %v1249_v52  ;;  %v2156_v62 = vadd.f32 %v2092_v6, %v1637_v19  ;;  %14807 = vst [vmem:[#allocation31_spill] sm:$0xff] %v9256_v39  ;;  %v2316_v51 = vsel %vm2285_vm0, %v9256_v39, 0.0  ;;  %v862_v52 = vadd.f32 %v798_v28, %v474_v59 }
 0x25b   :  { %v9248_v54 = vpop.permute.xlu0 %229 }
 0x25c   :  { %v9251_v38 = vadd.f32 %v8953_v53, %v2156_v62  ;;  %v1640_v20 = vmul.f32 %v8884_v42, %v1320_v37  ;;  %v2096_v37 = vmul.f32 %v8940_v27, %v8886_v43  ;;  %v9302_v43 = vld [vmem:[%s14775_s29 + $0xe0] sm:$0xff] }
 0x25e   :  { %14806 = vst [vmem:[#allocation30_spill] sm:$0xff] %v9251_v38  ;;  %v2313_v33 = vsel %vm2285_vm0, %v9251_v38, 0.0  ;;  %v2159_v0 = vadd.f32 %v2095_v31, %v1640_v20  ;;  %v1430_v20 = vpop.permute.xlu1 %1429 }
 0x25f   :  { %v9259_v41 = vpop.permute.xlu0 %244  ;;  %2314 = vadd.xlane.f32.xlu1 %v2313_v33  ;;  %v9308_v33 = vld [vmem:[%s14775_s29 + $0x110] sm:$0xff] }
 0x260   :  { %v9272_v42 = vadd.f32 %v9113_v49, %v2159_v0 }
 0x262   :  { %14809 = vst [vmem:[#allocation33_spill] sm:$0xff] %v9272_v42  ;;  %v2322_v12 = vsel %vm2285_vm0, %v9272_v42, 0.0  ;;  %v1830_v31 = vpop.permute.xlu1 %1829  ;;  %v14827_v42 = vld [vmem:[#allocation18_spill] sm:$0xff] }
 0x263   :  { %v9267_v14 = vpop.permute.xlu0 %254  ;;  %2317 = vadd.xlane.f32.xlu1 %v2316_v51  ;;  %v799_v34 = vmul.f32 %v8913_v61, %v14827_v42 }
 0x266   :  { %v1835_v51 = vpop.permute.xlu1 %1834 }
 0x267   :  { %v9274_v45 = vpop.permute.xlu0 %264  ;;  %2320 = vadd.xlane.f32.xlu1 %v2319_v17 }
 0x26a   :  { %v9312_v0 = vpop.permute.xlu1 %1437 }
 0x26b   :  { %v9278_v3 = vpop.permute.xlu0 %274  ;;  %2323 = vadd.xlane.f32.xlu1 %v2322_v12 }
 0x26c   :  { %14810 = vst [vmem:[#allocation34_spill] sm:$0xff] %v9278_v3  ;;  %v2097_v3 = vmul.f32 %v8940_v27, %v1830_v31  ;;  %v9397_v31 = vld [vmem:[%s14775_s29 + $0x118] sm:$0xff] }
 0x26e   :  { %v9314_v17 = vpop.permute.xlu1 %1441 }
 0x26f   :  { %v9280_v36 = vpop.permute.xlu0 %294 }
 0x270   :  { %14811 = vst [vmem:[#allocation35_spill] sm:$0xff] %v9280_v36  ;;  %v476_v36 = vmul.f32 %v8910_v60, %v9239_v10  ;;  %v2098_v10 = vmul.f32 %v8940_v27, %v1835_v51  ;;  %v9404_v51 = vld [vmem:[%s14775_s29 + $0x120] sm:$0xff] }
 0x272   :  { %v9316_v12 = vpop.permute.xlu1 %1844 }
 0x274   :  { %v967_v6 = vpop.permute.xlu0 %966 }
 0x275   :  { %v1186_v19 = vmul.f32 %v8921_v11, %v967_v6 }
 0x276   :  { %v9318_v59 = vpop.permute.xlu1 %1849 }
 0x277   :  { %v1250_v21 = vadd.f32 %v1186_v19, %v862_v52 }
 0x279   :  { %v1321_v24 = vadd.f32 %v8933_v44, %v1250_v21 }
 0x27a   :  { %v9320_v28 = vpop.permute.xlu1 %1859 }
 0x27b   :  { %v1641_v62 = vmul.f32 %v1426_v2, %v1321_v24 }
 0x27d   :  { %v2160_v23 = vadd.f32 %v2096_v37, %v1641_v62 }
 0x27e   :  { %v9322_v6 = vpop.xlane.xlu1 %2293 }
 0x27f   :  { %v9291_v40 = vadd.f32 %v9132_v7, %v2160_v23 }
 0x281   :  { %14812 = vst [vmem:[#allocation36_spill] sm:$0xff] %v9291_v40  ;;  %v2325_v55 = vsel %vm2285_vm0, %v9291_v40, 0.0  ;;  %v475_v40 = vmul.f32 %v8910_v60, %v14826_v13 }
 0x282   :  { %2326 = vadd.xlane.f32.xlu1 %v2325_v55  ;;  %v9324_v52 = vpop.xlane.xlu1 %2296 }
 0x283   :  { %14816 = vst [vmem:[#allocation7_spill] sm:$0xff] %v9324_v52  ;;  %v863_v38 = vadd.f32 %v799_v34, %v475_v40 }
 0x286   :  { %v9326_v19 = vpop.xlane.xlu1 %2299 }
 0x287   :  { %14817 = vst [vmem:[#allocation8_spill] sm:$0xff] %v9326_v19 }
 0x28a   :  { %v9328_v21 = vpop.xlane.xlu1 %2302 }
 0x28b   :  { %14818 = vst [vmem:[#allocation37_spill] sm:$0xff] %v9328_v21 }
 0x28e   :  { %v9330_v24 = vpop.xlane.xlu1 %2305 }
 0x28f   :  { %14819 = vst [vmem:[#allocation38_spill] sm:$0xff] %v9330_v24 }
 0x292   :  { %v9332_v2 = vpop.xlane.xlu1 %2308 }
 0x293   :  { %970 = vperm.xlu1 %8178, %v14813_v58   ;;  %14820 = vst [vmem:[#allocation39_spill] sm:$0xff] %v9332_v2  ;;  %v109_v2 = vld [vmem:[%s14775_s29 + $0x128] sm:$0xff] }
 0x297   :  { %974 = vperm.xlu1 %8178, %v8781_v22   ;;  %v14815_v22 = vmov 1  }
 0x29b   :  { %982 = vperm.xlu1 %8178, %v14814_v9  }
 0x29f   :  { %986 = vperm.xlu1 %8178, %v9026_v15  }
 0x2a3   :  { %1026 = vperm.xlu1 %8178, %v9302_v43  }
 0x2a7   :  { %1050 = vperm.xlu1 %8178, %v9308_v33  }
 0x2ab   :  { %8179 = vset.pattern.permute.xlu1 %v14815_v22 }
 0x2ec   :  { %v9334_v37 = vpop.xlane.xlu1 %2314 }
 0x2ed   :  { %14821 = vst [vmem:[#allocation40_spill] sm:$0xff] %v9334_v37 }
 0x2f0   :  { %v9336_v62 = vpop.xlane.xlu1 %2317 }
 0x2f1   :  { %14822 = vst [vmem:[#allocation41_spill] sm:$0xff] %v9336_v62  ;;  %v14828_v62 = vld [vmem:[#allocation19_spill] sm:$0xff] }
 0x2f4   :  { %v9338_v23 = vpop.xlane.xlu1 %2320 }
 0x2f5   :  { %14823 = vst [vmem:[#allocation42_spill] sm:$0xff] %v9338_v23  ;;  %v800_v23 = vmul.f32 %v8913_v61, %v14828_v62  ;;  %v14830_v62 = vld [vmem:[#allocation9_spill] sm:$0xff] }
 0x2f7   :  { %v864_v50 = vadd.f32 %v800_v23, %v476_v36  ;;  %v9409_v23 = vld [vmem:[%s14775_s29 + $0xc0] sm:$0xff] }
 0x2f8   :  { %v9340_v55 = vpop.xlane.xlu1 %2323 }
 0x2f9   :  { %14824 = vst [vmem:[#allocation43_spill] sm:$0xff] %v9340_v55 }
 0x30f   :  { %v9342_v58 = vpop.xlane.xlu1 %2326 }
 0x310   :  { %14825 = vst [vmem:[#allocation44_spill] sm:$0xff] %v9342_v58 }
 0x313   :  { %v971_v39 = vpop.permute.xlu1 %970 }
 0x314   :  { %v1187_v37 = vmul.f32 %v8921_v11, %v971_v39 }
 0x316   :  { %v1251_v29 = vadd.f32 %v1187_v37, %v863_v38 }
 0x317   :  { %v975_v55 = vpop.permute.xlu1 %974 }
 0x318   :  { %v1322_v58 = vadd.f32 %v8933_v44, %v1251_v29  ;;  %v1188_v13 = vmul.f32 %v8921_v11, %v975_v55  ;;  %v14835_v55 = vmov 0  }
 0x31a   :  { %v1252_v42 = vadd.f32 %v1188_v13, %v864_v50  ;;  %v1642_v56 = vmul.f32 %v1430_v20, %v1322_v58  ;;  %v9390_v20 = vld [vmem:[%s14775_s29 + $0xf0] sm:$0xff]  ;;  %v9428_v13 = vld [vmem:[%s14775_s29 + $0x100] sm:$0xff] }
 0x31b   :  { %v9418_v58 = vld [vmem:[%s14775_s29 + $0xd0] sm:$0xff] }
 0x31c   :  { %v1323_v34 = vadd.f32 %v8933_v44, %v1252_v42  ;;  %v2161_v40 = vadd.f32 %v2097_v3, %v1642_v56  ;;  %v14832_v56 = vld [vmem:[#allocation5_spill] sm:$0xff]  ;;  %v14834_v3 = vld [vmem:[#allocation16_spill] sm:$0xff] }
 0x31d   :  { %v9434_v42 = vld [vmem:[%s14775_s29 + $0x108] sm:$0xff] }
 0x31e   :  { %v9359_v39 = vadd.f32 %v9147_v35, %v2161_v40  ;;  %v1643_v38 = vmul.f32 %v14830_v62, %v1323_v34  ;;  %v14833_v35 = vld [vmem:[#allocation6_spill] sm:$0xff]  ;;  %v1708_v34 = vsub.f32 1.0, %v14832_v56  ;;  %v14836_v40 = vmov 3  }
 0x31f   :  { %v1713_v62 = vsub.f32 1.0, %v9184_v63 }
 0x320   :  { %14829 = vst [vmem:[#allocation17_spill] sm:$0xff] %v9359_v39  ;;  %v2328_v36 = vsel %vm2285_vm0, %v9359_v39, 0.0  ;;  %v2162_v29 = vadd.f32 %v2098_v10, %v1643_v38  ;;  %v1711_v10 = vsub.f32 1.0, %v14833_v35  ;;  %v1715_v38 = vsub.f32 1.0, %v9190_v46 }
 0x321   :  { %2329 = vadd.xlane.f32.xlu0 %v2328_v36  ;;  %v1727_v39 = vsub.f32 1.0, %v9397_v31 }
 0x322   :  { %v9365_v37 = vadd.f32 %v9161_v48, %v2162_v29  ;;  %v9378_v48 = vld [vmem:[%s14775_s29 + $0xe8] sm:$0xff] }
 0x323   :  { %v1721_v29 = vsub.f32 1.0, %v9378_v48 }
 0x324   :  { %14831 = vst [vmem:[#allocation18_spill] sm:$0xff] %v9365_v37  ;;  %v2331_v50 = vsel %vm2285_vm0, %v9365_v37, 0.0 }
 0x325   :  { %2332 = vadd.xlane.f32.xlu1 %v2331_v50 }
 0x336   :  { %594 = vperm.xlu1 %8179, %v14814_v9   ;;  %v9385_v9 = vld [vmem:[%s14775_s29 + $0xb0] sm:$0xff] }
 0x337   :  { %978 = vperm.xlu0 %8177, %v14832_v56  }
 0x33a   :  { %598 = vperm.xlu1 %8179, %v9026_v15  }
 0x33b   :  { %990 = vperm.xlu0 %8177, %v14833_v35  }
 0x33e   :  { %606 = vperm.xlu1 %8179, %v14834_v3  }
 0x33f   :  { %994 = vperm.xlu0 %8177, %v14834_v3  }
 0x342   :  { %642 = vperm.xlu1 %8179, %v9378_v48  }
 0x343   :  { %998 = vperm.xlu0 %8177, %v9184_v63  }
 0x346   :  { %646 = vperm.xlu1 %8179, %v9390_v20  }
 0x347   :  { %1002 = vperm.xlu0 %8177, %v9385_v9  }
 0x34a   :  { %666 = vperm.xlu1 %8179, %v9397_v31  }
 0x34b   :  { %1006 = vperm.xlu0 %8177, %v9190_v46  }
 0x34e   :  { %670 = vperm.xlu1 %8179, %v9404_v51  }
 0x34f   :  { %1010 = vperm.xlu0 %8177, %v9409_v23  }
 0x352   :  { %8181 = vset.pattern.permute.xlu1 %v14835_v55 }
 0x353   :  { %1014 = vperm.xlu0 %8177, %v9196_v16  }
 0x357   :  { %1018 = vperm.xlu0 %8177, %v9418_v58  }
 0x35b   :  { %1022 = vperm.xlu0 %8177, %v9202_v18  }
 0x35f   :  { %1030 = vperm.xlu0 %8177, %v9378_v48  }
 0x363   :  { %1034 = vperm.xlu0 %8177, %v9390_v20  }
 0x367   :  { %1038 = vperm.xlu0 %8177, %v9208_v57  }
 0x36b   :  { %1042 = vperm.xlu0 %8177, %v9428_v13  }
 0x36f   :  { %1046 = vperm.xlu0 %8177, %v9434_v42  }
 0x373   :  { %1054 = vperm.xlu0 %8177, %v9397_v31  }
 0x377   :  { %8180 = vset.pattern.permute.xlu0 %v14836_v40 }
 0x378   :  { %1839 = vperm.xlu0 %8180, %v1708_v34   ;;  %v1723_v34 = vsub.f32 1.0, %v9208_v57 }
 0x37c   :  { %1445 = vperm.xlu0 %8180, %v9026_v15   ;;  %v1717_v15 = vsub.f32 1.0, %v9196_v16 }
 0x380   :  { %1449 = vperm.xlu0 %8180, %v14833_v35  }
 0x384   :  { %1854 = vperm.xlu0 %8180, %v1711_v10  }
 0x388   :  { %1453 = vperm.xlu0 %8180, %v14834_v3  }
 0x38c   :  { %1457 = vperm.xlu0 %8180, %v9184_v63  }
 0x390   :  { %1864 = vperm.xlu0 %8180, %v1713_v62  }
 0x394   :  { %1461 = vperm.xlu0 %8180, %v9385_v9  }
 0x398   :  { %1465 = vperm.xlu0 %8180, %v9190_v46  }
 0x39c   :  { %1874 = vperm.xlu0 %8180, %v1715_v38   ;;  %v983_v38 = vpop.permute.xlu1 %982 }
 0x39d   :  { %v1190_v19 = vmul.f32 %v8921_v11, %v983_v38 }
 0x3a0   :  { %1469 = vperm.xlu0 %8180, %v9409_v23  }
 0x3a4   :  { %1473 = vperm.xlu0 %8180, %v9196_v16  }
 0x3a8   :  { %1884 = vperm.xlu0 %8180, %v1717_v15  }
 0x3ac   :  { %1477 = vperm.xlu0 %8180, %v9418_v58  }
 0x3ae   :  { %v9454_v36 = vpop.xlane.xlu0 %2329 }
 0x3af   :  { %14837 = vst [vmem:[#allocation19_spill] sm:$0xff] %v9454_v36 }
 0x3b0   :  { %1485 = vperm.xlu0 %8180, %v9302_v43  }
 0x3b4   :  { %1489 = vperm.xlu0 %8180, %v9378_v48  }
 0x3b6   :  { %v979_v50 = vpop.permute.xlu0 %978 }
 0x3b8   :  { %1904 = vperm.xlu0 %8180, %v1721_v29   ;;  %v9473_v29 = vpop.permute.xlu1 %986 }
 0x3ba   :  { %v9458_v56 = vpop.permute.xlu0 %990 }
 0x3bc   :  { %1493 = vperm.xlu0 %8180, %v9390_v20  }
 0x3be   :  { %v9461_v35 = vpop.permute.xlu0 %994 }
 0x3c0   :  { %1497 = vperm.xlu0 %8180, %v9208_v57  }
 0x3c2   :  { %v9465_v10 = vpop.permute.xlu0 %998 }
 0x3c4   :  { %1914 = vperm.xlu0 %8180, %v1723_v34   ;;  %v9481_v34 = vpop.permute.xlu1 %1026 }
 0x3c5   :  { %14841 = vst [vmem:[#allocation16_spill] sm:$0xff] %v9481_v34 }
 0x3c6   :  { %v9467_v62 = vpop.permute.xlu0 %1002 }
 0x3c7   :  { %14838 = vst [vmem:[#allocation9_spill] sm:$0xff] %v9467_v62 }
 0x3c8   :  { %1501 = vperm.xlu0 %8180, %v9428_v13   ;;  %v9486_v8 = vpop.permute.xlu1 %1050 }
 0x3c9   :  { %14843 = vst [vmem:[#allocation46_spill] sm:$0xff] %v9486_v8 }
 0x3ca   :  { %v9470_v15 = vpop.permute.xlu0 %1006 }
 0x3cc   :  { %1509 = vperm.xlu0 %8180, %v9308_v33   ;;  %v9493_v32 = vpop.xlane.xlu1 %2332 }
 0x3cd   :  { %14845 = vst [vmem:[#allocation48_spill] sm:$0xff] %v9493_v32  ;;  %v14849_v32 = vld [vmem:[#allocation21_spill] sm:$0xff] }
 0x3ce   :  { %v9475_v37 = vpop.permute.xlu0 %1010 }
 0x3cf   :  { %14839 = vst [vmem:[#allocation5_spill] sm:$0xff] %v9475_v37  ;;  %v1729_v37 = vsub.f32 1.0, %v109_v2 }
 0x3d0   :  { %1513 = vperm.xlu0 %8180, %v9397_v31   ;;  %v595_v8 = vpop.permute.xlu1 %594 }
 0x3d2   :  { %v9479_v36 = vpop.permute.xlu0 %1014 }
 0x3d3   :  { %14840 = vst [vmem:[#allocation6_spill] sm:$0xff] %v9479_v36  ;;  %v1189_v36 = vmul.f32 %v8921_v11, %v979_v50 }
 0x3d4   :  { %1934 = vperm.xlu0 %8180, %v1727_v39   ;;  %v9500_v39 = vld [vmem:[%s14775_s29 + $0x130] sm:$0xff] }
 0x3d6   :  { %v9483_v55 = vpop.permute.xlu0 %1018 }
 0x3d7   :  { %14842 = vst [vmem:[#allocation45_spill] sm:$0xff] %v9483_v55  ;;  %v1730_v55 = vsub.f32 1.0, %v9500_v39 }
 0x3d8   :  { %1517 = vperm.xlu0 %8180, %v9404_v51  }
 0x3da   :  { %v9491_v24 = vpop.permute.xlu0 %1022 }
 0x3db   :  { %14844 = vst [vmem:[#allocation47_spill] sm:$0xff] %v9491_v24  ;;  %v802_v24 = vmul.f32 %v8913_v61, %v595_v8 }
 0x3dc   :  { %1521 = vperm.xlu0 %8180, %v109_v2  }
 0x3de   :  { %v9495_v62 = vpop.permute.xlu0 %1030 }
 0x3df   :  { %14846 = vst [vmem:[#allocation49_spill] sm:$0xff] %v9495_v62  ;;  %v478_v62 = vmul.f32 %v8910_v60, %v14849_v32 }
 0x3e0   :  { %1944 = vperm.xlu0 %8180, %v1729_v37   ;;  %v14850_v37 = vld [vmem:[#allocation20_spill] sm:$0xff] }
 0x3e1   :  { %v477_v52 = vmul.f32 %v8910_v60, %v14850_v37  ;;  %v866_v47 = vadd.f32 %v802_v24, %v478_v62  ;;  %v8490_v37 = vld [vmem:[%s14775_s29 + $0x98] sm:$0xff] }
 0x3e2   :  { %v9502_v34 = vpop.permute.xlu0 %1034 }
 0x3e3   :  { %14847 = vst [vmem:[#allocation50_spill] sm:$0xff] %v9502_v34  ;;  %v14851_v34 = vld [vmem:[#allocation12_spill] sm:$0xff]  ;;  %v1254_v32 = vadd.f32 %v1190_v19, %v866_v47 }
 0x3e4   :  { %1525 = vperm.xlu0 %8180, %v9500_v39   ;;  %v801_v30 = vmul.f32 %v8913_v61, %v14851_v34 }
 0x3e5   :  { %v1325_v24 = vadd.f32 %v8933_v44, %v1254_v32 }
 0x3e6   :  { %v9507_v2 = vpop.permute.xlu0 %1038  ;;  %v865_v8 = vadd.f32 %v801_v30, %v477_v52  ;;  %v2100_v30 = vmul.f32 %v8940_v27, %v9316_v12 }
 0x3e7   :  { %14848 = vst [vmem:[#allocation51_spill] sm:$0xff] %v9507_v2  ;;  %v1645_v50 = vmul.f32 %v9314_v17, %v1325_v24  ;;  %v2480_v24 = vmul.f32 0.010416667, %v9061_v5 }
 0x3e8   :  { %1949 = vperm.xlu0 %8180, %v1730_v55   ;;  %v1253_v2 = vadd.f32 %v1189_v36, %v865_v8 }
 0x3e9   :  { %v2164_v19 = vadd.f32 %v2100_v30, %v1645_v50  ;;  %v14856_v50 = vld [vmem:[#allocation15_spill] sm:$0xff]  ;;  %v2481_v30 = vmul.f32 0.010416667, %v9322_v6 }
 0x3ea   :  { %v9513_v21 = vpop.permute.xlu0 %1042  ;;  %v1324_v34 = vadd.f32 %v8933_v44, %v1253_v2 }
 0x3eb   :  { %v9544_v17 = vadd.f32 %v8953_v53, %v2164_v19 }
 0x3ec   :  { %8182 = vset.pattern.permute.xlu0 %v14815_v22  ;;  %v1644_v47 = vmul.f32 %v9312_v0, %v1324_v34 }
 0x3ed   :  { %610 = vperm.xlu0 %8182, %v9184_v63   ;;  %14855 = vst [vmem:[#allocation52_spill] sm:$0xff] %v9544_v17 }
 0x3ee   :  { %v9521_v55 = vpop.permute.xlu0 %1046 }
 0x3ef   :  { %14852 = vst [vmem:[#allocation21_spill] sm:$0xff] %v9521_v55 }
 0x3f1   :  { %614 = vperm.xlu0 %8182, %v9385_v9  }
 0x3f2   :  { %v9525_v62 = vpop.permute.xlu0 %1054 }
 0x3f3   :  { %14853 = vst [vmem:[#allocation20_spill] sm:$0xff] %v9525_v62 }
 0x3f5   :  { %618 = vperm.xlu0 %8182, %v9190_v46  }
 0x3f7   :  { %v1840_v38 = vpop.permute.xlu0 %1839 }
 0x3f8   :  { %v2099_v63 = vmul.f32 %v8940_v27, %v1840_v38  ;;  %v2337_v27 = vsel %vm2285_vm0, %v9544_v17, 0.0  ;;  %v9582_v38 = vsub.f32 %v14856_v50, %v2480_v24 }
 0x3f9   :  { %622 = vperm.xlu0 %8182, %v9409_v23  }
 0x3fa   :  { %v2163_v52 = vadd.f32 %v2099_v63, %v1644_v47  ;;  %v9589_v47 = vsub.f32 %v9089_v1, %v2481_v30  ;;  %v2608_v63 = vmul.f32 %v9582_v38, %v9582_v38  ;;  %v479_v30 = vmul.f32 %v8910_v60, %v9248_v54  ;;  %v9636_v54 = vld [vmem:[%s14787_s0] ss:$0 sm:$0xff] }
 0x3fb   :  { %v9535_v36 = vpop.permute.xlu0 %1445 }
 0x3fc   :  { %v9538_v44 = vadd.f32 %v8948_v4, %v2163_v52  ;;  %v2674_v5 = vsel %vm2285_vm0, %v2608_v63, 0.0  ;;  %v2609_v52 = vmul.f32 %v9589_v47, %v9589_v47 }
 0x3fd   :  { %626 = vperm.xlu0 %8182, %v9196_v16  }
 0x3fe   :  { %14854 = vst [vmem:[#allocation12_spill] sm:$0xff] %v9538_v44  ;;  %v2334_v46 = vsel %vm2285_vm0, %v9538_v44, 0.0  ;;  %v2677_v6 = vsel %vm2285_vm0, %v2609_v52, 0.0  ;;  %v14874_v44 = vld [vmem:[#allocation13_spill] sm:$0xff] }
 0x3ff   :  { %v9546_v0 = vpop.permute.xlu0 %1449  ;;  %2335 = vadd.xlane.f32.xlu1 %v2334_v46 }
 0x401   :  { %630 = vperm.xlu0 %8182, %v9418_v58  }
 0x403   :  { %v9551_v12 = vpop.permute.xlu0 %1854  ;;  %2338 = vadd.xlane.f32.xlu1 %v2337_v27 }
 0x405   :  { %634 = vperm.xlu0 %8182, %v9202_v18  }
 0x407   :  { %v9554_v4 = vpop.permute.xlu0 %1453 }
 0x409   :  { %638 = vperm.xlu0 %8182, %v9302_v43  }
 0x40b   :  { %v9557_v16 = vpop.permute.xlu0 %1457 }
 0x40d   :  { %650 = vperm.xlu0 %8182, %v9208_v57  }
 0x40f   :  { %v9560_v53 = vpop.permute.xlu0 %1864 }
 0x411   :  { %654 = vperm.xlu0 %8182, %v9428_v13  }
 0x413   :  { %v9563_v2 = vpop.permute.xlu0 %1461 }
 0x414   :  { %234 = vperm.xlu1 %8181, %v8490_v37   ;;  %v599_v37 = vpop.permute.xlu1 %598 }
 0x415   :  { %v803_v24 = vmul.f32 %v8913_v61, %v599_v37 }
 0x417   :  { %v9568_v8 = vpop.permute.xlu0 %1465  ;;  %v867_v63 = vadd.f32 %v803_v24, %v479_v30 }
 0x418   :  { %239 = vperm.xlu1 %8181, %v14834_v3  }
 0x41b   :  { %v9571_v32 = vpop.permute.xlu0 %1874 }
 0x41c   :  { %249 = vperm.xlu1 %8181, %v9385_v9  }
 0x41f   :  { %v9574_v57 = vpop.permute.xlu0 %1469 }
 0x420   :  { %259 = vperm.xlu1 %8181, %v9409_v23  }
 0x423   :  { %v9578_v34 = vpop.permute.xlu0 %1473 }
 0x424   :  { %269 = vperm.xlu1 %8181, %v9418_v58  }
 0x427   :  { %v9586_v3 = vpop.permute.xlu0 %1884 }
 0x428   :  { %279 = vperm.xlu1 %8181, %v9302_v43  }
 0x42b   :  { %v9597_v19 = vpop.permute.xlu0 %1477 }
 0x42c   :  { %284 = vperm.xlu1 %8181, %v9378_v48  }
 0x42f   :  { %v9602_v1 = vpop.permute.xlu0 %1485 }
 0x430   :  { %2675 = vadd.xlane.f32.xlu0 %v2674_v5  ;;  %289 = vperm.xlu1 %8181, %v9390_v20  }
 0x433   :  { %v9605_v48 = vpop.permute.xlu0 %1489 }
 0x434   :  { %2678 = vadd.xlane.f32.xlu0 %v2677_v6  ;;  %299 = vperm.xlu1 %8181, %v9428_v13  }
 0x437   :  { %v9609_v46 = vpop.permute.xlu0 %1904 }
 0x438   :  { %309 = vperm.xlu1 %8181, %v9308_v33  }
 0x43b   :  { %v9612_v27 = vpop.permute.xlu0 %1493 }
 0x43c   :  { %314 = vperm.xlu1 %8181, %v9397_v31   ;;  %14857 = vst [vmem:[#allocation15_spill] sm:$0xff] %v9612_v27  ;;  %v1191_v31 = vmul.f32 %v8921_v11, %v9473_v29  ;;  %v2101_v29 = vmul.f32 %v9636_v54, %v9318_v59 }
 0x43e   :  { %v1255_v52 = vadd.f32 %v1191_v31, %v867_v63 }
 0x43f   :  { %v9616_v50 = vpop.permute.xlu0 %1497 }
 0x440   :  { %319 = vperm.xlu1 %8181, %v9404_v51   ;;  %14858 = vst [vmem:[#allocation53_spill] sm:$0xff] %v9616_v50 }
 0x443   :  { %v9622_v5 = vpop.permute.xlu0 %1914 }
 0x444   :  { %329 = vperm.xlu1 %8181, %v9500_v39   ;;  %14859 = vst [vmem:[#allocation54_spill] sm:$0xff] %v9622_v5  ;;  %v9627_v39 = vld [vmem:[%s14786_s28] ss:$0 sm:$0xff] }
 0x445   :  { %v1326_v6 = vadd.f32 %v9627_v39, %v1255_v52 }
 0x447   :  { %v9630_v37 = vpop.permute.xlu0 %1501 }
 0x448   :  { %8183 = vset.pattern.permute.xlu1 %v14836_v40  ;;  %14860 = vst [vmem:[#allocation55_spill] sm:$0xff] %v9630_v37  ;;  %v1646_v40 = vmul.f32 %v9535_v36, %v1326_v6  ;;  %v607_v6 = vpop.permute.xlu1 %606 }
 0x44a   :  { %v2165_v24 = vadd.f32 %v2101_v29, %v1646_v40 }
 0x44b   :  { %v9640_v30 = vpop.permute.xlu0 %1509 }
 0x44c   :  { %14861 = vst [vmem:[#allocation56_spill] sm:$0xff] %v9640_v30  ;;  %v9643_v63 = vadd.f32 %v9081_v25, %v2165_v24  ;;  %v9653_v62 = vpop.permute.xlu1 %642  ;;  %v804_v30 = vmul.f32 %v8913_v61, %v14874_v44  ;;  %v14875_v44 = vld [vmem:[#allocation22_spill] sm:$0xff] }
 0x44d   :  { %v2479_v50 = vmul.f32 0.010416667, %v14875_v44  ;;  %v3259_v44 = vld [vmem:[%s14624_s8] sm:$0xff] }
 0x44e   :  { %14862 = vst [vmem:[#allocation57_spill] sm:$0xff] %v9643_v63  ;;  %v2340_v52 = vsel %vm2285_vm0, %v9643_v63, 0.0 }
 0x44f   :  { %v9645_v31 = vpop.permute.xlu0 %1513 }
 0x450   :  { %14863 = vst [vmem:[#allocation58_spill] sm:$0xff] %v9645_v31  ;;  %v9657_v40 = vpop.permute.xlu1 %646 }
 0x453   :  { %v9649_v36 = vpop.permute.xlu0 %1934 }
 0x454   :  { %14864 = vst [vmem:[#allocation59_spill] sm:$0xff] %v9649_v36  ;;  %v9661_v25 = vpop.permute.xlu1 %666 }
 0x455   :  { %14868 = vst [vmem:[#allocation63_spill] sm:$0xff] %v9661_v25 }
 0x457   :  { %v9651_v17 = vpop.permute.xlu0 %1517 }
 0x458   :  { %14865 = vst [vmem:[#allocation60_spill] sm:$0xff] %v9651_v17  ;;  %v9665_v31 = vpop.permute.xlu1 %670 }
 0x459   :  { %14870 = vst [vmem:[#allocation65_spill] sm:$0xff] %v9665_v31  ;;  %v1192_v31 = vmul.f32 %v8921_v11, %v9458_v56 }
 0x45b   :  { %v9655_v59 = vpop.permute.xlu0 %1521 }
 0x45c   :  { %14866 = vst [vmem:[#allocation61_spill] sm:$0xff] %v9655_v59 }
 0x45f   :  { %v9659_v29 = vpop.permute.xlu0 %1944 }
 0x460   :  { %14867 = vst [vmem:[#allocation62_spill] sm:$0xff] %v9659_v29  ;;  %v482_v29 = vmul.f32 %v8910_v60, %v9259_v41  ;;  %v1193_v41 = vmul.f32 %v8921_v11, %v9461_v35  ;;  %v2103_v35 = vmul.f32 %v9636_v54, %v9320_v28 }
 0x463   :  { %v9663_v24 = vpop.permute.xlu0 %1525 }
 0x464   :  { %14869 = vst [vmem:[#allocation64_spill] sm:$0xff] %v9663_v24 }
 0x468   :  { %2341 = vadd.xlane.f32.xlu1 %v2340_v52  ;;  %v9667_v52 = vpop.permute.xlu0 %1949 }
 0x469   :  { %14871 = vst [vmem:[#allocation66_spill] sm:$0xff] %v9667_v52 }
 0x46c   :  { %v611_v36 = vpop.permute.xlu0 %610 }
 0x46d   :  { %v806_v55 = vmul.f32 %v8913_v61, %v611_v36  ;;  %v805_v36 = vmul.f32 %v8913_v61, %v607_v6 }
 0x46f   :  { %v870_v52 = vadd.f32 %v806_v55, %v482_v29  ;;  %v2102_v55 = vmul.f32 %v9636_v54, %v9551_v12  ;;  %v14876_v29 = vld [vmem:[#allocation14_spill] sm:$0xff] }
 0x470   :  { %v9693_v6 = vsub.f32 %v14876_v29, %v2479_v50 }
 0x48c   :  { %v9669_v63 = vpop.xlane.xlu1 %2335 }
 0x48d   :  { %14872 = vst [vmem:[#allocation67_spill] sm:$0xff] %v9669_v63 }
 0x490   :  { %v9671_v17 = vpop.xlane.xlu1 %2338 }
 0x491   :  { %14873 = vst [vmem:[#allocation68_spill] sm:$0xff] %v9671_v17  ;;  %v1194_v17 = vmul.f32 %v8921_v11, %v9465_v10 }
 0x494   :  { %v235_v59 = vpop.permute.xlu1 %234 }
 0x495   :  { %v480_v24 = vmul.f32 %v8910_v60, %v235_v59  ;;  %v1258_v59 = vadd.f32 %v1194_v17, %v870_v52 }
 0x497   :  { %v868_v25 = vadd.f32 %v804_v30, %v480_v24 }
 0x498   :  { %v240_v63 = vpop.permute.xlu1 %239 }
 0x499   :  { %v1256_v37 = vadd.f32 %v1192_v31, %v868_v25  ;;  %v481_v5 = vmul.f32 %v8910_v60, %v240_v63  ;;  %v1329_v63 = vadd.f32 %v9627_v39, %v1258_v59  ;;  %v3264_v59 = vld [vmem:[%s14624_s8 + $0x28] sm:$0xff] }
 0x49b   :  { %v1327_v27 = vadd.f32 %v9627_v39, %v1256_v37  ;;  %v869_v56 = vadd.f32 %v805_v36, %v481_v5  ;;  %v1649_v50 = vmul.f32 %v9557_v16, %v1329_v63  ;;  %v2104_v37 = vmul.f32 %v9636_v54, %v9560_v53  ;;  %v3260_v53 = vld [vmem:[%s14624_s8 + $0x8] sm:$0xff] }
 0x49c   :  { %v3268_v63 = vld [vmem:[%s14624_s8 + $0x48] sm:$0xff] }
 0x49d   :  { %v1257_v30 = vadd.f32 %v1193_v41, %v869_v56  ;;  %v1647_v10 = vmul.f32 %v9546_v0, %v1327_v27  ;;  %v2607_v0 = vmul.f32 %v9693_v6, %v9693_v6  ;;  %v2168_v24 = vadd.f32 %v2104_v37, %v1649_v50  ;;  %v3266_v56 = vld [vmem:[%s14624_s8 + $0x38] sm:$0xff] }
 0x49e   :  { %v1714_v50 = vsub.f32 1.0, %v9385_v9  ;;  %v3278_v9 = vld [vmem:[%s14624_s8 + $0x98] sm:$0xff] }
 0x49f   :  { %v1328_v31 = vadd.f32 %v9627_v39, %v1257_v30  ;;  %v2166_v25 = vadd.f32 %v2102_v55, %v1647_v10  ;;  %v2671_v28 = vsel %vm2285_vm0, %v2607_v0, 0.0  ;;  %v9717_v52 = vadd.f32 %v9132_v7, %v2168_v24  ;;  %v3261_v7 = vld [vmem:[%s14624_s8 + $0x10] sm:$0xff]  ;;  %v3263_v30 = vld [vmem:[%s14624_s8 + $0x20] sm:$0xff]  ;;  %v3272_v0 = vld [vmem:[%s14624_s8 + $0x68] sm:$0xff] }
 0x4a0   :  { %v7962_v41 = vpack.c.bf16 %v3261_v7, %v3259_v44  ;;  %v7964_v55 = vpack.c.bf16 %v3266_v56, %v3264_v59  ;;  %v3265_v10 = vld [vmem:[%s14624_s8 + $0x30] sm:$0xff]  ;;  %v1718_v59 = vsub.f32 1.0, %v9418_v58  ;;  %v1719_v58 = vsub.f32 1.0, %v9202_v18 }
 0x4a1   :  { %v9700_v17 = vadd.f32 %v9094_v26, %v2166_v25  ;;  %v1648_v5 = vmul.f32 %v9554_v4, %v1328_v31  ;;  %14877 = vst [vmem:[#allocation13_spill] sm:$0xff] %v9717_v52  ;;  %v2349_v16 = vsel %vm2285_vm0, %v9717_v52, 0.0  ;;  %v7966_v29 = vpack.c.bf16 %v3265_v10, %v3263_v30  ;;  %v3270_v31 = vld [vmem:[%s14624_s8 + $0x58] sm:$0xff]  ;;  %v3273_v24 = vld [vmem:[%s14624_s8 + $0x70] sm:$0xff] }
 0x4a2   :  { %v7968_v25 = vpack.c.bf16 %v3270_v31, %v3268_v63  ;;  %v3277_v44 = vld [vmem:[%s14624_s8 + $0x90] sm:$0xff]  ;;  %v1720_v63 = vsub.f32 1.0, %v9302_v43  ;;  %v1722_v31 = vsub.f32 1.0, %v9390_v20  ;;  %v9812_v43 = vld [vmem:[%s14775_s29 + $0x138] sm:$0xff] }
 0x4a3   :  { %v2343_v12 = vsel %vm2285_vm0, %v9700_v17, 0.0  ;;  %v2167_v27 = vadd.f32 %v2103_v35, %v1648_v5  ;;  %v3267_v35 = vld [vmem:[%s14624_s8 + $0x40] sm:$0xff]  ;;  %v3269_v5 = vld [vmem:[%s14624_s8 + $0x50] sm:$0xff]  ;;  %v1731_v20 = vsub.f32 1.0, %v9812_v43 }
 0x4a4   :  { %2344 = vadd.xlane.f32.xlu1 %v2343_v12  ;;  %v7970_v12 = vpack.c.bf16 %v3269_v5, %v3267_v35  ;;  %v3281_v30 = vld [vmem:[%s14624_s8 + $0xb0] sm:$0xff]  ;;  %v1725_v35 = vsub.f32 1.0, %v9434_v42  ;;  %v1726_v5 = vsub.f32 1.0, %v9308_v33  ;;  %v9821_v33 = vld [vmem:[%s14775_s29 + $0x140] sm:$0xff] }
 0x4a5   :  { %v9712_v26 = vadd.f32 %v9113_v49, %v2167_v27  ;;  %v3262_v49 = vld [vmem:[%s14624_s8 + $0x18] sm:$0xff]  ;;  %v14894_v52 = vld [vmem:[#allocation34_spill] sm:$0xff] }
 0x4a6   :  { %v7960_v36 = vpack.c.bf16 %v3262_v49, %v3260_v53  ;;  %v3274_v27 = vld [vmem:[%s14624_s8 + $0x78] sm:$0xff]  ;;  %v1716_v53 = vsub.f32 1.0, %v9409_v23 }
 0x4a7   :  { %v2346_v4 = vsel %vm2285_vm0, %v9712_v26, 0.0  ;;  %v7972_v37 = vpack.c.bf16 %v3274_v27, %v3272_v0  ;;  %v3282_v23 = vld [vmem:[%s14624_s8 + $0xb8] sm:$0xff]  ;;  %v1732_v0 = vsub.f32 1.0, %v9821_v33  ;;  %v9832_v27 = vld [vmem:[%s14775_s29 + $0x148] sm:$0xff] }
 0x4a8   :  { %2672 = vadd.xlane.f32.xlu1 %v2671_v28  ;;  %7961 = vmatprep.subr.bf16.mxu0 %v7960_v36  ;;  %v3271_v28 = vld [vmem:[%s14624_s8 + $0x60] sm:$0xff] }
 0x4a9   :  { %8122 = vmatprep.subr.bf16.mxu1 %v7960_v36  ;;  %7963 = vmatpush1.bf16.msra.mxu0 %v7962_v41  ;;  %v3275_v36 = vld [vmem:[%s14624_s8 + $0x80] sm:$0xff] }
 0x4aa   :  { %8128 = vmatpush1.bf16.msra.mxu1 %v7962_v41  ;;  %7965 = vmatprep.subr.bf16.mxu0 %v7964_v55  ;;  %v7978_v7 = vpack.c.bf16 %v3277_v44, %v3275_v36  ;;  %v3280_v41 = vld [vmem:[%s14624_s8 + $0xa8] sm:$0xff] }
 0x4ab   :  { %8123 = vmatprep.subr.bf16.mxu1 %v7964_v55  ;;  %v7980_v56 = vpack.c.bf16 %v3282_v23, %v3280_v41  ;;  %v3279_v55 = vld [vmem:[%s14624_s8 + $0xa0] sm:$0xff]  ;;  %v1196_v41 = vmul.f32 %v8921_v11, %v9470_v15  ;;  %v14878_v15 = vld [vmem:[#allocation6_spill] sm:$0xff] }
 0x4ac   :  { %2347 = vadd.xlane.f32.xlu1 %v2346_v4  ;;  %v7974_v4 = vpack.c.bf16 %v3273_v24, %v3271_v28  ;;  %v7982_v10 = vpack.c.bf16 %v3281_v30, %v3279_v55  ;;  %v1733_v28 = vsub.f32 1.0, %v9832_v27 }
 0x4ad   :  { %7967 = vmatpush1.bf16.msra.mxu0 %v7966_v29 }
 0x4ae   :  { %8129 = vmatpush1.bf16.msra.mxu1 %v7966_v29  ;;  %7969 = vmatprep.subr.bf16.mxu0 %v7968_v25  ;;  %v14686_v29 = vmov 0.0  }
 0x4af   :  { %8124 = vmatprep.subr.bf16.mxu1 %v7968_v25  ;;  %3551 = vmatprep.mubr.f32.mxu0 %v14686_v29  ;;  %v1724_v25 = vsub.f32 1.0, %v9428_v13 }
 0x4b0   :  { %2350 = vadd.xlane.f32.xlu1 %v2349_v16  ;;  %v3276_v16 = vld [vmem:[%s14624_s8 + $0x88] sm:$0xff]  ;;  %3899 = vmatprep.mubr.f32.mxu1 %v14686_v29 }
 0x4b1   :  { %7971 = vmatpush1.bf16.msra.mxu0 %v7970_v12  ;;  %v7976_v49 = vpack.c.bf16 %v3278_v9, %v3276_v16 }
 0x4b2   :  { %8130 = vmatpush1.bf16.msra.mxu1 %v7970_v12  ;;  %7973 = vmatprep.subr.bf16.mxu0 %v7972_v37  ;;  %v9807_v12 = vpop.permute.xlu1 %249 }
 0x4b3   :  { %8125 = vmatprep.subr.bf16.mxu1 %v7972_v37 }
 0x4b5   :  { %7975 = vmatpush1.bf16.msra.mxu0 %v7974_v4 }
 0x4b6   :  { %8131 = vmatpush1.bf16.msra.mxu1 %v7974_v4  ;;  %7977 = vmatprep.subr.bf16.mxu0 %v7976_v49  ;;  %v9816_v13 = vpop.permute.xlu1 %259 }
 0x4b7   :  { %8126 = vmatprep.subr.bf16.mxu1 %v7976_v49  ;;  %v484_v49 = vmul.f32 %v8910_v60, %v9267_v14  ;;  %v486_v14 = vmul.f32 %v8910_v60, %v9274_v45 }
 0x4b9   :  { %7979 = vmatpush1.bf16.msra.mxu0 %v7978_v7 }
 0x4ba   :  { %8132 = vmatpush1.bf16.msra.mxu1 %v7978_v7  ;;  %7981 = vmatprep.subr.bf16.mxu0 %v7980_v56 }
 0x4bb   :  { %8127 = vmatprep.subr.bf16.mxu1 %v7980_v56 }
 0x4bd   :  { %7983 = vmatpush1.bf16.msra.mxu0 %v7982_v10 }
 0x4be   :  { %8133 = vmatpush1.bf16.msra.mxu1 %v7982_v10 }
 0x4c1   :  { %1869 = vperm.xlu1 %8183, %v1714_v50  }
 0x4c5   :  { %1879 = vperm.xlu1 %8183, %v1716_v53  }
 0x4c9   :  { %1889 = vperm.xlu1 %8183, %v1718_v59  }
 0x4cd   :  { %1481 = vperm.xlu1 %8183, %v9202_v18   ;;  %v1728_v18 = vsub.f32 1.0, %v9404_v51  ;;  %v9823_v51 = vpop.permute.xlu0 %614 }
 0x4d1   :  { %1894 = vperm.xlu1 %8183, %v1719_v58   ;;  %v619_v50 = vpop.permute.xlu0 %618 }
 0x4d2   :  { %v808_v53 = vmul.f32 %v8913_v61, %v619_v50 }
 0x4d4   :  { %v872_v36 = vadd.f32 %v808_v53, %v484_v49 }
 0x4d5   :  { %1899 = vperm.xlu1 %8183, %v1720_v63   ;;  %v623_v24 = vpop.permute.xlu0 %622 }
 0x4d6   :  { %v1260_v23 = vadd.f32 %v1196_v41, %v872_v36  ;;  %v9882_v36 = vld [vmem:[%s14788_s5 + $0x38] sm:$0xff] }
 0x4d8   :  { %v1331_v55 = vadd.f32 %v9627_v39, %v1260_v23  ;;  %v14883_v23 = vld [vmem:[#allocation25_spill] sm:$0xff] }
 0x4d9   :  { %1909 = vperm.xlu1 %8183, %v1722_v31   ;;  %v627_v16 = vpop.permute.xlu0 %626 }
 0x4da   :  { %v810_v30 = vmul.f32 %v8913_v61, %v627_v16  ;;  %v1651_v58 = vmul.f32 %v9568_v8, %v1331_v55  ;;  %v14881_v16 = vld [vmem:[#allocation37_spill] sm:$0xff] }
 0x4db   :  { %v2484_v53 = vmul.f32 0.010416667, %v14881_v16 }
 0x4dc   :  { %v874_v10 = vadd.f32 %v810_v30, %v486_v14 }
 0x4dd   :  { %1919 = vperm.xlu1 %8183, %v1724_v25   ;;  %v9846_v44 = vpop.permute.xlu0 %630  ;;  %v1198_v25 = vmul.f32 %v8921_v11, %v14878_v15  ;;  %v9890_v55 = vsub.f32 %v14883_v23, %v2484_v53  ;;  %v2108_v15 = vmul.f32 %v9636_v54, %v9586_v3  ;;  %v483_v23 = vmul.f32 %v8910_v60, %v9807_v12 }
 0x4e1   :  { %1505 = vperm.xlu1 %8183, %v9434_v42   ;;  %v9825_v42 = vpop.permute.xlu1 %269  ;;  %v9852_v59 = vpop.permute.xlu0 %634 }
 0x4e5   :  { %1924 = vperm.xlu1 %8183, %v1725_v35   ;;  %v9834_v37 = vpop.permute.xlu1 %279  ;;  %v9861_v63 = vpop.permute.xlu0 %638  ;;  %v2106_v35 = vmul.f32 %v9636_v54, %v9571_v32 }
 0x4e9   :  { %1929 = vperm.xlu1 %8183, %v1726_v5   ;;  %v9838_v4 = vpop.permute.xlu1 %284  ;;  %v14879_v5 = vld [vmem:[#allocation8_spill] sm:$0xff]  ;;  %v9870_v50 = vpop.permute.xlu0 %650 }
 0x4ed   :  { %1939 = vperm.xlu1 %8183, %v1728_v18   ;;  %v9841_v9 = vpop.permute.xlu1 %289  ;;  %v2483_v18 = vmul.f32 0.010416667, %v14879_v5  ;;  %v9887_v41 = vpop.permute.xlu0 %654  ;;  %v2612_v5 = vmul.f32 %v9890_v55, %v9890_v55 }
 0x4f1   :  { %1529 = vperm.xlu1 %8183, %v9812_v43   ;;  %v9848_v7 = vpop.permute.xlu1 %299 }
 0x4f5   :  { %1954 = vperm.xlu1 %8183, %v1731_v20   ;;  %v9854_v56 = vpop.permute.xlu1 %309  ;;  %v1262_v20 = vadd.f32 %v1198_v25, %v874_v10  ;;  %v2676_v25 = vpop.xlane.xlu0 %2675 }
 0x4f7   :  { %v1333_v49 = vadd.f32 %v9627_v39, %v1262_v20 }
 0x4f9   :  { %1533 = vperm.xlu1 %8183, %v9821_v33   ;;  %v9863_v31 = vpop.permute.xlu1 %314  ;;  %v1653_v10 = vmul.f32 %v9578_v34, %v1333_v49  ;;  %v9910_v34 = vld [vmem:[%s14788_s5 + $0x8] sm:$0xff]  ;;  %v2679_v16 = vpop.xlane.xlu0 %2678  ;;  %v807_v49 = vmul.f32 %v8913_v61, %v9823_v51 }
 0x4fa   :  { %v14886_v51 = vld [vmem:[#allocation9_spill] sm:$0xff] }
 0x4fd   :  { %1959 = vperm.xlu1 %8183, %v1732_v0   ;;  %v2170_v0 = vadd.f32 %v2106_v35, %v1651_v58  ;;  %v9872_v45 = vpop.permute.xlu1 %319 }
 0x4ff   :  { %v9885_v32 = vadd.f32 %v9882_v36, %v2170_v0  ;;  %v2864_v0 = vmul.f32 0.010416667, %v2676_v25  ;;  %v809_v25 = vmul.f32 %v8913_v61, %v623_v24  ;;  %v487_v24 = vmul.f32 %v8910_v60, %v9825_v42 }
 0x501   :  { %1537 = vperm.xlu1 %8183, %v9832_v27   ;;  %14882 = vst [vmem:[#allocation22_spill] sm:$0xff] %v9885_v32  ;;  %v2355_v30 = vsel %vm2285_vm0, %v9885_v32, 0.0  ;;  %v9897_v58 = vpop.permute.xlu1 %329  ;;  %v1195_v32 = vmul.f32 %v8921_v11, %v14886_v51  ;;  %v14891_v51 = vld [vmem:[#allocation45_spill] sm:$0xff] }
 0x505   :  { %1964 = vperm.xlu1 %8183, %v1733_v28   ;;  %v14880_v28 = vld [vmem:[#allocation24_spill] sm:$0xff]  ;;  %v9904_v20 = vpop.xlane.xlu1 %2341 }
 0x506   :  { %v9875_v8 = vsub.f32 %v14880_v28, %v2483_v18  ;;  %v2172_v18 = vadd.f32 %v2108_v15, %v1653_v10  ;;  %v2686_v28 = vsel %vm2285_vm0, %v2612_v5, 0.0  ;;  %v485_v5 = vmul.f32 %v8910_v60, %v9816_v13  ;;  %v14888_v13 = vld [vmem:[#allocation5_spill] sm:$0xff] }
 0x508   :  { %v2611_v14 = vmul.f32 %v9875_v8, %v9875_v8  ;;  %v9913_v3 = vadd.f32 %v9910_v34, %v2172_v18 }
 0x509   :  { %8186 = vset.pattern.permute.xlu1 %v14815_v22  ;;  %v14893_v22 = vld [vmem:[#allocation27_spill] sm:$0xff] }
 0x50a   :  { %v2683_v35 = vsel %vm2285_vm0, %v2611_v14, 0.0  ;;  %14884 = vst [vmem:[#allocation14_spill] sm:$0xff] %v9913_v3  ;;  %v2865_v14 = vmul.f32 0.010416667, %v2679_v16  ;;  %v2361_v10 = vsel %vm2285_vm0, %v9913_v3, 0.0 }
 0x50c   :  { %v2929_v12 = vadd.f32 1e-06, %v2865_v14 }
 0x529   :  { %2356 = vadd.xlane.f32.xlu1 %v2355_v30  ;;  %v2928_v30 = vadd.f32 1e-06, %v2864_v0 }
 0x52b   :  { %8192 = vrsqrt.f32 %v2928_v30 }
 0x52d   :  { %2684 = vadd.xlane.f32.xlu1 %v2683_v35  ;;  %v871_v35 = vadd.f32 %v807_v49, %v483_v23  ;;  %v14887_v49 = vld [vmem:[#allocation23_spill] sm:$0xff] }
 0x52f   :  { %v1259_v3 = vadd.f32 %v1195_v32, %v871_v35 }
 0x531   :  { %2687 = vadd.xlane.f32.xlu1 %v2686_v28  ;;  %v9915_v53 = vpop.xlane.xlu1 %2344  ;;  %v14885_v28 = vld [vmem:[#allocation7_spill] sm:$0xff]  ;;  %v1330_v32 = vadd.f32 %v9627_v39, %v1259_v3  ;;  %v14892_v3 = vld [vmem:[#allocation26_spill] sm:$0xff] }
 0x532   :  { %v2482_v29 = vmul.f32 0.010416667, %v14885_v28  ;;  %v811_v28 = vmul.f32 %v8913_v61, %v9846_v44 }
 0x534   :  { %v9934_v23 = vsub.f32 %v14887_v49, %v2482_v29  ;;  %v14890_v29 = vld [vmem:[#allocation39_spill] sm:$0xff] }
 0x535   :  { %2362 = vadd.xlane.f32.xlu1 %v2361_v10  ;;  %v2673_v15 = vpop.xlane.xlu1 %2672  ;;  %v873_v10 = vadd.f32 %v809_v25, %v485_v5  ;;  %v14889_v25 = vld [vmem:[#allocation38_spill] sm:$0xff]  ;;  %v2486_v5 = vmul.f32 0.010416667, %v14890_v29 }
 0x536   :  { %v2863_v18 = vmul.f32 0.010416667, %v2673_v15  ;;  %v1197_v15 = vmul.f32 %v8921_v11, %v14888_v13  ;;  %v2485_v35 = vmul.f32 0.010416667, %v14889_v25  ;;  %v2610_v42 = vmul.f32 %v9934_v23, %v9934_v23  ;;  %v8193_v13 = vpop.eup %8192 }
 0x538   :  { %v2927_v0 = vadd.f32 1e-06, %v2863_v18  ;;  %v1261_v14 = vadd.f32 %v1197_v15, %v873_v10  ;;  %v875_v18 = vadd.f32 %v811_v28, %v487_v24  ;;  %v9953_v15 = vsub.f32 %v14892_v3, %v2485_v35 }
 0x539   :  { %v9929_v16 = vpop.xlane.xlu1 %2347  ;;  %v812_v28 = vmul.f32 %v8913_v61, %v9852_v59  ;;  %v2680_v25 = vsel %vm2285_vm0, %v2610_v42, 0.0  ;;  %v489_v35 = vmul.f32 %v8910_v60, %v9834_v37 }
 0x53a   :  { %8194 = vrsqrt.f32 %v2927_v0  ;;  %v1199_v0 = vmul.f32 %v8921_v11, %v14891_v51  ;;  %v1332_v24 = vadd.f32 %v9627_v39, %v1261_v14  ;;  %v9959_v51 = vsub.f32 %v14893_v22, %v2486_v5 }
 0x53b   :  { %8196 = vrsqrt.f32 %v2929_v12  ;;  %v1650_v12 = vmul.f32 %v9563_v2, %v1330_v32  ;;  %v490_v2 = vmul.f32 %v8910_v60, %v9838_v4  ;;  %v814_v14 = vmul.f32 %v8913_v61, %v9653_v62  ;;  %v9976_v4 = vld [vmem:[%s14788_s5 + $0x30] sm:$0xff] }
 0x53c   :  { %v1263_v44 = vadd.f32 %v1199_v0, %v875_v18  ;;  %v488_v18 = vmul.f32 %v8910_v60, %v14894_v52  ;;  %v3056_v0 = vmul.f32 %v8193_v13, %v9582_v38  ;;  %v1652_v5 = vmul.f32 %v9574_v57, %v1332_v24  ;;  %v14896_v38 = vld [vmem:[#allocation29_spill] sm:$0xff] }
 0x53d   :  { %v9940_v30 = vpop.xlane.xlu1 %2350  ;;  %v813_v13 = vmul.f32 %v8913_v61, %v9861_v63  ;;  %v878_v3 = vadd.f32 %v814_v14, %v490_v2  ;;  %v491_v14 = vmul.f32 %v8910_v60, %v9841_v9 }
 0x53e   :  { %v1334_v37 = vadd.f32 %v9627_v39, %v1263_v44  ;;  %v876_v57 = vadd.f32 %v812_v28, %v488_v18 }
 0x541   :  { %v1870_v49 = vpop.permute.xlu1 %1869 }
 0x542   :  { %v2105_v10 = vmul.f32 %v9636_v54, %v1870_v49  ;;  %v2487_v49 = vmul.f32 0.010416667, %v14896_v38  ;;  %v14898_v38 = vld [vmem:[#allocation49_spill] sm:$0xff] }
 0x543   :  { %v1202_v2 = vmul.f32 %v8921_v11, %v14898_v38 }
 0x544   :  { %v8195_v29 = vpop.eup %8194  ;;  %v2169_v32 = vadd.f32 %v2105_v10, %v1650_v12  ;;  %v14897_v10 = vld [vmem:[#allocation47_spill] sm:$0xff] }
 0x545   :  { %v1880_v59 = vpop.permute.xlu1 %1879  ;;  %v3055_v42 = vmul.f32 %v8195_v29, %v9693_v6  ;;  %v8197_v22 = vpop.eup %8196  ;;  %v9985_v6 = vld [vmem:[%s14895_s1] ss:$0 sm:$0xff]  ;;  %v1200_v24 = vmul.f32 %v8921_v11, %v14897_v10  ;;  %v1266_v9 = vadd.f32 %v1202_v2, %v878_v3  ;;  %v14903_v3 = vld [vmem:[#allocation35_spill] sm:$0xff]  ;;  %v10037_v2 = vld [vmem:[%s14788_s5 + $0x10] sm:$0xff] }
 0x546   :  { %v2107_v52 = vmul.f32 %v9636_v54, %v1880_v59  ;;  %v9979_v62 = vadd.f32 %v9976_v4, %v2169_v32  ;;  %v9998_v32 = vld [vmem:[%s14623_s7] ss:$0 sm:$0xff]  ;;  %v877_v59 = vadd.f32 %v813_v13, %v489_v35  ;;  %v3126_v18 = vmul.f32 %v9985_v6, %v3056_v0 }
 0x547   :  { %v3125_v12 = vmul.f32 %v9985_v6, %v3055_v42  ;;  %v3057_v42 = vmul.f32 %v8197_v22, %v9589_v47  ;;  %v14899_v10 = vld [vmem:[#allocation28_spill] sm:$0xff]  ;;  %v815_v0 = vmul.f32 %v8913_v61, %v9657_v40  ;;  %v1264_v47 = vadd.f32 %v1200_v24, %v876_v57 }
 0x548   :  { %v2171_v29 = vadd.f32 %v2107_v52, %v1652_v5  ;;  %v2352_v44 = vsel %vm2285_vm0, %v9979_v62, 0.0  ;;  %v1654_v5 = vmul.f32 %v9597_v19, %v1334_v37  ;;  %v10010_v35 = vsub.f32 %v14899_v10, %v2487_v49  ;;  %v14900_v13 = vld [vmem:[#allocation16_spill] sm:$0xff] }
 0x549   :  { %2353 = vadd.xlane.f32.xlu0 %v2352_v44  ;;  %v1890_v28 = vpop.permute.xlu1 %1889  ;;  %v3195_v63 = vadd.f32 %v9998_v32, %v3125_v12  ;;  %v1201_v12 = vmul.f32 %v8921_v11, %v14900_v13  ;;  %v816_v22 = vmul.f32 %v8913_v61, %v9870_v50  ;;  %v14901_v19 = vmov 0.0   ;;  %v10023_v37 = vld [vmem:[%s14788_s5] sm:$0xff] }
 0x54a   :  { %v2109_v52 = vmul.f32 %v9636_v54, %v1890_v28  ;;  %v10026_v49 = vadd.f32 %v10023_v37, %v2171_v29  ;;  %v3196_v57 = vadd.f32 %v9998_v32, %v3126_v18  ;;  %v3127_v24 = vmul.f32 %v9985_v6, %v3057_v42  ;;  %v14906_v42 = vld [vmem:[#allocation50_spill] sm:$0xff] }
 0x54b   :  { %7314 = vmatmul.mubr.msk.f32.vlgmr.msra.gmra.mrb[0].mxu0 %vm2285_vm0, %v3195_v63  ;;  %v1265_v28 = vadd.f32 %v1201_v12, %v877_v59  ;;  %v2613_v50 = vmul.f32 %v9953_v15, %v9953_v15  ;;  %v492_v63 = vmul.f32 %v8910_v60, %v14903_v3  ;;  %v879_v38 = vadd.f32 %v815_v0, %v491_v14  ;;  %v14905_v59 = vld [vmem:[#allocation40_spill] sm:$0xff] }
 0x54c   :  { %v2173_v44 = vadd.f32 %v2109_v52, %v1654_v5  ;;  %3557 = vmatprep.mubr.f32.mxu0 %v14901_v19  ;;  %14902 = vst [vmem:[#allocation6_spill] sm:$0xff] %v10026_v49  ;;  %v2488_v18 = vmul.f32 0.010416667, %v14905_v59  ;;  %v1203_v5 = vmul.f32 %v8921_v11, %v14906_v42  ;;  %v1335_v52 = vadd.f32 %v9627_v39, %v1264_v47 }
 0x54d   :  { %2681 = vadd.xlane.f32.xlu0 %v2680_v25  ;;  %v1482_v40 = vpop.permute.xlu1 %1481  ;;  %v2614_v25 = vmul.f32 %v9959_v51, %v9959_v51  ;;  %v2615_v14 = vmul.f32 %v10010_v35, %v10010_v35  ;;  %v880_v10 = vadd.f32 %v816_v22, %v492_v63  ;;  %v1337_v13 = vadd.f32 %v9627_v39, %v1266_v9 }
 0x54e   :  { %v10040_v29 = vadd.f32 %v10037_v2, %v2173_v44  ;;  %v2358_v12 = vsel %vm2285_vm0, %v10026_v49, 0.0  ;;  %v14907_v44 = vld [vmem:[#allocation51_spill] sm:$0xff]  ;;  %v1336_v22 = vadd.f32 %v9627_v39, %v1265_v28  ;;  %v1267_v63 = vadd.f32 %v1203_v5, %v879_v38  ;;  %v14910_v5 = vld [vmem:[#allocation41_spill] sm:$0xff] }
 0x54f   :  { %7315 = vmatmul.mubr.msk.f32.gmra.mrb[2].mxu0 %vm2285_vm0, %v3196_v57  ;;  %v1204_v3 = vmul.f32 %v8921_v11, %v14907_v44  ;;  %v3197_v57 = vadd.f32 %v9998_v32, %v3127_v24  ;;  %v493_v9 = vmul.f32 %v8910_v60, %v9848_v7  ;;  %v1655_v59 = vmul.f32 %v1482_v40, %v1335_v52 }
 0x550   :  { %14904 = vst [vmem:[#allocation8_spill] sm:$0xff] %v10040_v29  ;;  %v2364_v0 = vsel %vm2285_vm0, %v10040_v29, 0.0  ;;  %3563 = vmatprep.mubr.f32.mxu0 %v14901_v19  ;;  %v14908_v29 = vld [vmem:[#allocation30_spill] sm:$0xff]  ;;  %v817_v28 = vmul.f32 %v8913_v61, %v9887_v41  ;;  %v1657_v38 = vmul.f32 %v9605_v48, %v1337_v13  ;;  %v2112_v7 = vmul.f32 %v9636_v54, %v9609_v46  ;;  %v10082_v41 = vld [vmem:[%s14788_s5 + $0x18] sm:$0xff] }
 0x551   :  { %2359 = vadd.xlane.f32.xlu0 %v2358_v12  ;;  %2365 = vadd.xlane.f32.xlu1 %v2364_v0  ;;  %v1895_v47 = vpop.permute.xlu1 %1894  ;;  %v10065_v49 = vsub.f32 %v14908_v29, %v2488_v18  ;;  %v2689_v12 = vsel %vm2285_vm0, %v2613_v50, 0.0  ;;  %v2692_v0 = vsel %vm2285_vm0, %v2614_v25, 0.0  ;;  %v1268_v44 = vadd.f32 %v1204_v3, %v880_v10  ;;  %v14911_v10 = vld [vmem:[#allocation42_spill] sm:$0xff] }
 0x552   :  { %v2110_v42 = vmul.f32 %v9636_v54, %v1895_v47  ;;  %v1656_v40 = vmul.f32 %v9602_v1, %v1336_v22  ;;  %v2695_v50 = vsel %vm2285_vm0, %v2615_v14, 0.0  ;;  %v881_v25 = vadd.f32 %v817_v28, %v493_v9 }
 0x553   :  { %7316 = vmatmul.mubr.msk.f32.gmra.mrb[4].mxu0 %vm2285_vm0, %v3197_v57  ;;  %v1338_v46 = vadd.f32 %v9627_v39, %v1267_v63  ;;  %v2489_v52 = vmul.f32 0.010416667, %v14910_v5  ;;  %v2490_v1 = vmul.f32 0.010416667, %v14911_v10  ;;  %v1205_v14 = vmul.f32 %v8921_v11, %v9513_v21  ;;  %v10102_v21 = vld [vmem:[%s14788_s5 + $0x20] sm:$0xff]  ;;  %v14918_v5 = vld [vmem:[#allocation53_spill] sm:$0xff] }
 0x554   :  { %v2174_v24 = vadd.f32 %v2110_v42, %v1655_v59  ;;  %3569 = vmatprep.mubr.f32.mxu0 %v14901_v19  ;;  %v2616_v13 = vmul.f32 %v10065_v49, %v10065_v49  ;;  %v1339_v3 = vadd.f32 %v9627_v39, %v1268_v44  ;;  %v2176_v22 = vadd.f32 %v2112_v7, %v1657_v38  ;;  %v14912_v59 = vld [vmem:[#allocation15_spill] sm:$0xff] }
 0x555   :  { %2690 = vadd.xlane.f32.xlu0 %v2689_v12  ;;  %2693 = vadd.xlane.f32.xlu1 %v2692_v0  ;;  %v1900_v29 = vpop.permute.xlu1 %1899  ;;  %v1269_v9 = vadd.f32 %v1205_v14, %v881_v25  ;;  %v1658_v42 = vmul.f32 %v14912_v59, %v1338_v46  ;;  %v14914_v44 = vld [vmem:[#allocation31_spill] sm:$0xff]  ;;  %v14922_v59 = vld [vmem:[#allocation44_spill] sm:$0xff] }
 0x556   :  { %v2111_v18 = vmul.f32 %v9636_v54, %v1900_v29  ;;  %v10085_v48 = vadd.f32 %v10082_v41, %v2174_v24  ;;  %v10108_v28 = vsub.f32 %v14914_v44, %v2489_v52  ;;  %v14915_v24 = vld [vmem:[#allocation32_spill] sm:$0xff]  ;;  %v14916_v7 = vld [vmem:[#allocation43_spill] sm:$0xff]  ;;  %v2698_v29 = vsel %vm2285_vm0, %v2616_v13, 0.0 }
 0x557   :  { %v10111_v38 = vsub.f32 %v14915_v24, %v2490_v1  ;;  %v1659_v52 = vmul.f32 %v14918_v5, %v1339_v3  ;;  %v14919_v1 = vld [vmem:[#allocation54_spill] sm:$0xff]  ;;  %v1340_v13 = vadd.f32 %v9627_v39, %v1269_v9  ;;  %v14923_v24 = vld [vmem:[#allocation55_spill] sm:$0xff] }
 0x558   :  { %14909 = vst [vmem:[#allocation24_spill] sm:$0xff] %v10085_v48  ;;  %v2175_v47 = vadd.f32 %v2111_v18, %v1656_v40  ;;  %v2367_v57 = vsel %vm2285_vm0, %v10085_v48, 0.0  ;;  %v2491_v40 = vmul.f32 0.010416667, %v14916_v7  ;;  %v10120_v18 = vld [vmem:[%s14788_s5 + $0x28] sm:$0xff]  ;;  %v2114_v14 = vmul.f32 %v9636_v54, %v14919_v1 }
 0x559   :  { %2696 = vadd.xlane.f32.xlu0 %v2695_v50  ;;  %2368 = vadd.xlane.f32.xlu1 %v2367_v57  ;;  %v1910_v63 = vpop.permute.xlu1 %1909  ;;  %v10123_v46 = vadd.f32 %v10120_v18, %v2176_v22  ;;  %v14921_v57 = vld [vmem:[#allocation33_spill] sm:$0xff]  ;;  %v2617_v22 = vmul.f32 %v10108_v28, %v10108_v28  ;;  %v2618_v3 = vmul.f32 %v10111_v38, %v10111_v38 }
 0x55a   :  { %v2113_v12 = vmul.f32 %v9636_v54, %v1910_v63  ;;  %v10105_v0 = vadd.f32 %v10102_v21, %v2175_v47  ;;  %v10133_v63 = vsub.f32 %v14921_v57, %v2491_v40  ;;  %v2178_v9 = vadd.f32 %v2114_v14, %v1659_v52 }
 0x55b   :  { %14917 = vst [vmem:[#allocation25_spill] sm:$0xff] %v10123_v46  ;;  %v2373_v44 = vsel %vm2285_vm0, %v10123_v46, 0.0  ;;  %v1660_v7 = vmul.f32 %v14923_v24, %v1340_v13  ;;  %v2701_v40 = vsel %vm2285_vm0, %v2617_v22, 0.0  ;;  %v10205_v24 = vld [vmem:[%s14775_s29 + $0x160] sm:$0xff] }
 0x55c   :  { %14913 = vst [vmem:[#allocation37_spill] sm:$0xff] %v10105_v0  ;;  %v2177_v50 = vadd.f32 %v2113_v12, %v1658_v42  ;;  %v2370_v25 = vsel %vm2285_vm0, %v10105_v0, 0.0  ;;  %v2492_v42 = vmul.f32 0.010416667, %v14922_v59  ;;  %v8501_v59 = vld [vmem:[%s14775_s29 + $0x108] sm:$0xff]  ;;  %14927 = vst [vmem:[#allocation5_spill] sm:$0xff] %v10205_v24 }
 0x55d   :  { %2699 = vadd.xlane.f32.xlu0 %v2698_v29  ;;  %2371 = vadd.xlane.f32.xlu1 %v2370_v25  ;;  %v1920_v10 = vpop.permute.xlu1 %1919  ;;  %v2704_v29 = vsel %vm2285_vm0, %v2618_v3, 0.0  ;;  %v10184_v3 = vld [vmem:[%s14775_s29 + $0x130] sm:$0xff] }
 0x55e   :  { %v10130_v47 = vadd.f32 %v9976_v4, %v2177_v50  ;;  %v2115_v12 = vmul.f32 %v9636_v54, %v1920_v10  ;;  %v14924_v50 = vld [vmem:[#allocation36_spill] sm:$0xff]  ;;  %v10152_v54 = vadd.f32 %v9882_v36, %v2178_v9  ;;  %v2619_v10 = vmul.f32 %v10133_v63, %v10133_v63 }
 0x55f   :  { %v10149_v25 = vsub.f32 %v14924_v50, %v2492_v42  ;;  %v8502_v42 = vld [vmem:[%s14775_s29 + $0x110] sm:$0xff]  ;;  %v10233_v50 = vld [vmem:[%s14775_s29 + $0x198] sm:$0xff] }
 0x560   :  { %14920 = vst [vmem:[#allocation7_spill] sm:$0xff] %v10130_v47  ;;  %v2376_v39 = vsel %vm2285_vm0, %v10130_v47, 0.0  ;;  %v2179_v5 = vadd.f32 %v2115_v12, %v1660_v7  ;;  %14925 = vst [vmem:[#allocation9_spill] sm:$0xff] %v10152_v54  ;;  %v2379_v52 = vsel %vm2285_vm0, %v10152_v54, 0.0  ;;  %v2707_v1 = vsel %vm2285_vm0, %v2619_v10, 0.0  ;;  %v10219_v7 = vld [vmem:[%s14775_s29 + $0x180] sm:$0xff] }
 0x561   :  { %2374 = vadd.xlane.f32.xlu0 %v2373_v44  ;;  %2377 = vadd.xlane.f32.xlu1 %v2376_v39  ;;  %v2620_v14 = vmul.f32 %v10149_v25, %v10149_v25  ;;  %v10179_v22 = vpop.permute.xlu1 %1505  ;;  %v10197_v39 = vld [vmem:[%s14775_s29 + $0x158] sm:$0xff]  ;;  %14930 = vst [vmem:[#allocation45_spill] sm:$0xff] %v10233_v50  ;;  %v10241_v10 = vld [vmem:[%s14775_s29 + $0x1a8] sm:$0xff] }
 0x562   :  { %v10162_v13 = vadd.f32 %v10023_v37, %v2179_v5  ;;  %v10176_v37 = vld [vmem:[%s14775_s29 + $0x128] sm:$0xff] }
 0x563   :  { %v2710_v36 = vsel %vm2285_vm0, %v2620_v14, 0.0 }
 0x564   :  { %14926 = vst [vmem:[#allocation23_spill] sm:$0xff] %v10162_v13  ;;  %v2382_v57 = vsel %vm2285_vm0, %v10162_v13, 0.0 }
 0x565   :  { %2702 = vadd.xlane.f32.xlu0 %v2701_v40  ;;  %2705 = vadd.xlane.f32.xlu1 %v2704_v29  ;;  %v10188_v12 = vpop.permute.xlu1 %1924  ;;  %v10227_v29 = vld [vmem:[%s14775_s29 + $0x190] sm:$0xff] }
 0x569   :  { %2380 = vadd.xlane.f32.xlu0 %v2379_v52  ;;  %2708 = vadd.xlane.f32.xlu1 %v2707_v1  ;;  %v10191_v44 = vpop.permute.xlu1 %1929  ;;  %v14933_v1 = vmov 0  }
 0x56d   :  { %2711 = vadd.xlane.f32.xlu0 %v2710_v36  ;;  %2383 = vadd.xlane.f32.xlu1 %v2382_v57  ;;  %v10200_v9 = vpop.permute.xlu1 %1939 }
 0x583   :  { %658 = vperm.xlu0 %8182, %v8501_v59  }
 0x587   :  { %662 = vperm.xlu0 %8182, %v8502_v42  }
 0x58b   :  { %674 = vperm.xlu0 %8182, %v10176_v37  }
 0x58f   :  { %678 = vperm.xlu0 %8182, %v10184_v3  }
 0x593   :  { %682 = vperm.xlu0 %8182, %v9812_v43  }
 0x597   :  { %686 = vperm.xlu0 %8182, %v9821_v33   ;;  %v10211_v33 = vld [vmem:[%s14775_s29 + $0x170] sm:$0xff] }
 0x59b   :  { %690 = vperm.xlu0 %8182, %v9832_v27   ;;  %v10213_v27 = vpop.permute.xlu1 %1529 }
 0x59c   :  { %14928 = vst [vmem:[#allocation38_spill] sm:$0xff] %v10213_v27 }
 0x59f   :  { %698 = vperm.xlu0 %8182, %v10197_v39   ;;  %v10222_v40 = vpop.permute.xlu1 %1954 }
 0x5a0   :  { %14929 = vst [vmem:[#allocation39_spill] sm:$0xff] %v10222_v40 }
 0x5a3   :  { %702 = vperm.xlu0 %8182, %v10205_v24   ;;  %v10235_v5 = vpop.permute.xlu1 %1533 }
 0x5a4   :  { %14931 = vst [vmem:[#allocation26_spill] sm:$0xff] %v10235_v5 }
 0x5a7   :  { %710 = vperm.xlu0 %8182, %v10211_v33   ;;  %v10244_v52 = vpop.permute.xlu1 %1959 }
 0x5a8   :  { %14932 = vst [vmem:[#allocation27_spill] sm:$0xff] %v10244_v52 }
 0x5ab   :  { %718 = vperm.xlu0 %8182, %v10219_v7   ;;  %v10247_v14 = vpop.permute.xlu1 %1537 }
 0x5ac   :  { %14934 = vst [vmem:[#allocation34_spill] sm:$0xff] %v10247_v14 }
 0x5af   :  { %726 = vperm.xlu0 %8182, %v10227_v29   ;;  %v10249_v36 = vpop.permute.xlu1 %1964 }
 0x5b0   :  { %14935 = vst [vmem:[#allocation29_spill] sm:$0xff] %v10249_v36 }
 0x5b3   :  { %730 = vperm.xlu0 %8182, %v10233_v50  }
 0x5b6   :  { %v10251_v57 = vpop.xlane.xlu1 %2356 }
 0x5b7   :  { %738 = vperm.xlu0 %8182, %v10241_v10   ;;  %14936 = vst [vmem:[#allocation47_spill] sm:$0xff] %v10251_v57 }
 0x5ba   :  { %v2685_v42 = vpop.xlane.xlu1 %2684 }
 0x5bb   :  { %8184 = vset.pattern.permute.xlu0 %v14933_v1  ;;  %v2867_v54 = vmul.f32 0.010416667, %v2685_v42 }
 0x5bc   :  { %304 = vperm.xlu0 %8184, %v8501_v59  }
 0x5bd   :  { %v2931_v46 = vadd.f32 1e-06, %v2867_v54 }
 0x5be   :  { %v2688_v13 = vpop.xlane.xlu1 %2687 }
 0x5bf   :  { %v2868_v0 = vmul.f32 0.010416667, %v2688_v13  ;;  %8198 = vrsqrt.f32 %v2931_v46 }
 0x5c1   :  { %v2932_v50 = vadd.f32 1e-06, %v2868_v0 }
 0x5c2   :  { %v10255_v48 = vpop.xlane.xlu1 %2362 }
 0x5c3   :  { %14937 = vst [vmem:[#allocation49_spill] sm:$0xff] %v10255_v48 }
 0x5c9   :  { %v8199_v48 = vpop.eup %8198 }
 0x5d6   :  { %v10253_v47 = vpop.xlane.xlu0 %2353 }
 0x5da   :  { %v2682_v5 = vpop.xlane.xlu0 %2681 }
 0x5db   :  { %v2866_v52 = vmul.f32 0.010416667, %v2682_v5 }
 0x5dd   :  { %v2930_v59 = vadd.f32 1e-06, %v2866_v52 }
 0x5de   :  { %v10257_v24 = vpop.xlane.xlu0 %2359  ;;  %v10259_v14 = vpop.xlane.xlu1 %2365 }
 0x5df   :  { %14938 = vst [vmem:[#allocation28_spill] sm:$0xff] %v10257_v24  ;;  %14939 = vst [vmem:[#allocation16_spill] sm:$0xff] %v10259_v14  ;;  %8200 = vrsqrt.f32 %v2930_v59  ;;  %v3059_v59 = vmul.f32 %v8199_v48, %v9875_v8 }
 0x5e0   :  { %8202 = vrsqrt.f32 %v2932_v50 }
 0x5e2   :  { %v2691_v57 = vpop.xlane.xlu0 %2690  ;;  %v2694_v36 = vpop.xlane.xlu1 %2693 }
 0x5e3   :  { %v2869_v42 = vmul.f32 0.010416667, %v2691_v57  ;;  %v2870_v40 = vmul.f32 0.010416667, %v2694_v36 }
 0x5e5   :  { %v2933_v27 = vadd.f32 1e-06, %v2869_v42  ;;  %v2934_v54 = vadd.f32 1e-06, %v2870_v40 }
 0x5e6   :  { %v2697_v13 = vpop.xlane.xlu0 %2696  ;;  %v10261_v1 = vpop.xlane.xlu1 %2368 }
 0x5e7   :  { %14940 = vst [vmem:[#allocation35_spill] sm:$0xff] %v10261_v1  ;;  %8204 = vrsqrt.f32 %v2933_v27  ;;  %v2871_v46 = vmul.f32 0.010416667, %v2697_v13  ;;  %v3129_v13 = vmul.f32 %v9985_v6, %v3059_v59 }
 0x5e8   :  { %8206 = vrsqrt.f32 %v2934_v54 }
 0x5e9   :  { %v8201_v0 = vpop.eup %8200  ;;  %v2935_v5 = vadd.f32 1e-06, %v2871_v46 }
 0x5ea   :  { %v2700_v52 = vpop.xlane.xlu0 %2699  ;;  %v10263_v24 = vpop.xlane.xlu1 %2371  ;;  %v3058_v50 = vmul.f32 %v8201_v0, %v9934_v23  ;;  %v3199_v0 = vadd.f32 %v9998_v32, %v3129_v13 }
 0x5eb   :  { %14941 = vst [vmem:[#allocation40_spill] sm:$0xff] %v10263_v24  ;;  %v8203_v57 = vpop.eup %8202  ;;  %v2872_v36 = vmul.f32 0.010416667, %v2700_v52  ;;  %8208 = vrsqrt.f32 %v2935_v5 }
 0x5ec   :  { %v3128_v40 = vmul.f32 %v9985_v6, %v3058_v50  ;;  %v3060_v46 = vmul.f32 %v8203_v57, %v9890_v55 }
 0x5ed   :  { %v2936_v42 = vadd.f32 1e-06, %v2872_v36 }
 0x5ee   :  { %v10268_v1 = vpop.xlane.xlu0 %2374  ;;  %v10270_v27 = vpop.xlane.xlu1 %2377  ;;  %v3198_v54 = vadd.f32 %v9998_v32, %v3128_v40  ;;  %v3130_v5 = vmul.f32 %v9985_v6, %v3060_v46 }
 0x5ef   :  { %14942 = vst [vmem:[#allocation50_spill] sm:$0xff] %v10268_v1  ;;  %14943 = vst [vmem:[#allocation51_spill] sm:$0xff] %v10270_v27  ;;  %8210 = vrsqrt.f32 %v2936_v42 }
 0x5f0   :  { %7317 = vmatmul.mubr.msk.f32.gmra.mrb[6].mxu0 %vm2285_vm0, %v3198_v54  ;;  %v3200_v54 = vadd.f32 %v9998_v32, %v3130_v5 }
 0x5f1   :  { %v8205_v23 = vpop.eup %8204  ;;  %3575 = vmatprep.mubr.f32.mxu0 %v14901_v19 }
 0x5f2   :  { %v2703_v8 = vpop.xlane.xlu0 %2702  ;;  %v2706_v48 = vpop.xlane.xlu1 %2705  ;;  %v3061_v52 = vmul.f32 %v8205_v23, %v9953_v15 }
 0x5f3   :  { %v8207_v50 = vpop.eup %8206  ;;  %v2873_v36 = vmul.f32 0.010416667, %v2703_v8  ;;  %v2874_v40 = vmul.f32 0.010416667, %v2706_v48 }
 0x5f4   :  { %7318 = vmatmul.mubr.msk.f32.gmra.mrb[8].mxu0 %vm2285_vm0, %v3199_v0  ;;  %v3131_v13 = vmul.f32 %v9985_v6, %v3061_v52  ;;  %v3062_v46 = vmul.f32 %v8207_v50, %v9959_v51 }
 0x5f5   :  { %v2937_v55 = vadd.f32 1e-06, %v2873_v36  ;;  %v2938_v59 = vadd.f32 1e-06, %v2874_v40  ;;  %3581 = vmatprep.mubr.f32.mxu0 %v14901_v19  ;;  %v8209_v27 = vpop.eup %8208 }
 0x5f6   :  { %v10282_v57 = vpop.xlane.xlu0 %2380  ;;  %v2709_v42 = vpop.xlane.xlu1 %2708  ;;  %v3201_v48 = vadd.f32 %v9998_v32, %v3131_v13  ;;  %v3132_v0 = vmul.f32 %v9985_v6, %v3062_v46  ;;  %v3063_v5 = vmul.f32 %v8209_v27, %v10010_v35 }
 0x5f7   :  { %14944 = vst [vmem:[#allocation30_spill] sm:$0xff] %v10282_v57  ;;  %8212 = vrsqrt.f32 %v2937_v55  ;;  %v2875_v15 = vmul.f32 0.010416667, %v2709_v42 }
 0x5f8   :  { %7319 = vmatmul.mubr.msk.f32.gmra.mrb[10].mxu0 %vm2285_vm0, %v3200_v54  ;;  %8214 = vrsqrt.f32 %v2938_v59  ;;  %v3202_v50 = vadd.f32 %v9998_v32, %v3132_v0  ;;  %v3133_v40 = vmul.f32 %v9985_v6, %v3063_v5 }
 0x5f9   :  { %v2939_v23 = vadd.f32 1e-06, %v2875_v15  ;;  %3587 = vmatprep.mubr.f32.mxu0 %v14901_v19  ;;  %v8211_v36 = vpop.eup %8210 }
 0x5fa   :  { %v2712_v8 = vpop.xlane.xlu0 %2711  ;;  %v3064_v55 = vmul.f32 %v8211_v36, %v10065_v49  ;;  %v3203_v27 = vadd.f32 %v9998_v32, %v3133_v40 }
 0x5fb   :  { %v2876_v52 = vmul.f32 0.010416667, %v2712_v8  ;;  %8216 = vrsqrt.f32 %v2939_v23 }
 0x5fc   :  { %7320 = vmatmul.mubr.msk.f32.gmra.mrb[12].mxu0 %vm2285_vm0, %v3201_v48  ;;  %v3134_v42 = vmul.f32 %v9985_v6, %v3064_v55  ;;  %v495_v48 = vmul.f32 %v8910_v60, %v9854_v56  ;;  %v14946_v55 = vld [vmem:[#allocation67_spill] sm:$0xff] }
 0x5fd   :  { %v2940_v51 = vadd.f32 1e-06, %v2876_v52  ;;  %3593 = vmatprep.mubr.f32.mxu0 %v14901_v19 }
 0x5fe   :  { %v3204_v46 = vadd.f32 %v9998_v32, %v3134_v42 }
 0x5ff   :  { %8218 = vrsqrt.f32 %v2940_v51 }
 0x600   :  { %7321 = vmatmul.mubr.msk.f32.gmra.mrb[14].mxu0 %vm2285_vm0, %v3202_v50 }
 0x601   :  { %v8213_v59 = vpop.eup %8212  ;;  %3599 = vmatprep.mubr.f32.mxu0 %v14901_v19 }
 0x602   :  { %v10299_v35 = vpop.permute.xlu0 %658  ;;  %v3065_v54 = vmul.f32 %v8213_v59, %v10108_v28  ;;  %v8215_v13 = vpop.eup %8214  ;;  %v14945_v28 = vld [vmem:[#allocation46_spill] sm:$0xff]  ;;  %v2495_v59 = vmul.f32 0.010416667, %v14946_v55 }
 0x603   :  { %v3066_v23 = vmul.f32 %v8215_v13, %v10111_v38  ;;  %v1207_v5 = vmul.f32 %v8921_v11, %v14945_v28 }
 0x604   :  { %7322 = vmatmul.mubr.msk.f32.gmra.mrb[16].mxu0 %vm2285_vm0, %v3203_v27  ;;  %v3135_v15 = vmul.f32 %v9985_v6, %v3065_v54  ;;  %v10326_v27 = vld [vmem:[%s14786_s28] ss:$0 sm:$0xff] }
 0x605   :  { %3605 = vmatprep.mubr.f32.mxu0 %v14901_v19  ;;  %v8217_v8 = vpop.eup %8216  ;;  %v3136_v38 = vmul.f32 %v9985_v6, %v3066_v23  ;;  %v14947_v23 = vld [vmem:[#allocation56_spill] sm:$0xff] }
 0x606   :  { %v663_v49 = vpop.permute.xlu0 %662  ;;  %v3205_v51 = vadd.f32 %v9998_v32, %v3135_v15  ;;  %v3067_v50 = vmul.f32 %v8217_v8, %v10133_v63 }
 0x607   :  { %v819_v0 = vmul.f32 %v8913_v61, %v663_v49  ;;  %v3206_v13 = vadd.f32 %v9998_v32, %v3136_v38 }
 0x608   :  { %7323 = vmatmul.mubr.msk.f32.gmra.mrb[18].mxu0 %vm2285_vm0, %v3204_v46  ;;  %v3137_v63 = vmul.f32 %v9985_v6, %v3067_v50  ;;  %v10338_v46 = vld [vmem:[%s14787_s0] ss:$0 sm:$0xff] }
 0x609   :  { %v883_v36 = vadd.f32 %v819_v0, %v495_v48  ;;  %3611 = vmatprep.mubr.f32.mxu0 %v14901_v19  ;;  %v8219_v40 = vpop.eup %8218  ;;  %v2117_v15 = vmul.f32 %v10338_v46, %v10191_v44  ;;  %v14948_v48 = vld [vmem:[#allocation12_spill] sm:$0xff] }
 0x60a   :  { %v10316_v52 = vpop.permute.xlu0 %674  ;;  %v3068_v49 = vmul.f32 %v8219_v40, %v10149_v25  ;;  %v10345_v0 = vsub.f32 %v14948_v48, %v2495_v59  ;;  %v3207_v25 = vadd.f32 %v9998_v32, %v3137_v63 }
 0x60b   :  { %v1271_v56 = vadd.f32 %v1207_v5, %v883_v36 }
 0x60c   :  { %7324 = vmatmul.mubr.msk.f32.gmra.mrb[20].mxu0 %vm2285_vm0, %v3205_v51  ;;  %v3138_v36 = vmul.f32 %v9985_v6, %v3068_v49  ;;  %v2623_v38 = vmul.f32 %v10345_v0, %v10345_v0 }
 0x60d   :  { %v1342_v42 = vadd.f32 %v10326_v27, %v1271_v56  ;;  %3617 = vmatprep.mubr.f32.mxu0 %v14901_v19 }
 0x60e   :  { %v10330_v54 = vpop.permute.xlu0 %678  ;;  %v3208_v40 = vadd.f32 %v9998_v32, %v3138_v36  ;;  %v10398_v36 = vld [vmem:[%s14775_s29 + $0x168] sm:$0xff] }
 0x60f   :  { %v1662_v8 = vmul.f32 %v14947_v23, %v1342_v42 }
 0x610   :  { %7325 = vmatmul.mubr.msk.f32.gmra.mrb[22].mxu0 %vm2285_vm0, %v3206_v13 }
 0x611   :  { %3623 = vmatprep.mubr.f32.mxu0 %v14901_v19  ;;  %v2181_v28 = vadd.f32 %v2117_v15, %v1662_v8 }
 0x612   :  { %v10348_v5 = vpop.permute.xlu0 %682 }
 0x613   :  { %v10353_v51 = vadd.f32 %v10037_v2, %v2181_v28  ;;  %v2719_v2 = vsel %vm2285_vm0, %v2623_v38, 0.0  ;;  %v10406_v38 = vld [vmem:[%s14775_s29 + $0x178] sm:$0xff] }
 0x614   :  { %7326 = vmatmul.mubr.msk.f32.gmra.mrb[24].mxu0 %vm2285_vm0, %v3207_v25 }
 0x615   :  { %14949 = vst [vmem:[#allocation41_spill] sm:$0xff] %v10353_v51  ;;  %v2388_v44 = vsel %vm2285_vm0, %v10353_v51, 0.0  ;;  %3629 = vmatprep.mubr.f32.mxu0 %v14901_v19 }
 0x616   :  { %v10361_v50 = vpop.permute.xlu0 %686  ;;  %2389 = vadd.xlane.f32.xlu0 %v2388_v44 }
 0x618   :  { %7327 = vmatmul.mubr.msk.f32.gmra.mrb[26].mxu0 %vm2285_vm0, %v3208_v40  ;;  %v496_v40 = vmul.f32 %v8910_v60, %v9863_v31 }
 0x619   :  { %3635 = vmatprep.mubr.f32.mxu0 %v14901_v19 }
 0x61a   :  { %v10367_v56 = vpop.permute.xlu0 %690  ;;  %2720 = vadd.xlane.f32.xlu0 %v2719_v2 }
 0x61b   :  { %14950 = vst [vmem:[#allocation42_spill] sm:$0xff] %v10367_v56  ;;  %v15002_v56 = vld [vmem:[#allocation62_spill] sm:$0xff] }
 0x61e   :  { %v10369_v55 = vpop.f32.mrb[0].mxu0  ;;  %v10371_v59 = vpop.permute.xlu0 %698 }
 0x61f   :  { %14951 = vst [vmem:[#allocation15_spill] sm:$0xff] %v10369_v55  ;;  %14952 = vst [vmem:[#allocation31_spill] sm:$0xff] %v10371_v59  ;;  %v10373_v42 = vpop.f32.mrb[1].mxu0  ;;  %v14965_v55 = vld [vmem:[#allocation21_spill] sm:$0xff] }
 0x620   :  { %14953 = vst [vmem:[#allocation32_spill] sm:$0xff] %v10373_v42  ;;  %v10419_v42 = vld [vmem:[%s14775_s29 + $0x1a0] sm:$0xff] }
 0x622   :  { %v10375_v13 = vpop.f32.mrb[2].mxu0  ;;  %v10377_v63 = vpop.permute.xlu0 %702 }
 0x623   :  { %14954 = vst [vmem:[#allocation43_spill] sm:$0xff] %v10375_v13  ;;  %14955 = vst [vmem:[#allocation53_spill] sm:$0xff] %v10377_v63  ;;  %v10379_v49 = vpop.f32.mrb[3].mxu0 }
 0x624   :  { %14956 = vst [vmem:[#allocation54_spill] sm:$0xff] %v10379_v49  ;;  %v1206_v49 = vmul.f32 %v8921_v11, %v14965_v55  ;;  %v2116_v55 = vmul.f32 %v10338_v46, %v10188_v12 }
 0x626   :  { %v10381_v15 = vpop.f32.mrb[4].mxu0  ;;  %v10383_v23 = vpop.permute.xlu0 %710 }
 0x627   :  { %14957 = vst [vmem:[#allocation33_spill] sm:$0xff] %v10381_v15  ;;  %14958 = vst [vmem:[#allocation44_spill] sm:$0xff] %v10383_v23  ;;  %v10385_v8 = vpop.f32.mrb[5].mxu0  ;;  %v14964_v15 = vld [vmem:[#allocation63_spill] sm:$0xff] }
 0x628   :  { %14959 = vst [vmem:[#allocation55_spill] sm:$0xff] %v10385_v8  ;;  %v818_v8 = vmul.f32 %v8913_v61, %v10299_v35  ;;  %v10429_v35 = vld [vmem:[%s14775_s29 + $0x1b0] sm:$0xff] }
 0x62a   :  { %v10387_v48 = vpop.permute.xlu0 %718 }
 0x62b   :  { %14960 = vst [vmem:[#allocation36_spill] sm:$0xff] %v10387_v48 }
 0x62e   :  { %v10389_v28 = vpop.permute.xlu0 %726 }
 0x62f   :  { %14961 = vst [vmem:[#allocation46_spill] sm:$0xff] %v10389_v28 }
 0x630   :  { %324 = vperm.xlu0 %8184, %v10176_v37  }
 0x632   :  { %v10392_v25 = vpop.permute.xlu0 %730 }
 0x633   :  { %14962 = vst [vmem:[#allocation67_spill] sm:$0xff] %v10392_v25 }
 0x634   :  { %334 = vperm.xlu0 %8184, %v9812_v43   ;;  %v820_v43 = vmul.f32 %v8913_v61, %v14964_v15 }
 0x636   :  { %v10400_v44 = vpop.permute.xlu0 %738  ;;  %v884_v31 = vadd.f32 %v820_v43, %v496_v40 }
 0x637   :  { %14963 = vst [vmem:[#allocation56_spill] sm:$0xff] %v10400_v44  ;;  %v14966_v44 = vld [vmem:[#allocation20_spill] sm:$0xff] }
 0x638   :  { %364 = vperm.xlu0 %8184, %v10398_v36   ;;  %v1208_v15 = vmul.f32 %v8921_v11, %v14966_v44  ;;  %v14969_v44 = vld [vmem:[#allocation48_spill] sm:$0xff] }
 0x639   :  { %v2494_v40 = vmul.f32 0.010416667, %v14969_v44 }
 0x63a   :  { %v1272_v28 = vadd.f32 %v1208_v15, %v884_v31  ;;  %v14972_v15 = vld [vmem:[#allocation58_spill] sm:$0xff] }
 0x63b   :  { %v305_v2 = vpop.permute.xlu0 %304 }
 0x63c   :  { %v494_v13 = vmul.f32 %v8910_v60, %v305_v2  ;;  %374 = vperm.xlu0 %8184, %v10406_v38   ;;  %v14967_v2 = vld [vmem:[#allocation19_spill] sm:$0xff]  ;;  %v1343_v43 = vadd.f32 %v10326_v27, %v1272_v28 }
 0x63d   :  { %v2493_v57 = vmul.f32 0.010416667, %v14967_v2 }
 0x63e   :  { %v882_v51 = vadd.f32 %v818_v8, %v494_v13  ;;  %v1663_v2 = vmul.f32 %v14972_v15, %v1343_v43 }
 0x640   :  { %v1270_v25 = vadd.f32 %v1206_v49, %v882_v51  ;;  %399 = vperm.xlu0 %8184, %v10419_v42   ;;  %v10440_v51 = vld [vmem:[%s14775_s29 + $0x1b8] sm:$0xff]  ;;  %v14968_v49 = vld [vmem:[#allocation17_spill] sm:$0xff] }
 0x641   :  { %v10443_v8 = vsub.f32 %v14968_v49, %v2493_v57 }
 0x642   :  { %v1341_v1 = vadd.f32 %v10326_v27, %v1270_v25 }
 0x643   :  { %v2621_v28 = vmul.f32 %v10443_v8, %v10443_v8 }
 0x644   :  { %409 = vperm.xlu0 %8184, %v10429_v35   ;;  %v1661_v13 = vmul.f32 %v10179_v22, %v1341_v1  ;;  %v10454_v22 = vld [vmem:[%s14775_s29 + $0x1d8] sm:$0xff]  ;;  %v14971_v1 = vld [vmem:[#allocation18_spill] sm:$0xff] }
 0x645   :  { %v10457_v31 = vsub.f32 %v14971_v1, %v2494_v40  ;;  %v14974_v40 = vmov 2  }
 0x646   :  { %v2180_v25 = vadd.f32 %v2116_v55, %v1661_v13  ;;  %v14973_v55 = vld [vmem:[#allocation59_spill] sm:$0xff]  ;;  %v2713_v13 = vsel %vm2285_vm0, %v2621_v28, 0.0  ;;  %v14976_v28 = vld [vmem:[#allocation68_spill] sm:$0xff] }
 0x647   :  { %v2622_v49 = vmul.f32 %v10457_v31, %v10457_v31  ;;  %v2496_v15 = vmul.f32 0.010416667, %v14976_v28  ;;  %v10515_v28 = vld [vmem:[%s14775_s29 + $0x148] sm:$0xff] }
 0x648   :  { %414 = vperm.xlu0 %8184, %v10440_v51   ;;  %v10449_v12 = vadd.f32 %v9910_v34, %v2180_v25  ;;  %v2118_v34 = vmul.f32 %v10338_v46, %v14973_v55  ;;  %v8507_v25 = vld [vmem:[%s14775_s29 + $0x120] sm:$0xff] }
 0x649   :  { %v2716_v43 = vsel %vm2285_vm0, %v2622_v49, 0.0 }
 0x64a   :  { %14970 = vst [vmem:[#allocation12_spill] sm:$0xff] %v10449_v12  ;;  %v2385_v57 = vsel %vm2285_vm0, %v10449_v12, 0.0  ;;  %v2182_v44 = vadd.f32 %v2118_v34, %v1663_v2  ;;  %v14977_v2 = vld [vmem:[#allocation52_spill] sm:$0xff]  ;;  %v2497_v34 = vmul.f32 0.010416667, %v9904_v20 }
 0x64b   :  { %2386 = vadd.xlane.f32.xlu1 %v2385_v57  ;;  %v10484_v55 = vsub.f32 %v14977_v2, %v2496_v15  ;;  %v10558_v12 = vld [vmem:[%s14775_s29 + $0x1c0] sm:$0xff] }
 0x64c   :  { %434 = vperm.xlu0 %8184, %v10454_v22   ;;  %v10476_v1 = vadd.f32 %v10082_v41, %v2182_v44  ;;  %v2498_v41 = vmul.f32 0.010416667, %v9915_v53 }
 0x64e   :  { %14975 = vst [vmem:[#allocation63_spill] sm:$0xff] %v10476_v1  ;;  %v2391_v57 = vsel %vm2285_vm0, %v10476_v1, 0.0  ;;  %v10494_v44 = vsub.f32 %v9700_v17, %v2498_v41  ;;  %v8508_v17 = vld [vmem:[%s14775_s29 + $0x138] sm:$0xff] }
 0x64f   :  { %2714 = vadd.xlane.f32.xlu1 %v2713_v13  ;;  %v14978_v13 = vld [vmem:[#allocation57_spill] sm:$0xff] }
 0x650   :  { %8185 = vset.pattern.permute.xlu0 %v14974_v40  ;;  %v10488_v49 = vsub.f32 %v14978_v13, %v2497_v34  ;;  %v2626_v20 = vmul.f32 %v10494_v44, %v10494_v44 }
 0x651   :  { %1058 = vperm.xlu0 %8185, %v8507_v25  }
 0x652   :  { %v2625_v25 = vmul.f32 %v10488_v49, %v10488_v49  ;;  %v2728_v53 = vsel %vm2285_vm0, %v2626_v20, 0.0  ;;  %v10546_v20 = vld [vmem:[%s14775_s29 + $0x1d0] sm:$0xff] }
 0x653   :  { %2717 = vadd.xlane.f32.xlu1 %v2716_v43 }
 0x654   :  { %v2725_v43 = vsel %vm2285_vm0, %v2625_v25, 0.0 }
 0x655   :  { %1062 = vperm.xlu0 %8185, %v10176_v37   ;;  %v2624_v37 = vmul.f32 %v10484_v55, %v10484_v55 }
 0x657   :  { %2392 = vadd.xlane.f32.xlu1 %v2391_v57  ;;  %v10509_v57 = vld [vmem:[%s14775_s29 + $0x140] sm:$0xff] }
 0x659   :  { %1066 = vperm.xlu0 %8185, %v10184_v3   ;;  %v2722_v3 = vsel %vm2285_vm0, %v2624_v37, 0.0 }
 0x678   :  { %2723 = vadd.xlane.f32.xlu0 %v2722_v3 }
 0x67c   :  { %2726 = vadd.xlane.f32.xlu0 %v2725_v43 }
 0x680   :  { %2729 = vadd.xlane.f32.xlu0 %v2728_v53 }
 0x696   :  { %1070 = vperm.xlu0 %8185, %v8508_v17  }
 0x69a   :  { %1074 = vperm.xlu0 %8185, %v10509_v57  }
 0x69e   :  { %1078 = vperm.xlu0 %8185, %v10515_v28  }
 0x6a2   :  { %1086 = vperm.xlu0 %8185, %v10197_v39  }
 0x6a3   :  { %v10519_v15 = vpop.xlane.xlu0 %2389 }
 0x6a4   :  { %14979 = vst [vmem:[#allocation21_spill] sm:$0xff] %v10519_v15 }
 0x6a6   :  { %1094 = vperm.xlu0 %8185, %v10398_v36  }
 0x6a7   :  { %v10523_v2 = vpop.xlane.xlu0 %2720 }
 0x6aa   :  { %1098 = vperm.xlu0 %8185, %v10211_v33  }
 0x6ae   :  { %1102 = vperm.xlu0 %8185, %v10406_v38  }
 0x6af   :  { %v325_v34 = vpop.permute.xlu0 %324 }
 0x6b2   :  { %1106 = vperm.xlu0 %8185, %v10219_v7  }
 0x6b3   :  { %v10527_v13 = vpop.permute.xlu0 %334 }
 0x6b6   :  { %1114 = vperm.xlu0 %8185, %v10227_v29  }
 0x6b7   :  { %v10530_v41 = vpop.permute.xlu0 %364 }
 0x6b8   :  { %14980 = vst [vmem:[#allocation20_spill] sm:$0xff] %v10530_v41 }
 0x6ba   :  { %1122 = vperm.xlu0 %8185, %v10419_v42  }
 0x6bb   :  { %v10533_v37 = vpop.permute.xlu0 %374 }
 0x6bc   :  { %14981 = vst [vmem:[#allocation19_spill] sm:$0xff] %v10533_v37  ;;  %v10593_v37 = vld [vmem:[%s14775_s29 + $0x1f0] sm:$0xff] }
 0x6be   :  { %1126 = vperm.xlu0 %8185, %v10241_v10  }
 0x6bf   :  { %v10536_v3 = vpop.permute.xlu0 %399 }
 0x6c0   :  { %14982 = vst [vmem:[#allocation17_spill] sm:$0xff] %v10536_v3 }
 0x6c2   :  { %1134 = vperm.xlu0 %8185, %v10440_v51  }
 0x6c3   :  { %v10539_v25 = vpop.f32.mrb[6].mxu0  ;;  %v10541_v43 = vpop.permute.xlu0 %409 }
 0x6c4   :  { %14983 = vst [vmem:[#allocation48_spill] sm:$0xff] %v10539_v25  ;;  %14984 = vst [vmem:[#allocation18_spill] sm:$0xff] %v10541_v43  ;;  %v10548_v53 = vpop.f32.mrb[7].mxu0 }
 0x6c5   :  { %14985 = vst [vmem:[#allocation58_spill] sm:$0xff] %v10548_v53 }
 0x6c6   :  { %1146 = vperm.xlu0 %8185, %v10546_v20  }
 0x6c7   :  { %v10551_v17 = vpop.permute.xlu0 %414  ;;  %v10553_v1 = vpop.f32.mrb[8].mxu0 }
 0x6c8   :  { %14986 = vst [vmem:[#allocation59_spill] sm:$0xff] %v10551_v17  ;;  %14987 = vst [vmem:[#allocation68_spill] sm:$0xff] %v10553_v1  ;;  %v10560_v25 = vpop.f32.mrb[9].mxu0  ;;  %v497_v17 = vmul.f32 %v8910_v60, %v9872_v45  ;;  %v14992_v1 = vld [vmem:[#allocation65_spill] sm:$0xff] }
 0x6c9   :  { %14988 = vst [vmem:[#allocation52_spill] sm:$0xff] %v10560_v25  ;;  %v821_v3 = vmul.f32 %v8913_v61, %v14992_v1  ;;  %v10579_v25 = vld [vmem:[%s14775_s29 + $0x1c8] sm:$0xff]  ;;  %v822_v1 = vmul.f32 %v8913_v61, %v10316_v52 }
 0x6ca   :  { %1138 = vperm.xlu0 %8185, %v10558_v12  }
 0x6cb   :  { %v10563_v43 = vpop.permute.xlu0 %434  ;;  %v10565_v15 = vpop.f32.mrb[10].mxu0 }
 0x6cc   :  { %14989 = vst [vmem:[#allocation57_spill] sm:$0xff] %v10563_v43  ;;  %14990 = vst [vmem:[#allocation69_spill] sm:$0xff] %v10565_v15  ;;  %v10567_v53 = vpop.f32.mrb[11].mxu0  ;;  %v885_v15 = vadd.f32 %v821_v3, %v497_v17  ;;  %v10597_v3 = vpop.xlane.xlu1 %2383 }
 0x6cd   :  { %14991 = vst [vmem:[#allocation70_spill] sm:$0xff] %v10567_v53  ;;  %v498_v53 = vmul.f32 %v8910_v60, %v325_v34  ;;  %14997 = vst [vmem:[#allocation74_spill] sm:$0xff] %v10597_v3  ;;  %v823_v34 = vmul.f32 %v8913_v61, %v10330_v54  ;;  %v14999_v3 = vld [vmem:[#allocation60_spill] sm:$0xff] }
 0x6ce   :  { %1150 = vperm.xlu0 %8185, %v10454_v22  }
 0x6cf   :  { %v10574_v24 = vpop.f32.mrb[12].mxu0 }
 0x6d0   :  { %14993 = vst [vmem:[#allocation65_spill] sm:$0xff] %v10574_v24  ;;  %v1059_v43 = vpop.permute.xlu0 %1058  ;;  %v10581_v48 = vpop.f32.mrb[13].mxu0 }
 0x6d1   :  { %14994 = vst [vmem:[#allocation71_spill] sm:$0xff] %v10581_v48  ;;  %v1209_v45 = vmul.f32 %v8921_v11, %v1059_v43  ;;  %v886_v43 = vadd.f32 %v822_v1, %v498_v53 }
 0x6d2   :  { %1142 = vperm.xlu0 %8185, %v10579_v25  }
 0x6d3   :  { %v1273_v14 = vadd.f32 %v1209_v45, %v885_v15  ;;  %v10588_v24 = vpop.f32.mrb[14].mxu0  ;;  %v499_v15 = vmul.f32 %v8910_v60, %v9897_v58  ;;  %v2119_v45 = vmul.f32 %v10338_v46, %v10200_v9  ;;  %v15001_v58 = vmov 3  }
 0x6d4   :  { %14995 = vst [vmem:[#allocation72_spill] sm:$0xff] %v10588_v24  ;;  %v1063_v23 = vpop.permute.xlu0 %1062  ;;  %v10595_v48 = vpop.f32.mrb[15].mxu0  ;;  %v2120_v9 = vmul.f32 %v10338_v46, %v15002_v56 }
 0x6d5   :  { %14996 = vst [vmem:[#allocation73_spill] sm:$0xff] %v10595_v48  ;;  %v1344_v17 = vadd.f32 %v10326_v27, %v1273_v14  ;;  %v1210_v52 = vmul.f32 %v8921_v11, %v1063_v23  ;;  %v887_v53 = vadd.f32 %v823_v34, %v499_v15 }
 0x6d6   :  { %1162 = vperm.xlu0 %8185, %v10593_v37  }
 0x6d7   :  { %v1274_v24 = vadd.f32 %v1210_v52, %v886_v43  ;;  %v10608_v48 = vpop.f32.mrb[16].mxu0  ;;  %v1664_v41 = vmul.f32 %v14999_v3, %v1344_v17  ;;  %v15004_v17 = vld [vmem:[#allocation61_spill] sm:$0xff] }
 0x6d8   :  { %14998 = vst [vmem:[#allocation75_spill] sm:$0xff] %v10608_v48  ;;  %v1067_v63 = vpop.permute.xlu0 %1066  ;;  %v10611_v54 = vpop.f32.mrb[17].mxu0 }
 0x6d9   :  { %15000 = vst [vmem:[#allocation60_spill] sm:$0xff] %v10611_v54  ;;  %v1345_v14 = vadd.f32 %v10326_v27, %v1274_v24  ;;  %v1211_v23 = vmul.f32 %v8921_v11, %v1067_v63  ;;  %v10615_v1 = vpop.xlane.xlu1 %2386  ;;  %v2183_v59 = vadd.f32 %v2119_v45, %v1664_v41  ;;  %v2879_v24 = vmul.f32 0.010416667, %v10523_v2  ;;  %v15009_v2 = vld [vmem:[#allocation64_spill] sm:$0xff] }
 0x6da   :  { %8191 = vset.pattern.permute.xlu0 %v15001_v58 }
 0x6db   :  { %v1275_v43 = vadd.f32 %v1211_v23, %v887_v53  ;;  %v10620_v52 = vpop.f32.mrb[18].mxu0  ;;  %v10623_v3 = vadd.f32 %v10102_v21, %v2183_v59  ;;  %v1665_v34 = vmul.f32 %v15004_v17, %v1345_v14  ;;  %v15006_v53 = vld [vmem:[#allocation66_spill] sm:$0xff]  ;;  %v2943_v17 = vadd.f32 1e-06, %v2879_v24 }
 0x6dc   :  { %15003 = vst [vmem:[#allocation62_spill] sm:$0xff] %v10620_v52  ;;  %v10627_v15 = vpop.f32.mrb[19].mxu0  ;;  %v2121_v23 = vmul.f32 %v10338_v46, %v15006_v53 }
 0x6dd   :  { %15005 = vst [vmem:[#allocation61_spill] sm:$0xff] %v10627_v15  ;;  %v1346_v63 = vadd.f32 %v10326_v27, %v1275_v43  ;;  %v2715_v41 = vpop.xlane.xlu1 %2714  ;;  %v2394_v45 = vsel %vm2285_vm0, %v10623_v3, 0.0  ;;  %v2184_v48 = vadd.f32 %v2120_v9, %v1665_v34 }
 0x6de   :  { %v2877_v56 = vmul.f32 0.010416667, %v2715_v41  ;;  %2395 = vadd.xlane.f32.xlu1 %v2394_v45 }
 0x6df   :  { %v10634_v21 = vpop.f32.mrb[20].mxu0  ;;  %v10637_v59 = vadd.f32 %v10120_v18, %v2184_v48  ;;  %v1666_v14 = vmul.f32 %v15009_v2, %v1346_v63  ;;  %v2500_v2 = vmul.f32 0.010416667, %v9940_v30 }
 0x6e0   :  { %15007 = vst [vmem:[#allocation66_spill] sm:$0xff] %v10634_v21  ;;  %v2941_v52 = vadd.f32 1e-06, %v2877_v56  ;;  %v10640_v43 = vpop.f32.mrb[21].mxu0 }
 0x6e1   :  { %15008 = vst [vmem:[#allocation76_spill] sm:$0xff] %v10637_v59  ;;  %15010 = vst [vmem:[#allocation64_spill] sm:$0xff] %v10640_v43  ;;  %v2718_v15 = vpop.xlane.xlu1 %2717  ;;  %v2397_v9 = vsel %vm2285_vm0, %v10637_v59, 0.0  ;;  %v2185_v34 = vadd.f32 %v2121_v23, %v1666_v14 }
 0x6e2   :  { %8220 = vrsqrt.f32 %v2941_v52  ;;  %v2878_v41 = vmul.f32 0.010416667, %v2718_v15  ;;  %2398 = vadd.xlane.f32.xlu1 %v2397_v9  ;;  %v2499_v52 = vmul.f32 0.010416667, %v9929_v16 }
 0x6e3   :  { %v10644_v45 = vpop.f32.mrb[22].mxu0  ;;  %v10647_v53 = vadd.f32 %v9976_v4, %v2185_v34  ;;  %8222 = vrsqrt.f32 %v2943_v17 }
 0x6e4   :  { %15011 = vst [vmem:[#allocation77_spill] sm:$0xff] %v10644_v45  ;;  %v2942_v18 = vadd.f32 1e-06, %v2878_v41  ;;  %v10649_v48 = vpop.f32.mrb[23].mxu0  ;;  %v10661_v4 = vsub.f32 %v9712_v26, %v2499_v52 }
 0x6e5   :  { %15012 = vst [vmem:[#allocation78_spill] sm:$0xff] %v10647_v53  ;;  %15013 = vst [vmem:[#allocation79_spill] sm:$0xff] %v10649_v48  ;;  %v2400_v24 = vsel %vm2285_vm0, %v10647_v53, 0.0 }
 0x6e6   :  { %8224 = vrsqrt.f32 %v2942_v18  ;;  %2401 = vadd.xlane.f32.xlu1 %v2400_v24  ;;  %v15018_v18 = vld [vmem:[#allocation13_spill] sm:$0xff]  ;;  %v2501_v24 = vmul.f32 0.010416667, %v10253_v47 }
 0x6e7   :  { %v10653_v63 = vpop.f32.mrb[24].mxu0  ;;  %v10669_v16 = vsub.f32 %v15018_v18, %v2500_v2 }
 0x6e8   :  { %15014 = vst [vmem:[#allocation80_spill] sm:$0xff] %v10653_v63  ;;  %v10656_v15 = vpop.f32.mrb[25].mxu0  ;;  %v10685_v47 = vsub.f32 %v9979_v62, %v2501_v24 }
 0x6e9   :  { %15015 = vst [vmem:[#allocation81_spill] sm:$0xff] %v10656_v15  ;;  %v2627_v15 = vmul.f32 %v10661_v4, %v10661_v4 }
 0x6eb   :  { %v10658_v56 = vpop.f32.mrb[26].mxu0 }
 0x6ec   :  { %15016 = vst [vmem:[#allocation82_spill] sm:$0xff] %v10658_v56  ;;  %v8221_v23 = vpop.eup %8220  ;;  %v10664_v14 = vpop.f32.mrb[27].mxu0  ;;  %v15029_v56 = vld [vmem:[#allocation45_spill] sm:$0xff] }
 0x6ed   :  { %15017 = vst [vmem:[#allocation83_spill] sm:$0xff] %v10664_v14  ;;  %v3069_v17 = vmul.f32 %v8221_v23, %v10443_v8  ;;  %v8223_v9 = vpop.eup %8222  ;;  %v2731_v23 = vsel %vm2285_vm0, %v2627_v15, 0.0 }
 0x6ee   :  { %v3071_v52 = vmul.f32 %v8223_v9, %v10345_v0  ;;  %v2628_v0 = vmul.f32 %v10669_v16, %v10669_v16 }
 0x6ef   :  { %v3139_v34 = vmul.f32 %v9985_v6, %v3069_v17  ;;  %v10681_v6 = vld [vmem:[%s14895_s1] ss:$0 sm:$0xff]  ;;  %v2629_v17 = vmul.f32 %v10685_v47, %v10685_v47 }
 0x6f0   :  { %v8225_v41 = vpop.eup %8224  ;;  %v3141_v15 = vmul.f32 %v10681_v6, %v3071_v52  ;;  %v2734_v2 = vsel %vm2285_vm0, %v2628_v0, 0.0 }
 0x6f1   :  { %v3209_v26 = vadd.f32 %v9998_v32, %v3139_v34  ;;  %v3070_v30 = vmul.f32 %v8225_v41, %v10457_v31  ;;  %v10692_v32 = vld [vmem:[%s14775_s29 + $0x150] sm:$0xff]  ;;  %v10699_v31 = vld [vmem:[%s14623_s7] ss:$0 sm:$0xff]  ;;  %v2737_v34 = vsel %vm2285_vm0, %v2629_v17, 0.0  ;;  %v10718_v41 = vld [vmem:[%s14775_s29 + $0x188] sm:$0xff]  ;;  %v1737_v17 = vsub.f32 1.0, %v10398_v36 }
 0x6f2   :  { %v3211_v9 = vadd.f32 %v10699_v31, %v3141_v15 }
 0x6f3   :  { %7328 = vmatmul.mubr.msk.f32.gmra.mrb[28].mxu0 %vm2285_vm0, %v3209_v26  ;;  %v3140_v8 = vmul.f32 %v10681_v6, %v3070_v30 }
 0x6f4   :  { %3641 = vmatprep.mubr.f32.mxu0 %v14901_v19 }
 0x6f5   :  { %2732 = vadd.xlane.f32.xlu0 %v2731_v23  ;;  %v3210_v62 = vadd.f32 %v10699_v31, %v3140_v8 }
 0x6f7   :  { %7329 = vmatmul.mubr.msk.f32.gmra.mrb[30].mxu0 %vm2285_vm0, %v3210_v62  ;;  %694 = vperm.xlu1 %8186, %v10692_v32  }
 0x6f8   :  { %3647 = vmatprep.mubr.f32.mxu0 %v14901_v19 }
 0x6f9   :  { %2735 = vadd.xlane.f32.xlu0 %v2734_v2 }
 0x6fb   :  { %7330 = vmatmul.mubr.msk.f32.gmra.mrb[32].mxu0 %vm2285_vm0, %v3211_v9  ;;  %706 = vperm.xlu1 %8186, %v10398_v36  }
 0x6fc   :  { %3653 = vmatprep.mubr.f32.mxu0 %v14901_v19 }
 0x6fd   :  { %2738 = vadd.xlane.f32.xlu0 %v2737_v34 }
 0x6ff   :  { %714 = vperm.xlu1 %8186, %v10406_v38  }
 0x703   :  { %722 = vperm.xlu1 %8186, %v10718_v41  }
 0x705   :  { %v2724_v18 = vpop.xlane.xlu0 %2723 }
 0x706   :  { %v2880_v24 = vmul.f32 0.010416667, %v2724_v18 }
 0x707   :  { %734 = vperm.xlu1 %8186, %v10419_v42  }
 0x708   :  { %v2944_v26 = vadd.f32 1e-06, %v2880_v24 }
 0x709   :  { %v2727_v30 = vpop.xlane.xlu0 %2726 }
 0x70a   :  { %8226 = vrsqrt.f32 %v2944_v26  ;;  %v2881_v52 = vmul.f32 0.010416667, %v2727_v30 }
 0x70b   :  { %742 = vperm.xlu1 %8186, %v10429_v35  }
 0x70c   :  { %v2945_v8 = vadd.f32 1e-06, %v2881_v52 }
 0x70d   :  { %v2730_v23 = vpop.xlane.xlu0 %2729 }
 0x70e   :  { %8228 = vrsqrt.f32 %v2945_v8  ;;  %v2882_v0 = vmul.f32 0.010416667, %v2730_v23  ;;  %v10746_v8 = vld [vmem:[%s14775_s29 + $0x1e0] sm:$0xff] }
 0x70f   :  { %746 = vperm.xlu1 %8186, %v10440_v51  }
 0x710   :  { %v2946_v62 = vadd.f32 1e-06, %v2882_v0 }
 0x712   :  { %8230 = vrsqrt.f32 %v2946_v62  ;;  %v10759_v62 = vld [vmem:[%s14775_s29 + $0x1e8] sm:$0xff] }
 0x713   :  { %1541 = vperm.xlu0 %8191, %v10692_v32   ;;  %758 = vperm.xlu1 %8186, %v10546_v20  }
 0x714   :  { %v8227_v15 = vpop.eup %8226 }
 0x715   :  { %v3072_v2 = vmul.f32 %v8227_v15, %v10484_v55  ;;  %v1071_v52 = vpop.permute.xlu0 %1070 }
 0x717   :  { %1553 = vperm.xlu0 %8191, %v10398_v36   ;;  %750 = vperm.xlu1 %8186, %v10558_v12   ;;  %v3142_v9 = vmul.f32 %v10681_v6, %v3072_v2 }
 0x718   :  { %v8229_v34 = vpop.eup %8228 }
 0x719   :  { %v3212_v18 = vadd.f32 %v10699_v31, %v3142_v9  ;;  %v3073_v24 = vmul.f32 %v8229_v34, %v10488_v49  ;;  %v10753_v0 = vpop.permute.xlu0 %1074  ;;  %v824_v9 = vmul.f32 %v8913_v61, %v10348_v5  ;;  %v1212_v34 = vmul.f32 %v8921_v11, %v1071_v52  ;;  %v10790_v5 = vld [vmem:[%s14788_s5 + $0x38] sm:$0xff] }
 0x71b   :  { %1984 = vperm.xlu0 %8191, %v1737_v17   ;;  %762 = vperm.xlu1 %8186, %v10454_v22   ;;  %v3143_v26 = vmul.f32 %v10681_v6, %v3073_v24  ;;  %v500_v17 = vmul.f32 %v8910_v60, %v10527_v13 }
 0x71c   :  { %v8231_v30 = vpop.eup %8230  ;;  %7331 = vmatmul.mubr.msk.f32.gmra.mrb[34].mxu0 %vm2285_vm0, %v3212_v18 }
 0x71d   :  { %3659 = vmatprep.mubr.f32.mxu0 %v14901_v19  ;;  %v3213_v55 = vadd.f32 %v10699_v31, %v3143_v26  ;;  %v3074_v36 = vmul.f32 %v8231_v30, %v10494_v44  ;;  %v1744_v44 = vsub.f32 1.0, %v10419_v42  ;;  %v10763_v15 = vpop.permute.xlu0 %1078  ;;  %v888_v24 = vadd.f32 %v824_v9, %v500_v17 }
 0x71f   :  { %1569 = vperm.xlu0 %8191, %v10718_v41   ;;  %754 = vperm.xlu1 %8186, %v10579_v25   ;;  %v3144_v49 = vmul.f32 %v10681_v6, %v3074_v36  ;;  %v1276_v26 = vadd.f32 %v1212_v34, %v888_v24 }
 0x720   :  { %7332 = vmatmul.mubr.msk.f32.gmra.mrb[36].mxu0 %vm2285_vm0, %v3213_v55 }
 0x721   :  { %3665 = vmatprep.mubr.f32.mxu0 %v14901_v19  ;;  %v3214_v23 = vadd.f32 %v10699_v31, %v3144_v49  ;;  %v10768_v2 = vpop.permute.xlu0 %1086  ;;  %v1347_v55 = vadd.f32 %v10326_v27, %v1276_v26  ;;  %v15020_v49 = vld [vmem:[#allocation38_spill] sm:$0xff] }
 0x723   :  { %1581 = vperm.xlu0 %8191, %v10419_v42   ;;  %766 = vperm.xlu1 %8186, %v10746_v8   ;;  %v15019_v42 = vmov 0  }
 0x724   :  { %7333 = vmatmul.mubr.msk.f32.gmra.mrb[38].mxu0 %vm2285_vm0, %v3214_v23  ;;  %v1667_v23 = vmul.f32 %v15020_v49, %v1347_v55 }
 0x725   :  { %3671 = vmatprep.mubr.f32.mxu0 %v14901_v19  ;;  %v10775_v18 = vpop.permute.xlu0 %1094 }
 0x727   :  { %2019 = vperm.xlu0 %8191, %v1744_v44   ;;  %770 = vperm.xlu1 %8186, %v10759_v62   ;;  %v15021_v44 = vld [vmem:[#allocation39_spill] sm:$0xff] }
 0x728   :  { %v2122_v13 = vmul.f32 %v10338_v46, %v15021_v44 }
 0x729   :  { %v10777_v30 = vpop.permute.xlu0 %1098 }
 0x72b   :  { %1593 = vperm.xlu0 %8191, %v10440_v51   ;;  %774 = vperm.xlu1 %8186, %v10593_v37  }
 0x72d   :  { %v10780_v36 = vpop.permute.xlu0 %1102 }
 0x72f   :  { %8187 = vset.pattern.permute.xlu1 %v15019_v42  ;;  %v2186_v42 = vadd.f32 %v2122_v13, %v1667_v23  ;;  %v15023_v23 = vld [vmem:[#allocation5_spill] sm:$0xff]  ;;  %v10816_v13 = vpop.xlane.xlu1 %2392 }
 0x731   :  { %v10785_v14 = vpop.permute.xlu0 %1106  ;;  %v10793_v52 = vadd.f32 %v10790_v5, %v2186_v42 }
 0x733   :  { %15022 = vst [vmem:[#allocation13_spill] sm:$0xff] %v10793_v52  ;;  %v2403_v9 = vsel %vm2285_vm0, %v10793_v52, 0.0 }
 0x735   :  { %v10795_v17 = vpop.permute.xlu0 %1114 }
 0x739   :  { %v10799_v34 = vpop.permute.xlu0 %1122 }
 0x73d   :  { %v10801_v24 = vpop.permute.xlu0 %1126 }
 0x741   :  { %v10803_v26 = vpop.permute.xlu0 %1134 }
 0x745   :  { %v10807_v55 = vpop.permute.xlu0 %1146 }
 0x749   :  { %v10810_v49 = vpop.permute.xlu0 %1138 }
 0x74d   :  { %v10814_v44 = vpop.permute.xlu0 %1150 }
 0x74e   :  { %15024 = vst [vmem:[#allocation38_spill] sm:$0xff] %v10814_v44 }
 0x74f   :  { %2404 = vadd.xlane.f32.xlu1 %v2403_v9 }
 0x751   :  { %v10819_v42 = vpop.permute.xlu0 %1142 }
 0x752   :  { %15025 = vst [vmem:[#allocation39_spill] sm:$0xff] %v10819_v42 }
 0x760   :  { %339 = vperm.xlu1 %8187, %v10509_v57  }
 0x764   :  { %344 = vperm.xlu1 %8187, %v10515_v28   ;;  %v10825_v28 = vpop.permute.xlu0 %1162 }
 0x765   :  { %15026 = vst [vmem:[#allocation5_spill] sm:$0xff] %v10825_v28 }
 0x768   :  { %349 = vperm.xlu1 %8187, %v10692_v32  }
 0x76b   :  { %v10821_v57 = vpop.xlane.xlu1 %2395 }
 0x76c   :  { %354 = vperm.xlu1 %8187, %v10197_v39  }
 0x76f   :  { %v10827_v9 = vpop.xlane.xlu1 %2398 }
 0x770   :  { %359 = vperm.xlu1 %8187, %v15023_v23   ;;  %15027 = vst [vmem:[#allocation84_spill] sm:$0xff] %v10827_v9 }
 0x773   :  { %v10830_v48 = vpop.xlane.xlu1 %2401 }
 0x774   :  { %369 = vperm.xlu1 %8187, %v10211_v33   ;;  %15028 = vst [vmem:[#allocation85_spill] sm:$0xff] %v10830_v48 }
 0x777   :  { %v10834_v21 = vpop.permute.xlu1 %694 }
 0x778   :  { %379 = vperm.xlu1 %8187, %v10219_v7  }
 0x77c   :  { %384 = vperm.xlu1 %8187, %v10718_v41  }
 0x780   :  { %389 = vperm.xlu1 %8187, %v10227_v29  }
 0x782   :  { %v2733_v39 = vpop.xlane.xlu0 %2732 }
 0x783   :  { %v2883_v23 = vmul.f32 0.010416667, %v2733_v39  ;;  %v10837_v39 = vpop.permute.xlu1 %706 }
 0x784   :  { %394 = vperm.xlu1 %8187, %v15029_v56  }
 0x785   :  { %v2947_v33 = vadd.f32 1e-06, %v2883_v23 }
 0x786   :  { %v2736_v63 = vpop.xlane.xlu0 %2735 }
 0x787   :  { %8232 = vrsqrt.f32 %v2947_v33  ;;  %v2884_v45 = vmul.f32 0.010416667, %v2736_v63  ;;  %v10843_v63 = vpop.permute.xlu1 %714 }
 0x788   :  { %404 = vperm.xlu1 %8187, %v10241_v10  }
 0x789   :  { %v2948_v7 = vadd.f32 1e-06, %v2884_v45 }
 0x78a   :  { %v2739_v43 = vpop.xlane.xlu0 %2738 }
 0x78b   :  { %8234 = vrsqrt.f32 %v2948_v7  ;;  %v2885_v54 = vmul.f32 0.010416667, %v2739_v43 }
 0x78c   :  { %429 = vperm.xlu1 %8187, %v10546_v20  }
 0x78d   :  { %v2949_v29 = vadd.f32 1e-06, %v2885_v54  ;;  %v1748_v54 = vsub.f32 1.0, %v10558_v12 }
 0x78f   :  { %8236 = vrsqrt.f32 %v2949_v29  ;;  %2039 = vperm.xlu0 %8191, %v1748_v54  }
 0x790   :  { %419 = vperm.xlu1 %8187, %v10558_v12  }
 0x791   :  { %v8233_v56 = vpop.eup %8232 }
 0x792   :  { %v3075_v23 = vmul.f32 %v8233_v56, %v10661_v4 }
 0x794   :  { %424 = vperm.xlu1 %8187, %v10579_v25   ;;  %v3145_v10 = vmul.f32 %v10681_v6, %v3075_v23  ;;  %v1752_v23 = vsub.f32 1.0, %v10746_v8 }
 0x795   :  { %v8235_v45 = vpop.eup %8234 }
 0x796   :  { %v3215_v43 = vadd.f32 %v10699_v31, %v3145_v10  ;;  %v3076_v33 = vmul.f32 %v8235_v45, %v10669_v16  ;;  %v10855_v10 = vpop.permute.xlu1 %722  ;;  %2059 = vperm.xlu0 %8191, %v1752_v23  }
 0x798   :  { %439 = vperm.xlu1 %8187, %v10746_v8   ;;  %7334 = vmatmul.mubr.msk.f32.gmra.mrb[40].mxu0 %vm2285_vm0, %v3215_v43  ;;  %v3146_v7 = vmul.f32 %v10681_v6, %v3076_v33  ;;  %v1753_v43 = vsub.f32 1.0, %v10759_v62  ;;  %v15030_v33 = vmov 1  }
 0x799   :  { %v8237_v4 = vpop.eup %8236  ;;  %3677 = vmatprep.mubr.f32.mxu0 %v14901_v19 }
 0x79a   :  { %v3216_v29 = vadd.f32 %v10699_v31, %v3146_v7  ;;  %v3077_v56 = vmul.f32 %v8237_v4, %v10685_v47  ;;  %v10868_v47 = vld [vmem:[%s14775_s29 + $0x1f8] sm:$0xff]  ;;  %2064 = vperm.xlu0 %8191, %v1753_v43  }
 0x79c   :  { %444 = vperm.xlu1 %8187, %v10759_v62   ;;  %7335 = vmatmul.mubr.msk.f32.gmra.mrb[42].mxu0 %vm2285_vm0, %v3216_v29  ;;  %v3147_v16 = vmul.f32 %v10681_v6, %v3077_v56  ;;  %v10871_v6 = vpop.permute.xlu1 %734 }
 0x79d   :  { %3683 = vmatprep.mubr.f32.mxu0 %v14901_v19 }
 0x79e   :  { %v3217_v45 = vadd.f32 %v10699_v31, %v3147_v16  ;;  %1625 = vperm.xlu0 %8191, %v10868_v47  }
 0x7a0   :  { %449 = vperm.xlu1 %8187, %v10593_v37   ;;  %7336 = vmatmul.mubr.msk.f32.gmra.mrb[44].mxu0 %vm2285_vm0, %v3217_v45  ;;  %v10875_v31 = vpop.permute.xlu1 %742 }
 0x7a1   :  { %3689 = vmatprep.mubr.f32.mxu0 %v14901_v19 }
 0x7a4   :  { %454 = vperm.xlu1 %8187, %v10868_v47   ;;  %v10880_v54 = vpop.permute.xlu1 %746 }
 0x7a8   :  { %8188 = vset.pattern.permute.xlu1 %v15030_v33  ;;  %v10882_v7 = vpop.permute.xlu1 %758 }
 0x7a9   :  { %778 = vperm.xlu1 %8188, %v10868_v47  }
 0x7ac   :  { %v10884_v4 = vpop.permute.xlu1 %750 }
 0x7ad   :  { %8189 = vset.pattern.permute.xlu1 %v14974_v40 }
 0x7b0   :  { %v10886_v29 = vpop.permute.xlu1 %762 }
 0x7b4   :  { %v10888_v56 = vpop.permute.xlu1 %754 }
 0x7b5   :  { %15031 = vst [vmem:[#allocation45_spill] sm:$0xff] %v10888_v56  ;;  %v15043_v56 = vld [vmem:[#allocation26_spill] sm:$0xff] }
 0x7b8   :  { %v10898_v33 = vpop.permute.xlu1 %766 }
 0x7b9   :  { %15036 = vst [vmem:[#allocation90_spill] sm:$0xff] %v10898_v33 }
 0x7bc   :  { %v10904_v52 = vpop.permute.xlu1 %770 }
 0x7bd   :  { %15039 = vst [vmem:[#allocation93_spill] sm:$0xff] %v10904_v52 }
 0x7c0   :  { %v10906_v28 = vpop.permute.xlu1 %774 }
 0x7c1   :  { %15040 = vst [vmem:[#allocation94_spill] sm:$0xff] %v10906_v28 }
 0x7c6   :  { %v10890_v23 = vpop.f32.mrb[28].mxu0 }
 0x7c7   :  { %15032 = vst [vmem:[#allocation86_spill] sm:$0xff] %v10890_v23  ;;  %v10892_v16 = vpop.f32.mrb[29].mxu0 }
 0x7c8   :  { %15033 = vst [vmem:[#allocation87_spill] sm:$0xff] %v10892_v16  ;;  %v825_v16 = vmul.f32 %v8913_v61, %v10361_v50 }
 0x7ca   :  { %v10894_v45 = vpop.f32.mrb[30].mxu0 }
 0x7cb   :  { %15034 = vst [vmem:[#allocation88_spill] sm:$0xff] %v10894_v45  ;;  %v10896_v43 = vpop.f32.mrb[31].mxu0 }
 0x7cc   :  { %15035 = vst [vmem:[#allocation89_spill] sm:$0xff] %v10896_v43  ;;  %v1213_v43 = vmul.f32 %v8921_v11, %v10753_v0 }
 0x7ce   :  { %v10900_v40 = vpop.f32.mrb[32].mxu0 }
 0x7cf   :  { %15037 = vst [vmem:[#allocation91_spill] sm:$0xff] %v10900_v40  ;;  %v10902_v19 = vpop.f32.mrb[33].mxu0 }
 0x7d0   :  { %15038 = vst [vmem:[#allocation92_spill] sm:$0xff] %v10902_v19  ;;  %v15042_v19 = vld [vmem:[#allocation27_spill] sm:$0xff] }
 0x7d1   :  { %v2123_v52 = vmul.f32 %v10338_v46, %v15042_v19 }
 0x7dc   :  { %v10908_v53 = vpop.xlane.xlu1 %2404 }
 0x7dd   :  { %15041 = vst [vmem:[#allocation95_spill] sm:$0xff] %v10908_v53  ;;  %v10922_v53 = vld [vmem:[%s14788_s5] sm:$0xff] }
 0x7e0   :  { %v340_v48 = vpop.permute.xlu1 %339 }
 0x7e1   :  { %v501_v45 = vmul.f32 %v8910_v60, %v340_v48 }
 0x7e3   :  { %v889_v23 = vadd.f32 %v825_v16, %v501_v45  ;;  %v10949_v16 = vld [vmem:[%s14775_s29 + $0x198] sm:$0xff] }
 0x7e4   :  { %v345_v45 = vpop.permute.xlu1 %344 }
 0x7e5   :  { %v1277_v42 = vadd.f32 %v1213_v43, %v889_v23  ;;  %v8515_v23 = vld [vmem:[%s14775_s29 + $0x160] sm:$0xff]  ;;  %v502_v43 = vmul.f32 %v8910_v60, %v345_v45  ;;  %v10973_v45 = vld [vmem:[%s14788_s5 + $0x8] sm:$0xff] }
 0x7e7   :  { %v1348_v40 = vadd.f32 %v10326_v27, %v1277_v42 }
 0x7e8   :  { %v10966_v59 = vpop.permute.xlu1 %349 }
 0x7e9   :  { %v1668_v28 = vmul.f32 %v15043_v56, %v1348_v40 }
 0x7eb   :  { %v2187_v33 = vadd.f32 %v2123_v52, %v1668_v28 }
 0x7ec   :  { %v10968_v44 = vpop.permute.xlu1 %354 }
 0x7ed   :  { %v10925_v50 = vadd.f32 %v10922_v53, %v2187_v33  ;;  %v15051_v33 = vld [vmem:[#allocation42_spill] sm:$0xff] }
 0x7ee   :  { %v826_v40 = vmul.f32 %v8913_v61, %v15051_v33 }
 0x7ef   :  { %15044 = vst [vmem:[#allocation27_spill] sm:$0xff] %v10925_v50  ;;  %v10927_v48 = vpop.f32.mrb[34].mxu0  ;;  %v2406_v0 = vsel %vm2285_vm0, %v10925_v50, 0.0 }
 0x7f0   :  { %15045 = vst [vmem:[#allocation26_spill] sm:$0xff] %v10927_v48  ;;  %v10931_v42 = vpop.f32.mrb[35].mxu0  ;;  %2407 = vadd.xlane.f32.xlu1 %v2406_v0  ;;  %v890_v0 = vadd.f32 %v826_v40, %v502_v43  ;;  %v1736_v43 = vsub.f32 1.0, %v8515_v23 }
 0x7f1   :  { %15046 = vst [vmem:[#allocation96_spill] sm:$0xff] %v10931_v42  ;;  %v15053_v42 = vld [vmem:[#allocation29_spill] sm:$0xff] }
 0x7f2   :  { %v2124_v50 = vmul.f32 %v10338_v46, %v15053_v42 }
 0x7f3   :  { %v10933_v19 = vpop.f32.mrb[36].mxu0 }
 0x7f4   :  { %15047 = vst [vmem:[#allocation97_spill] sm:$0xff] %v10933_v19  ;;  %v10935_v56 = vpop.f32.mrb[37].mxu0 }
 0x7f5   :  { %15048 = vst [vmem:[#allocation98_spill] sm:$0xff] %v10935_v56  ;;  %v15052_v56 = vld [vmem:[#allocation34_spill] sm:$0xff] }
 0x7f7   :  { %v10937_v52 = vpop.f32.mrb[38].mxu0 }
 0x7f8   :  { %15049 = vst [vmem:[#allocation99_spill] sm:$0xff] %v10937_v52  ;;  %v10939_v28 = vpop.f32.mrb[39].mxu0 }
 0x7f9   :  { %15050 = vst [vmem:[#allocation100_spill] sm:$0xff] %v10939_v28  ;;  %v1214_v28 = vmul.f32 %v8921_v11, %v10763_v15 }
 0x7fb   :  { %v1278_v52 = vadd.f32 %v1214_v28, %v890_v0 }
 0x7fd   :  { %v1349_v19 = vadd.f32 %v10326_v27, %v1278_v52 }
 0x7ff   :  { %v1669_v48 = vmul.f32 %v15052_v56, %v1349_v19  ;;  %v10980_v19 = vpop.permute.xlu1 %359  ;;  %v8518_v56 = vld [vmem:[%s14775_s29 + $0x158] sm:$0xff] }
 0x800   :  { %v1735_v52 = vsub.f32 1.0, %v8518_v56 }
 0x801   :  { %1082 = vperm.xlu1 %8189, %v10692_v32  }
 0x803   :  { %v10982_v46 = vpop.permute.xlu1 %369 }
 0x805   :  { %1090 = vperm.xlu1 %8189, %v8515_v23  }
 0x807   :  { %v10984_v42 = vpop.permute.xlu1 %379 }
 0x809   :  { %1110 = vperm.xlu1 %8189, %v10718_v41  }
 0x80d   :  { %1118 = vperm.xlu1 %8189, %v10949_v16  }
 0x811   :  { %1130 = vperm.xlu1 %8189, %v10429_v35  }
 0x815   :  { %1154 = vperm.xlu1 %8189, %v10746_v8  }
 0x819   :  { %1158 = vperm.xlu1 %8189, %v10759_v62  }
 0x81d   :  { %1166 = vperm.xlu1 %8189, %v10868_v47  }
 0x821   :  { %8190 = vset.pattern.permute.xlu1 %v15001_v58  ;;  %v2188_v58 = vadd.f32 %v2124_v50, %v1669_v48  ;;  %v1734_v50 = vsub.f32 1.0, %v10692_v32  ;;  %v10987_v48 = vpop.permute.xlu1 %384  ;;  %v8519_v32 = vld [vmem:[%s14775_s29 + $0x170] sm:$0xff] }
 0x822   :  { %v1738_v0 = vsub.f32 1.0, %v8519_v32 }
 0x823   :  { %v10976_v15 = vadd.f32 %v10973_v45, %v2188_v58 }
 0x825   :  { %15054 = vst [vmem:[#allocation42_spill] sm:$0xff] %v10976_v15  ;;  %v2409_v27 = vsel %vm2285_vm0, %v10976_v15, 0.0  ;;  %v10992_v28 = vpop.permute.xlu1 %389 }
 0x829   :  { %v10994_v33 = vpop.permute.xlu1 %394 }
 0x82d   :  { %v10996_v40 = vpop.permute.xlu1 %404 }
 0x841   :  { %2410 = vadd.xlane.f32.xlu1 %v2409_v27  ;;  %v11003_v27 = vpop.permute.xlu1 %429 }
 0x852   :  { %1969 = vperm.xlu1 %8190, %v1734_v50  }
 0x856   :  { %1545 = vperm.xlu1 %8190, %v8518_v56  }
 0x85a   :  { %1974 = vperm.xlu1 %8190, %v1735_v52  }
 0x85e   :  { %1549 = vperm.xlu1 %8190, %v8515_v23   ;;  %v1739_v23 = vsub.f32 1.0, %v10406_v38 }
 0x862   :  { %1979 = vperm.xlu1 %8190, %v1736_v43   ;;  %v11013_v43 = vpop.permute.xlu1 %419 }
 0x866   :  { %1557 = vperm.xlu1 %8190, %v8519_v32  }
 0x86a   :  { %1989 = vperm.xlu1 %8190, %v1738_v0   ;;  %v8520_v0 = vld [vmem:[%s14775_s29 + $0x180] sm:$0xff] }
 0x86b   :  { %v11001_v58 = vpop.f32.mrb[40].mxu0 }
 0x86c   :  { %15055 = vst [vmem:[#allocation34_spill] sm:$0xff] %v11001_v58  ;;  %v11005_v50 = vpop.f32.mrb[41].mxu0  ;;  %v11022_v58 = vpop.permute.xlu1 %424 }
 0x86d   :  { %15056 = vst [vmem:[#allocation29_spill] sm:$0xff] %v11005_v50  ;;  %v1740_v50 = vsub.f32 1.0, %v8520_v0  ;;  %15061 = vst [vmem:[#allocation105_spill] sm:$0xff] %v11022_v58 }
 0x86e   :  { %1561 = vperm.xlu1 %8190, %v10406_v38   ;;  %v1741_v38 = vsub.f32 1.0, %v10718_v41 }
 0x86f   :  { %v11009_v56 = vpop.f32.mrb[42].mxu0 }
 0x870   :  { %15057 = vst [vmem:[#allocation101_spill] sm:$0xff] %v11009_v56  ;;  %v11011_v52 = vpop.f32.mrb[43].mxu0  ;;  %v11025_v56 = vpop.permute.xlu1 %439 }
 0x871   :  { %15058 = vst [vmem:[#allocation102_spill] sm:$0xff] %v11011_v52  ;;  %15062 = vst [vmem:[#allocation106_spill] sm:$0xff] %v11025_v56 }
 0x872   :  { %1994 = vperm.xlu1 %8190, %v1739_v23   ;;  %v8521_v23 = vld [vmem:[%s14775_s29 + $0x190] sm:$0xff] }
 0x873   :  { %v11015_v15 = vpop.f32.mrb[44].mxu0 }
 0x874   :  { %15059 = vst [vmem:[#allocation103_spill] sm:$0xff] %v11015_v15  ;;  %v11017_v32 = vpop.f32.mrb[45].mxu0  ;;  %v11030_v52 = vpop.permute.xlu1 %444 }
 0x875   :  { %15060 = vst [vmem:[#allocation104_spill] sm:$0xff] %v11017_v32  ;;  %v1742_v32 = vsub.f32 1.0, %v8521_v23  ;;  %15063 = vst [vmem:[#allocation107_spill] sm:$0xff] %v11030_v52 }
 0x876   :  { %1565 = vperm.xlu1 %8190, %v8520_v0   ;;  %v8522_v0 = vld [vmem:[%s14775_s29 + $0x1a8] sm:$0xff] }
 0x878   :  { %v11032_v15 = vpop.permute.xlu1 %449 }
 0x879   :  { %15064 = vst [vmem:[#allocation108_spill] sm:$0xff] %v11032_v15  ;;  %v1750_v15 = vsub.f32 1.0, %v10546_v20 }
 0x87a   :  { %1999 = vperm.xlu1 %8190, %v1740_v50   ;;  %v1743_v50 = vsub.f32 1.0, %v10949_v16 }
 0x87c   :  { %v11036_v41 = vpop.permute.xlu1 %454 }
 0x87d   :  { %15065 = vst [vmem:[#allocation109_spill] sm:$0xff] %v11036_v41 }
 0x87e   :  { %2004 = vperm.xlu1 %8190, %v1741_v38   ;;  %v1745_v38 = vsub.f32 1.0, %v8522_v0 }
 0x880   :  { %v11041_v58 = vpop.permute.xlu1 %778 }
 0x881   :  { %15066 = vst [vmem:[#allocation110_spill] sm:$0xff] %v11041_v58  ;;  %v15072_v58 = vld [vmem:[#allocation31_spill] sm:$0xff] }
 0x882   :  { %1573 = vperm.xlu1 %8190, %v8521_v23  }
 0x884   :  { %v11043_v23 = vpop.xlane.xlu1 %2407 }
 0x885   :  { %15067 = vst [vmem:[#allocation111_spill] sm:$0xff] %v11043_v23 }
 0x886   :  { %2009 = vperm.xlu1 %8190, %v1742_v32   ;;  %v1746_v32 = vsub.f32 1.0, %v10429_v35 }
 0x88a   :  { %1577 = vperm.xlu1 %8190, %v10949_v16   ;;  %v1083_v16 = vpop.permute.xlu1 %1082 }
 0x88e   :  { %2014 = vperm.xlu1 %8190, %v1743_v50   ;;  %v1747_v50 = vsub.f32 1.0, %v10440_v51  ;;  %v1091_v41 = vpop.permute.xlu1 %1090 }
 0x892   :  { %1585 = vperm.xlu1 %8190, %v8522_v0   ;;  %v11050_v0 = vpop.permute.xlu1 %1110 }
 0x896   :  { %2024 = vperm.xlu1 %8190, %v1745_v38   ;;  %v11053_v38 = vpop.permute.xlu1 %1118 }
 0x89a   :  { %1589 = vperm.xlu1 %8190, %v10429_v35   ;;  %v1751_v35 = vsub.f32 1.0, %v10454_v22 }
 0x89e   :  { %2029 = vperm.xlu1 %8190, %v1746_v32   ;;  %v11057_v32 = vpop.permute.xlu1 %1130 }
 0x8a2   :  { %1605 = vperm.xlu1 %8190, %v10546_v20   ;;  %v11060_v51 = vpop.permute.xlu1 %1154  ;;  %v1749_v20 = vsub.f32 1.0, %v10579_v25 }
 0x8a3   :  { %15068 = vst [vmem:[#allocation112_spill] sm:$0xff] %v11060_v51 }
 0x8a6   :  { %2034 = vperm.xlu1 %8190, %v1747_v50   ;;  %v1215_v50 = vmul.f32 %v8921_v11, %v1083_v16  ;;  %v11086_v16 = vld [vmem:[%s14786_s28] ss:$0 sm:$0xff] }
 0x8aa   :  { %2049 = vperm.xlu1 %8190, %v1750_v15   ;;  %v11064_v15 = vpop.permute.xlu1 %1158 }
 0x8ab   :  { %15069 = vst [vmem:[#allocation113_spill] sm:$0xff] %v11064_v15 }
 0x8ae   :  { %1597 = vperm.xlu1 %8190, %v10558_v12   ;;  %v503_v12 = vmul.f32 %v8910_v60, %v10966_v59  ;;  %v11072_v23 = vpop.permute.xlu1 %1166 }
 0x8af   :  { %15070 = vst [vmem:[#allocation114_spill] sm:$0xff] %v11072_v23 }
 0x8b2   :  { %1609 = vperm.xlu1 %8190, %v10454_v22   ;;  %v827_v22 = vmul.f32 %v8913_v61, %v10834_v21  ;;  %v828_v21 = vmul.f32 %v8913_v61, %v15072_v58 }
 0x8b6   :  { %2054 = vperm.xlu1 %8190, %v1751_v35   ;;  %v891_v35 = vadd.f32 %v827_v22, %v503_v12  ;;  %v1542_v22 = vpop.permute.xlu0 %1541 }
 0x8ba   :  { %1601 = vperm.xlu1 %8190, %v10579_v25   ;;  %v1754_v25 = vsub.f32 1.0, %v10593_v37 }
 0x8be   :  { %1613 = vperm.xlu1 %8190, %v10746_v8   ;;  %v1279_v8 = vadd.f32 %v1215_v50, %v891_v35 }
 0x8c0   :  { %v1350_v12 = vadd.f32 %v11086_v16, %v1279_v8  ;;  %v505_v8 = vmul.f32 %v8910_v60, %v10980_v19 }
 0x8c2   :  { %2044 = vperm.xlu1 %8190, %v1749_v20   ;;  %v504_v20 = vmul.f32 %v8910_v60, %v10968_v44  ;;  %v1216_v44 = vmul.f32 %v8921_v11, %v10768_v2  ;;  %v1670_v35 = vmul.f32 %v1542_v22, %v1350_v12  ;;  %v15075_v12 = vld [vmem:[#allocation53_spill] sm:$0xff] }
 0x8c3   :  { %v829_v22 = vmul.f32 %v8913_v61, %v15075_v12  ;;  %v15077_v12 = vld [vmem:[#allocation6_spill] sm:$0xff] }
 0x8c5   :  { %v893_v15 = vadd.f32 %v829_v22, %v505_v8  ;;  %v15080_v8 = vld [vmem:[#allocation49_spill] sm:$0xff] }
 0x8c6   :  { %1617 = vperm.xlu1 %8190, %v10759_v62   ;;  %v1755_v62 = vsub.f32 1.0, %v10868_v47  ;;  %v11094_v47 = vld [vmem:[%s14787_s0] ss:$0 sm:$0xff]  ;;  %v2504_v22 = vmul.f32 0.010416667, %v15080_v8 }
 0x8ca   :  { %1621 = vperm.xlu1 %8190, %v10593_v37   ;;  %v892_v37 = vadd.f32 %v828_v21, %v504_v20  ;;  %v11102_v20 = vld [vmem:[%s14788_s5 + $0x10] sm:$0xff] }
 0x8ce   :  { %2069 = vperm.xlu1 %8190, %v1754_v25   ;;  %v11078_v59 = vpop.xlane.xlu1 %2410 }
 0x8cf   :  { %15071 = vst [vmem:[#allocation115_spill] sm:$0xff] %v11078_v59  ;;  %v1280_v59 = vadd.f32 %v1216_v44, %v892_v37  ;;  %v830_v37 = vmul.f32 %v8913_v61, %v10837_v39  ;;  %v1554_v39 = vpop.permute.xlu0 %1553 }
 0x8d1   :  { %v1351_v19 = vadd.f32 %v11086_v16, %v1280_v59 }
 0x8d2   :  { %2074 = vperm.xlu1 %8190, %v1755_v62   ;;  %v1970_v50 = vpop.permute.xlu1 %1969  ;;  %v15074_v62 = vld [vmem:[#allocation28_spill] sm:$0xff] }
 0x8d3   :  { %v2125_v58 = vmul.f32 %v11094_v47, %v1970_v50  ;;  %v2503_v21 = vmul.f32 0.010416667, %v15074_v62  ;;  %v1217_v50 = vmul.f32 %v8921_v11, %v1091_v41 }
 0x8d5   :  { %v2189_v25 = vadd.f32 %v2125_v58, %v1670_v35  ;;  %v15076_v58 = vld [vmem:[#allocation20_spill] sm:$0xff]  ;;  %v11120_v51 = vsub.f32 %v15077_v12, %v2503_v21  ;;  %v1281_v41 = vadd.f32 %v1217_v50, %v893_v15  ;;  %v1985_v50 = vpop.permute.xlu0 %1984 }
 0x8d6   :  { %v1546_v23 = vpop.permute.xlu1 %1545 }
 0x8d7   :  { %v11105_v2 = vadd.f32 %v11102_v20, %v2189_v25  ;;  %v506_v25 = vmul.f32 %v8910_v60, %v15076_v58  ;;  %v1671_v62 = vmul.f32 %v1546_v23, %v1351_v19  ;;  %15078 = vst [vmem:[#allocation28_spill] sm:$0xff] %v11120_v51  ;;  %v2631_v21 = vmul.f32 %v11120_v51, %v11120_v51  ;;  %v15084_v51 = vld [vmem:[#allocation47_spill] sm:$0xff] }
 0x8d8   :  { %v1352_v15 = vadd.f32 %v11086_v16, %v1281_v41  ;;  %v2128_v41 = vmul.f32 %v11094_v47, %v1985_v50 }
 0x8d9   :  { %15073 = vst [vmem:[#allocation31_spill] sm:$0xff] %v11105_v2  ;;  %v2412_v44 = vsel %vm2285_vm0, %v11105_v2, 0.0  ;;  %v894_v56 = vadd.f32 %v830_v37, %v506_v25  ;;  %v1218_v2 = vmul.f32 %v8921_v11, %v10775_v18 }
 0x8da   :  { %2413 = vadd.xlane.f32.xlu0 %v2412_v44  ;;  %v1975_v35 = vpop.permute.xlu1 %1974  ;;  %v11127_v44 = vld [vmem:[%s14788_s5 + $0x18] sm:$0xff] }
 0x8db   :  { %v2126_v52 = vmul.f32 %v11094_v47, %v1975_v35  ;;  %v1282_v37 = vadd.f32 %v1218_v2, %v894_v56  ;;  %v15081_v35 = vld [vmem:[#allocation44_spill] sm:$0xff]  ;;  %v2743_v56 = vsel %vm2285_vm0, %v2631_v21, 0.0 }
 0x8dd   :  { %v2190_v9 = vadd.f32 %v2126_v52, %v1671_v62  ;;  %v507_v52 = vmul.f32 %v8910_v60, %v10982_v46  ;;  %v15082_v62 = vld [vmem:[#allocation14_spill] sm:$0xff]  ;;  %v832_v46 = vmul.f32 %v8913_v61, %v10843_v63  ;;  %v1353_v2 = vadd.f32 %v11086_v16, %v1282_v37  ;;  %v11159_v63 = vld [vmem:[%s14788_s5 + $0x20] sm:$0xff] }
 0x8de   :  { %v1550_v59 = vpop.permute.xlu1 %1549  ;;  %v11144_v12 = vsub.f32 %v15082_v62, %v2504_v22  ;;  %v1219_v22 = vmul.f32 %v8921_v11, %v10777_v30  ;;  %v15086_v37 = vld [vmem:[#allocation16_spill] sm:$0xff]  ;;  %v1220_v62 = vmul.f32 %v8921_v11, %v10780_v36  ;;  %v11186_v36 = vld [vmem:[%s14788_s5 + $0x28] sm:$0xff] }
 0x8df   :  { %v11130_v23 = vadd.f32 %v11127_v44, %v2190_v9  ;;  %v831_v9 = vmul.f32 %v8913_v61, %v15081_v35  ;;  %v1672_v58 = vmul.f32 %v1550_v59, %v1352_v15  ;;  %v15085_v35 = vld [vmem:[#allocation19_spill] sm:$0xff] }
 0x8e0   :  { %15083 = vst [vmem:[#allocation20_spill] sm:$0xff] %v11144_v12  ;;  %v508_v59 = vmul.f32 %v8910_v60, %v15085_v35  ;;  %v2632_v50 = vmul.f32 %v11144_v12, %v11144_v12 }
 0x8e1   :  { %15079 = vst [vmem:[#allocation53_spill] sm:$0xff] %v11130_v23  ;;  %v2415_v18 = vsel %vm2285_vm0, %v11130_v23, 0.0  ;;  %v895_v8 = vadd.f32 %v831_v9, %v507_v52  ;;  %v2502_v23 = vmul.f32 0.010416667, %v15084_v51  ;;  %v2505_v52 = vmul.f32 0.010416667, %v15086_v37 }
 0x8e2   :  { %2416 = vadd.xlane.f32.xlu0 %v2415_v18  ;;  %v1980_v19 = vpop.permute.xlu1 %1979  ;;  %v896_v51 = vadd.f32 %v832_v46, %v508_v59  ;;  %v15090_v46 = vld [vmem:[#allocation35_spill] sm:$0xff]  ;;  %v2746_v59 = vsel %vm2285_vm0, %v2632_v50, 0.0 }
 0x8e3   :  { %v2127_v25 = vmul.f32 %v11094_v47, %v1980_v19  ;;  %v1673_v19 = vmul.f32 %v1554_v39, %v1353_v2  ;;  %v15087_v39 = vld [vmem:[#allocation22_spill] sm:$0xff]  ;;  %v15088_v2 = vld [vmem:[#allocation8_spill] sm:$0xff]  ;;  %v2506_v35 = vmul.f32 0.010416667, %v15090_v46  ;;  %v510_v46 = vmul.f32 %v8910_v60, %v10987_v48 }
 0x8e5   :  { %v2191_v18 = vadd.f32 %v2127_v25, %v1672_v58  ;;  %v2192_v9 = vadd.f32 %v2128_v41, %v1673_v19  ;;  %v1283_v58 = vadd.f32 %v1219_v22, %v895_v8  ;;  %v11170_v25 = vsub.f32 %v15087_v39, %v2502_v23  ;;  %v15093_v39 = vld [vmem:[#allocation40_spill] sm:$0xff] }
 0x8e6   :  { %2744 = vadd.xlane.f32.xlu0 %v2743_v56  ;;  %v1558_v15 = vpop.permute.xlu1 %1557  ;;  %v1284_v41 = vadd.f32 %v1220_v62, %v896_v51  ;;  %v509_v8 = vmul.f32 %v8910_v60, %v10984_v42  ;;  %v15091_v51 = vld [vmem:[#allocation36_spill] sm:$0xff]  ;;  %v2507_v62 = vmul.f32 0.010416667, %v15093_v39 }
 0x8e7   :  { %v11162_v21 = vadd.f32 %v11159_v63, %v2191_v18  ;;  %v11175_v18 = vsub.f32 %v15088_v2, %v2505_v52  ;;  %v1354_v22 = vadd.f32 %v11086_v16, %v1283_v58  ;;  %v11189_v19 = vadd.f32 %v11186_v36, %v2192_v9  ;;  %v15092_v58 = vld [vmem:[#allocation24_spill] sm:$0xff] }
 0x8e8   :  { %v2630_v52 = vmul.f32 %v11170_v25, %v11170_v25  ;;  %v833_v42 = vmul.f32 %v8913_v61, %v15091_v51 }
 0x8e9   :  { %v2418_v30 = vsel %vm2285_vm0, %v11162_v21, 0.0  ;;  %15089 = vst [vmem:[#allocation6_spill] sm:$0xff] %v11175_v18  ;;  %v1674_v50 = vmul.f32 %v1558_v15, %v1354_v22  ;;  %v2633_v9 = vmul.f32 %v11175_v18, %v11175_v18  ;;  %v2421_v12 = vsel %vm2285_vm0, %v11189_v19, 0.0 }
 0x8ea   :  { %2419 = vadd.xlane.f32.xlu0 %v2418_v30  ;;  %v1990_v56 = vpop.permute.xlu1 %1989  ;;  %v11196_v30 = vsub.f32 %v15092_v58, %v2506_v35  ;;  %v897_v2 = vadd.f32 %v833_v42, %v509_v8  ;;  %v1221_v15 = vmul.f32 %v8921_v11, %v10785_v14  ;;  %v2740_v22 = vsel %vm2285_vm0, %v2630_v52, 0.0 }
 0x8eb   :  { %v2129_v23 = vmul.f32 %v11094_v47, %v1990_v56  ;;  %v1355_v56 = vadd.f32 %v11086_v16, %v1284_v41  ;;  %v834_v41 = vmul.f32 %v8913_v61, %v10855_v10  ;;  %v1222_v8 = vmul.f32 %v8921_v11, %v11050_v0  ;;  %v11224_v10 = vld [vmem:[%s14788_s5 + $0x30] sm:$0xff] }
 0x8ec   :  { %v2749_v14 = vsel %vm2285_vm0, %v2633_v9, 0.0  ;;  %v1285_v18 = vadd.f32 %v1221_v15, %v897_v2  ;;  %v511_v15 = vmul.f32 %v8910_v60, %v10992_v28  ;;  %v15099_v28 = vld [vmem:[#allocation7_spill] sm:$0xff] }
 0x8ed   :  { %v898_v52 = vadd.f32 %v834_v41, %v510_v46 }
 0x8ee   :  { %2747 = vadd.xlane.f32.xlu0 %v2746_v59  ;;  %v1562_v37 = vpop.permute.xlu1 %1561  ;;  %v2193_v59 = vadd.f32 %v2129_v23, %v1674_v50  ;;  %v15094_v23 = vld [vmem:[#allocation37_spill] sm:$0xff]  ;;  %v15095_v50 = vld [vmem:[#allocation50_spill] sm:$0xff] }
 0x8ef   :  { %v1675_v51 = vmul.f32 %v1562_v37, %v1355_v56  ;;  %v11215_v42 = vsub.f32 %v15094_v23, %v2507_v62  ;;  %v2508_v58 = vmul.f32 0.010416667, %v15095_v50  ;;  %v1286_v62 = vadd.f32 %v1222_v8, %v898_v52  ;;  %v15096_v56 = vld [vmem:[#allocation25_spill] sm:$0xff] }
 0x8f0   :  { %v11227_v0 = vadd.f32 %v11224_v10, %v2193_v59  ;;  %v1356_v59 = vadd.f32 %v11086_v16, %v1285_v18  ;;  %v15101_v18 = vld [vmem:[#allocation30_spill] sm:$0xff] }
 0x8f1   :  { %v11230_v9 = vsub.f32 %v15096_v56, %v2508_v58  ;;  %v2635_v2 = vmul.f32 %v11215_v42, %v11215_v42  ;;  %v1357_v50 = vadd.f32 %v11086_v16, %v1286_v62  ;;  %v2510_v52 = vmul.f32 0.010416667, %v15101_v18 }
 0x8f2   :  { %2422 = vadd.xlane.f32.xlu0 %v2421_v12  ;;  %v1995_v35 = vpop.permute.xlu1 %1994  ;;  %v2634_v12 = vmul.f32 %v11196_v30, %v11196_v30 }
 0x8f3   :  { %v2130_v48 = vmul.f32 %v11094_v47, %v1995_v35  ;;  %v15097_v35 = vld [vmem:[#allocation51_spill] sm:$0xff]  ;;  %v2755_v56 = vsel %vm2285_vm0, %v2635_v2, 0.0 }
 0x8f4   :  { %v2509_v23 = vmul.f32 0.010416667, %v15097_v35  ;;  %v2752_v46 = vsel %vm2285_vm0, %v2634_v12, 0.0 }
 0x8f5   :  { %v2194_v39 = vadd.f32 %v2130_v48, %v1675_v51  ;;  %v15098_v51 = vld [vmem:[#allocation46_spill] sm:$0xff] }
 0x8f6   :  { %2741 = vadd.xlane.f32.xlu1 %v2740_v22  ;;  %2750 = vadd.xlane.f32.xlu0 %v2749_v14  ;;  %v1566_v37 = vpop.permute.xlu1 %1565  ;;  %v2424_v22 = vsel %vm2285_vm0, %v11227_v0, 0.0  ;;  %v835_v48 = vmul.f32 %v8913_v61, %v15098_v51  ;;  %v11249_v12 = vsub.f32 %v15099_v28, %v2509_v23  ;;  %v15102_v51 = vld [vmem:[#allocation74_spill] sm:$0xff]  ;;  %v1223_v23 = vmul.f32 %v8921_v11, %v10795_v17 }
 0x8f7   :  { %v11242_v41 = vadd.f32 %v10790_v5, %v2194_v39  ;;  %v1676_v58 = vmul.f32 %v1566_v37, %v1356_v59  ;;  %v2511_v62 = vmul.f32 0.010416667, %v15102_v51  ;;  %v1570_v37 = vpop.permute.xlu0 %1569  ;;  %v15106_v51 = vld [vmem:[#allocation23_spill] sm:$0xff] }
 0x8f8   :  { %15100 = vst [vmem:[#allocation49_spill] sm:$0xff] %v11249_v12  ;;  %v899_v39 = vadd.f32 %v835_v48, %v511_v15  ;;  %v15103_v48 = vld [vmem:[#allocation9_spill] sm:$0xff]  ;;  %v2637_v28 = vmul.f32 %v11249_v12, %v11249_v12  ;;  %v514_v12 = vmul.f32 %v8910_v60, %v10996_v40  ;;  %v2514_v40 = vmul.f32 0.010416667, %v10816_v13 }
 0x8fa   :  { %2753 = vadd.xlane.f32.xlu0 %v2752_v46  ;;  %2425 = vadd.xlane.f32.xlu1 %v2424_v22  ;;  %v2000_v8 = vpop.permute.xlu1 %1999  ;;  %v2427_v46 = vsel %vm2285_vm0, %v11242_v41, 0.0  ;;  %v2636_v22 = vmul.f32 %v11230_v9, %v11230_v9 }
 0x8fb   :  { %v2131_v14 = vmul.f32 %v11094_v47, %v2000_v8  ;;  %v1677_v8 = vmul.f32 %v1570_v37, %v1357_v50  ;;  %v1287_v50 = vadd.f32 %v1223_v23, %v899_v39  ;;  %v11277_v37 = vsub.f32 %v15106_v51, %v2511_v62  ;;  %v15108_v51 = vld [vmem:[#allocation21_spill] sm:$0xff] }
 0x8fc   :  { %v2761_v39 = vsel %vm2285_vm0, %v2637_v28, 0.0  ;;  %v1224_v62 = vmul.f32 %v8921_v11, %v11053_v38  ;;  %v2513_v38 = vmul.f32 0.010416667, %v15108_v51 }
 0x8fd   :  { %v2195_v35 = vadd.f32 %v2131_v14, %v1676_v58  ;;  %v11265_v58 = vsub.f32 %v15103_v48, %v2510_v52  ;;  %v837_v14 = vmul.f32 %v8913_v61, %v10871_v6  ;;  %v512_v6 = vmul.f32 %v8910_v60, %v10994_v33  ;;  %v15107_v48 = vld [vmem:[#allocation67_spill] sm:$0xff] }
 0x8fe   :  { %2756 = vadd.xlane.f32.xlu0 %v2755_v56  ;;  %2428 = vadd.xlane.f32.xlu1 %v2427_v46  ;;  %v2005_v59 = vpop.permute.xlu1 %2004  ;;  %v2758_v56 = vsel %vm2285_vm0, %v2636_v22, 0.0  ;;  %v15105_v46 = vld [vmem:[#allocation17_spill] sm:$0xff]  ;;  %v2512_v22 = vmul.f32 0.010416667, %v10615_v1  ;;  %v1358_v33 = vadd.f32 %v11086_v16, %v1287_v50  ;;  %v1225_v1 = vmul.f32 %v8921_v11, %v10799_v34 }
 0x8ff   :  { %v2132_v2 = vmul.f32 %v11094_v47, %v2005_v59  ;;  %v11262_v15 = vadd.f32 %v10922_v53, %v2195_v35  ;;  %15104 = vst [vmem:[#allocation44_spill] sm:$0xff] %v11265_v58  ;;  %v513_v35 = vmul.f32 %v8910_v60, %v15105_v46  ;;  %v2638_v23 = vmul.f32 %v11265_v58, %v11265_v58 }
 0x901   :  { %v2196_v18 = vadd.f32 %v2132_v2, %v1677_v8  ;;  %v2430_v17 = vsel %vm2285_vm0, %v11262_v15, 0.0  ;;  %v901_v8 = vadd.f32 %v837_v14, %v513_v35  ;;  %v1582_v2 = vpop.permute.xlu0 %1581  ;;  %v2639_v35 = vmul.f32 %v11277_v37, %v11277_v37 }
 0x902   :  { %2759 = vadd.xlane.f32.xlu0 %v2758_v56  ;;  %2431 = vadd.xlane.f32.xlu1 %v2430_v17  ;;  %v1574_v52 = vpop.permute.xlu1 %1573  ;;  %v836_v56 = vmul.f32 %v8913_v61, %v15107_v48  ;;  %v15109_v48 = vld [vmem:[#allocation12_spill] sm:$0xff] }
 0x903   :  { %v11282_v59 = vadd.f32 %v10973_v45, %v2196_v18  ;;  %v1678_v17 = vmul.f32 %v1574_v52, %v1358_v33  ;;  %v11302_v50 = vsub.f32 %v15109_v48, %v2512_v22  ;;  %v1289_v58 = vadd.f32 %v1225_v1, %v901_v8  ;;  %v15111_v22 = vld [vmem:[#allocation41_spill] sm:$0xff] }
 0x904   :  { %v900_v28 = vadd.f32 %v836_v56, %v512_v6  ;;  %v15110_v56 = vld [vmem:[#allocation56_spill] sm:$0xff]  ;;  %v11314_v8 = vsub.f32 %v15111_v22, %v2513_v38  ;;  %v1226_v38 = vmul.f32 %v8921_v11, %v10801_v24  ;;  %v839_v24 = vmul.f32 %v8913_v61, %v10875_v31 }
 0x905   :  { %v2433_v18 = vsel %vm2285_vm0, %v11282_v59, 0.0  ;;  %v2020_v6 = vpop.permute.xlu0 %2019  ;;  %v838_v33 = vmul.f32 %v8913_v61, %v15110_v56 }
 0x906   :  { %2762 = vadd.xlane.f32.xlu0 %v2761_v39  ;;  %2434 = vadd.xlane.f32.xlu1 %v2433_v18  ;;  %v2010_v14 = vpop.permute.xlu1 %2009  ;;  %v1288_v34 = vadd.f32 %v1224_v62, %v900_v28  ;;  %v2764_v18 = vsel %vm2285_vm0, %v2638_v23, 0.0  ;;  %v1360_v62 = vadd.f32 %v11086_v16, %v1289_v58  ;;  %v2640_v23 = vmul.f32 %v11302_v50, %v11302_v50 }
 0x907   :  { %v2133_v46 = vmul.f32 %v11094_v47, %v2010_v14  ;;  %v2767_v14 = vsel %vm2285_vm0, %v2639_v35, 0.0  ;;  %v2135_v1 = vmul.f32 %v11094_v47, %v2020_v6  ;;  %v902_v28 = vadd.f32 %v838_v33, %v514_v12 }
 0x908   :  { %v1680_v13 = vmul.f32 %v1582_v2, %v1360_v62  ;;  %v2641_v12 = vmul.f32 %v11314_v8, %v11314_v8  ;;  %v2770_v56 = vsel %vm2285_vm0, %v2640_v23, 0.0  ;;  %v1227_v23 = vmul.f32 %v8921_v11, %v11057_v32 }
 0x909   :  { %v2197_v39 = vadd.f32 %v2133_v46, %v1678_v17  ;;  %v1359_v17 = vadd.f32 %v11086_v16, %v1288_v34  ;;  %v1290_v33 = vadd.f32 %v1226_v38, %v902_v28  ;;  %v840_v32 = vmul.f32 %v8913_v61, %v10880_v54 }
 0x90a   :  { %2765 = vadd.xlane.f32.xlu0 %v2764_v18  ;;  %v1578_v52 = vpop.permute.xlu1 %1577  ;;  %v2199_v34 = vadd.f32 %v2135_v1, %v1680_v13 }
 0x90b   :  { %v11311_v51 = vadd.f32 %v11102_v20, %v2197_v39  ;;  %v1679_v48 = vmul.f32 %v1578_v52, %v1359_v17  ;;  %v15112_v39 = vld [vmem:[#allocation63_spill] sm:$0xff]  ;;  %v15113_v52 = vld [vmem:[#allocation18_spill] sm:$0xff]  ;;  %v1361_v1 = vadd.f32 %v11086_v16, %v1290_v33 }
 0x90c   :  { %v11328_v18 = vsub.f32 %v15112_v39, %v2514_v40  ;;  %v515_v22 = vmul.f32 %v8910_v60, %v15113_v52  ;;  %v2773_v40 = vsel %vm2285_vm0, %v2641_v12, 0.0  ;;  %v11349_v31 = vadd.f32 %v11159_v63, %v2199_v34  ;;  %v15114_v34 = vld [vmem:[#allocation59_spill] sm:$0xff] }
 0x90d   :  { %v2436_v46 = vsel %vm2285_vm0, %v11311_v51, 0.0 }
 0x90e   :  { %2768 = vadd.xlane.f32.xlu0 %v2767_v14  ;;  %2437 = vadd.xlane.f32.xlu1 %v2436_v46  ;;  %v2015_v35 = vpop.permute.xlu1 %2014  ;;  %v2642_v62 = vmul.f32 %v11328_v18, %v11328_v18  ;;  %v903_v46 = vadd.f32 %v839_v24, %v515_v22  ;;  %v2442_v39 = vsel %vm2285_vm0, %v11349_v31, 0.0  ;;  %v1228_v22 = vmul.f32 %v8921_v11, %v10803_v26 }
 0x90f   :  { %v2134_v58 = vmul.f32 %v11094_v47, %v2015_v35 }
 0x910   :  { %v2776_v13 = vsel %vm2285_vm0, %v2642_v62, 0.0 }
 0x911   :  { %v2198_v6 = vadd.f32 %v2134_v58, %v1679_v48  ;;  %v1291_v48 = vadd.f32 %v1227_v23, %v903_v46 }
 0x912   :  { %2771 = vadd.xlane.f32.xlu0 %v2770_v56  ;;  %v1586_v14 = vpop.permute.xlu1 %1585 }
 0x913   :  { %v11336_v2 = vadd.f32 %v11127_v44, %v2198_v6  ;;  %v1681_v35 = vmul.f32 %v1586_v14, %v1361_v1  ;;  %v516_v6 = vmul.f32 %v8910_v60, %v15114_v34  ;;  %v519_v14 = vmul.f32 %v8910_v60, %v11003_v27 }
 0x914   :  { %v1362_v54 = vadd.f32 %v11086_v16, %v1291_v48  ;;  %v517_v27 = vmul.f32 %v8910_v60, %v11013_v43  ;;  %v844_v34 = vmul.f32 %v8913_v61, %v10886_v29 }
 0x915   :  { %v2439_v28 = vsel %vm2285_vm0, %v11336_v2, 0.0  ;;  %v904_v33 = vadd.f32 %v840_v32, %v516_v6 }
 0x916   :  { %2774 = vadd.xlane.f32.xlu0 %v2773_v40  ;;  %2440 = vadd.xlane.f32.xlu1 %v2439_v28  ;;  %v2025_v17 = vpop.permute.xlu1 %2024  ;;  %v843_v40 = vmul.f32 %v8913_v61, %v10882_v7  ;;  %v2515_v7 = vmul.f32 0.010416667, %v10821_v57 }
 0x917   :  { %v2136_v38 = vmul.f32 %v11094_v47, %v2025_v17  ;;  %v1292_v1 = vadd.f32 %v1228_v22, %v904_v33 }
 0x918   :  { %v907_v28 = vadd.f32 %v843_v40, %v519_v14  ;;  %v11391_v57 = vsub.f32 %v10623_v3, %v2515_v7 }
 0x919   :  { %v2200_v58 = vadd.f32 %v2136_v38, %v1681_v35  ;;  %v1231_v35 = vmul.f32 %v8921_v11, %v10807_v55  ;;  %v841_v38 = vmul.f32 %v8913_v61, %v10884_v4  ;;  %v1363_v32 = vadd.f32 %v11086_v16, %v1292_v1 }
 0x91a   :  { %2777 = vadd.xlane.f32.xlu0 %v2776_v13  ;;  %2443 = vadd.xlane.f32.xlu1 %v2442_v39  ;;  %v1590_v12 = vpop.permute.xlu1 %1589  ;;  %v1594_v13 = vpop.permute.xlu0 %1593  ;;  %v1229_v55 = vmul.f32 %v8921_v11, %v10810_v49 }
 0x91b   :  { %v11360_v56 = vadd.f32 %v11186_v36, %v2200_v58  ;;  %v1682_v62 = vmul.f32 %v1590_v12, %v1362_v54  ;;  %v905_v48 = vadd.f32 %v841_v38, %v517_v27  ;;  %v1295_v58 = vadd.f32 %v1231_v35, %v907_v28  ;;  %v15115_v54 = vld [vmem:[#allocation57_spill] sm:$0xff] }
 0x91c   :  { %v1683_v12 = vmul.f32 %v1594_v13, %v1363_v32  ;;  %v2643_v27 = vmul.f32 %v11391_v57, %v11391_v57  ;;  %v15118_v32 = vld [vmem:[#allocation76_spill] sm:$0xff] }
 0x91d   :  { %v2445_v24 = vsel %vm2285_vm0, %v11360_v56, 0.0  ;;  %v1366_v6 = vadd.f32 %v11086_v16, %v1295_v58  ;;  %v1293_v14 = vadd.f32 %v1229_v55, %v905_v48 }
 0x91e   :  { %2446 = vadd.xlane.f32.xlu1 %v2445_v24  ;;  %v2030_v52 = vpop.permute.xlu1 %2029  ;;  %v520_v24 = vmul.f32 %v8910_v60, %v15115_v54  ;;  %v2040_v35 = vpop.permute.xlu0 %2039 }
 0x91f   :  { %v2137_v23 = vmul.f32 %v11094_v47, %v2030_v52  ;;  %v1364_v28 = vadd.f32 %v11086_v16, %v1293_v14  ;;  %v15120_v14 = vld [vmem:[#allocation90_spill] sm:$0xff] }
 0x920   :  { %v908_v29 = vadd.f32 %v844_v34, %v520_v24  ;;  %v845_v54 = vmul.f32 %v8913_v61, %v15120_v14  ;;  %v15121_v24 = vld [vmem:[#allocation105_spill] sm:$0xff] }
 0x921   :  { %v2201_v17 = vadd.f32 %v2137_v23, %v1682_v62  ;;  %v15116_v62 = vld [vmem:[#allocation84_spill] sm:$0xff] }
 0x922   :  { %v1606_v46 = vpop.permute.xlu1 %1605  ;;  %v2516_v23 = vmul.f32 0.010416667, %v15116_v62  ;;  %v2060_v14 = vpop.permute.xlu0 %2059 }
 0x923   :  { %v11379_v26 = vadd.f32 %v11224_v10, %v2201_v17  ;;  %v1686_v22 = vmul.f32 %v1606_v46, %v1366_v6  ;;  %v15117_v17 = vld [vmem:[#allocation38_spill] sm:$0xff] }
 0x924   :  { %v1232_v46 = vmul.f32 %v8921_v11, %v15117_v17  ;;  %v11413_v48 = vsub.f32 %v15118_v32, %v2516_v23  ;;  %v15123_v23 = vld [vmem:[#allocation45_spill] sm:$0xff]  ;;  %v15125_v32 = vld [vmem:[#allocation107_spill] sm:$0xff] }
 0x925   :  { %v2448_v43 = vsel %vm2285_vm0, %v11379_v26, 0.0 }
 0x926   :  { %2449 = vadd.xlane.f32.xlu1 %v2448_v43  ;;  %v2035_v39 = vpop.permute.xlu1 %2034  ;;  %v1296_v58 = vadd.f32 %v1232_v46, %v908_v29  ;;  %v842_v29 = vmul.f32 %v8913_v61, %v15123_v23 }
 0x927   :  { %v2138_v4 = vmul.f32 %v11094_v47, %v2035_v39  ;;  %v2779_v39 = vsel %vm2285_vm0, %v2643_v27, 0.0 }
 0x929   :  { %v2202_v33 = vadd.f32 %v2138_v4, %v1683_v12  ;;  %v15119_v4 = vld [vmem:[#allocation106_spill] sm:$0xff] }
 0x92a   :  { %v2050_v52 = vpop.permute.xlu1 %2049  ;;  %v521_v34 = vmul.f32 %v8910_v60, %v15119_v4 }
 0x92b   :  { %v2141_v49 = vmul.f32 %v11094_v47, %v2050_v52  ;;  %v11398_v40 = vadd.f32 %v10790_v5, %v2202_v33  ;;  %v2139_v5 = vmul.f32 %v11094_v47, %v2040_v35  ;;  %v2644_v33 = vmul.f32 %v11413_v48, %v11413_v48 }
 0x92c   :  { %v518_v52 = vmul.f32 %v8910_v60, %v15121_v24 }
 0x92d   :  { %v2205_v1 = vadd.f32 %v2141_v49, %v1686_v22  ;;  %v2451_v3 = vsel %vm2285_vm0, %v11398_v40, 0.0  ;;  %v15122_v22 = vld [vmem:[#allocation112_spill] sm:$0xff]  ;;  %v2782_v35 = vsel %vm2285_vm0, %v2644_v33, 0.0 }
 0x92e   :  { %2452 = vadd.xlane.f32.xlu1 %v2451_v3  ;;  %v1598_v38 = vpop.permute.xlu1 %1597  ;;  %v1233_v49 = vmul.f32 %v8921_v11, %v15122_v22  ;;  %v906_v27 = vadd.f32 %v842_v29, %v518_v52  ;;  %v2143_v52 = vmul.f32 %v11094_v47, %v2060_v14  ;;  %v15128_v22 = vld [vmem:[#allocation85_spill] sm:$0xff] }
 0x92f   :  { %v1684_v7 = vmul.f32 %v1598_v38, %v1364_v28  ;;  %v11410_v13 = vadd.f32 %v11102_v20, %v2205_v1  ;;  %v1367_v20 = vadd.f32 %v11086_v16, %v1296_v58  ;;  %v909_v1 = vadd.f32 %v845_v54, %v521_v34 }
 0x930   :  { %v522_v58 = vmul.f32 %v8910_v60, %v15125_v32  ;;  %v15132_v32 = vld [vmem:[#allocation95_spill] sm:$0xff] }
 0x931   :  { %v2203_v43 = vadd.f32 %v2139_v5, %v1684_v7  ;;  %v2460_v55 = vsel %vm2285_vm0, %v11410_v13, 0.0  ;;  %v1297_v17 = vadd.f32 %v1233_v49, %v909_v1  ;;  %v15124_v5 = vld [vmem:[#allocation39_spill] sm:$0xff]  ;;  %v2517_v49 = vmul.f32 0.010416667, %v15128_v22 }
 0x932   :  { %2780 = vadd.xlane.f32.xlu1 %v2779_v39  ;;  %2461 = vadd.xlane.f32.xlu0 %v2460_v55  ;;  %v1610_v12 = vpop.permute.xlu1 %1609  ;;  %v1230_v7 = vmul.f32 %v8921_v11, %v15124_v5  ;;  %v15126_v39 = vld [vmem:[#allocation93_spill] sm:$0xff]  ;;  %v15131_v5 = vld [vmem:[#allocation78_spill] sm:$0xff] }
 0x933   :  { %v11421_v6 = vadd.f32 %v10922_v53, %v2203_v43  ;;  %v1687_v3 = vmul.f32 %v1610_v12, %v1367_v20  ;;  %v846_v55 = vmul.f32 %v8913_v61, %v15126_v39  ;;  %v15127_v12 = vld [vmem:[#allocation113_spill] sm:$0xff]  ;;  %v1368_v33 = vadd.f32 %v11086_v16, %v1297_v17 }
 0x934   :  { %v1234_v4 = vmul.f32 %v8921_v11, %v15127_v12  ;;  %v1294_v34 = vadd.f32 %v1230_v7, %v906_v27  ;;  %v11464_v7 = vsub.f32 %v15131_v5, %v2517_v49 }
 0x935   :  { %v2454_v62 = vsel %vm2285_vm0, %v11421_v6, 0.0  ;;  %v910_v24 = vadd.f32 %v846_v55, %v522_v58  ;;  %v2518_v58 = vmul.f32 0.010416667, %v15132_v32  ;;  %v15133_v55 = vld [vmem:[#allocation110_spill] sm:$0xff]  ;;  %v15139_v32 = vld [vmem:[#allocation27_spill] sm:$0xff] }
 0x936   :  { %2455 = vadd.xlane.f32.xlu0 %v2454_v62  ;;  %v2055_v53 = vpop.permute.xlu1 %2054  ;;  %v15129_v62 = vld [vmem:[#allocation108_spill] sm:$0xff]  ;;  %v1365_v29 = vadd.f32 %v11086_v16, %v1294_v34  ;;  %v848_v12 = vmul.f32 %v8913_v61, %v15133_v55 }
 0x937   :  { %v2142_v28 = vmul.f32 %v11094_v47, %v2055_v53  ;;  %v523_v53 = vmul.f32 %v8910_v60, %v15129_v62  ;;  %v1298_v23 = vadd.f32 %v1234_v4, %v910_v24  ;;  %v2065_v4 = vpop.permute.xlu0 %2064  ;;  %v15135_v24 = vld [vmem:[#allocation109_spill] sm:$0xff] }
 0x938   :  { %v2144_v14 = vmul.f32 %v11094_v47, %v2065_v4  ;;  %v15137_v62 = vld [vmem:[#allocation13_spill] sm:$0xff] }
 0x939   :  { %v2206_v46 = vadd.f32 %v2142_v28, %v1687_v3  ;;  %v15130_v3 = vld [vmem:[#allocation94_spill] sm:$0xff] }
 0x93a   :  { %2783 = vadd.xlane.f32.xlu0 %v2782_v35  ;;  %v1602_v38 = vpop.permute.xlu1 %1601  ;;  %v847_v28 = vmul.f32 %v8913_v61, %v15130_v3  ;;  %v15138_v3 = vld [vmem:[#allocation111_spill] sm:$0xff] }
 0x93b   :  { %v11443_v43 = vadd.f32 %v11127_v44, %v2206_v46  ;;  %v1685_v17 = vmul.f32 %v1602_v38, %v1365_v29  ;;  %v1369_v38 = vadd.f32 %v11086_v16, %v1298_v23  ;;  %v2645_v29 = vmul.f32 %v11464_v7, %v11464_v7 }
 0x93c   :  { %v911_v39 = vadd.f32 %v847_v28, %v523_v53  ;;  %v11483_v53 = vsub.f32 %v15137_v62, %v2518_v58  ;;  %v2519_v28 = vmul.f32 0.010416667, %v15138_v3  ;;  %v8530_v3 = vld [vmem:[%s14788_s5 + $0x38] sm:$0xff] }
 0x93d   :  { %v2463_v20 = vsel %vm2285_vm0, %v11443_v43, 0.0 }
 0x93e   :  { %2464 = vadd.xlane.f32.xlu1 %v2463_v20  ;;  %v1614_v54 = vpop.permute.xlu1 %1613  ;;  %v2646_v5 = vmul.f32 %v11483_v53, %v11483_v53  ;;  %v11497_v58 = vsub.f32 %v15139_v32, %v2519_v28 }
 0x93f   :  { %v1688_v44 = vmul.f32 %v1614_v54, %v1368_v33  ;;  %v15134_v33 = vld [vmem:[#allocation5_spill] sm:$0xff] }
 0x941   :  { %v2207_v1 = vadd.f32 %v2143_v52, %v1688_v44  ;;  %v524_v52 = vmul.f32 %v8910_v60, %v15135_v24  ;;  %v15136_v44 = vld [vmem:[#allocation114_spill] sm:$0xff]  ;;  %v2788_v24 = vsel %vm2285_vm0, %v2646_v5, 0.0 }
 0x942   :  { %v2045_v27 = vpop.permute.xlu1 %2044  ;;  %v1236_v61 = vmul.f32 %v8921_v11, %v15136_v44 }
 0x943   :  { %v2140_v46 = vmul.f32 %v11094_v47, %v2045_v27  ;;  %v11461_v35 = vadd.f32 %v11159_v63, %v2207_v1  ;;  %v1235_v63 = vmul.f32 %v8921_v11, %v15134_v33  ;;  %v912_v1 = vadd.f32 %v848_v12, %v524_v52  ;;  %v1626_v33 = vpop.permute.xlu0 %1625 }
 0x944   :  { %v2647_v52 = vmul.f32 %v11497_v58, %v11497_v58 }
 0x945   :  { %v2204_v34 = vadd.f32 %v2140_v46, %v1685_v17  ;;  %v2466_v20 = vsel %vm2285_vm0, %v11461_v35, 0.0  ;;  %v1299_v23 = vadd.f32 %v1235_v63, %v911_v39  ;;  %v1300_v17 = vadd.f32 %v1236_v61, %v912_v1  ;;  %v15140_v39 = vld [vmem:[#allocation115_spill] sm:$0xff]  ;;  %v15141_v63 = vld [vmem:[#allocation42_spill] sm:$0xff] }
 0x946   :  { %2467 = vadd.xlane.f32.xlu0 %v2466_v20  ;;  %v1618_v54 = vpop.permute.xlu1 %1617  ;;  %v2785_v46 = vsel %vm2285_vm0, %v2645_v29, 0.0  ;;  %v2520_v55 = vmul.f32 0.010416667, %v15140_v39 }
 0x947   :  { %v1689_v22 = vmul.f32 %v1618_v54, %v1369_v38  ;;  %v11480_v49 = vadd.f32 %v10973_v45, %v2204_v34  ;;  %v1370_v12 = vadd.f32 %v11086_v16, %v1299_v23  ;;  %v2791_v23 = vsel %vm2285_vm0, %v2647_v52, 0.0 }
 0x949   :  { %v2208_v27 = vadd.f32 %v2144_v14, %v1689_v22  ;;  %v2457_v60 = vsel %vm2285_vm0, %v11480_v49, 0.0  ;;  %v11506_v14 = vsub.f32 %v15141_v63, %v2520_v55  ;;  %v15143_v55 = vld [vmem:[#allocation53_spill] sm:$0xff] }
 0x94a   :  { %2458 = vadd.xlane.f32.xlu1 %v2457_v60  ;;  %v1622_v11 = vpop.permute.xlu1 %1621 }
 0x94b   :  { %v11491_v45 = vadd.f32 %v11186_v36, %v2208_v27  ;;  %v1371_v36 = vadd.f32 %v11086_v16, %v1300_v17  ;;  %v1690_v20 = vmul.f32 %v1622_v11, %v1370_v12  ;;  %v2648_v1 = vmul.f32 %v11506_v14, %v11506_v14  ;;  %v15142_v11 = vld [vmem:[#allocation31_spill] sm:$0xff] }
 0x94d   :  { %v2469_v4 = vsel %vm2285_vm0, %v11491_v45, 0.0  ;;  %v1691_v61 = vmul.f32 %v1626_v33, %v1371_v36 }
 0x94e   :  { %2786 = vadd.xlane.f32.xlu1 %v2785_v46  ;;  %2470 = vadd.xlane.f32.xlu0 %v2469_v4  ;;  %v2070_v34 = vpop.permute.xlu1 %2069 }
 0x94f   :  { %v2145_v38 = vmul.f32 %v11094_v47, %v2070_v34 }
 0x951   :  { %v2209_v54 = vadd.f32 %v2145_v38, %v1690_v20 }
 0x952   :  { %2789 = vadd.xlane.f32.xlu1 %v2788_v24  ;;  %v2075_v44 = vpop.permute.xlu1 %2074 }
 0x953   :  { %v2146_v22 = vmul.f32 %v11094_v47, %v2075_v44  ;;  %v11513_v16 = vadd.f32 %v11224_v10, %v2209_v54  ;;  %v2794_v47 = vsel %vm2285_vm0, %v2648_v1, 0.0 }
 0x955   :  { %v2210_v62 = vadd.f32 %v2146_v22, %v1691_v61  ;;  %v2472_v29 = vsel %vm2285_vm0, %v11513_v16, 0.0 }
 0x956   :  { %2792 = vadd.xlane.f32.xlu1 %v2791_v23  ;;  %2473 = vadd.xlane.f32.xlu0 %v2472_v29 }
 0x957   :  { %v11523_v28 = vadd.f32 %v8530_v3, %v2210_v62 }
 0x959   :  { %v2475_v10 = vsel %vm2285_vm0, %v11523_v28, 0.0 }
 0x95a   :  { %2795 = vadd.xlane.f32.xlu1 %v2794_v47  ;;  %2476 = vadd.xlane.f32.xlu0 %v2475_v10 }
 0x967   :  { %v2414_v27 = vpop.xlane.xlu0 %2413 }
 0x968   :  { %v2521_v60 = vmul.f32 0.010416667, %v2414_v27 }
 0x96a   :  { %v11529_v17 = vsub.f32 %v15142_v11, %v2521_v60 }
 0x96c   :  { %v2649_v46 = vmul.f32 %v11529_v17, %v11529_v17 }
 0x96e   :  { %v2797_v5 = vsel %vm2285_vm0, %v2649_v46, 0.0 }
 0x96f   :  { %v2417_v32 = vpop.xlane.xlu0 %2416  ;;  %2798 = vadd.xlane.f32.xlu0 %v2797_v5 }
 0x970   :  { %v2522_v39 = vmul.f32 0.010416667, %v2417_v32 }
 0x972   :  { %v11535_v12 = vsub.f32 %v15143_v55, %v2522_v39 }
 0x973   :  { %v2745_v4 = vpop.xlane.xlu0 %2744 }
 0x974   :  { %v2650_v34 = vmul.f32 %v11535_v12, %v11535_v12  ;;  %v2887_v44 = vmul.f32 0.010416667, %v2745_v4 }
 0x976   :  { %v2800_v36 = vsel %vm2285_vm0, %v2650_v34, 0.0  ;;  %v2951_v29 = vadd.f32 1e-06, %v2887_v44 }
 0x977   :  { %v2420_v20 = vpop.xlane.xlu0 %2419  ;;  %2801 = vadd.xlane.f32.xlu1 %v2800_v36 }
 0x978   :  { %v2523_v38 = vmul.f32 0.010416667, %v2420_v20  ;;  %8238 = vrsqrt.f32 %v2951_v29 }
 0x97a   :  { %v11541_v33 = vsub.f32 %v11162_v21, %v2523_v38 }
 0x97b   :  { %v2748_v63 = vpop.xlane.xlu0 %2747 }
 0x97c   :  { %v2651_v54 = vmul.f32 %v11541_v33, %v11541_v33  ;;  %v2888_v1 = vmul.f32 0.010416667, %v2748_v63 }
 0x97e   :  { %v2803_v24 = vsel %vm2285_vm0, %v2651_v54, 0.0  ;;  %v2952_v11 = vadd.f32 1e-06, %v2888_v1 }
 0x97f   :  { %v2423_v52 = vpop.xlane.xlu0 %2422  ;;  %2804 = vadd.xlane.f32.xlu0 %v2803_v24 }
 0x980   :  { %v2524_v61 = vmul.f32 0.010416667, %v2423_v52 }
 0x982   :  { %v11547_v22 = vsub.f32 %v11189_v19, %v2524_v61  ;;  %v8239_v61 = vpop.eup %8238 }
 0x983   :  { %v2751_v62 = vpop.xlane.xlu0 %2750  ;;  %v2742_v23 = vpop.xlane.xlu1 %2741 }
 0x984   :  { %v2886_v3 = vmul.f32 0.010416667, %v2742_v23  ;;  %v2652_v21 = vmul.f32 %v11547_v22, %v11547_v22  ;;  %v2889_v46 = vmul.f32 0.010416667, %v2751_v62 }
 0x986   :  { %v2950_v47 = vadd.f32 1e-06, %v2886_v3  ;;  %v2806_v10 = vsel %vm2285_vm0, %v2652_v21, 0.0  ;;  %v2953_v4 = vadd.f32 1e-06, %v2889_v46 }
 0x987   :  { %v2754_v27 = vpop.xlane.xlu0 %2753  ;;  %2807 = vadd.xlane.f32.xlu1 %v2806_v10  ;;  %v2426_v60 = vpop.xlane.xlu1 %2425 }
 0x988   :  { %v2525_v5 = vmul.f32 0.010416667, %v2426_v60  ;;  %8240 = vrsqrt.f32 %v2950_v47  ;;  %v2890_v32 = vmul.f32 0.010416667, %v2754_v27  ;;  %v15144_v60 = vld [vmem:[#allocation28_spill] sm:$0xff] }
 0x989   :  { %8242 = vrsqrt.f32 %v2952_v11  ;;  %v3079_v11 = vmul.f32 %v8239_v61, %v15144_v60 }
 0x98a   :  { %v11553_v19 = vsub.f32 %v11227_v0, %v2525_v5  ;;  %v2954_v63 = vadd.f32 1e-06, %v2890_v32  ;;  %8244 = vrsqrt.f32 %v2953_v4 }
 0x98b   :  { %v2757_v39 = vpop.xlane.xlu0 %2756  ;;  %v2429_v55 = vpop.xlane.xlu1 %2428 }
 0x98c   :  { %v2526_v34 = vmul.f32 0.010416667, %v2429_v55  ;;  %v2653_v36 = vmul.f32 %v11553_v19, %v11553_v19  ;;  %v2891_v0 = vmul.f32 0.010416667, %v2757_v39  ;;  %8246 = vrsqrt.f32 %v2954_v63  ;;  %v11578_v39 = vld [vmem:[%s14895_s1] ss:$0 sm:$0xff] }
 0x98d   :  { %v15145_v63 = vld [vmem:[#allocation20_spill] sm:$0xff] }
 0x98e   :  { %v11558_v20 = vsub.f32 %v11242_v41, %v2526_v34  ;;  %v2809_v38 = vsel %vm2285_vm0, %v2653_v36, 0.0  ;;  %v2955_v3 = vadd.f32 1e-06, %v2891_v0 }
 0x98f   :  { %v2760_v54 = vpop.xlane.xlu0 %2759  ;;  %2810 = vadd.xlane.f32.xlu0 %v2809_v38  ;;  %v2432_v24 = vpop.xlane.xlu1 %2431  ;;  %v3149_v38 = vmul.f32 %v11578_v39, %v3079_v11 }
 0x990   :  { %v2527_v52 = vmul.f32 0.010416667, %v2432_v24  ;;  %v2654_v44 = vmul.f32 %v11558_v20, %v11558_v20  ;;  %v2892_v21 = vmul.f32 0.010416667, %v2760_v54  ;;  %8248 = vrsqrt.f32 %v2955_v3 }
 0x992   :  { %v11564_v62 = vsub.f32 %v11262_v15, %v2527_v52  ;;  %v2812_v23 = vsel %vm2285_vm0, %v2654_v44, 0.0  ;;  %v8241_v41 = vpop.eup %8240  ;;  %v2956_v4 = vadd.f32 1e-06, %v2892_v21 }
 0x993   :  { %v2763_v29 = vpop.xlane.xlu0 %2762  ;;  %2813 = vadd.xlane.f32.xlu1 %v2812_v23  ;;  %v2435_v1 = vpop.xlane.xlu1 %2434  ;;  %v3078_v27 = vmul.f32 %v8241_v41, %v11170_v25 }
 0x994   :  { %v2528_v47 = vmul.f32 0.010416667, %v2435_v1  ;;  %v2655_v10 = vmul.f32 %v11564_v62, %v11564_v62  ;;  %v8243_v46 = vpop.eup %8242  ;;  %v2893_v25 = vmul.f32 0.010416667, %v2763_v29  ;;  %8250 = vrsqrt.f32 %v2956_v4 }
 0x995   :  { %v3148_v55 = vmul.f32 %v11578_v39, %v3078_v27  ;;  %v3080_v54 = vmul.f32 %v8243_v46, %v15145_v63  ;;  %v8245_v24 = vpop.eup %8244  ;;  %v15146_v29 = vmov 0.0  }
 0x996   :  { %v11572_v15 = vsub.f32 %v11282_v59, %v2528_v47  ;;  %v2815_v5 = vsel %vm2285_vm0, %v2655_v10, 0.0  ;;  %v11586_v59 = vld [vmem:[%s14623_s7] ss:$0 sm:$0xff]  ;;  %v2957_v61 = vadd.f32 1e-06, %v2893_v25  ;;  %v8247_v1 = vpop.eup %8246  ;;  %v15147_v47 = vld [vmem:[#allocation6_spill] sm:$0xff] }
 0x997   :  { %v2766_v32 = vpop.xlane.xlu0 %2765  ;;  %2816 = vadd.xlane.f32.xlu0 %v2815_v5  ;;  %v3218_v36 = vadd.f32 %v11586_v59, %v3148_v55  ;;  %v3219_v3 = vadd.f32 %v11586_v59, %v3149_v38  ;;  %v3150_v21 = vmul.f32 %v11578_v39, %v3080_v54  ;;  %v3081_v10 = vmul.f32 %v8245_v24, %v15147_v47 }
 0x998   :  { %v2656_v34 = vmul.f32 %v11572_v15, %v11572_v15  ;;  %v2894_v23 = vmul.f32 0.010416667, %v2766_v32  ;;  %8252 = vrsqrt.f32 %v2957_v61  ;;  %v3082_v4 = vmul.f32 %v8247_v1, %v11196_v30 }
 0x999   :  { %7337 = vmatmul.mubr.msk.f32.gmra.mrb[46].mxu0 %vm2285_vm0, %v3218_v36  ;;  %v3220_v32 = vadd.f32 %v11586_v59, %v3150_v21  ;;  %v3151_v55 = vmul.f32 %v11578_v39, %v3081_v10 }
 0x99a   :  { %v2818_v0 = vsel %vm2285_vm0, %v2656_v34, 0.0  ;;  %3695 = vmatprep.mubr.f32.mxu0 %v15146_v29  ;;  %v2958_v11 = vadd.f32 1e-06, %v2894_v23  ;;  %v8249_v25 = vpop.eup %8248 }
 0x99b   :  { %v2769_v52 = vpop.xlane.xlu0 %2768  ;;  %2819 = vadd.xlane.f32.xlu1 %v2818_v0  ;;  %v2438_v44 = vpop.xlane.xlu1 %2437  ;;  %v3221_v24 = vadd.f32 %v11586_v59, %v3151_v55  ;;  %v3152_v0 = vmul.f32 %v11578_v39, %v3082_v4  ;;  %v3083_v30 = vmul.f32 %v8249_v25, %v11215_v42  ;;  %v15148_v25 = vld [vmem:[#allocation49_spill] sm:$0xff] }
 0x99c   :  { %v2529_v41 = vmul.f32 0.010416667, %v2438_v44  ;;  %v2895_v46 = vmul.f32 0.010416667, %v2769_v52  ;;  %8254 = vrsqrt.f32 %v2958_v11 }
 0x99d   :  { %7338 = vmatmul.mubr.msk.f32.gmra.mrb[48].mxu0 %vm2285_vm0, %v3219_v3  ;;  %v3222_v47 = vadd.f32 %v11586_v59, %v3152_v0  ;;  %v3153_v42 = vmul.f32 %v11578_v39, %v3083_v30  ;;  %v15149_v30 = vld [vmem:[#allocation44_spill] sm:$0xff] }
 0x99e   :  { %v11598_v27 = vsub.f32 %v11311_v51, %v2529_v41  ;;  %3701 = vmatprep.mubr.f32.mxu0 %v15146_v29  ;;  %v2959_v63 = vadd.f32 1e-06, %v2895_v46  ;;  %v8251_v52 = vpop.eup %8250 }
 0x99f   :  { %v2772_v60 = vpop.xlane.xlu0 %2771 }
 0x9a0   :  { %v2657_v5 = vmul.f32 %v11598_v27, %v11598_v27  ;;  %v2896_v34 = vmul.f32 0.010416667, %v2772_v60  ;;  %8256 = vrsqrt.f32 %v2959_v63 }
 0x9a1   :  { %7339 = vmatmul.mubr.msk.f32.gmra.mrb[50].mxu0 %vm2285_vm0, %v3220_v32 }
 0x9a2   :  { %v2821_v51 = vsel %vm2285_vm0, %v2657_v5, 0.0  ;;  %3707 = vmatprep.mubr.f32.mxu0 %v15146_v29  ;;  %v2960_v61 = vadd.f32 1e-06, %v2896_v34  ;;  %v8253_v10 = vpop.eup %8252 }
 0x9a3   :  { %v2775_v36 = vpop.xlane.xlu0 %2774  ;;  %2822 = vadd.xlane.f32.xlu0 %v2821_v51  ;;  %v2441_v38 = vpop.xlane.xlu1 %2440  ;;  %v3085_v51 = vmul.f32 %v8253_v10, %v15148_v25 }
 0x9a4   :  { %v2530_v54 = vmul.f32 0.010416667, %v2441_v38  ;;  %v2897_v41 = vmul.f32 0.010416667, %v2775_v36  ;;  %8258 = vrsqrt.f32 %v2960_v61 }
 0x9a5   :  { %7340 = vmatmul.mubr.msk.f32.gmra.mrb[52].mxu0 %vm2285_vm0, %v3221_v24  ;;  %v3155_v0 = vmul.f32 %v11578_v39, %v3085_v51 }
 0x9a6   :  { %v11614_v44 = vsub.f32 %v11336_v2, %v2530_v54  ;;  %3713 = vmatprep.mubr.f32.mxu0 %v15146_v29  ;;  %v3084_v2 = vmul.f32 %v8251_v52, %v11230_v9  ;;  %v2961_v5 = vadd.f32 1e-06, %v2897_v41  ;;  %v3223_v9 = vadd.f32 %v11586_v59, %v3153_v42  ;;  %v8255_v34 = vpop.eup %8254 }
 0x9a7   :  { %v2444_v23 = vpop.xlane.xlu1 %2443  ;;  %v2778_v21 = vpop.xlane.xlu0 %2777  ;;  %v3086_v52 = vmul.f32 %v8255_v34, %v15149_v30 }
 0x9a8   :  { %v2531_v1 = vmul.f32 0.010416667, %v2444_v23  ;;  %v2658_v3 = vmul.f32 %v11614_v44, %v11614_v44  ;;  %v2898_v32 = vmul.f32 0.010416667, %v2778_v21  ;;  %8260 = vrsqrt.f32 %v2961_v5 }
 0x9a9   :  { %7341 = vmatmul.mubr.msk.f32.gmra.mrb[54].mxu0 %vm2285_vm0, %v3222_v47  ;;  %v3156_v21 = vmul.f32 %v11578_v39, %v3086_v52 }
 0x9aa   :  { %v11624_v60 = vsub.f32 %v11349_v31, %v2531_v1  ;;  %v2824_v11 = vsel %vm2285_vm0, %v2658_v3, 0.0  ;;  %3719 = vmatprep.mubr.f32.mxu0 %v15146_v29  ;;  %v3154_v31 = vmul.f32 %v11578_v39, %v3084_v2  ;;  %v2962_v63 = vadd.f32 1e-06, %v2898_v32 }
 0x9ab   :  { %2825 = vadd.xlane.f32.xlu1 %v2824_v11  ;;  %v2447_v46 = vpop.xlane.xlu1 %2446  ;;  %v3225_v3 = vadd.f32 %v11586_v59, %v3155_v0  ;;  %v3226_v10 = vadd.f32 %v11586_v59, %v3156_v21 }
 0x9ac   :  { %v2532_v55 = vmul.f32 0.010416667, %v2447_v46  ;;  %v2659_v4 = vmul.f32 %v11624_v60, %v11624_v60  ;;  %v3224_v24 = vadd.f32 %v11586_v59, %v3154_v31  ;;  %8262 = vrsqrt.f32 %v2962_v63 }
 0x9ad   :  { %7342 = vmatmul.mubr.msk.f32.gmra.mrb[56].mxu0 %vm2285_vm0, %v3223_v9 }
 0x9ae   :  { %v11635_v36 = vsub.f32 %v11360_v56, %v2532_v55  ;;  %v2827_v38 = vsel %vm2285_vm0, %v2659_v4, 0.0  ;;  %3725 = vmatprep.mubr.f32.mxu0 %v15146_v29  ;;  %v8257_v56 = vpop.eup %8256 }
 0x9af   :  { %2828 = vadd.xlane.f32.xlu0 %v2827_v38  ;;  %v8259_v1 = vpop.eup %8258  ;;  %v3087_v47 = vmul.f32 %v8257_v56, %v11277_v37 }
 0x9b0   :  { %v2660_v54 = vmul.f32 %v11635_v36, %v11635_v36  ;;  %v3088_v46 = vmul.f32 %v8259_v1, %v11302_v50 }
 0x9b1   :  { %7343 = vmatmul.mubr.msk.f32.gmra.mrb[58].mxu0 %vm2285_vm0, %v3224_v24  ;;  %v3157_v11 = vmul.f32 %v11578_v39, %v3087_v47 }
 0x9b2   :  { %v2830_v61 = vsel %vm2285_vm0, %v2660_v54, 0.0  ;;  %3731 = vmatprep.mubr.f32.mxu0 %v15146_v29  ;;  %v8261_v5 = vpop.eup %8260  ;;  %v3158_v4 = vmul.f32 %v11578_v39, %v3088_v46 }
 0x9b3   :  { %2831 = vadd.xlane.f32.xlu1 %v2830_v61  ;;  %v2450_v23 = vpop.xlane.xlu1 %2449  ;;  %v3227_v55 = vadd.f32 %v11586_v59, %v3157_v11  ;;  %v3089_v9 = vmul.f32 %v8261_v5, %v11314_v8 }
 0x9b4   :  { %v2533_v41 = vmul.f32 0.010416667, %v2450_v23  ;;  %v3228_v54 = vadd.f32 %v11586_v59, %v3158_v4 }
 0x9b5   :  { %7344 = vmatmul.mubr.msk.f32.gmra.mrb[60].mxu0 %vm2285_vm0, %v3225_v3  ;;  %v3159_v24 = vmul.f32 %v11578_v39, %v3089_v9 }
 0x9b6   :  { %v11652_v42 = vsub.f32 %v11379_v26, %v2533_v41  ;;  %3737 = vmatprep.mubr.f32.mxu0 %v15146_v29  ;;  %v8263_v31 = vpop.eup %8262 }
 0x9b7   :  { %v3090_v8 = vmul.f32 %v8263_v31, %v11328_v18  ;;  %v3229_v23 = vadd.f32 %v11586_v59, %v3159_v24 }
 0x9b8   :  { %v2661_v2 = vmul.f32 %v11652_v42, %v11652_v42 }
 0x9b9   :  { %7345 = vmatmul.mubr.msk.f32.gmra.mrb[62].mxu0 %vm2285_vm0, %v3226_v10  ;;  %v3160_v18 = vmul.f32 %v11578_v39, %v3090_v8 }
 0x9ba   :  { %v2833_v32 = vsel %vm2285_vm0, %v2661_v2, 0.0  ;;  %3743 = vmatprep.mubr.f32.mxu0 %v15146_v29 }
 0x9bb   :  { %2834 = vadd.xlane.f32.xlu0 %v2833_v32  ;;  %v2453_v37 = vpop.xlane.xlu1 %2452  ;;  %v3230_v47 = vadd.f32 %v11586_v59, %v3160_v18 }
 0x9bc   :  { %v2534_v26 = vmul.f32 0.010416667, %v2453_v37 }
 0x9bd   :  { %7346 = vmatmul.mubr.msk.f32.gmra.mrb[64].mxu0 %vm2285_vm0, %v3227_v55 }
 0x9be   :  { %v11668_v25 = vsub.f32 %v11398_v40, %v2534_v26  ;;  %3749 = vmatprep.mubr.f32.mxu0 %v15146_v29 }
 0x9bf   :  { %v2462_v50 = vpop.xlane.xlu0 %2461  ;;  %v2781_v51 = vpop.xlane.xlu1 %2780 }
 0x9c0   :  { %v2537_v34 = vmul.f32 0.010416667, %v2462_v50  ;;  %v2899_v38 = vmul.f32 0.010416667, %v2781_v51  ;;  %v2662_v63 = vmul.f32 %v11668_v25, %v11668_v25 }
 0x9c1   :  { %7347 = vmatmul.mubr.msk.f32.gmra.mrb[66].mxu0 %vm2285_vm0, %v3228_v54 }
 0x9c2   :  { %v11678_v40 = vsub.f32 %v11410_v13, %v2537_v34  ;;  %v2963_v0 = vadd.f32 1e-06, %v2899_v38  ;;  %v2836_v30 = vsel %vm2285_vm0, %v2662_v63, 0.0  ;;  %3755 = vmatprep.mubr.f32.mxu0 %v15146_v29 }
 0x9c3   :  { %v2456_v52 = vpop.xlane.xlu0 %2455  ;;  %2837 = vadd.xlane.f32.xlu1 %v2836_v30 }
 0x9c4   :  { %8264 = vrsqrt.f32 %v2963_v0  ;;  %v2535_v56 = vmul.f32 0.010416667, %v2456_v52  ;;  %v2665_v61 = vmul.f32 %v11678_v40, %v11678_v40 }
 0x9c5   :  { %7348 = vmatmul.mubr.msk.f32.gmra.mrb[68].mxu0 %vm2285_vm0, %v3229_v23 }
 0x9c6   :  { %v11688_v13 = vsub.f32 %v11421_v6, %v2535_v56  ;;  %v2845_v41 = vsel %vm2285_vm0, %v2665_v61, 0.0  ;;  %3761 = vmatprep.mubr.f32.mxu0 %v15146_v29 }
 0x9c7   :  { %v2784_v1 = vpop.xlane.xlu0 %2783  ;;  %2846 = vadd.xlane.f32.xlu0 %v2845_v41 }
 0x9c8   :  { %v2900_v3 = vmul.f32 0.010416667, %v2784_v1  ;;  %v2663_v21 = vmul.f32 %v11688_v13, %v11688_v13 }
 0x9c9   :  { %7349 = vmatmul.mubr.msk.f32.gmra.mrb[70].mxu0 %vm2285_vm0, %v3230_v47 }
 0x9ca   :  { %v2964_v2 = vadd.f32 1e-06, %v2900_v3  ;;  %v2839_v10 = vsel %vm2285_vm0, %v2663_v21, 0.0  ;;  %3767 = vmatprep.mubr.f32.mxu0 %v15146_v29 }
 0x9cb   :  { %2840 = vadd.xlane.f32.xlu1 %v2839_v10  ;;  %v2465_v6 = vpop.xlane.xlu1 %2464 }
 0x9cc   :  { %8266 = vrsqrt.f32 %v2964_v2  ;;  %v2538_v11 = vmul.f32 0.010416667, %v2465_v6 }
 0x9ce   :  { %v8265_v46 = vpop.eup %8264  ;;  %v11700_v5 = vsub.f32 %v11443_v43, %v2538_v11 }
 0x9cf   :  { %v3091_v32 = vmul.f32 %v8265_v46, %v11391_v57 }
 0x9d0   :  { %v2666_v37 = vmul.f32 %v11700_v5, %v11700_v5 }
 0x9d1   :  { %v3161_v26 = vmul.f32 %v11578_v39, %v3091_v32 }
 0x9d2   :  { %v2848_v55 = vsel %vm2285_vm0, %v2666_v37, 0.0 }
 0x9d3   :  { %v2468_v4 = vpop.xlane.xlu0 %2467  ;;  %2849 = vadd.xlane.f32.xlu0 %v2848_v55  ;;  %v3231_v9 = vadd.f32 %v11586_v59, %v3161_v26 }
 0x9d4   :  { %v2539_v31 = vmul.f32 0.010416667, %v2468_v4 }
 0x9d5   :  { %7350 = vmatmul.mubr.msk.f32.gmra.mrb[72].mxu0 %vm2285_vm0, %v3231_v9 }
 0x9d6   :  { %v8267_v50 = vpop.eup %8266  ;;  %v11710_v43 = vsub.f32 %v11461_v35, %v2539_v31  ;;  %3773 = vmatprep.mubr.f32.mxu0 %v15146_v29 }
 0x9d7   :  { %v2459_v57 = vpop.xlane.xlu1 %2458  ;;  %v3092_v51 = vmul.f32 %v8267_v50, %v11413_v48 }
 0x9d8   :  { %v2536_v34 = vmul.f32 0.010416667, %v2459_v57  ;;  %v2667_v38 = vmul.f32 %v11710_v43, %v11710_v43 }
 0x9d9   :  { %v3162_v63 = vmul.f32 %v11578_v39, %v3092_v51 }
 0x9da   :  { %v11718_v54 = vsub.f32 %v11480_v49, %v2536_v34  ;;  %v2851_v24 = vsel %vm2285_vm0, %v2667_v38, 0.0 }
 0x9db   :  { %v2471_v8 = vpop.xlane.xlu0 %2470  ;;  %2852 = vadd.xlane.f32.xlu0 %v2851_v24  ;;  %v2787_v35 = vpop.xlane.xlu1 %2786  ;;  %v3232_v0 = vadd.f32 %v11586_v59, %v3162_v63 }
 0x9dc   :  { %v2540_v30 = vmul.f32 0.010416667, %v2471_v8  ;;  %v2901_v52 = vmul.f32 0.010416667, %v2787_v35  ;;  %v2664_v48 = vmul.f32 %v11718_v54, %v11718_v54 }
 0x9dd   :  { %7351 = vmatmul.mubr.msk.f32.gmra.mrb[74].mxu0 %vm2285_vm0, %v3232_v0 }
 0x9de   :  { %v11726_v56 = vsub.f32 %v11491_v45, %v2540_v30  ;;  %v2965_v61 = vadd.f32 1e-06, %v2901_v52  ;;  %v2842_v49 = vsel %vm2285_vm0, %v2664_v48, 0.0  ;;  %3779 = vmatprep.mubr.f32.mxu0 %v15146_v29 }
 0x9df   :  { %2843 = vadd.xlane.f32.xlu1 %v2842_v49  ;;  %v2790_v23 = vpop.xlane.xlu1 %2789  ;;  %v4007_v49 = vld [vmem:[%s15150_s27] sm:$0xff] }
 0x9e0   :  { %8268 = vrsqrt.f32 %v2965_v61  ;;  %v2902_v18 = vmul.f32 0.010416667, %v2790_v23  ;;  %v2668_v41 = vmul.f32 %v11726_v56, %v11726_v56  ;;  %v7519_v23 = vld [vmem:[%s14628_s12] ss:$0 sm:$0xff] }
 0x9e2   :  { %v2966_v1 = vadd.f32 1e-06, %v2902_v18  ;;  %v2854_v3 = vsel %vm2285_vm0, %v2668_v41, 0.0 }
 0x9e3   :  { %v2474_v21 = vpop.xlane.xlu0 %2473  ;;  %2855 = vadd.xlane.f32.xlu1 %v2854_v3  ;;  %v2793_v47 = vpop.xlane.xlu1 %2792 }
 0x9e4   :  { %8270 = vrsqrt.f32 %v2966_v1  ;;  %v2541_v45 = vmul.f32 0.010416667, %v2474_v21  ;;  %v2903_v2 = vmul.f32 0.010416667, %v2793_v47 }
 0x9e6   :  { %v11734_v10 = vsub.f32 %v11513_v16, %v2541_v45  ;;  %v2967_v6 = vadd.f32 1e-06, %v2903_v2 }
 0x9e7   :  { %v2477_v11 = vpop.xlane.xlu0 %2476  ;;  %v2796_v46 = vpop.xlane.xlu1 %2795 }
 0x9e8   :  { %8272 = vrsqrt.f32 %v2967_v6  ;;  %v2542_v32 = vmul.f32 0.010416667, %v2477_v11  ;;  %v2904_v37 = vmul.f32 0.010416667, %v2796_v46  ;;  %v2669_v26 = vmul.f32 %v11734_v10, %v11734_v10 }
 0x9ea   :  { %v8269_v55 = vpop.eup %8268  ;;  %v11739_v4 = vsub.f32 %v11523_v28, %v2542_v32  ;;  %v2968_v9 = vadd.f32 1e-06, %v2904_v37  ;;  %v2857_v31 = vsel %vm2285_vm0, %v2669_v26, 0.0 }
 0x9eb   :  { %2858 = vadd.xlane.f32.xlu0 %v2857_v31  ;;  %v3093_v16 = vmul.f32 %v8269_v55, %v11464_v7 }
 0x9ec   :  { %8274 = vrsqrt.f32 %v2968_v9  ;;  %v2670_v50 = vmul.f32 %v11739_v4, %v11739_v4 }
 0x9ed   :  { %v3163_v57 = vmul.f32 %v11578_v39, %v3093_v16 }
 0x9ee   :  { %v8271_v51 = vpop.eup %8270  ;;  %v2860_v34 = vsel %vm2285_vm0, %v2670_v50, 0.0 }
 0x9ef   :  { %2861 = vadd.xlane.f32.xlu1 %v2860_v34  ;;  %v3233_v38 = vadd.f32 %v11586_v59, %v3163_v57  ;;  %v3094_v28 = vmul.f32 %v8271_v51, %v11483_v53 }
 0x9f1   :  { %7352 = vmatmul.mubr.msk.f32.gmra.mrb[76].mxu0 %vm2285_vm0, %v3233_v38  ;;  %v3164_v63 = vmul.f32 %v11578_v39, %v3094_v28 }
 0x9f2   :  { %v8273_v24 = vpop.eup %8272  ;;  %3785 = vmatprep.mubr.f32.mxu0 %v15146_v29 }
 0x9f3   :  { %v3234_v7 = vadd.f32 %v11586_v59, %v3164_v63  ;;  %v3095_v8 = vmul.f32 %v8273_v24, %v11497_v58 }
 0x9f5   :  { %7353 = vmatmul.mubr.msk.f32.gmra.mrb[78].mxu0 %vm2285_vm0, %v3234_v7  ;;  %v3165_v35 = vmul.f32 %v11578_v39, %v3095_v8 }
 0x9f6   :  { %v8275_v0 = vpop.eup %8274  ;;  %3791 = vmatprep.mubr.f32.mxu0 %v15146_v29 }
 0x9f7   :  { %v3235_v53 = vadd.f32 %v11586_v59, %v3165_v35  ;;  %v3096_v30 = vmul.f32 %v8275_v0, %v11506_v14  ;;  %v4008_v14 = vld [vmem:[%s15150_s27 + $0x8] sm:$0xff] }
 0x9f8   :  { %v11774_v18 = vpack.c.bf16 %v4008_v14, %v4007_v49 }
 0x9f9   :  { %7354 = vmatmul.mubr.msk.f32.gmra.mrb[80].mxu0 %vm2285_vm0, %v3235_v53  ;;  %v3166_v52 = vmul.f32 %v11578_v39, %v3096_v30 }
 0x9fa   :  { %3797 = vmatprep.mubr.f32.mxu0 %v15146_v29  ;;  %7985 = vmatprep.subr.bf16.mxu1 %v11774_v18 }
 0x9fb   :  { %v3236_v48 = vadd.f32 %v11586_v59, %v3166_v52 }
 0x9fc   :  { %v2799_v58 = vpop.xlane.xlu0 %2798 }
 0x9fd   :  { %v2905_v61 = vmul.f32 0.010416667, %v2799_v58  ;;  %7355 = vmatmul.mubr.msk.f32.gmra.mrb[82].mxu0 %vm2285_vm0, %v3236_v48 }
 0x9fe   :  { %3803 = vmatprep.mubr.f32.mxu0 %v15146_v29 }
 0x9ff   :  { %v2969_v41 = vadd.f32 1e-06, %v2905_v61 }
 0xa01   :  { %8276 = vrsqrt.f32 %v2969_v41  ;;  %5993 = vrot.lane.b32.xlu0 %v7519_v23, %s8566_s23 }
 0xa04   :  { %v2802_v1 = vpop.xlane.xlu1 %2801 }
 0xa05   :  { %v2906_v3 = vmul.f32 0.010416667, %v2802_v1 }
 0xa07   :  { %v2970_v21 = vadd.f32 1e-06, %v2906_v3 }
 0xa09   :  { %8278 = vrsqrt.f32 %v2970_v21 }
 0xa0b   :  { %v8277_v47 = vpop.eup %8276 }
 0xa0c   :  { %v2805_v45 = vpop.xlane.xlu0 %2804  ;;  %v3097_v2 = vmul.f32 %v8277_v47, %v11529_v17 }
 0xa0d   :  { %v2907_v6 = vmul.f32 0.010416667, %v2805_v45 }
 0xa0e   :  { %v3167_v11 = vmul.f32 %v11578_v39, %v3097_v2 }
 0xa0f   :  { %v2971_v46 = vadd.f32 1e-06, %v2907_v6 }
 0xa10   :  { %v3237_v32 = vadd.f32 %v11586_v59, %v3167_v11 }
 0xa11   :  { %8280 = vrsqrt.f32 %v2971_v46 }
 0xa12   :  { %7356 = vmatmul.mubr.msk.f32.gmra.mrb[84].mxu0 %vm2285_vm0, %v3237_v32 }
 0xa13   :  { %v8279_v37 = vpop.eup %8278  ;;  %3809 = vmatprep.mubr.f32.mxu0 %v15146_v29 }
 0xa14   :  { %v2808_v26 = vpop.xlane.xlu1 %2807  ;;  %v3098_v55 = vmul.f32 %v8279_v37, %v11535_v12 }
 0xa15   :  { %v2908_v9 = vmul.f32 0.010416667, %v2808_v26 }
 0xa16   :  { %v3168_v31 = vmul.f32 %v11578_v39, %v3098_v55 }
 0xa17   :  { %v2972_v16 = vadd.f32 1e-06, %v2908_v9 }
 0xa18   :  { %v3238_v17 = vadd.f32 %v11586_v59, %v3168_v31 }
 0xa19   :  { %8282 = vrsqrt.f32 %v2972_v16 }
 0xa1a   :  { %7357 = vmatmul.mubr.msk.f32.gmra.mrb[86].mxu0 %vm2285_vm0, %v3238_v17 }
 0xa1b   :  { %v8281_v50 = vpop.eup %8280  ;;  %3815 = vmatprep.mubr.f32.mxu0 %v15146_v29 }
 0xa1c   :  { %v2811_v57 = vpop.xlane.xlu0 %2810  ;;  %v3099_v51 = vmul.f32 %v8281_v50, %v11541_v33 }
 0xa1d   :  { %v2909_v34 = vmul.f32 0.010416667, %v2811_v57 }
 0xa1e   :  { %v3169_v38 = vmul.f32 %v11578_v39, %v3099_v51 }
 0xa1f   :  { %v2973_v28 = vadd.f32 1e-06, %v2909_v34 }
 0xa20   :  { %v2814_v12 = vpop.xlane.xlu1 %2813  ;;  %v3239_v63 = vadd.f32 %v11586_v59, %v3169_v38 }
 0xa21   :  { %8284 = vrsqrt.f32 %v2973_v28  ;;  %v2910_v24 = vmul.f32 0.010416667, %v2814_v12 }
 0xa22   :  { %7358 = vmatmul.mubr.msk.f32.gmra.mrb[88].mxu0 %vm2285_vm0, %v3239_v63 }
 0xa23   :  { %v8283_v7 = vpop.eup %8282  ;;  %v2974_v8 = vadd.f32 1e-06, %v2910_v24  ;;  %3821 = vmatprep.mubr.f32.mxu0 %v15146_v29 }
 0xa24   :  { %v2817_v35 = vpop.xlane.xlu0 %2816  ;;  %v3100_v0 = vmul.f32 %v8283_v7, %v11547_v22 }
 0xa25   :  { %8286 = vrsqrt.f32 %v2974_v8  ;;  %v2911_v33 = vmul.f32 0.010416667, %v2817_v35 }
 0xa26   :  { %v3170_v53 = vmul.f32 %v11578_v39, %v3100_v0 }
 0xa27   :  { %v2975_v30 = vadd.f32 1e-06, %v2911_v33 }
 0xa28   :  { %v2820_v52 = vpop.xlane.xlu1 %2819  ;;  %v3240_v48 = vadd.f32 %v11586_v59, %v3170_v53 }
 0xa29   :  { %8288 = vrsqrt.f32 %v2975_v30  ;;  %v2912_v58 = vmul.f32 0.010416667, %v2820_v52 }
 0xa2a   :  { %7359 = vmatmul.mubr.msk.f32.gmra.mrb[90].mxu0 %vm2285_vm0, %v3240_v48 }
 0xa2b   :  { %v8285_v61 = vpop.eup %8284  ;;  %v2976_v49 = vadd.f32 1e-06, %v2912_v58  ;;  %3827 = vmatprep.mubr.f32.mxu0 %v15146_v29 }
 0xa2c   :  { %v3101_v14 = vmul.f32 %v8285_v61, %v11553_v19 }
 0xa2d   :  { %8290 = vrsqrt.f32 %v2976_v49 }
 0xa2e   :  { %v3171_v22 = vmul.f32 %v11578_v39, %v3101_v14 }
 0xa2f   :  { %v8287_v23 = vpop.eup %8286 }
 0xa30   :  { %v2823_v41 = vpop.xlane.xlu0 %2822  ;;  %v3241_v1 = vadd.f32 %v11586_v59, %v3171_v22  ;;  %v3102_v3 = vmul.f32 %v8287_v23, %v11558_v20 }
 0xa31   :  { %v2913_v21 = vmul.f32 0.010416667, %v2823_v41 }
 0xa32   :  { %7360 = vmatmul.mubr.msk.f32.gmra.mrb[92].mxu0 %vm2285_vm0, %v3241_v1  ;;  %v3172_v47 = vmul.f32 %v11578_v39, %v3102_v3 }
 0xa33   :  { %v8289_v45 = vpop.eup %8288  ;;  %v2977_v2 = vadd.f32 1e-06, %v2913_v21  ;;  %3833 = vmatprep.mubr.f32.mxu0 %v15146_v29 }
 0xa34   :  { %v3242_v19 = vadd.f32 %v11586_v59, %v3172_v47  ;;  %v3103_v6 = vmul.f32 %v8289_v45, %v11564_v62 }
 0xa35   :  { %8292 = vrsqrt.f32 %v2977_v2 }
 0xa36   :  { %7361 = vmatmul.mubr.msk.f32.gmra.mrb[94].mxu0 %vm2285_vm0, %v3242_v19  ;;  %v3173_v11 = vmul.f32 %v11578_v39, %v3103_v6 }
 0xa37   :  { %v8291_v46 = vpop.eup %8290  ;;  %3839 = vmatprep.mubr.f32.mxu0 %v15146_v29 }
 0xa38   :  { %v2826_v20 = vpop.xlane.xlu1 %2825  ;;  %v3243_v32 = vadd.f32 %v11586_v59, %v3173_v11  ;;  %v3104_v37 = vmul.f32 %v8291_v46, %v11572_v15 }
 0xa39   :  { %v2914_v26 = vmul.f32 0.010416667, %v2826_v20 }
 0xa3a   :  { %7362 = vmatmul.mubr.msk.f32.gmra.mrb[96].mxu0 %vm2285_vm0, %v3243_v32  ;;  %v3174_v55 = vmul.f32 %v11578_v39, %v3104_v37 }
 0xa3b   :  { %v2978_v9 = vadd.f32 1e-06, %v2914_v26  ;;  %3845 = vmatprep.mubr.f32.mxu0 %v15146_v29  ;;  %v4009_v26 = vld [vmem:[%s15150_s27 + $0x10] sm:$0xff] }
 0xa3c   :  { %v2829_v62 = vpop.xlane.xlu0 %2828  ;;  %v3244_v31 = vadd.f32 %v11586_v59, %v3174_v55  ;;  %v4010_v55 = vld [vmem:[%s15150_s27 + $0x18] sm:$0xff] }
 0xa3d   :  { %8294 = vrsqrt.f32 %v2978_v9  ;;  %v2915_v16 = vmul.f32 0.010416667, %v2829_v62 }
 0xa3e   :  { %7363 = vmatmul.mubr.msk.f32.gmra.mrb[98].mxu0 %vm2285_vm0, %v3244_v31 }
 0xa3f   :  { %v8293_v17 = vpop.eup %8292  ;;  %v2979_v50 = vadd.f32 1e-06, %v2915_v16  ;;  %3851 = vmatprep.mubr.f32.mxu0 %v15146_v29  ;;  %v11857_v16 = vpack.c.bf16 %v4010_v55, %v4009_v26 }
 0xa40   :  { %v2832_v15 = vpop.xlane.xlu1 %2831  ;;  %v3105_v57 = vmul.f32 %v8293_v17, %v11598_v27 }
 0xa41   :  { %8296 = vrsqrt.f32 %v2979_v50  ;;  %v2916_v51 = vmul.f32 0.010416667, %v2832_v15  ;;  %v4011_v50 = vld [vmem:[%s15150_s27 + $0x20] sm:$0xff]  ;;  %v4012_v15 = vld [vmem:[%s15150_s27 + $0x28] sm:$0xff] }
 0xa42   :  { %v3175_v34 = vmul.f32 %v11578_v39, %v3105_v57 }
 0xa43   :  { %v2980_v38 = vadd.f32 1e-06, %v2916_v51 }
 0xa44   :  { %v3245_v28 = vadd.f32 %v11586_v59, %v3175_v34 }
 0xa45   :  { %8298 = vrsqrt.f32 %v2980_v38  ;;  %v11871_v38 = vpack.c.bf16 %v4012_v15, %v4011_v50 }
 0xa46   :  { %7364 = vmatmul.mubr.msk.f32.gmra.mrb[100].mxu0 %vm2285_vm0, %v3245_v28 }
 0xa47   :  { %v8295_v12 = vpop.eup %8294  ;;  %3857 = vmatprep.mubr.f32.mxu0 %v15146_v29 }
 0xa48   :  { %v2835_v63 = vpop.xlane.xlu0 %2834  ;;  %v3106_v24 = vmul.f32 %v8295_v12, %v11614_v44  ;;  %v4013_v12 = vld [vmem:[%s15150_s27 + $0x30] sm:$0xff] }
 0xa49   :  { %v2917_v7 = vmul.f32 0.010416667, %v2835_v63  ;;  %v4014_v63 = vld [vmem:[%s15150_s27 + $0x38] sm:$0xff] }
 0xa4a   :  { %v3176_v8 = vmul.f32 %v11578_v39, %v3106_v24 }
 0xa4b   :  { %v8297_v27 = vpop.eup %8296  ;;  %v2981_v35 = vadd.f32 1e-06, %v2917_v7 }
 0xa4c   :  { %v3246_v0 = vadd.f32 %v11586_v59, %v3176_v8  ;;  %v3107_v33 = vmul.f32 %v8297_v27, %v11624_v60 }
 0xa4d   :  { %8300 = vrsqrt.f32 %v2981_v35 }
 0xa4e   :  { %7365 = vmatmul.mubr.msk.f32.gmra.mrb[102].mxu0 %vm2285_vm0, %v3246_v0  ;;  %v3177_v53 = vmul.f32 %v11578_v39, %v3107_v33  ;;  %v11888_v33 = vpack.c.bf16 %v4014_v63, %v4013_v12  ;;  %v15156_v12 = vld [vmem:[#allocation32_spill] sm:$0xff] }
 0xa4f   :  { %v8299_v30 = vpop.eup %8298  ;;  %3863 = vmatprep.mubr.f32.mxu0 %v15146_v29 }
 0xa50   :  { %v2838_v52 = vpop.xlane.xlu1 %2837  ;;  %v3247_v44 = vadd.f32 %v11586_v59, %v3177_v53  ;;  %v3108_v48 = vmul.f32 %v8299_v30, %v11635_v36  ;;  %v4015_v30 = vld [vmem:[%s15150_s27 + $0x40] sm:$0xff] }
 0xa51   :  { %v2918_v58 = vmul.f32 0.010416667, %v2838_v52  ;;  %v4016_v52 = vld [vmem:[%s15150_s27 + $0x48] sm:$0xff] }
 0xa52   :  { %7366 = vmatmul.mubr.msk.f32.gmra.mrb[104].mxu0 %vm2285_vm0, %v3247_v44  ;;  %v3178_v61 = vmul.f32 %v11578_v39, %v3108_v48 }
 0xa53   :  { %v2982_v49 = vadd.f32 1e-06, %v2918_v58  ;;  %3869 = vmatprep.mubr.f32.mxu0 %v15146_v29 }
 0xa54   :  { %v2847_v60 = vpop.xlane.xlu0 %2846  ;;  %v3248_v14 = vadd.f32 %v11586_v59, %v3178_v61 }
 0xa55   :  { %8302 = vrsqrt.f32 %v2982_v49  ;;  %v2921_v22 = vmul.f32 0.010416667, %v2847_v60  ;;  %v11904_v49 = vpack.c.bf16 %v4016_v52, %v4015_v30  ;;  %v3283_v60 = vld [vmem:[%s14625_s9] sm:$0x3]  ;;  %s8567_s9 = smov 32   ;;  %v15157_v52 = vld [vmem:[#allocation61_spill] sm:$0xff] }
 0xa56   :  { %7367 = vmatmul.mubr.msk.f32.gmra.mrb[106].mxu0 %vm2285_vm0, %v3248_v14  ;;  %v4017_v14 = vld [vmem:[%s15150_s27 + $0x50] sm:$0xff] }
 0xa57   :  { %v8301_v23 = vpop.eup %8300  ;;  %v2985_v41 = vadd.f32 1e-06, %v2921_v22  ;;  %3875 = vmatprep.mubr.f32.mxu0 %v15146_v29  ;;  %v4018_v22 = vld [vmem:[%s15150_s27 + $0x58] sm:$0xff] }
 0xa58   :  { %v2841_v36 = vpop.xlane.xlu1 %2840  ;;  %v3109_v1 = vmul.f32 %v8301_v23, %v11652_v42 }
 0xa59   :  { %8304 = vrsqrt.f32 %v2985_v41  ;;  %v2919_v3 = vmul.f32 0.010416667, %v2841_v36 }
 0xa5a   :  { %v3179_v21 = vmul.f32 %v11578_v39, %v3109_v1  ;;  %v15151_v1 = vld [vmem:[#allocation10_spill] sm:$0xff] }
 0xa5b   :  { %v2983_v47 = vadd.f32 1e-06, %v2919_v3  ;;  %v11923_v3 = vrot.slane %v3283_v60, %v15151_v1 }
 0xa5c   :  { %v3249_v45 = vadd.f32 %v11586_v59, %v3179_v21 }
 0xa5d   :  { %8306 = vrsqrt.f32 %v2983_v47 }
 0xa5e   :  { %7368 = vmatmul.mubr.msk.f32.gmra.mrb[108].mxu0 %vm2285_vm0, %v3249_v45  ;;  %v11927_v45 = vpack.c.bf16 %v4018_v22, %v4017_v14 }
 0xa5f   :  { %v8303_v2 = vpop.eup %8302  ;;  %3881 = vmatprep.mubr.f32.mxu0 %v15146_v29 }
 0xa60   :  { %v2850_v19 = vpop.xlane.xlu0 %2849  ;;  %v3110_v6 = vmul.f32 %v8303_v2, %v11668_v25  ;;  %v15152_v2 = vld [vmem:[#allocation11_spill] sm:$0xff] }
 0xa61   :  { %v2922_v11 = vmul.f32 0.010416667, %v2850_v19  ;;  %v11930_v19 = vrot.slane %v3283_v60, %v15152_v2 }
 0xa62   :  { %v3180_v46 = vmul.f32 %v11578_v39, %v3110_v6 }
 0xa63   :  { %v8305_v42 = vpop.eup %8304  ;;  %v2986_v20 = vadd.f32 1e-06, %v2922_v11  ;;  %v3556_v63 = vadd.f32 %v15156_v12, %v11930_v19 }
 0xa64   :  { %v3250_v32 = vadd.f32 %v11586_v59, %v3180_v46  ;;  %v3113_v37 = vmul.f32 %v8305_v42, %v11678_v40 }
 0xa65   :  { %8308 = vrsqrt.f32 %v2986_v20  ;;  %v15153_v20 = vld [vmem:[#allocation54_spill] sm:$0xff] }
 0xa66   :  { %7369 = vmatmul.mubr.msk.f32.gmra.mrb[110].mxu0 %vm2285_vm0, %v3250_v32  ;;  %v3183_v25 = vmul.f32 %v11578_v39, %v3113_v37  ;;  %v3562_v32 = vadd.f32 %v15153_v20, %v11930_v19 }
 0xa67   :  { %v8307_v9 = vpop.eup %8306  ;;  %3887 = vmatprep.mubr.f32.mxu0 %v15146_v29 }
 0xa68   :  { %v2853_v62 = vpop.xlane.xlu0 %2852  ;;  %v3253_v31 = vadd.f32 %v11586_v59, %v3183_v25  ;;  %v3111_v40 = vmul.f32 %v8307_v9, %v11688_v13 }
 0xa69   :  { %v2923_v17 = vmul.f32 0.010416667, %v2853_v62 }
 0xa6a   :  { %7372 = vmatmul.mubr.msk.f32.vlgmr.msra.gmra.mrb[0].mxu1 %vm2285_vm0, %v3253_v31  ;;  %v3181_v57 = vmul.f32 %v11578_v39, %v3111_v40 }
 0xa6b   :  { %v2987_v51 = vadd.f32 1e-06, %v2923_v17  ;;  %3905 = vmatprep.mubr.f32.mxu1 %v15146_v29  ;;  %7987 = vmatpush3.bf16.msra.mxu1 %v11774_v18 }
 0xa6c   :  { %v2844_v13 = vpop.xlane.xlu1 %2843  ;;  %v3251_v34 = vadd.f32 %v11586_v59, %v3181_v57  ;;  %7989 = vmatprep.subr.bf16.mxu1 %v11857_v16  ;;  %v11879_v24 = vpop.f32.mrb[46].mxu0 }
 0xa6d   :  { %8310 = vrsqrt.f32 %v2987_v51  ;;  %v2920_v28 = vmul.f32 0.010416667, %v2844_v13  ;;  %v11882_v27 = vpop.f32.mrb[47].mxu0  ;;  %v15155_v13 = vld [vmem:[#allocation60_spill] sm:$0xff] }
 0xa6e   :  { %7370 = vmatmul.mubr.msk.f32.gmra.mrb[112].mxu0 %vm2285_vm0, %v3251_v34  ;;  %v3604_v34 = vadd.f32 %v15155_v13, %v11930_v19 }
 0xa6f   :  { %v8309_v7 = vpop.eup %8308  ;;  %v2984_v8 = vadd.f32 1e-06, %v2920_v28  ;;  %3893 = vmatprep.mubr.f32.mxu0 %v15146_v29  ;;  %7991 = vmatpush3.bf16.msra.mxu1 %v11857_v16 }
 0xa70   :  { %v2856_v35 = vpop.xlane.xlu1 %2855  ;;  %v3114_v0 = vmul.f32 %v8309_v7, %v11700_v5  ;;  %7993 = vmatprep.subr.bf16.mxu1 %v11871_v38  ;;  %v11896_v44 = vpop.f32.mrb[48].mxu0 }
 0xa71   :  { %8312 = vrsqrt.f32 %v2984_v8  ;;  %v2924_v53 = vmul.f32 0.010416667, %v2856_v35  ;;  %v11899_v5 = vpop.f32.mrb[49].mxu0 }
 0xa72   :  { %v3184_v48 = vmul.f32 %v11578_v39, %v3114_v0 }
 0xa73   :  { %v2988_v58 = vadd.f32 1e-06, %v2924_v53  ;;  %7995 = vmatpush3.bf16.msra.mxu1 %v11871_v38 }
 0xa74   :  { %v3254_v61 = vadd.f32 %v11586_v59, %v3184_v48  ;;  %7997 = vmatprep.subr.bf16.mxu1 %v11888_v33  ;;  %v11915_v23 = vpop.f32.mrb[50].mxu0  ;;  %v3610_v48 = vadd.f32 %v15157_v52, %v11930_v19 }
 0xa75   :  { %8314 = vrsqrt.f32 %v2988_v58  ;;  %v11918_v36 = vpop.f32.mrb[51].mxu0 }
 0xa76   :  { %7373 = vmatmul.mubr.msk.f32.gmra.mrb[2].mxu1 %vm2285_vm0, %v3254_v61 }
 0xa77   :  { %v8311_v41 = vpop.eup %8310  ;;  %3911 = vmatprep.mubr.f32.mxu1 %v15146_v29  ;;  %7999 = vmatpush3.bf16.msra.mxu1 %v11888_v33 }
 0xa78   :  { %v2859_v21 = vpop.xlane.xlu0 %2858  ;;  %v3115_v47 = vmul.f32 %v8311_v41, %v11710_v43  ;;  %8001 = vmatprep.subr.bf16.mxu1 %v11904_v49  ;;  %v11932_v11 = vpop.f32.mrb[52].mxu0  ;;  %v15154_v43 = vld [vmem:[#allocation15_spill] sm:$0xff] }
 0xa79   :  { %v2925_v6 = vmul.f32 0.010416667, %v2859_v21  ;;  %v11937_v26 = vpop.f32.mrb[53].mxu0  ;;  %v11942_v55 = vadd.f32 %v15154_v43, %v11923_v3  ;;  %v15159_v21 = vld [vmem:[#allocation92_spill] sm:$0xff] }
 0xa7a   :  { %v3185_v46 = vmul.f32 %v11578_v39, %v3115_v47  ;;  %v3652_v47 = vadd.f32 %v15159_v21, %v11930_v19  ;;  %v8533_v43 = vld [vmem:[%s14895_s1] ss:$0 sm:$0xff] }
 0xa7b   :  { %v8313_v42 = vpop.eup %8312  ;;  %v2989_v37 = vadd.f32 1e-06, %v2925_v6  ;;  %8003 = vmatpush3.bf16.msra.mxu1 %v11904_v49  ;;  %v15166_v21 = vld [vmem:[#allocation64_spill] sm:$0xff] }
 0xa7c   :  { %v11944_v25 = vpop.permute.xlu0 %5993  ;;  %v2862_v9 = vpop.xlane.xlu1 %2861  ;;  %v3255_v62 = vadd.f32 %v11586_v59, %v3185_v46  ;;  %v3112_v31 = vmul.f32 %v8313_v42, %v11718_v54  ;;  %8005 = vmatprep.subr.bf16.mxu1 %v11927_v45 }
 0xa7d   :  { %8316 = vrsqrt.f32 %v2989_v37  ;;  %v2926_v40 = vmul.f32 0.010416667, %v2862_v9  ;;  %v5999_v17 = vsub.f32 %v3562_v32, %v11944_v25  ;;  %v11950_v50 = vpop.f32.mrb[54].mxu0  ;;  %v5996_v15 = vsub.f32 %v11942_v55, %v11944_v25 }
 0xa7e   :  { %7374 = vmatmul.mubr.msk.f32.gmra.mrb[4].mxu1 %vm2285_vm0, %v3255_v62  ;;  %v3182_v57 = vmul.f32 %v11578_v39, %v3112_v31  ;;  %v11958_v28 = vpop.f32.mrb[55].mxu0  ;;  %v6013_v35 = vsub.f32 %v3604_v34, %v11944_v25  ;;  %v5997_v53 = vsub.f32 %v3556_v63, %v11944_v25  ;;  %v6015_v14 = vsub.f32 %v3610_v48, %v11944_v25  ;;  %v15161_v31 = vld [vmem:[#allocation96_spill] sm:$0xff] }
 0xa7f   :  { %v8315_v51 = vpop.eup %8314  ;;  %v2990_v54 = vadd.f32 1e-06, %v2926_v40  ;;  %6258 = vrot.lane.b32.xlu0 %v5999_v17, %s8567_s9  ;;  %3917 = vmatprep.mubr.f32.mxu1 %v15146_v29  ;;  %v6029_v20 = vsub.f32 %v3652_v47, %v11944_v25  ;;  %v3658_v40 = vadd.f32 %v15161_v31, %v11930_v19  ;;  %v3616_v47 = vadd.f32 %v15166_v21, %v11930_v19 }
 0xa80   :  { %6252 = vrot.lane.b32.xlu1 %v5996_v15, %s8567_s9  ;;  %v3252_v7 = vadd.f32 %v11586_v59, %v3182_v57  ;;  %v3116_v8 = vmul.f32 %v8315_v51, %v11726_v56  ;;  %8007 = vmatpush3.bf16.msra.mxu1 %v11927_v45  ;;  %v11969_v0 = vpop.f32.mrb[56].mxu0  ;;  %v15158_v56 = vld [vmem:[#allocation43_spill] sm:$0xff]  ;;  %v8534_v57 = vld [vmem:[%s14623_s7] ss:$0 sm:$0xff] }
 0xa81   :  { %8318 = vrsqrt.f32 %v2990_v54  ;;  %v11976_v58 = vpop.f32.mrb[57].mxu0  ;;  %v3560_v61 = vadd.f32 %v15158_v56, %v11923_v3  ;;  %v6031_v34 = vsub.f32 %v3658_v40, %v11944_v25  ;;  %v12026_v54 = vld [vmem:[%s14626_s10] ss:$0 sm:$0xff]  ;;  %v15165_v56 = vld [vmem:[#allocation33_spill] sm:$0xff]  ;;  %v6017_v40 = vsub.f32 %v3616_v47, %v11944_v25  ;;  %v15173_v47 = vld [vmem:[#allocation66_spill] sm:$0xff]  ;;  %8010 = vmatprep.subr.msk.bf16.mxu1 %vm12586_vm2, %v11774_v18 }
 0xa82   :  { %7371 = vmatmul.mubr.msk.f32.gmra.mrb[114].mxu0 %vm2285_vm0, %v3252_v7  ;;  %v3186_v30 = vmul.f32 %v11578_v39, %v3116_v8  ;;  %v15163_v8 = vld [vmem:[#allocation55_spill] sm:$0xff]  ;;  %v3943_v48 = vmul.f32 %v12026_v54, %v11942_v55 }
 0xa83   :  { %6286 = vrot.lane.b32.xlu0 %v6013_v35, %s8567_s9  ;;  %v5998_v39 = vsub.f32 %v3560_v61, %v11944_v25  ;;  %v3568_v35 = vadd.f32 %v15163_v8, %v11930_v19  ;;  %v3944_v55 = vmul.f32 %v12026_v54, %v3560_v61  ;;  %v15171_v8 = vld [vmem:[#allocation65_spill] sm:$0xff] }
 0xa84   :  { %6254 = vrot.lane.b32.xlu1 %v5997_v53, %s8567_s9  ;;  %v3256_v60 = vadd.f32 %v11586_v59, %v3186_v30  ;;  %v11984_v22 = vpop.f32.mrb[58].mxu0  ;;  %v15160_v59 = vld [vmem:[#allocation75_spill] sm:$0xff] }
 0xa85   :  { %v11990_v6 = vpop.f32.mrb[59].mxu0  ;;  %v11996_v46 = vadd.f32 %v15160_v59, %v11923_v3 }
 0xa86   :  { %7375 = vmatmul.mubr.msk.f32.gmra.mrb[6].mxu1 %vm2285_vm0, %v3256_v60  ;;  %v3566_v60 = vadd.f32 %v15165_v56, %v11923_v3 }
 0xa87   :  { %v8317_v41 = vpop.eup %8316  ;;  %6290 = vrot.lane.b32.xlu0 %v6015_v14, %s8567_s9  ;;  %3923 = vmatprep.mubr.f32.mxu1 %v15146_v29  ;;  %v6012_v37 = vsub.f32 %v11996_v46, %v11944_v25  ;;  %v6001_v14 = vsub.f32 %v3568_v35, %v11944_v25 }
 0xa88   :  { %6256 = vrot.lane.b32.xlu1 %v5998_v39, %s8567_s9  ;;  %v3117_v42 = vmul.f32 %v8317_v41, %v11734_v10  ;;  %v12001_v32 = vpop.f32.mrb[60].mxu0  ;;  %v15162_v10 = vld [vmem:[#allocation62_spill] sm:$0xff] }
 0xa89   :  { %v12010_v17 = vpop.f32.mrb[61].mxu0  ;;  %v12015_v15 = vadd.f32 %v15162_v10, %v11923_v3 }
 0xa8a   :  { %v3187_v9 = vmul.f32 %v8533_v43, %v3117_v42  ;;  %v15167_v42 = vld [vmem:[#allocation48_spill] sm:$0xff] }
 0xa8b   :  { %v8319_v62 = vpop.eup %8318  ;;  %6318 = vrot.lane.b32.xlu0 %v6029_v20, %s8567_s9  ;;  %v6014_v63 = vsub.f32 %v12015_v15, %v11944_v25  ;;  %v12061_v20 = vadd.f32 %v15167_v42, %v11923_v3 }
 0xa8c   :  { %6284 = vrot.lane.b32.xlu1 %v6012_v37, %s8567_s9  ;;  %v3257_v51 = vadd.f32 %v8534_v57, %v3187_v9  ;;  %v3118_v13 = vmul.f32 %v8319_v62, %v11739_v4  ;;  %v12028_v12 = vpop.f32.mrb[62].mxu0  ;;  %v15164_v4 = vld [vmem:[#allocation91_spill] sm:$0xff]  ;;  %v15168_v37 = vld [vmem:[#allocation26_spill] sm:$0xff]  ;;  %v3945_v9 = vmul.f32 %v12026_v54, %v3566_v60  ;;  %v15169_v62 = vld [vmem:[#allocation68_spill] sm:$0xff] }
 0xa8d   :  { %v12035_v53 = vpop.f32.mrb[63].mxu0  ;;  %v12041_v30 = vadd.f32 %v15164_v4, %v11923_v3  ;;  %v12071_v31 = vadd.f32 %v15169_v62, %v11923_v3 }
 0xa8e   :  { %7376 = vmatmul.mubr.msk.f32.gmra.mrb[8].mxu1 %vm2285_vm0, %v3257_v51  ;;  %v3188_v7 = vmul.f32 %v8533_v43, %v3118_v13  ;;  %v12065_v43 = vadd.f32 %v15168_v37, %v11923_v3  ;;  %v3946_v13 = vmul.f32 %v12026_v54, %v12061_v20 }
 0xa8f   :  { %6322 = vrot.lane.b32.xlu0 %v6031_v34, %s8567_s9  ;;  %3929 = vmatprep.mubr.f32.mxu1 %v15146_v29  ;;  %v6028_v41 = vsub.f32 %v12041_v30, %v11944_v25  ;;  %v15170_v34 = vld [vmem:[#allocation69_spill] sm:$0xff] }
 0xa90   :  { %6288 = vrot.lane.b32.xlu1 %v6014_v63, %s8567_s9  ;;  %v3258_v52 = vadd.f32 %v8534_v57, %v3188_v7  ;;  %v12049_v39 = vpop.f32.mrb[64].mxu0  ;;  %v6030_v61 = vsub.f32 %v12065_v43, %v11944_v25  ;;  %v3700_v57 = vadd.f32 %v11899_v5, %v11930_v19  ;;  %v12087_v63 = vadd.f32 %v15170_v34, %v11923_v3 }
 0xa91   :  { %v3747_v59 = vpop.f32.mrb[65].mxu0  ;;  %v3947_v7 = vmul.f32 %v12026_v54, %v12071_v31  ;;  %v12094_v5 = vadd.f32 %v15171_v8, %v11923_v3 }
 0xa92   :  { %7377 = vmatmul.mubr.msk.f32.gmra.mrb[10].mxu1 %vm2285_vm0, %v3258_v52  ;;  %v6045_v35 = vsub.f32 %v3700_v57, %v11944_v25  ;;  %v6000_v52 = vsub.f32 %v3566_v60, %v11944_v25  ;;  %v12133_v57 = vadd.f32 %v11896_v44, %v11923_v3  ;;  %v3748_v34 = vadd.f32 %v3747_v59, %v11930_v19 }
 0xa93   :  { %6262 = vrot.lane.b32.xlu0 %v6001_v14, %s8567_s9  ;;  %7717 = vmatprep.mubr.msk.f32.mxu1 %vm2285_vm0, %v3943_v48  ;;  %v3706_v48 = vadd.f32 %v11918_v36, %v11930_v19  ;;  %v3948_v14 = vmul.f32 %v12026_v54, %v12087_v63  ;;  %v3949_v36 = vmul.f32 %v12026_v54, %v12094_v5 }
 0xa94   :  { %6316 = vrot.lane.b32.xlu1 %v6028_v41, %s8567_s9  ;;  %v12074_v10 = vpop.f32.mrb[66].mxu0  ;;  %v15172_v41 = vld [vmem:[#allocation72_spill] sm:$0xff]  ;;  %v6044_v8 = vsub.f32 %v12133_v57, %v11944_v25  ;;  %v3952_v44 = vmul.f32 %v12026_v54, %v12015_v15 }
 0xa95   :  { %v3753_v51 = vpop.f32.mrb[67].mxu0  ;;  %v12111_v21 = vadd.f32 %v15172_v41, %v11923_v3  ;;  %v6047_v60 = vsub.f32 %v3706_v48, %v11944_v25  ;;  %v15176_v48 = vld [vmem:[#allocation80_spill] sm:$0xff]  ;;  %v6061_v41 = vsub.f32 %v3748_v34, %v11944_v25 }
 0xa96   :  { %7718 = vmatmul.mubr.msk.f32.vlgmr.msra.gmra.mrb[12].mxu1 %vm2285_vm0, %v3944_v55  ;;  %v3614_v55 = vadd.f32 %v15173_v47, %v11923_v3  ;;  %v3754_v15 = vadd.f32 %v3753_v51, %v11930_v19 }
 0xa97   :  { %6294 = vrot.lane.b32.xlu0 %v6017_v40, %s8567_s9  ;;  %7720 = vmatprep.mubr.msk.f32.mxu1 %vm2285_vm0, %v3945_v9  ;;  %v15174_v9 = vld [vmem:[#allocation98_spill] sm:$0xff] }
 0xa98   :  { %6320 = vrot.lane.b32.xlu1 %v6030_v61, %s8567_s9  ;;  %v12097_v4 = vpop.f32.mrb[68].mxu0  ;;  %v6016_v37 = vsub.f32 %v3614_v55, %v11944_v25  ;;  %v3664_v62 = vadd.f32 %v15174_v9, %v11930_v19  ;;  %v3950_v61 = vmul.f32 %v12026_v54, %v12111_v21  ;;  %v3953_v59 = vmul.f32 %v12026_v54, %v3614_v55  ;;  %v15177_v55 = vld [vmem:[#allocation82_spill] sm:$0xff] }
 0xa99   :  { %v12103_v56 = vpop.f32.mrb[69].mxu0  ;;  %8013 = vmatpush3.bf16.xpose.msk.msra.mxu1 %vm12586_vm2, %v11774_v18 }
 0xa9a   :  { %7721 = vmatmul.mubr.msk.f32.gmra.mrb[14].mxu1 %vm2285_vm0, %v3946_v13  ;;  %v3951_v13 = vmul.f32 %v12026_v54, %v11996_v46  ;;  %v12153_v46 = vadd.f32 %v11915_v23, %v11923_v3  ;;  %8016 = vmatprep.subr.msk.bf16.mxu1 %vm12586_vm2, %v11857_v16 }
 0xa9b   :  { %6350 = vrot.lane.b32.xlu0 %v6045_v35, %s8567_s9  ;;  %7723 = vmatprep.mubr.msk.f32.mxu1 %vm2285_vm0, %v3947_v7  ;;  %v6033_v7 = vsub.f32 %v3664_v62, %v11944_v25  ;;  %v15175_v35 = vld [vmem:[#allocation77_spill] sm:$0xff]  ;;  %v15179_v62 = vld [vmem:[#allocation86_spill] sm:$0xff] }
 0xa9c   :  { %6260 = vrot.lane.b32.xlu1 %v6000_v52, %s8567_s9  ;;  %v12119_v42 = vpop.f32.mrb[70].mxu0  ;;  %v12149_v52 = vadd.f32 %v15175_v35, %v11923_v3  ;;  %v6046_v47 = vsub.f32 %v12153_v46, %v11944_v25 }
 0xa9d   :  { %v12125_v40 = vpop.f32.mrb[71].mxu0 }
 0xa9e   :  { %7724 = vmatmul.mubr.msk.f32.gmra.mrb[16].mxu1 %vm2285_vm0, %v3948_v14  ;;  %v12159_v14 = vadd.f32 %v15176_v48, %v11923_v3  ;;  %v3954_v23 = vmul.f32 %v12026_v54, %v12149_v52  ;;  %v15181_v48 = vld [vmem:[#allocation88_spill] sm:$0xff] }
 0xa9f   :  { %6354 = vrot.lane.b32.xlu0 %v6047_v60, %s8567_s9  ;;  %7726 = vmatprep.mubr.msk.f32.mxu1 %vm2285_vm0, %v3949_v36  ;;  %v12172_v36 = vadd.f32 %v15177_v55, %v11923_v3  ;;  %v15178_v60 = vld [vmem:[#allocation97_spill] sm:$0xff]  ;;  %v15182_v55 = vld [vmem:[#allocation79_spill] sm:$0xff] }
 0xaa0   :  { %6292 = vrot.lane.b32.xlu1 %v6016_v37, %s8567_s9  ;;  %v3662_v37 = vadd.f32 %v15178_v60, %v11923_v3  ;;  %v3955_v9 = vmul.f32 %v12026_v54, %v12159_v14  ;;  %v3622_v60 = vadd.f32 %v15182_v55, %v11930_v19  ;;  %v6002_v55 = vsub.f32 %v12061_v20, %v11944_v25 }
 0xaa1   :  { %v6018_v20 = vsub.f32 %v12149_v52, %v11944_v25  ;;  %8019 = vmatpush3.bf16.xpose.msk.msra.mxu1 %vm12586_vm2, %v11857_v16 }
 0xaa2   :  { %7727 = vmatmul.mubr.msk.f32.gmra.mrb[18].mxu1 %vm2285_vm0, %v3950_v61  ;;  %v12183_v61 = vadd.f32 %v15179_v62, %v11923_v3  ;;  %8022 = vmatprep.subr.msk.bf16.mxu1 %vm12586_vm2, %v11871_v38 }
 0xaa3   :  { %6326 = vrot.lane.b32.xlu0 %v6033_v7, %s8567_s9  ;;  %7729 = vmatprep.mubr.msk.f32.mxu1 %vm2285_vm0, %v3951_v13  ;;  %v6063_v13 = vsub.f32 %v3754_v15, %v11944_v25  ;;  %v12190_v7 = vadd.f32 %v12049_v39, %v11923_v3 }
 0xaa4   :  { %6348 = vrot.lane.b32.xlu1 %v6044_v8, %s8567_s9  ;;  %v6032_v8 = vsub.f32 %v3662_v37, %v11944_v25  ;;  %v3957_v39 = vmul.f32 %v12026_v54, %v12183_v61 }
 0xaa6   :  { %7730 = vmatmul.mubr.msk.f32.gmra.mrb[20].mxu1 %vm2285_vm0, %v3952_v44  ;;  %v15180_v44 = vld [vmem:[#allocation58_spill] sm:$0xff] }
 0xaa7   :  { %6382 = vrot.lane.b32.xlu0 %v6061_v41, %s8567_s9  ;;  %7732 = vmatprep.mubr.msk.f32.mxu1 %vm2285_vm0, %v3953_v59  ;;  %v3574_v35 = vadd.f32 %v15180_v44, %v11930_v19  ;;  %v3956_v59 = vmul.f32 %v12026_v54, %v12172_v36  ;;  %v12202_v41 = vadd.f32 %v15181_v48, %v11923_v3 }
 0xaa8   :  { %6352 = vrot.lane.b32.xlu1 %v6046_v47, %s8567_s9  ;;  %v12177_v51 = vpop.f32.mrb[72].mxu0  ;;  %v6060_v47 = vsub.f32 %v12190_v7, %v11944_v25  ;;  %v6019_v44 = vsub.f32 %v3622_v60, %v11944_v25 }
 0xaa9   :  { %v12186_v34 = vpop.f32.mrb[73].mxu0  ;;  %v6003_v15 = vsub.f32 %v3574_v35, %v11944_v25  ;;  %8025 = vmatpush3.bf16.xpose.msk.msra.mxu1 %vm12586_vm2, %v11871_v38 }
 0xaaa   :  { %7733 = vmatmul.mubr.msk.f32.gmra.mrb[22].mxu1 %vm2285_vm0, %v3954_v23  ;;  %v12212_v23 = vadd.f32 %v12074_v10, %v11923_v3  ;;  %v3959_v10 = vmul.f32 %v12026_v54, %v12041_v30  ;;  %v15183_v30 = vld [vmem:[#allocation99_spill] sm:$0xff]  ;;  %8028 = vmatprep.subr.msk.bf16.mxu1 %vm12586_vm2, %v11888_v33 }
 0xaab   :  { %6386 = vrot.lane.b32.xlu0 %v6063_v13, %s8567_s9  ;;  %7735 = vmatprep.mubr.msk.f32.mxu1 %vm2285_vm0, %v3955_v9  ;;  %v3958_v9 = vmul.f32 %v12026_v54, %v12202_v41  ;;  %v3712_v13 = vadd.f32 %v11937_v26, %v11930_v19  ;;  %v12240_v48 = vadd.f32 %v15183_v30, %v11923_v3 }
 0xaac   :  { %6324 = vrot.lane.b32.xlu1 %v6032_v8, %s8567_s9  ;;  %v6062_v35 = vsub.f32 %v12212_v23, %v11944_v25  ;;  %v3961_v26 = vmul.f32 %v12026_v54, %v3662_v37  ;;  %v15185_v37 = vld [vmem:[#allocation101_spill] sm:$0xff] }
 0xaad   :  { %v12258_v60 = vadd.f32 %v15185_v37, %v11923_v3 }
 0xaae   :  { %7736 = vmatmul.mubr.msk.f32.gmra.mrb[24].mxu1 %vm2285_vm0, %v3956_v59  ;;  %v3960_v59 = vmul.f32 %v12026_v54, %v12065_v43  ;;  %v3962_v43 = vmul.f32 %v12026_v54, %v12240_v48 }
 0xaaf   :  { %6266 = vrot.lane.b32.xlu0 %v6003_v15, %s8567_s9  ;;  %7738 = vmatprep.mubr.msk.f32.mxu1 %vm2285_vm0, %v3957_v39  ;;  %v15184_v39 = vld [vmem:[#allocation34_spill] sm:$0xff] }
 0xab0   :  { %6380 = vrot.lane.b32.xlu1 %v6060_v47, %s8567_s9  ;;  %v12222_v62 = vpop.f32.mrb[74].mxu0  ;;  %v12246_v15 = vadd.f32 %v15184_v39, %v11923_v3  ;;  %v6049_v47 = vsub.f32 %v3712_v13, %v11944_v25  ;;  %v12296_v39 = vadd.f32 %v11950_v50, %v11923_v3  ;;  %v12311_v50 = vadd.f32 %v11984_v22, %v11923_v3 }
 0xab1   :  { %v12228_v8 = vpop.f32.mrb[75].mxu0  ;;  %v12327_v22 = vadd.f32 %v12028_v12, %v11923_v3  ;;  %8031 = vmatpush3.bf16.xpose.msk.msra.mxu1 %vm12586_vm2, %v11888_v33 }
 0xab2   :  { %7739 = vmatmul.mubr.msk.f32.gmra.mrb[26].mxu1 %vm2285_vm0, %v3958_v9  ;;  %v3963_v9 = vmul.f32 %v12026_v54, %v12246_v15  ;;  %8034 = vmatprep.subr.msk.bf16.mxu1 %vm12586_vm2, %v11904_v49 }
 0xab3   :  { %6298 = vrot.lane.b32.xlu0 %v6019_v44, %s8567_s9  ;;  %7741 = vmatprep.mubr.msk.f32.mxu1 %vm2285_vm0, %v3959_v10  ;;  %v15186_v10 = vld [vmem:[#allocation103_spill] sm:$0xff]  ;;  %v3964_v44 = vmul.f32 %v12026_v54, %v12258_v60  ;;  %15189 = vst [vmem:[#allocation19_spill] sm:$0xff] %v12327_v22 }
 0xab4   :  { %6384 = vrot.lane.b32.xlu1 %v6062_v35, %s8567_s9  ;;  %v12265_v13 = vadd.f32 %v15186_v10, %v11923_v3  ;;  %v12275_v35 = vadd.f32 %v11879_v24, %v11923_v3  ;;  %v3967_v24 = vmul.f32 %v12026_v54, %v12133_v57  ;;  %v3970_v57 = vmul.f32 %v12026_v54, %v12296_v39 }
 0xab6   :  { %7742 = vmatmul.mubr.msk.f32.gmra.mrb[28].mxu1 %vm2285_vm0, %v3960_v59  ;;  %15187 = vst [vmem:[#allocation14_spill] sm:$0xff] %v12275_v35  ;;  %v3710_v59 = vadd.f32 %v11932_v11, %v11923_v3  ;;  %v3965_v30 = vmul.f32 %v12026_v54, %v12265_v13  ;;  %v3968_v11 = vmul.f32 %v12026_v54, %v12153_v46 }
 0xab7   :  { %6358 = vrot.lane.b32.xlu0 %v6049_v47, %s8567_s9  ;;  %7744 = vmatprep.mubr.msk.f32.mxu1 %vm2285_vm0, %v3961_v26  ;;  %v3966_v26 = vmul.f32 %v12026_v54, %v12275_v35 }
 0xab8   :  { %6264 = vrot.lane.b32.xlu1 %v6002_v55, %s8567_s9  ;;  %v6048_v52 = vsub.f32 %v3710_v59, %v11944_v25  ;;  %v3969_v55 = vmul.f32 %v12026_v54, %v3710_v59 }
 0xab9   :  { %8037 = vmatpush3.bf16.xpose.msk.msra.mxu1 %vm12586_vm2, %v11904_v49 }
 0xaba   :  { %7745 = vmatmul.mubr.msk.f32.gmra.mrb[30].mxu1 %vm2285_vm0, %v3962_v43  ;;  %v12301_v43 = vadd.f32 %v11969_v0, %v11923_v3  ;;  %v12317_v0 = vadd.f32 %v12001_v32, %v11923_v3  ;;  %8040 = vmatprep.subr.msk.bf16.mxu1 %vm12586_vm2, %v11927_v45 }
 0xabb   :  { %7747 = vmatprep.mubr.msk.f32.mxu1 %vm2285_vm0, %v3963_v9 }
 0xabc   :  { %6296 = vrot.lane.b32.xlu1 %v6018_v20, %s8567_s9  ;;  %v3971_v9 = vmul.f32 %v12026_v54, %v12301_v43  ;;  %15188 = vst [vmem:[#allocation47_spill] sm:$0xff] %v12317_v0  ;;  %v3972_v20 = vmul.f32 %v12026_v54, %v12311_v50  ;;  %v3973_v59 = vmul.f32 %v12026_v54, %v12317_v0 }
 0xabe   :  { %7748 = vmatmul.mubr.msk.f32.gmra.mrb[32].mxu1 %vm2285_vm0, %v3964_v44 }
 0xabf   :  { %7750 = vmatprep.mubr.msk.f32.mxu1 %vm2285_vm0, %v3965_v30 }
 0xac0   :  { %6356 = vrot.lane.b32.xlu1 %v6048_v52, %s8567_s9 }
 0xac1   :  { %8043 = vmatpush3.bf16.xpose.msk.msra.mxu1 %vm12586_vm2, %v11927_v45  ;;  %v6036_v45 = vsub.f32 %v12246_v15, %v11944_v25 }
 0xac2   :  { %7751 = vmatmul.mubr.msk.f32.gmra.mrb[34].mxu1 %vm2285_vm0, %v3966_v26 }
 0xac3   :  { %7753 = vmatprep.mubr.msk.f32.mxu1 %vm2285_vm0, %v3967_v24  ;;  %v3974_v24 = vmul.f32 %v12026_v54, %v12327_v22 }
 0xac4   :  { %v3781_v47 = vpop.f32.mrb[76].mxu0 }
 0xac5   :  { %v12303_v37 = vpop.f32.mrb[77].mxu0 }
 0xac6   :  { %7754 = vmatmul.mubr.msk.f32.gmra.mrb[36].mxu1 %vm2285_vm0, %v3968_v11 }
 0xac7   :  { %7756 = vmatprep.mubr.msk.f32.mxu1 %vm2285_vm0, %v3969_v55  ;;  %v3975_v55 = vmul.f32 %v12026_v54, %v12190_v7  ;;  %v3976_v7 = vmul.f32 %v12026_v54, %v12212_v23  ;;  %v3760_v23 = vadd.f32 %v12103_v56, %v11930_v19 }
 0xac8   :  { %v3787_v46 = vpop.f32.mrb[78].mxu0 }
 0xac9   :  { %v12319_v10 = vpop.f32.mrb[79].mxu0 }
 0xaca   :  { %7757 = vmatmul.mubr.msk.f32.gmra.mrb[38].mxu1 %vm2285_vm0, %v3970_v57  ;;  %v3758_v57 = vadd.f32 %v12097_v4, %v11923_v3  ;;  %v12354_v4 = vadd.f32 %v12119_v42, %v11923_v3  ;;  %v6034_v42 = vsub.f32 %v12240_v48, %v11944_v25 }
 0xacb   :  { %7759 = vmatprep.mubr.msk.f32.mxu1 %vm2285_vm0, %v3971_v9 }
 0xacc   :  { %v3793_v44 = vpop.f32.mrb[80].mxu0  ;;  %v6064_v56 = vsub.f32 %v3758_v57, %v11944_v25 }
 0xacd   :  { %v3794_v32 = vadd.f32 %v3793_v44, %v11923_v3  ;;  %v3795_v30 = vpop.f32.mrb[81].mxu0 }
 0xace   :  { %v3796_v52 = vadd.f32 %v3795_v30, %v11930_v19  ;;  %7760 = vmatmul.mubr.msk.f32.gmra.mrb[40].mxu1 %vm2285_vm0, %v3972_v20 }
 0xacf   :  { %v6076_v26 = vsub.f32 %v3794_v32, %v11944_v25  ;;  %7762 = vmatprep.mubr.msk.f32.mxu1 %vm2285_vm0, %v3973_v59 }
 0xad0   :  { %v6077_v12 = vsub.f32 %v3796_v52, %v11944_v25  ;;  %v3799_v11 = vpop.f32.mrb[82].mxu0  ;;  %v3977_v52 = vmul.f32 %v12026_v54, %v3758_v57 }
 0xad1   :  { %v3800_v9 = vadd.f32 %v3799_v11, %v11923_v3  ;;  %6412 = vrot.lane.b32.xlu1 %v6076_v26, %s8567_s9  ;;  %v3801_v20 = vpop.f32.mrb[83].mxu0  ;;  %v12360_v26 = vadd.f32 %v12177_v51, %v11923_v3  ;;  %v3978_v51 = vmul.f32 %v12026_v54, %v12354_v4  ;;  %v12376_v11 = vadd.f32 %v12222_v62, %v11923_v3 }
 0xad2   :  { %v3802_v44 = vadd.f32 %v3801_v20, %v11930_v19  ;;  %6414 = vrot.lane.b32.xlu0 %v6077_v12, %s8567_s9  ;;  %7763 = vmatmul.mubr.msk.f32.gmra.mrb[42].mxu1 %vm2285_vm0, %v3974_v24  ;;  %v15190_v24 = vld [vmem:[#allocation100_spill] sm:$0xff]  ;;  %v6065_v62 = vsub.f32 %v3760_v23, %v11944_v25 }
 0xad3   :  { %v6078_v59 = vsub.f32 %v3800_v9, %v11944_v25  ;;  %7765 = vmatprep.mubr.msk.f32.mxu1 %vm2285_vm0, %v3975_v55  ;;  %v3670_v12 = vadd.f32 %v15190_v24, %v11930_v19  ;;  %v3979_v20 = vmul.f32 %v12026_v54, %v12360_v26  ;;  %v3980_v48 = vmul.f32 %v12026_v54, %v12376_v11 }
 0xad4   :  { %v6079_v30 = vsub.f32 %v3802_v44, %v11944_v25  ;;  %v12382_v44 = vadd.f32 %v3781_v47, %v11923_v3 }
 0xad5   :  { %6416 = vrot.lane.b32.xlu1 %v6078_v59, %s8567_s9  ;;  %v6035_v55 = vsub.f32 %v3670_v12, %v11944_v25  ;;  %v12393_v59 = vadd.f32 %v3787_v46, %v11923_v3  ;;  %v3984_v46 = vmul.f32 %v12026_v54, %v3800_v9 }
 0xad6   :  { %6418 = vrot.lane.b32.xlu0 %v6079_v30, %s8567_s9  ;;  %7766 = vmatmul.mubr.msk.f32.gmra.mrb[44].mxu1 %vm2285_vm0, %v3976_v7  ;;  %15191 = vst [vmem:[#allocation16_spill] sm:$0xff] %v12382_v44  ;;  %v3981_v47 = vmul.f32 %v12026_v54, %v12382_v44  ;;  %v3983_v7 = vmul.f32 %v12026_v54, %v3794_v32 }
 0xad7   :  { %7768 = vmatprep.mubr.msk.f32.mxu1 %vm2285_vm0, %v3977_v52  ;;  %15192 = vst [vmem:[#allocation22_spill] sm:$0xff] %v12393_v59  ;;  %v3982_v57 = vmul.f32 %v12026_v54, %v12393_v59 }
 0xad9   :  { %6328 = vrot.lane.b32.xlu1 %v6034_v42, %s8567_s9 }
 0xada   :  { %6330 = vrot.lane.b32.xlu0 %v6035_v55, %s8567_s9  ;;  %7769 = vmatmul.mubr.msk.f32.gmra.mrb[46].mxu1 %vm2285_vm0, %v3978_v51 }
 0xadb   :  { %7771 = vmatprep.mubr.msk.f32.mxu1 %vm2285_vm0, %v3979_v20 }
 0xadd   :  { %6388 = vrot.lane.b32.xlu1 %v6064_v56, %s8567_s9 }
 0xade   :  { %6390 = vrot.lane.b32.xlu0 %v6065_v62, %s8567_s9  ;;  %7772 = vmatmul.mubr.msk.f32.gmra.mrb[48].mxu1 %vm2285_vm0, %v3980_v48 }
 0xadf   :  { %7774 = vmatprep.mubr.msk.f32.mxu1 %vm2285_vm0, %v3981_v47 }
 0xae2   :  { %7775 = vmatmul.mubr.msk.f32.gmra.mrb[50].mxu1 %vm2285_vm0, %v3982_v57 }
 0xae3   :  { %7777 = vmatprep.mubr.msk.f32.mxu1 %vm2285_vm0, %v3983_v7 }
 0xae5   :  { %v3805_v30 = vpop.f32.mrb[84].mxu0 }
 0xae6   :  { %v12408_v52 = vadd.f32 %v3805_v30, %v11923_v3  ;;  %v12410_v24 = vpop.f32.mrb[85].mxu0  ;;  %7778 = vmatmul.mubr.msk.f32.gmra.mrb[52].mxu1 %vm2285_vm0, %v3984_v46 }
 0xae8   :  { %v3985_v12 = vmul.f32 %v12026_v54, %v12408_v52 }
 0xaea   :  { %7780 = vmatprep.mubr.msk.f32.mxu1 %vm2285_vm0, %v3985_v12 }
 0xaed   :  { %v3811_v32 = vpop.f32.mrb[86].mxu0 }
 0xaee   :  { %v12417_v42 = vadd.f32 %v3811_v32, %v11923_v3  ;;  %v12419_v23 = vpop.f32.mrb[87].mxu0 }
 0xaf0   :  { %v3986_v9 = vmul.f32 %v12026_v54, %v12417_v42 }
 0xaf1   :  { %v12423_v51 = vpop.permute.xlu0 %6258 }
 0xaf2   :  { %15193 = vst [vmem:[#allocation8_spill] sm:$0xff] %v12423_v51  ;;  %v12425_v55 = vpop.permute.xlu1 %6252  ;;  %7781 = vmatmul.mubr.msk.f32.gmra.mrb[54].mxu1 %vm2285_vm0, %v3986_v9 }
 0xaf3   :  { %15194 = vst [vmem:[#allocation35_spill] sm:$0xff] %v12425_v55 }
 0xaf5   :  { %v12428_v20 = vpop.permute.xlu0 %6286  ;;  %v3817_v56 = vpop.f32.mrb[88].mxu0 }
 0xaf6   :  { %15195 = vst [vmem:[#allocation36_spill] sm:$0xff] %v12428_v20  ;;  %v12431_v62 = vadd.f32 %v3817_v56, %v11923_v3  ;;  %v12433_v48 = vpop.permute.xlu1 %6254  ;;  %v12435_v47 = vpop.f32.mrb[89].mxu0 }
 0xaf7   :  { %15196 = vst [vmem:[#allocation24_spill] sm:$0xff] %v12433_v48 }
 0xaf8   :  { %v3987_v57 = vmul.f32 %v12026_v54, %v12431_v62 }
 0xaf9   :  { %v12439_v7 = vpop.permute.xlu0 %6290 }
 0xafa   :  { %15197 = vst [vmem:[#allocation40_spill] sm:$0xff] %v12439_v7  ;;  %v12441_v46 = vpop.permute.xlu1 %6256  ;;  %7783 = vmatprep.mubr.msk.f32.mxu1 %vm2285_vm0, %v3987_v57 }
 0xafb   :  { %15198 = vst [vmem:[#allocation37_spill] sm:$0xff] %v12441_v46 }
 0xafd   :  { %v12444_v30 = vpop.permute.xlu0 %6318  ;;  %v3823_v12 = vpop.f32.mrb[90].mxu0 }
 0xafe   :  { %15199 = vst [vmem:[#allocation50_spill] sm:$0xff] %v12444_v30  ;;  %v12447_v32 = vadd.f32 %v3823_v12, %v11923_v3  ;;  %v12449_v9 = vpop.permute.xlu1 %6284  ;;  %v12451_v56 = vpop.f32.mrb[91].mxu0 }
 0xaff   :  { %15201 = vst [vmem:[#allocation51_spill] sm:$0xff] %v12449_v9 }
 0xb00   :  { %15200 = vst [vmem:[#allocation25_spill] sm:$0xff] %v12447_v32  ;;  %v3988_v2 = vmul.f32 %v12026_v54, %v12447_v32 }
 0xb01   :  { %v12458_v7 = vpop.permute.xlu0 %6322 }
 0xb02   :  { %v12455_v20 = vpop.permute.xlu1 %6288  ;;  %7784 = vmatmul.mubr.msk.f32.gmra.mrb[56].mxu1 %vm2285_vm0, %v3988_v2  ;;  %15203 = vst [vmem:[#allocation7_spill] sm:$0xff] %v12458_v7 }
 0xb03   :  { %15202 = vst [vmem:[#allocation46_spill] sm:$0xff] %v12455_v20 }
 0xb05   :  { %v3829_v57 = vpop.f32.mrb[92].mxu0  ;;  %v12469_v48 = vpop.permute.xlu0 %6262 }
 0xb06   :  { %v12461_v30 = vadd.f32 %v3829_v57, %v11923_v3  ;;  %v12463_v55 = vpop.permute.xlu1 %6316  ;;  %v12465_v12 = vpop.f32.mrb[93].mxu0  ;;  %15206 = vst [vmem:[#allocation9_spill] sm:$0xff] %v12469_v48 }
 0xb07   :  { %15205 = vst [vmem:[#allocation74_spill] sm:$0xff] %v12463_v55 }
 0xb08   :  { %15204 = vst [vmem:[#allocation30_spill] sm:$0xff] %v12461_v30  ;;  %v3989_v9 = vmul.f32 %v12026_v54, %v12461_v30 }
 0xb09   :  { %v3835_v46 = vpop.f32.mrb[94].mxu0  ;;  %v12486_v48 = vpop.permute.xlu0 %6294 }
 0xb0a   :  { %v12472_v20 = vadd.f32 %v3835_v46, %v11923_v3  ;;  %v12474_v2 = vpop.permute.xlu1 %6320  ;;  %v12476_v7 = vpop.f32.mrb[95].mxu0  ;;  %7786 = vmatprep.mubr.msk.f32.mxu1 %vm2285_vm0, %v3989_v9  ;;  %15211 = vst [vmem:[#allocation12_spill] sm:$0xff] %v12486_v48 }
 0xb0b   :  { %15208 = vst [vmem:[#allocation23_spill] sm:$0xff] %v12474_v2  ;;  %15209 = vst [vmem:[#allocation67_spill] sm:$0xff] %v12476_v7 }
 0xb0c   :  { %15207 = vst [vmem:[#allocation17_spill] sm:$0xff] %v12472_v20  ;;  %v3990_v57 = vmul.f32 %v12026_v54, %v12472_v20 }
 0xb0d   :  { %v3841_v55 = vpop.f32.mrb[96].mxu0  ;;  %v12501_v48 = vpop.permute.xlu0 %6350 }
 0xb0e   :  { %v3842_v51 = vadd.f32 %v3841_v55, %v11923_v3  ;;  %v12482_v29 = vpop.permute.xlu1 %6260  ;;  %v3843_v1 = vpop.f32.mrb[97].mxu0  ;;  %7787 = vmatmul.mubr.msk.f32.gmra.mrb[58].mxu1 %vm2285_vm0, %v3990_v57  ;;  %15213 = vst [vmem:[#allocation41_spill] sm:$0xff] %v12501_v48 }
 0xb0f   :  { %15210 = vst [vmem:[#allocation21_spill] sm:$0xff] %v12482_v29  ;;  %v3844_v46 = vadd.f32 %v3843_v1, %v11930_v19 }
 0xb10   :  { %v3991_v2 = vmul.f32 %v12026_v54, %v3842_v51  ;;  %v6092_v7 = vsub.f32 %v3842_v51, %v11944_v25 }
 0xb11   :  { %v6093_v9 = vsub.f32 %v3844_v46, %v11944_v25  ;;  %v3847_v30 = vpop.f32.mrb[98].mxu0 }
 0xb12   :  { %v3848_v20 = vadd.f32 %v3847_v30, %v11923_v3  ;;  %v12492_v32 = vpop.permute.xlu1 %6292  ;;  %6444 = vrot.lane.b32.xlu1 %v6092_v7, %s8567_s9  ;;  %v3849_v55 = vpop.f32.mrb[99].mxu0  ;;  %7789 = vmatprep.mubr.msk.f32.mxu1 %vm2285_vm0, %v3991_v2  ;;  %v15215_v7 = vld [vmem:[#allocation52_spill] sm:$0xff] }
 0xb13   :  { %15212 = vst [vmem:[#allocation56_spill] sm:$0xff] %v12492_v32  ;;  %v3850_v1 = vadd.f32 %v3849_v55, %v11930_v19  ;;  %6446 = vrot.lane.b32.xlu0 %v6093_v9, %s8567_s9  ;;  %v3580_v2 = vadd.f32 %v15215_v7, %v11930_v19  ;;  %v6004_v9 = vsub.f32 %v12071_v31, %v11944_v25 }
 0xb14   :  { %v3992_v57 = vmul.f32 %v12026_v54, %v3848_v20  ;;  %v6094_v51 = vsub.f32 %v3848_v20, %v11944_v25  ;;  %v6020_v7 = vsub.f32 %v12159_v14, %v11944_v25 }
 0xb15   :  { %v6095_v46 = vsub.f32 %v3850_v1, %v11944_v25  ;;  %v6005_v20 = vsub.f32 %v3580_v2, %v11944_v25  ;;  %v3718_v2 = vadd.f32 %v11958_v28, %v11930_v19 }
 0xb16   :  { %v12503_v30 = vpop.permute.xlu1 %6348  ;;  %6448 = vrot.lane.b32.xlu1 %v6094_v51, %s8567_s9  ;;  %7790 = vmatmul.mubr.msk.f32.gmra.mrb[60].mxu1 %vm2285_vm0, %v3992_v57  ;;  %v15216_v57 = vld [vmem:[#allocation81_spill] sm:$0xff] }
 0xb17   :  { %15214 = vst [vmem:[#allocation63_spill] sm:$0xff] %v12503_v30  ;;  %6450 = vrot.lane.b32.xlu0 %v6095_v46, %s8567_s9  ;;  %v3628_v51 = vadd.f32 %v15216_v57, %v11930_v19  ;;  %v12524_v46 = vpop.permute.xlu0 %6354  ;;  %v3808_v57 = vadd.f32 %v12410_v24, %v11930_v19 }
 0xb18   :  { %15218 = vst [vmem:[#allocation59_spill] sm:$0xff] %v12524_v46 }
 0xb19   :  { %v3853_v55 = vpop.f32.mrb[100].mxu0 }
 0xb1a   :  { %v12514_v1 = vadd.f32 %v3853_v55, %v11923_v3  ;;  %v12516_v48 = vpop.f32.mrb[101].mxu0  ;;  %6268 = vrot.lane.b32.xlu1 %v6004_v9, %s8567_s9  ;;  %v12521_v30 = vpop.permute.xlu1 %6352  ;;  %v6021_v9 = vsub.f32 %v3628_v51, %v11944_v25  ;;  %v6050_v55 = vsub.f32 %v12296_v39, %v11944_v25  ;;  %v6080_v39 = vsub.f32 %v12408_v52, %v11944_v25 }
 0xb1b   :  { %15217 = vst [vmem:[#allocation18_spill] sm:$0xff] %v12521_v30  ;;  %6270 = vrot.lane.b32.xlu0 %v6005_v20, %s8567_s9  ;;  %v6051_v20 = vsub.f32 %v3718_v2, %v11944_v25  ;;  %v12543_v28 = vpop.permute.xlu0 %6326 }
 0xb1c   :  { %v3993_v31 = vmul.f32 %v12026_v54, %v12514_v1  ;;  %15220 = vst [vmem:[#allocation84_spill] sm:$0xff] %v12543_v28 }
 0xb1e   :  { %6300 = vrot.lane.b32.xlu1 %v6020_v7, %s8567_s9  ;;  %7792 = vmatprep.mubr.msk.f32.mxu1 %vm2285_vm0, %v3993_v31  ;;  %v12541_v14 = vpop.permute.xlu1 %6324  ;;  %v6081_v7 = vsub.f32 %v3808_v57, %v11944_v25 }
 0xb1f   :  { %6302 = vrot.lane.b32.xlu0 %v6021_v9, %s8567_s9  ;;  %15219 = vst [vmem:[#allocation57_spill] sm:$0xff] %v12541_v14  ;;  %v12567_v52 = vpop.permute.xlu0 %6382 }
 0xb20   :  { %15222 = vst [vmem:[#allocation76_spill] sm:$0xff] %v12567_v52 }
 0xb21   :  { %v3859_v30 = vpop.f32.mrb[102].mxu0 }
 0xb22   :  { %v12546_v51 = vadd.f32 %v3859_v30, %v11923_v3  ;;  %6360 = vrot.lane.b32.xlu1 %v6050_v55, %s8567_s9  ;;  %v12549_v31 = vpop.f32.mrb[103].mxu0  ;;  %v12564_v55 = vpop.permute.xlu1 %6380 }
 0xb23   :  { %6362 = vrot.lane.b32.xlu0 %v6051_v20, %s8567_s9  ;;  %15221 = vst [vmem:[#allocation38_spill] sm:$0xff] %v12564_v55  ;;  %v12581_v55 = vpop.permute.xlu0 %6386 }
 0xb24   :  { %v3994_v24 = vmul.f32 %v12026_v54, %v12546_v51  ;;  %15225 = vst [vmem:[#allocation105_spill] sm:$0xff] %v12581_v55 }
 0xb25   :  { %v3865_v2 = vpop.f32.mrb[104].mxu0 }
 0xb26   :  { %v12558_v9 = vadd.f32 %v3865_v2, %v11923_v3  ;;  %6420 = vrot.lane.b32.xlu1 %v6080_v39, %s8567_s9  ;;  %v12561_v30 = vpop.f32.mrb[105].mxu0  ;;  %7793 = vmatmul.mubr.msk.f32.gmra.mrb[62].mxu1 %vm2285_vm0, %v3994_v24  ;;  %v12579_v24 = vpop.permute.xlu1 %6384 }
 0xb27   :  { %6422 = vrot.lane.b32.xlu0 %v6081_v7, %s8567_s9  ;;  %15224 = vst [vmem:[#allocation90_spill] sm:$0xff] %v12579_v24  ;;  %v12606_v24 = vpop.permute.xlu0 %6266  ;;  %v3766_v7 = vadd.f32 %v12125_v40, %v11930_v19 }
 0xb28   :  { %v3995_v20 = vmul.f32 %v12026_v54, %v12558_v9  ;;  %15230 = vst [vmem:[#allocation39_spill] sm:$0xff] %v12606_v24 }
 0xb29   :  { %v3871_v57 = vpop.f32.mrb[106].mxu0  ;;  %v6067_v40 = vsub.f32 %v3766_v7, %v11944_v25 }
 0xb2a   :  { %v12572_v46 = vadd.f32 %v3871_v57, %v11923_v3  ;;  %v12574_v2 = vpop.f32.mrb[107].mxu0  ;;  %7795 = vmatprep.mubr.msk.f32.mxu1 %vm2285_vm0, %v3995_v20  ;;  %v12604_v52 = vpop.permute.xlu1 %6264 }
 0xb2b   :  { %15229 = vst [vmem:[#allocation45_spill] sm:$0xff] %v12604_v52 }
 0xb2c   :  { %15223 = vst [vmem:[#allocation106_spill] sm:$0xff] %v12572_v46  ;;  %v3996_v39 = vmul.f32 %v12026_v54, %v12572_v46 }
 0xb2e   :  { %7796 = vmatmul.mubr.msk.f32.gmra.mrb[64].mxu1 %vm2285_vm0, %v3996_v39  ;;  %v12611_v14 = vpop.permute.xlu1 %6296 }
 0xb2f   :  { %15231 = vst [vmem:[#allocation107_spill] sm:$0xff] %v12611_v14 }
 0xb31   :  { %v3877_v20 = vpop.f32.mrb[108].mxu0 }
 0xb32   :  { %v12597_v57 = vadd.f32 %v3877_v20, %v11923_v3  ;;  %v12599_v39 = vpop.f32.mrb[109].mxu0  ;;  %v12616_v20 = vpop.permute.xlu0 %6298 }
 0xb33   :  { %15232 = vst [vmem:[#allocation93_spill] sm:$0xff] %v12616_v20  ;;  %v12631_v16 = vpop.permute.xlu1 %6356 }
 0xb34   :  { %15228 = vst [vmem:[#allocation112_spill] sm:$0xff] %v12597_v57  ;;  %v3997_v55 = vmul.f32 %v12026_v54, %v12597_v57  ;;  %15235 = vst [vmem:[#allocation108_spill] sm:$0xff] %v12631_v16 }
 0xb36   :  { %7798 = vmatprep.mubr.msk.f32.mxu1 %vm2285_vm0, %v3997_v55  ;;  %v12633_v20 = vpop.permute.xlu0 %6358 }
 0xb37   :  { %15236 = vst [vmem:[#allocation94_spill] sm:$0xff] %v12633_v20 }
 0xb39   :  { %v3883_v18 = vpop.f32.mrb[110].mxu0 }
 0xb3a   :  { %v12619_v28 = vadd.f32 %v3883_v18, %v11923_v3  ;;  %v12621_v32 = vpop.f32.mrb[111].mxu0 }
 0xb3b   :  { %15234 = vst [vmem:[#allocation85_spill] sm:$0xff] %v12621_v32 }
 0xb3c   :  { %15233 = vst [vmem:[#allocation113_spill] sm:$0xff] %v12619_v28  ;;  %v3998_v55 = vmul.f32 %v12026_v54, %v12619_v28 }
 0xb3d   :  { %v3901_v14 = vpop.f32.mrb[0].mxu1 }
 0xb3e   :  { %v12628_v29 = vpop.f32.mrb[1].mxu1  ;;  %7799 = vmatmul.mubr.msk.f32.gmra.mrb[66].mxu1 %vm2285_vm0, %v3998_v55 }
 0xb41   :  { %v3889_v18 = vpop.f32.mrb[112].mxu0 }
 0xb42   :  { %v3890_v52 = vadd.f32 %v3889_v18, %v11923_v3  ;;  %v3891_v24 = vpop.f32.mrb[113].mxu0 }
 0xb43   :  { %v3892_v28 = vadd.f32 %v3891_v24, %v11930_v19  ;;  %v6413_v32 = vpop.permute.xlu1 %6412 }
 0xb44   :  { %v3999_v55 = vmul.f32 %v12026_v54, %v3890_v52  ;;  %v6108_v16 = vsub.f32 %v3890_v52, %v11944_v25  ;;  %v6415_v20 = vpop.permute.xlu0 %6414 }
 0xb45   :  { %v6109_v57 = vsub.f32 %v3892_v28, %v11944_v25  ;;  %v12647_v38 = vsel %vm6508_vm3, %v6413_v32, %v6415_v20 }
 0xb46   :  { %15237 = vst [vmem:[#allocation78_spill] sm:$0xff] %v12647_v38  ;;  %6476 = vrot.lane.b32.xlu1 %v6108_v16, %s8567_s9  ;;  %7801 = vmatprep.mubr.msk.f32.mxu1 %vm2285_vm0, %v3999_v55 }
 0xb47   :  { %6478 = vrot.lane.b32.xlu0 %v6109_v57, %s8567_s9  ;;  %v6417_v18 = vpop.permute.xlu1 %6416 }
 0xb48   :  { %v6419_v24 = vpop.permute.xlu0 %6418 }
 0xb49   :  { %v3907_v46 = vpop.f32.mrb[2].mxu1  ;;  %v12656_v52 = vsel %vm6508_vm3, %v6417_v18, %v6419_v24  ;;  %v12678_v24 = vadd.f32 %v3901_v14, %v11923_v3 }
 0xb4a   :  { %15238 = vst [vmem:[#allocation95_spill] sm:$0xff] %v12656_v52  ;;  %v12658_v28 = vpop.f32.mrb[3].mxu1  ;;  %v12683_v49 = vadd.f32 %v3907_v46, %v11923_v3 }
 0xb4b   :  { %15239 = vst [vmem:[#allocation110_spill] sm:$0xff] %v12658_v28  ;;  %v6329_v32 = vpop.permute.xlu1 %6328 }
 0xb4c   :  { %v6331_v20 = vpop.permute.xlu0 %6330 }
 0xb4d   :  { %v12664_v57 = vsel %vm6508_vm3, %v6329_v32, %v6331_v20 }
 0xb4e   :  { %15240 = vst [vmem:[#allocation5_spill] sm:$0xff] %v12664_v57 }
 0xb4f   :  { %v6389_v16 = vpop.permute.xlu1 %6388 }
 0xb50   :  { %v6391_v55 = vpop.permute.xlu0 %6390 }
 0xb51   :  { %v3913_v38 = vpop.f32.mrb[4].mxu1  ;;  %v12670_v33 = vsel %vm6508_vm3, %v6389_v16, %v6391_v55 }
 0xb52   :  { %15241 = vst [vmem:[#allocation109_spill] sm:$0xff] %v12670_v33  ;;  %v12672_v18 = vpop.f32.mrb[5].mxu1  ;;  %v4001_v33 = vmul.f32 %v12026_v54, %v12678_v24 }
 0xb53   :  { %15242 = vst [vmem:[#allocation114_spill] sm:$0xff] %v12672_v18  ;;  %v12690_v18 = vadd.f32 %v3913_v38, %v11923_v3  ;;  %v4002_v38 = vmul.f32 %v12026_v54, %v12683_v49 }
 0xb55   :  { %v3895_v32 = vpop.f32.mrb[114].mxu0 }
 0xb56   :  { %v3896_v20 = vadd.f32 %v3895_v32, %v11923_v3  ;;  %v3897_v52 = vpop.f32.mrb[115].mxu0 }
 0xb57   :  { %v3898_v57 = vadd.f32 %v3897_v52, %v11930_v19  ;;  %v15243_v52 = vld [vmem:[#allocation29_spill] sm:$0xff] }
 0xb58   :  { %v4000_v16 = vmul.f32 %v12026_v54, %v3896_v20  ;;  %v6110_v55 = vsub.f32 %v3896_v20, %v11944_v25  ;;  %v3676_v32 = vadd.f32 %v15243_v52, %v11930_v19  ;;  %v4003_v20 = vmul.f32 %v12026_v54, %v12690_v18 }
 0xb59   :  { %v6111_v14 = vsub.f32 %v3898_v57, %v11944_v25  ;;  %v3919_v28 = vpop.f32.mrb[6].mxu1 }
 0xb5a   :  { %6480 = vrot.lane.b32.xlu1 %v6110_v55, %s8567_s9  ;;  %v12697_v46 = vpop.f32.mrb[7].mxu1  ;;  %7802 = vmatmul.mubr.msk.f32.gmra.mrb[68].mxu1 %vm2285_vm0, %v4000_v16  ;;  %v12707_v57 = vadd.f32 %v3919_v28, %v11923_v3  ;;  %v6037_v16 = vsub.f32 %v3676_v32, %v11944_v25  ;;  %v6066_v28 = vsub.f32 %v12354_v4, %v11944_v25 }
 0xb5b   :  { %6482 = vrot.lane.b32.xlu0 %v6111_v14, %s8567_s9  ;;  %7804 = vmatprep.mubr.msk.f32.mxu1 %vm2285_vm0, %v4001_v33  ;;  %v3856_v33 = vadd.f32 %v12516_v48, %v11930_v19  ;;  %v6096_v4 = vsub.f32 %v12514_v1, %v11944_v25 }
 0xb5c   :  { %v4004_v15 = vmul.f32 %v12026_v54, %v12707_v57 }
 0xb5d   :  { %v6097_v48 = vsub.f32 %v3856_v33, %v11944_v25 }
 0xb5e   :  { %6332 = vrot.lane.b32.xlu1 %v6036_v45, %s8567_s9  ;;  %7805 = vmatmul.mubr.msk.f32.gmra.mrb[70].mxu1 %vm2285_vm0, %v4002_v38 }
 0xb5f   :  { %6334 = vrot.lane.b32.xlu0 %v6037_v16, %s8567_s9  ;;  %7807 = vmatprep.mubr.msk.f32.mxu1 %vm2285_vm0, %v4003_v20  ;;  %v15248_v20 = vld [vmem:[#allocation70_spill] sm:$0xff] }
 0xb60   :  { %v3586_v16 = vadd.f32 %v15248_v20, %v11930_v19  ;;  %v3724_v20 = vadd.f32 %v11976_v58, %v11930_v19 }
 0xb61   :  { %v3925_v55 = vpop.f32.mrb[8].mxu1 }
 0xb62   :  { %v12728_v14 = vadd.f32 %v3925_v55, %v11923_v3  ;;  %6392 = vrot.lane.b32.xlu1 %v6066_v28, %s8567_s9  ;;  %v12731_v52 = vpop.f32.mrb[9].mxu1  ;;  %7808 = vmatmul.mubr.msk.f32.gmra.mrb[72].mxu1 %vm2285_vm0, %v4004_v15  ;;  %v6006_v28 = vsub.f32 %v12087_v63, %v11944_v25  ;;  %v15249_v55 = vld [vmem:[#allocation71_spill] sm:$0xff] }
 0xb63   :  { %15245 = vst [vmem:[#allocation111_spill] sm:$0xff] %v12731_v52  ;;  %6394 = vrot.lane.b32.xlu0 %v6067_v40, %s8567_s9  ;;  %v15251_v63 = vld [vmem:[#allocation83_spill] sm:$0xff]  ;;  %v12808_v52 = vadd.f32 %v11882_v27, %v11930_v19 }
 0xb64   :  { %15244 = vst [vmem:[#allocation13_spill] sm:$0xff] %v12728_v14  ;;  %v4005_v32 = vmul.f32 %v12026_v54, %v12728_v14 }
 0xb65   :  { %v3931_v38 = vpop.f32.mrb[10].mxu1  ;;  %15257 = vst [vmem:[#allocation31_spill] sm:$0xff] %v12808_v52 }
 0xb66   :  { %v12741_v45 = vadd.f32 %v3931_v38, %v11923_v3  ;;  %6452 = vrot.lane.b32.xlu1 %v6096_v4, %s8567_s9  ;;  %v12744_v7 = vpop.f32.mrb[11].mxu1  ;;  %7810 = vmatprep.mubr.msk.f32.mxu1 %vm2285_vm0, %v4005_v32  ;;  %v6007_v3 = vsub.f32 %v3586_v16, %v11944_v25  ;;  %v12761_v4 = vadd.f32 %v15249_v55, %v11930_v19  ;;  %v15250_v32 = vld [vmem:[#allocation73_spill] sm:$0xff] }
 0xb67   :  { %15247 = vst [vmem:[#allocation115_spill] sm:$0xff] %v12744_v7  ;;  %6454 = vrot.lane.b32.xlu0 %v6097_v48, %s8567_s9  ;;  %v3634_v48 = vadd.f32 %v15251_v63, %v11930_v19  ;;  %v12776_v16 = vadd.f32 %v11990_v6, %v11930_v19 }
 0xb68   :  { %15246 = vst [vmem:[#allocation27_spill] sm:$0xff] %v12741_v45  ;;  %v4006_v1 = vmul.f32 %v12026_v54, %v12741_v45  ;;  %v12765_v54 = vadd.f32 %v15250_v32, %v11930_v19  ;;  %v15254_v32 = vld [vmem:[#allocation89_spill] sm:$0xff] }
 0xb69   :  { %v7719_v15 = vpop.f32.mrb[12].mxu1  ;;  %v6023_v6 = vsub.f32 %v3634_v48, %v11944_v25  ;;  %v12795_v63 = vadd.f32 %v15254_v32, %v11930_v19  ;;  %v12812_v48 = vadd.f32 %v12035_v53, %v11930_v19  ;;  %v6038_v53 = vsub.f32 %v12258_v60, %v11944_v25 }
 0xb6a   :  { %v12755_v40 = vmul.f32 0.35355338, %v7719_v15  ;;  %6272 = vrot.lane.b32.xlu1 %v6006_v28, %s8567_s9  ;;  %v4277_v33 = vpop.f32.mrb[13].mxu1  ;;  %7811 = vmatmul.mubr.msk.f32.gmra.mrb[74].mxu1 %vm2285_vm0, %v4006_v1  ;;  %v6022_v28 = vsub.f32 %v12172_v36, %v11944_v25  ;;  %v15252_v15 = vld [vmem:[#allocation87_spill] sm:$0xff]  ;;  %v15255_v36 = vld [vmem:[#allocation102_spill] sm:$0xff] }
 0xb6b   :  { %v12769_v38 = vmul.f32 0.35355338, %v4277_v33  ;;  %6274 = vrot.lane.b32.xlu0 %v6007_v3, %s8567_s9  ;;  %v12784_v55 = vadd.f32 %v15252_v15, %v11930_v19  ;;  %v12788_v3 = vadd.f32 %v12010_v17, %v11930_v19  ;;  %v12799_v45 = vadd.f32 %v15255_v36, %v11930_v19  ;;  %v15256_v15 = vld [vmem:[#allocation104_spill] sm:$0xff]  ;;  %15258 = vst [vmem:[#allocation53_spill] sm:$0xff] %v12812_v48 }
 0xb6c   :  { %v4663_v1 = vsel %vm4661_vm1, %v12755_v40, -inf  ;;  %v12803_v7 = vadd.f32 %v15256_v15, %v11930_v19 }
 0xb6d   :  { %15253 = vst [vmem:[#allocation42_spill] sm:$0xff] %v12788_v3  ;;  %v4662_v58 = vsel %vm4661_vm1, %v12769_v38, -inf  ;;  %v7722_v33 = vpop.f32.mrb[14].mxu1 }
 0xb6e   :  { %v4664_v17 = vmax.f32 %v4662_v58, %v4663_v1  ;;  %6304 = vrot.lane.b32.xlu1 %v6022_v28, %s8567_s9  ;;  %v4287_v14 = vpop.f32.mrb[15].mxu1  ;;  %v12814_v32 = vmul.f32 0.35355338, %v7722_v33  ;;  %v6052_v1 = vsub.f32 %v12301_v43, %v11944_v25  ;;  %v6053_v28 = vsub.f32 %v3724_v20, %v11944_v25 }
 0xb6f   :  { %v12816_v36 = vmul.f32 0.35355338, %v4287_v14  ;;  %6306 = vrot.lane.b32.xlu0 %v6023_v6, %s8567_s9  ;;  %v3814_v33 = vadd.f32 %v12419_v23, %v11930_v19 }
 0xb70   :  { %v4667_v58 = vsel %vm4661_vm1, %v12814_v32, -inf }
 0xb71   :  { %v4665_v43 = vsel %vm4661_vm1, %v12816_v36, -inf  ;;  %v7725_v6 = vpop.f32.mrb[16].mxu1  ;;  %v6083_v23 = vsub.f32 %v3814_v33, %v11944_v25 }
 0xb72   :  { %v4666_v15 = vmax.f32 %v4664_v17, %v4665_v43  ;;  %6364 = vrot.lane.b32.xlu1 %v6052_v1, %s8567_s9  ;;  %v4297_v27 = vpop.f32.mrb[17].mxu1  ;;  %v12845_v3 = vmul.f32 0.35355338, %v7725_v6  ;;  %v6082_v17 = vsub.f32 %v12417_v42, %v11944_v25  ;;  %v3904_v6 = vadd.f32 %v12628_v29, %v11930_v19 }
 0xb73   :  { %v12847_v0 = vmul.f32 0.35355338, %v4297_v27  ;;  %6366 = vrot.lane.b32.xlu0 %v6053_v28, %s8567_s9 }
 0xb74   :  { %v4668_v1 = vmax.f32 %v4666_v15, %v4667_v58  ;;  %v4671_v43 = vsel %vm4661_vm1, %v12845_v3, -inf }
 0xb75   :  { %v4669_v27 = vsel %vm4661_vm1, %v12847_v0, -inf  ;;  %v7728_v20 = vpop.f32.mrb[18].mxu1 }
 0xb76   :  { %v4670_v42 = vmax.f32 %v4668_v1, %v4669_v27  ;;  %6424 = vrot.lane.b32.xlu1 %v6082_v17, %s8567_s9  ;;  %v4307_v58 = vpop.f32.mrb[19].mxu1  ;;  %v12872_v60 = vmul.f32 0.35355338, %v7728_v20  ;;  %v6112_v1 = vsub.f32 %v12678_v24, %v11944_v25  ;;  %v3772_v20 = vadd.f32 %v12186_v34, %v11930_v19 }
 0xb77   :  { %v12874_v14 = vmul.f32 0.35355338, %v4307_v58  ;;  %6426 = vrot.lane.b32.xlu0 %v6083_v23, %s8567_s9  ;;  %v6113_v58 = vsub.f32 %v3904_v6, %v11944_v25  ;;  %v12894_v24 = vadd.f32 %v12228_v8, %v11930_v19  ;;  %v12903_v6 = vadd.f32 %v12303_v37, %v11930_v19 }
 0xb78   :  { %v4672_v27 = vmax.f32 %v4670_v42, %v4671_v43  ;;  %v4675_v17 = vsel %vm4661_vm1, %v12872_v60, -inf }
 0xb79   :  { %v4673_v23 = vsel %vm4661_vm1, %v12874_v14, -inf  ;;  %v7731_v15 = vpop.f32.mrb[20].mxu1  ;;  %15259 = vst [vmem:[#allocation28_spill] sm:$0xff] %v12903_v6 }
 0xb7a   :  { %v4674_v43 = vmax.f32 %v4672_v27, %v4673_v23  ;;  %v12896_v42 = vmul.f32 0.35355338, %v7731_v15  ;;  %6484 = vrot.lane.b32.xlu1 %v6112_v1, %s8567_s9  ;;  %v4317_v29 = vpop.f32.mrb[21].mxu1  ;;  %v6068_v15 = vsub.f32 %v12360_v26, %v11944_v25  ;;  %v12916_v1 = vadd.f32 %v12319_v10, %v11930_v19 }
 0xb7b   :  { %v12907_v33 = vmul.f32 0.35355338, %v4317_v29  ;;  %6486 = vrot.lane.b32.xlu0 %v6113_v58, %s8567_s9  ;;  %v6069_v23 = vsub.f32 %v3772_v20, %v11944_v25  ;;  %v12925_v58 = vadd.f32 %v12435_v47, %v11930_v19  ;;  %v15266_v29 = vld [vmem:[#allocation67_spill] sm:$0xff] }
 0xb7c   :  { %15260 = vst [vmem:[#allocation20_spill] sm:$0xff] %v12916_v1  ;;  %v4676_v27 = vmax.f32 %v4674_v43, %v4675_v17  ;;  %v4684_v37 = vsel %vm4661_vm1, %v12896_v42, -inf  ;;  %v12933_v17 = vadd.f32 %v12451_v56, %v11930_v19  ;;  %v15262_v56 = vsub.f32 %v12799_v45, %v11944_v25 }
 0xb7d   :  { %v4683_v26 = vsel %vm4661_vm1, %v12907_v33, -inf  ;;  %v7734_v8 = vpop.f32.mrb[22].mxu1  ;;  %v3862_v45 = vadd.f32 %v12549_v31, %v11930_v19 }
 0xb7e   :  { %15261 = vst [vmem:[#allocation6_spill] sm:$0xff] %v12933_v17  ;;  %v4677_v43 = vrot.slane %v4676_v27, 4  ;;  %v4685_v20 = vmax.f32 %v4683_v26, %v4684_v37  ;;  %6336 = vrot.lane.b32.xlu1 %v6038_v53, %s8567_s9  ;;  %v4327_v34 = vpop.f32.mrb[23].mxu1  ;;  %v12940_v28 = vmul.f32 0.35355338, %v7734_v8  ;;  %v15264_v53 = vld [vmem:[#allocation25_spill] sm:$0xff] }
 0xb7f   :  { %v12942_v48 = vmul.f32 0.35355338, %v4327_v34  ;;  %6338 = vrot.lane.b32.xlu0 %v15262_v56, %s8567_s9  ;;  %v12958_v34 = vadd.f32 %v12465_v12, %v11930_v19 }
 0xb80   :  { %v4678_v47 = vmax.f32 %v4676_v27, %v4677_v43  ;;  %v4688_v31 = vsel %vm4661_vm1, %v12940_v28, -inf  ;;  %v12980_v27 = vadd.f32 %v15266_v29, %v11930_v19 }
 0xb81   :  { %15263 = vst [vmem:[#allocation49_spill] sm:$0xff] %v12958_v34  ;;  %v4686_v56 = vsel %vm4661_vm1, %v12942_v48, -inf  ;;  %v7737_v37 = vpop.f32.mrb[24].mxu1 }
 0xb82   :  { %v4679_v43 = vrot.slane %v4678_v47, 2  ;;  %v4687_v10 = vmax.f32 %v4685_v20, %v4686_v56  ;;  %6396 = vrot.lane.b32.xlu1 %v6068_v15, %s8567_s9  ;;  %v4337_v8 = vpop.f32.mrb[25].mxu1  ;;  %v12973_v1 = vmul.f32 0.35355338, %v7737_v37  ;;  %15267 = vst [vmem:[#allocation44_spill] sm:$0xff] %v12980_v27  ;;  %v6098_v15 = vsub.f32 %v12546_v51, %v11944_v25 }
 0xb83   :  { %v12975_v59 = vmul.f32 0.35355338, %v4337_v8  ;;  %6398 = vrot.lane.b32.xlu0 %v6069_v23, %s8567_s9  ;;  %v6099_v37 = vsub.f32 %v3862_v45, %v11944_v25  ;;  %v12989_v8 = vadd.f32 %v12561_v30, %v11930_v19 }
 0xb84   :  { %v4680_v20 = vmax.f32 %v4678_v47, %v4679_v43  ;;  %v4689_v56 = vmax.f32 %v4687_v10, %v4688_v31  ;;  %v6445_v22 = vpop.permute.xlu1 %6444  ;;  %v12998_v10 = vld [vmem:[%s14627_s11] sm:$0x1]  ;;  %v13006_v31 = vadd.f32 %v12574_v2, %v11930_v19  ;;  %v4692_v51 = vsel %vm4661_vm1, %v12973_v1, -inf }
 0xb85   :  { %v4690_v23 = vsel %vm4661_vm1, %v12975_v59, -inf  ;;  %v6447_v29 = vpop.permute.xlu0 %6446  ;;  %v7740_v12 = vpop.f32.mrb[26].mxu1 }
 0xb86   :  { %v4681_v47 = vrot.slane %v4680_v20, 1  ;;  %v4691_v43 = vmax.f32 %v4689_v56, %v4690_v23  ;;  %6456 = vrot.lane.b32.xlu1 %v6098_v15, %s8567_s9  ;;  %v4347_v45 = vpop.f32.mrb[27].mxu1  ;;  %v13002_v30 = vsel %vm6508_vm3, %v6445_v22, %v6447_v29  ;;  %15270 = vst [vmem:[#allocation15_spill] sm:$0xff] %v13006_v31  ;;  %v13010_v26 = vmul.f32 0.35355338, %v7740_v12  ;;  %v15281_v29 = vld [vmem:[#allocation110_spill] sm:$0xff] }
 0xb87   :  { %15269 = vst [vmem:[#allocation54_spill] sm:$0xff] %v13002_v30  ;;  %v13012_v6 = vmul.f32 0.35355338, %v4347_v45  ;;  %6458 = vrot.lane.b32.xlu0 %v6099_v37, %s8567_s9  ;;  %v13019_v22 = vadd.f32 %v12599_v39, %v11930_v19  ;;  %v13065_v31 = vadd.f32 %v15281_v29, %v11930_v19  ;;  %v15282_v29 = vsub.f32 %v12183_v61, %v11944_v25 }
 0xb88   :  { %v4682_v56 = vmax.f32 %v4680_v20, %v4681_v47  ;;  %v4693_v23 = vmax.f32 %v4691_v43, %v4692_v51  ;;  %v6449_v2 = vpop.permute.xlu1 %6448  ;;  %v15273_v47 = vsub.f32 %v12094_v5, %v11944_v25  ;;  %v15276_v5 = vsub.f32 %v12761_v4, %v11944_v25 }
 0xb89   :  { %15271 = vst [vmem:[#allocation60_spill] sm:$0xff] %v13019_v22  ;;  %v4694_v37 = vsel %vm4661_vm1, %v13012_v6, -inf  ;;  %v6451_v15 = vpop.permute.xlu0 %6450  ;;  %v7743_v27 = vpop.f32.mrb[28].mxu1 }
 0xb8a   :  { %v13030_v39 = vmax.f32 %v4682_v56, %v12998_v10  ;;  %v4695_v20 = vmax.f32 %v4693_v23, %v4694_v37  ;;  %v13032_v51 = vmul.f32 0.35355338, %v7743_v27  ;;  %6276 = vrot.lane.b32.xlu1 %v15273_v47, %s8567_s9  ;;  %v4357_v43 = vpop.f32.mrb[29].mxu1  ;;  %v13039_v12 = vsel %vm6508_vm3, %v6449_v2, %v6451_v15  ;;  %v15277_v23 = vld [vmem:[#allocation85_spill] sm:$0xff]  ;;  %v15279_v37 = vld [vmem:[#allocation10_spill] sm:$0xff] }
 0xb8b   :  { %15274 = vst [vmem:[#allocation32_spill] sm:$0xff] %v13039_v12  ;;  %v4696_v56 = vsel %vm4661_vm1, %v13010_v26, -inf  ;;  %v13047_v27 = vmul.f32 0.35355338, %v4357_v43  ;;  %6278 = vrot.lane.b32.xlu0 %v15276_v5, %s8567_s9  ;;  %v13057_v2 = vadd.f32 %v15277_v23, %v11930_v19 }
 0xb8c   :  { %v4841_v47 = vrot.slane %v13030_v39, %v15279_v37  ;;  %v4697_v34 = vmax.f32 %v4695_v20, %v4696_v56  ;;  %v6269_v30 = vpop.permute.xlu1 %6268  ;;  %v4705_v4 = vsel %vm4661_vm1, %v13032_v51, -inf }
 0xb8d   :  { %15278 = vst [vmem:[#allocation61_spill] sm:$0xff] %v13057_v2  ;;  %v4704_v5 = vsel %vm4661_vm1, %v13047_v27, -inf  ;;  %v6271_v23 = vpop.permute.xlu0 %6270  ;;  %v7746_v15 = vpop.f32.mrb[30].mxu1 }
 0xb8e   :  { %v4870_v22 = vsub.f32 %v12769_v38, %v4841_v47  ;;  %v4871_v20 = vsub.f32 %v12755_v40, %v4841_v47  ;;  %v4872_v56 = vsub.f32 %v12816_v36, %v4841_v47  ;;  %v4873_v12 = vsub.f32 %v12814_v32, %v4841_v47  ;;  %6308 = vrot.lane.b32.xlu1 %v15282_v29, %s8567_s9  ;;  %v4367_v43 = vpop.f32.mrb[31].mxu1 }
 0xb8f   :  { %v4874_v45 = vsub.f32 %v12847_v0, %v4841_v47  ;;  %v4875_v44 = vsub.f32 %v12845_v3, %v4841_v47  ;;  %v4876_v52 = vsub.f32 %v12874_v14, %v4841_v47  ;;  %v4877_v38 = vsub.f32 %v12872_v60, %v4841_v47 }
 0xb90   :  { %v15283_v40 = vsub.f32 %v12784_v55, %v11944_v25  ;;  %v4934_v32 = vmul.f32 1.442695, %v4870_v22  ;;  %v4936_v36 = vmul.f32 1.442695, %v4871_v20  ;;  %v4938_v35 = vmul.f32 1.442695, %v4872_v56  ;;  %v6301_v61 = vpop.permute.xlu1 %6300 }
 0xb91   :  { %v4706_v17 = vmax.f32 %v4704_v5, %v4705_v4  ;;  %v6114_v0 = vsub.f32 %v12683_v49, %v11944_v25  ;;  %v4940_v3 = vmul.f32 1.442695, %v4873_v12  ;;  %v6303_v14 = vpop.permute.xlu0 %6302  ;;  %v13092_v60 = vsel %vm6508_vm3, %v6269_v30, %v6271_v23  ;;  %v7749_v12 = vpop.f32.mrb[32].mxu1 }
 0xb92   :  { %6310 = vrot.lane.b32.xlu0 %v15283_v40, %s8567_s9  ;;  %15284 = vst [vmem:[#allocation43_spill] sm:$0xff] %v13092_v60  ;;  %v6115_v55 = vsub.f32 %v13065_v31, %v11944_v25  ;;  %8320 = vpow2.f32 %v4934_v32  ;;  %v4942_v22 = vmul.f32 1.442695, %v4874_v45  ;;  %v4944_v47 = vmul.f32 1.442695, %v4875_v44  ;;  %v15287_v31 = vld [vmem:[#allocation114_spill] sm:$0xff] }
 0xb93   :  { %v15285_v4 = vsub.f32 %v12311_v50, %v11944_v25  ;;  %8322 = vpow2.f32 %v4936_v36  ;;  %v4698_v5 = vrot.slane %v4697_v34, 4  ;;  %v13100_v20 = vmul.f32 0.35355338, %v7746_v15  ;;  %v4377_v50 = vpop.f32.mrb[33].mxu1 }
 0xb94   :  { %v13102_v49 = vmul.f32 0.35355338, %v4367_v43  ;;  %v15286_v30 = vsub.f32 %v12776_v16, %v11944_v25  ;;  %v13110_v44 = vadd.f32 %v15287_v31, %v11930_v19  ;;  %8324 = vpow2.f32 %v4938_v35  ;;  %v6361_v23 = vpop.permute.xlu1 %6360 }
 0xb95   :  { %6368 = vrot.lane.b32.xlu1 %v15285_v4, %s8567_s9  ;;  %v4946_v45 = vmul.f32 1.442695, %v4876_v52  ;;  %v13113_v56 = vsel %vm6508_vm3, %v6301_v61, %v6303_v14  ;;  %8326 = vpow2.f32 %v4940_v3  ;;  %v4699_v15 = vmax.f32 %v4697_v34, %v4698_v5  ;;  %v6363_v16 = vpop.permute.xlu0 %6362  ;;  %v7752_v32 = vpop.f32.mrb[34].mxu1 }
 0xb96   :  { %6370 = vrot.lane.b32.xlu0 %v15286_v30, %s8567_s9  ;;  %15288 = vst [vmem:[#allocation92_spill] sm:$0xff] %v13113_v56  ;;  %v4707_v43 = vsel %vm4661_vm1, %v13102_v49, -inf  ;;  %v13117_v40 = vmul.f32 0.35355338, %v7749_v12  ;;  %8328 = vpow2.f32 %v4942_v22  ;;  %v4948_v36 = vmul.f32 1.442695, %v4877_v38 }
 0xb97   :  { %v4708_v4 = vmax.f32 %v4706_v17, %v4707_v43  ;;  %v13119_v30 = vmul.f32 0.35355338, %v4377_v50  ;;  %v15289_v35 = vsub.f32 %v12431_v62, %v11944_v25  ;;  %v4387_v52 = vpop.f32.mrb[35].mxu1  ;;  %8330 = vpow2.f32 %v4944_v47 }
 0xb98   :  { %v4700_v34 = vrot.slane %v4699_v15, 2  ;;  %v4709_v61 = vsel %vm4661_vm1, %v13100_v20, -inf  ;;  %v13127_v3 = vmul.f32 0.35355338, %v4387_v52  ;;  %v15290_v38 = vsub.f32 %v12925_v58, %v11944_v25  ;;  %v6421_v22 = vpop.permute.xlu1 %6420 }
 0xb99   :  { %6428 = vrot.lane.b32.xlu1 %v15289_v35, %s8567_s9  ;;  %v5062_v17 = vsub.f32 %v12998_v10, %v13030_v39  ;;  %v4710_v14 = vmax.f32 %v4708_v4, %v4709_v61  ;;  %v4711_v62 = vsel %vm4661_vm1, %v13119_v30, -inf  ;;  %v13138_v47 = vsel %vm6508_vm3, %v6361_v23, %v6363_v16  ;;  %v6423_v31 = vpop.permute.xlu0 %6422  ;;  %v7755_v50 = vpop.f32.mrb[36].mxu1 }
 0xb9a   :  { %6430 = vrot.lane.b32.xlu0 %v15290_v38, %s8567_s9  ;;  %15291 = vst [vmem:[#allocation75_spill] sm:$0xff] %v13138_v47  ;;  %8332 = vpow2.f32 %v4946_v45  ;;  %v4701_v12 = vmax.f32 %v4699_v15, %v4700_v34  ;;  %v4713_v58 = vsel %vm4661_vm1, %v13117_v40, -inf  ;;  %v13144_v43 = vmul.f32 0.35355338, %v7755_v50  ;;  %v4397_v4 = vpop.f32.mrb[37].mxu1 }
 0xb9b   :  { %8334 = vpow2.f32 %v4948_v36  ;;  %v4712_v39 = vmax.f32 %v4710_v14, %v4711_v62  ;;  %v13148_v23 = vsel %vm6508_vm3, %v6421_v22, %v6423_v31  ;;  %v13150_v35 = vmul.f32 0.35355338, %v7752_v32 }
 0xb9c   :  { %15292 = vst [vmem:[#allocation96_spill] sm:$0xff] %v13148_v23  ;;  %v4702_v16 = vrot.slane %v4701_v12, 1  ;;  %v4715_v45 = vsel %vm4661_vm1, %v13127_v3, -inf  ;;  %v13154_v15 = vmul.f32 0.35355338, %v4397_v4  ;;  %v13157_v36 = vpop.eup %8320  ;;  %v13163_v61 = vsel %vm4661_vm1, %v13144_v43, -inf }
 0xb9d   :  { %6488 = vrot.lane.b32.xlu1 %v6114_v0, %s8567_s9  ;;  %v5070_v0 = vmul.f32 1.442695, %v5062_v17  ;;  %v4714_v34 = vmax.f32 %v4712_v39, %v4713_v58  ;;  %v13165_v32 = vpop.eup %8322  ;;  %v13169_v38 = vadd.f32 %v12697_v46, %v11930_v19  ;;  %v7758_v17 = vpop.f32.mrb[38].mxu1 }
 0xb9e   :  { %6490 = vrot.lane.b32.xlu0 %v6115_v55, %s8567_s9  ;;  %v5086_v55 = vsel %vm4661_vm1, %v13157_v36, 0.0  ;;  %v4703_v14 = vmax.f32 %v4701_v12, %v4702_v16  ;;  %v13175_v62 = vsel %vm4661_vm1, %v13154_v15, -inf  ;;  %v13177_v22 = vpop.eup %8324  ;;  %v5087_v58 = vsel %vm4661_vm1, %v13165_v32, 0.0  ;;  %v4407_v39 = vpop.f32.mrb[39].mxu1 }
 0xb9f   :  { %15293 = vst [vmem:[#allocation62_spill] sm:$0xff] %v13177_v22  ;;  %v4716_v31 = vmax.f32 %v4714_v34, %v4715_v45  ;;  %v4727_v50 = vmax.f32 %v13175_v62, %v13163_v61  ;;  %v13183_v46 = vmul.f32 0.35355338, %v7758_v17  ;;  %v15294_v12 = vsub.f32 %v12265_v13, %v11944_v25  ;;  %v13189_v4 = vpop.eup %8326 }
 0xba0   :  { %15295 = vst [vmem:[#allocation55_spill] sm:$0xff] %v13189_v4  ;;  %v5088_v16 = vadd.f32 %v5087_v58, %v5086_v55  ;;  %v13192_v29 = vmax.f32 %v4703_v14, %v12998_v10  ;;  %v4717_v45 = vsel %vm4661_vm1, %v13150_v35, -inf  ;;  %v13196_v34 = vmul.f32 0.35355338, %v4407_v39  ;;  %v13202_v62 = vpop.eup %8328 }
 0xba1   :  { %6340 = vrot.lane.b32.xlu1 %v15294_v12, %s8567_s9  ;;  %v15296_v61 = vsub.f32 %v12803_v7, %v11944_v25  ;;  %15297 = vst [vmem:[#allocation91_spill] sm:$0xff] %v13202_v62  ;;  %8336 = vpow2.f32 %v5070_v0  ;;  %v5089_v55 = vsel %vm4661_vm1, %v13177_v22, 0.0  ;;  %v4718_v14 = vmax.f32 %v4716_v31, %v4717_v45  ;;  %v13208_v17 = vpop.eup %8330 }
 0xba2   :  { %15298 = vst [vmem:[#allocation33_spill] sm:$0xff] %v13208_v17  ;;  %v5090_v58 = vadd.f32 %v5089_v55, %v5088_v16  ;;  %v5091_v12 = vsel %vm4661_vm1, %v13189_v4, 0.0  ;;  %v4845_v7 = vrot.slane %v13192_v29, %v15279_v37  ;;  %v13216_v39 = vsel %vm4661_vm1, %v13183_v46, -inf }
 0xba3   :  { %6342 = vrot.lane.b32.xlu0 %v15296_v61, %s8567_s9  ;;  %v7761_v61 = vpop.f32.mrb[40].mxu1  ;;  %v5093_v0 = vsel %vm4661_vm1, %v13202_v62, 0.0  ;;  %v5095_v31 = vsel %vm4661_vm1, %v13208_v17, 0.0  ;;  %v4719_v45 = vrot.slane %v4718_v14, 4  ;;  %v15299_v55 = vsub.f32 %v12376_v11, %v11944_v25 }
 0xba4   :  { %v4417_v13 = vpop.f32.mrb[41].mxu1  ;;  %v13228_v52 = vpop.eup %8332  ;;  %v5092_v5 = vadd.f32 %v5091_v12, %v5090_v58  ;;  %v4878_v23 = vsub.f32 %v12907_v33, %v4845_v7  ;;  %v4879_v47 = vsub.f32 %v12896_v42, %v4845_v7  ;;  %v4728_v56 = vsel %vm4661_vm1, %v13196_v34, -inf }
 0xba5   :  { %6400 = vrot.lane.b32.xlu1 %v15299_v55, %s8567_s9  ;;  %v15300_v16 = vsub.f32 %v12894_v24, %v11944_v25  ;;  %v13238_v60 = vpop.eup %8334  ;;  %v4880_v11 = vsub.f32 %v12942_v48, %v4845_v7  ;;  %v4881_v55 = vsub.f32 %v12940_v28, %v4845_v7  ;;  %v4882_v58 = vsub.f32 %v12975_v59, %v4845_v7  ;;  %v7764_v62 = vpop.f32.mrb[42].mxu1 }
 0xba6   :  { %v13243_v12 = vmul.f32 0.35355338, %v7761_v61  ;;  %v5094_v33 = vadd.f32 %v5093_v0, %v5092_v5  ;;  %v4883_v42 = vsub.f32 %v12973_v1, %v4845_v7  ;;  %v4884_v2 = vsub.f32 %v13012_v6, %v4845_v7  ;;  %v4427_v61 = vpop.f32.mrb[43].mxu1 }
 0xba7   :  { %6402 = vrot.lane.b32.xlu0 %v15300_v16, %s8567_s9  ;;  %v4885_v17 = vsub.f32 %v13010_v26, %v4845_v7  ;;  %v4950_v24 = vmul.f32 1.442695, %v4878_v23  ;;  %v4952_v16 = vmul.f32 1.442695, %v4879_v47  ;;  %v4954_v4 = vmul.f32 1.442695, %v4880_v11 }
 0xba8   :  { %v4720_v22 = vmax.f32 %v4718_v14, %v4719_v45  ;;  %v15301_v48 = vsub.f32 %v12558_v9, %v11944_v25  ;;  %v5096_v59 = vadd.f32 %v5095_v31, %v5094_v33  ;;  %v5097_v28 = vsel %vm4661_vm1, %v13228_v52, 0.0 }
 0xba9   :  { %v5099_v1 = vsel %vm4661_vm1, %v13238_v60, 0.0  ;;  %v4956_v6 = vmul.f32 1.442695, %v4881_v55  ;;  %v15302_v26 = vsub.f32 %v12989_v8, %v11944_v25  ;;  %8338 = vpow2.f32 %v4950_v24  ;;  %v7767_v8 = vpop.f32.mrb[44].mxu1 }
 0xbaa   :  { %6460 = vrot.lane.b32.xlu1 %v15301_v48, %s8567_s9  ;;  %v4958_v47 = vmul.f32 1.442695, %v4882_v58  ;;  %v4960_v5 = vmul.f32 1.442695, %v4883_v42  ;;  %v4962_v23 = vmul.f32 1.442695, %v4884_v2  ;;  %v5098_v14 = vadd.f32 %v5097_v28, %v5096_v59 }
 0xbab   :  { %6462 = vrot.lane.b32.xlu0 %v15302_v26, %s8567_s9  ;;  %8340 = vpow2.f32 %v4952_v16  ;;  %v4721_v9 = vrot.slane %v4720_v22, 2  ;;  %v4729_v7 = vmax.f32 %v4727_v50, %v4728_v56  ;;  %v13260_v0 = vpop.eup %8336  ;;  %v4964_v31 = vmul.f32 1.442695, %v4885_v17  ;;  %v4437_v50 = vpop.f32.mrb[45].mxu1 }
 0xbac   :  { %8342 = vpow2.f32 %v4954_v4  ;;  %v4734_v45 = vsel %vm4661_vm1, %v13243_v12, -inf  ;;  %v13264_v11 = vmul.f32 0.35355338, %v4417_v13  ;;  %v15303_v55 = vsub.f32 %v12111_v21, %v11944_v25 }
 0xbad   :  { %v5100_v2 = vadd.f32 %v5099_v1, %v5098_v14  ;;  %8344 = vpow2.f32 %v4956_v6  ;;  %v4722_v58 = vmax.f32 %v4720_v22, %v4721_v9  ;;  %v4731_v56 = vmax.f32 %v4729_v7, %v13216_v39  ;;  %v7770_v24 = vpop.f32.mrb[46].mxu1 }
 0xbae   :  { %6280 = vrot.lane.b32.xlu1 %v15303_v55, %s8567_s9  ;;  %v15304_v4 = vsub.f32 %v12765_v54, %v11944_v25  ;;  %8346 = vpow2.f32 %v4958_v47  ;;  %v4732_v13 = vsel %vm4661_vm1, %v13264_v11, -inf  ;;  %v13277_v17 = vmul.f32 0.35355338, %v7764_v62  ;;  %v4447_v48 = vpop.f32.mrb[47].mxu1 }
 0xbaf   :  { %v13279_v33 = vmul.f32 0.35355338, %v4427_v61  ;;  %v5101_v21 = vrot.slane %v5100_v2, 4  ;;  %8348 = vpow2.f32 %v4960_v5  ;;  %v4723_v42 = vrot.slane %v4722_v58, 1 }
 0xbb0   :  { %6282 = vrot.lane.b32.xlu0 %v15304_v4, %s8567_s9  ;;  %v4733_v22 = vmax.f32 %v4731_v56, %v4732_v13  ;;  %8350 = vpow2.f32 %v4962_v23  ;;  %v13283_v16 = vmul.f32 0.35355338, %v7767_v8  ;;  %v13285_v54 = vmul.f32 0.35355338, %v4437_v50  ;;  %v15310_v50 = vld [vmem:[#allocation47_spill] sm:$0xff] }
 0xbb1   :  { %v4736_v39 = vsel %vm4661_vm1, %v13279_v33, -inf  ;;  %v15305_v62 = vsub.f32 %v12202_v41, %v11944_v25  ;;  %v5102_v59 = vadd.f32 %v5101_v21, %v5100_v2  ;;  %8352 = vpow2.f32 %v4964_v31  ;;  %v7773_v7 = vpop.f32.mrb[48].mxu1  ;;  %v15308_v31 = vld [vmem:[#allocation111_spill] sm:$0xff] }
 0xbb2   :  { %v4724_v28 = vmax.f32 %v4722_v58, %v4723_v42  ;;  %v4735_v1 = vmax.f32 %v4733_v22, %v4734_v45  ;;  %v15306_v6 = vsub.f32 %v12795_v63, %v11944_v25  ;;  %v13299_v47 = vsel %vm4661_vm1, %v13283_v16, -inf  ;;  %v13327_v56 = vpop.f32.mrb[49].mxu1 }
 0xbb3   :  { %6312 = vrot.lane.b32.xlu1 %v15305_v62, %s8567_s9  ;;  %v13303_v41 = vsel %vm4661_vm1, %v13285_v54, -inf  ;;  %v13305_v5 = vmul.f32 0.35355338, %v7770_v24  ;;  %v5103_v23 = vrot.slane %v5102_v59, 2  ;;  %v13312_v61 = vpop.eup %8338  ;;  %v13316_v45 = vadd.f32 %v15308_v31, %v11930_v19  ;;  %v15314_v24 = vld [vmem:[#allocation42_spill] sm:$0xff] }
 0xbb4   :  { %6314 = vrot.lane.b32.xlu0 %v15306_v6, %s8567_s9  ;;  %v13308_v14 = vmax.f32 %v4724_v28, %v12998_v10  ;;  %v4737_v9 = vmax.f32 %v4735_v1, %v4736_v39  ;;  %15307 = vst [vmem:[#allocation64_spill] sm:$0xff] %v13312_v61  ;;  %v15309_v8 = vsub.f32 %v12998_v10, %v13192_v29  ;;  %v4738_v2 = vsel %vm4661_vm1, %v13277_v17, -inf }
 0xbb5   :  { %v13325_v58 = vmul.f32 0.35355338, %v4447_v48  ;;  %v15311_v4 = vsub.f32 %v15310_v50, %v11944_v25  ;;  %v13333_v13 = vpop.eup %8340  ;;  %v5104_v21 = vadd.f32 %v5103_v23, %v5102_v59  ;;  %v5107_v29 = vsel %vm4661_vm1, %v13312_v61, 0.0  ;;  %v7776_v50 = vpop.f32.mrb[50].mxu1 }
 0xbb6   :  { %v13321_v55 = vmul.f32 1.442695, %v15309_v8  ;;  %15312 = vst [vmem:[#allocation48_spill] sm:$0xff] %v13333_v13  ;;  %v4849_v42 = vrot.slane %v13308_v14, %v15279_v37  ;;  %v13339_v22 = vmul.f32 0.35355338, %v7773_v7  ;;  %v15315_v39 = vsub.f32 %v15314_v24, %v11944_v25  ;;  %v13345_v48 = vpop.eup %8342  ;;  %v4467_v26 = vpop.f32.mrb[51].mxu1 }
 0xbb7   :  { %6372 = vrot.lane.b32.xlu1 %v15311_v4, %s8567_s9  ;;  %15316 = vst [vmem:[#allocation68_spill] sm:$0xff] %v13345_v48  ;;  %v5108_v62 = vsel %vm4661_vm1, %v13333_v13, 0.0  ;;  %v4739_v28 = vmax.f32 %v4737_v9, %v4738_v2  ;;  %v13353_v1 = vsel %vm4661_vm1, %v13305_v5, -inf  ;;  %v13355_v6 = vpop.eup %8344  ;;  %v5105_v23 = vrot.slane %v5104_v21, 1 }
 0xbb8   :  { %15313 = vst [vmem:[#allocation26_spill] sm:$0xff] %v13339_v22  ;;  %6374 = vrot.lane.b32.xlu0 %v15315_v39, %s8567_s9  ;;  %15317 = vst [vmem:[#allocation69_spill] sm:$0xff] %v13355_v6  ;;  %v5109_v7 = vadd.f32 %v5108_v62, %v5107_v29  ;;  %v4886_v31 = vsub.f32 %v13047_v27, %v4849_v42  ;;  %v4749_v8 = vsel %vm4661_vm1, %v13325_v58, -inf  ;;  %v13360_v4 = vpop.eup %8346  ;;  %v5110_v24 = vsel %vm4661_vm1, %v13345_v48, 0.0 }
 0xbb9   :  { %v4887_v9 = vsub.f32 %v13032_v51, %v4849_v42  ;;  %v4888_v2 = vsub.f32 %v13102_v49, %v4849_v42  ;;  %v4889_v39 = vsub.f32 %v13100_v20, %v4849_v42  ;;  %v15318_v27 = vsub.f32 %v15264_v53, %v11944_v25  ;;  %v13371_v29 = vpop.eup %8348  ;;  %v15319_v51 = vld [vmem:[#allocation6_spill] sm:$0xff]  ;;  %v7779_v13 = vpop.f32.mrb[52].mxu1 }
 0xbba   :  { %v5106_v62 = vadd.f32 %v5105_v23, %v5104_v21  ;;  %v5111_v59 = vadd.f32 %v5110_v24, %v5109_v7  ;;  %v4890_v63 = vsub.f32 %v13119_v30, %v4849_v42  ;;  %v13376_v48 = vsel %vm4661_vm1, %v13339_v22, -inf  ;;  %v13382_v49 = vpop.eup %8350 }
 0xbbb   :  { %6432 = vrot.lane.b32.xlu1 %v15318_v27, %s8567_s9  ;;  %v15320_v20 = vsub.f32 %v15319_v51, %v11944_v25  ;;  %v5112_v53 = vsel %vm4661_vm1, %v13355_v6, 0.0  ;;  %v4891_v27 = vsub.f32 %v13117_v40, %v4849_v42  ;;  %v4892_v21 = vsub.f32 %v13127_v3, %v4849_v42  ;;  %v13389_v23 = vpop.eup %8352 }
 0xbbc   :  { %v4893_v30 = vsub.f32 %v13150_v35, %v4849_v42  ;;  %v5254_v7 = vadd.f32 %v13260_v0, %v5106_v62  ;;  %v5113_v24 = vadd.f32 %v5112_v53, %v5111_v59  ;;  %v5114_v51 = vsel %vm4661_vm1, %v13360_v4, 0.0  ;;  %v4477_v59 = vpop.f32.mrb[53].mxu1 }
 0xbbd   :  { %6434 = vrot.lane.b32.xlu0 %v15320_v20, %s8567_s9  ;;  %v4966_v20 = vmul.f32 1.442695, %v4886_v31  ;;  %v5116_v61 = vsel %vm4661_vm1, %v13371_v29, 0.0  ;;  %v4968_v6 = vmul.f32 1.442695, %v4887_v9  ;;  %v4740_v40 = vrot.slane %v4739_v28, 4 }
 0xbbe   :  { %v4970_v22 = vmul.f32 1.442695, %v4888_v2  ;;  %v15321_v3 = vsub.f32 %v12690_v18, %v11944_v25  ;;  %8354 = vrcp.f32 %v5254_v7  ;;  %v5115_v35 = vadd.f32 %v5114_v51, %v5113_v24 }
 0xbbf   :  { %v5118_v0 = vsel %vm4661_vm1, %v13382_v49, 0.0  ;;  %v4972_v42 = vmul.f32 1.442695, %v4889_v39  ;;  %v15322_v31 = vsub.f32 %v13110_v44, %v11944_v25  ;;  %v5120_v9 = vsel %vm4661_vm1, %v13389_v23, 0.0  ;;  %v15324_v44 = vld [vmem:[#allocation14_spill] sm:$0xff] }
 0xbc0   :  { %6492 = vrot.lane.b32.xlu1 %v15321_v3, %s8567_s9  ;;  %8356 = vpow2.f32 %v4966_v20  ;;  %v4974_v2 = vmul.f32 1.442695, %v4890_v63  ;;  %v4976_v62 = vmul.f32 1.442695, %v4891_v27  ;;  %v5117_v18 = vadd.f32 %v5116_v61, %v5115_v35  ;;  %v6479_v27 = vpop.permute.xlu0 %6478 }
 0xbc1   :  { %6494 = vrot.lane.b32.xlu0 %v15322_v31, %s8567_s9  ;;  %8358 = vpow2.f32 %v4968_v6  ;;  %v4978_v53 = vmul.f32 1.442695, %v4892_v21  ;;  %v4741_v7 = vmax.f32 %v4739_v28, %v4740_v40  ;;  %v4980_v24 = vmul.f32 1.442695, %v4893_v30 }
 0xbc2   :  { %8360 = vpow2.f32 %v4970_v22  ;;  %v15323_v39 = vmax.f32 %v13303_v41, %v13299_v47  ;;  %v13412_v3 = vmul.f32 0.35355338, %v13327_v56  ;;  %v15325_v31 = vsub.f32 %v15324_v44, %v11944_v25  ;;  %v15326_v22 = vld [vmem:[#allocation31_spill] sm:$0xff] }
 0xbc3   :  { %v5119_v63 = vadd.f32 %v5118_v0, %v5117_v18  ;;  %8362 = vpow2.f32 %v4972_v42  ;;  %v4742_v61 = vrot.slane %v4741_v7, 2  ;;  %v13418_v6 = vmul.f32 0.35355338, %v4467_v26 }
 0xbc4   :  { %v4750_v51 = vmax.f32 %v15323_v39, %v4749_v8  ;;  %6344 = vrot.lane.b32.xlu1 %v15325_v31, %s8567_s9  ;;  %v15327_v28 = vsub.f32 %v15326_v22, %v11944_v25  ;;  %8364 = vpow2.f32 %v4974_v2  ;;  %v4753_v41 = vsel %vm4661_vm1, %v13412_v3, -inf  ;;  %v6477_v8 = vpop.permute.xlu1 %6476 }
 0xbc5   :  { %v13427_v56 = vmul.f32 0.35355338, %v7776_v50  ;;  %v5121_v21 = vadd.f32 %v5120_v9, %v5119_v63  ;;  %8366 = vpow2.f32 %v4976_v62  ;;  %v4743_v30 = vmax.f32 %v4741_v7, %v4742_v61  ;;  %v15332_v9 = vld [vmem:[#allocation28_spill] sm:$0xff]  ;;  %v7782_v44 = vpop.f32.mrb[54].mxu1 }
 0xbc6   :  { %6346 = vrot.lane.b32.xlu0 %v15327_v28, %s8567_s9  ;;  %v4752_v47 = vmax.f32 %v4750_v51, %v13353_v1  ;;  %v4757_v26 = vsel %vm4661_vm1, %v13418_v6, -inf  ;;  %8368 = vpow2.f32 %v4978_v53  ;;  %v13431_v40 = vmul.f32 0.35355338, %v7779_v13  ;;  %v15330_v1 = vld [vmem:[#allocation16_spill] sm:$0xff]  ;;  %v4487_v28 = vpop.f32.mrb[55].mxu1 }
 0xbc7   :  { %v13433_v35 = vmul.f32 0.35355338, %v4477_v59  ;;  %v15331_v0 = vsub.f32 %v15330_v1, %v11944_v25  ;;  %v5122_v50 = vrot.slane %v5121_v21, 4  ;;  %8370 = vpow2.f32 %v4980_v24 }
 0xbc8   :  { %v4754_v20 = vmax.f32 %v4752_v47, %v4753_v41  ;;  %15328 = vst [vmem:[#allocation65_spill] sm:$0xff] %v13431_v40  ;;  %v4744_v42 = vrot.slane %v4743_v30, 1  ;;  %v15333_v2 = vsub.f32 %v15332_v9, %v11944_v25  ;;  %v13444_v62 = vsel %vm6508_vm3, %v6477_v8, %v6479_v27  ;;  %v8355_v53 = vpop.eup %8354 }
 0xbc9   :  { %15329 = vst [vmem:[#allocation72_spill] sm:$0xff] %v13433_v35  ;;  %6404 = vrot.lane.b32.xlu1 %v15331_v0, %s8567_s9  ;;  %15334 = vst [vmem:[#allocation66_spill] sm:$0xff] %v13444_v62  ;;  %8372 = vpow2.f32 %v13321_v55  ;;  %v13450_v59 = vsel %vm4661_vm1, %v13431_v40, -inf  ;;  %v13454_v18 = vsel %vm4661_vm1, %v13433_v35, -inf  ;;  %v5123_v7 = vadd.f32 %v5122_v50, %v5121_v21  ;;  %v15342_v0 = vld [vmem:[#allocation13_spill] sm:$0xff] }
 0xbca   :  { %6406 = vrot.lane.b32.xlu0 %v15333_v2, %s8567_s9  ;;  %v4756_v13 = vmax.f32 %v4754_v20, %v13376_v48  ;;  %v15335_v24 = vsub.f32 %v12998_v10, %v13308_v14  ;;  %v4745_v51 = vmax.f32 %v4743_v30, %v4744_v42  ;;  %v13461_v48 = vpop.eup %8356  ;;  %v13464_v31 = vrot.slane %v8355_v53, %v15279_v37  ;;  %v15337_v14 = vld [vmem:[#allocation106_spill] sm:$0xff] }
 0xbcb   :  { %v4759_v63 = vsel %vm4661_vm1, %v13427_v56, -inf  ;;  %v13468_v22 = vmul.f32 0.35355338, %v7782_v44  ;;  %v15338_v47 = vsub.f32 %v15337_v14, %v11944_v25  ;;  %v13474_v41 = vpop.eup %8358  ;;  %v5124_v8 = vrot.slane %v5123_v7, 2 }
 0xbcc   :  { %v5074_v39 = vmul.f32 1.442695, %v15335_v24  ;;  %v4758_v61 = vmax.f32 %v4756_v13, %v4757_v26  ;;  %v5128_v27 = vsel %vm4661_vm1, %v13461_v48, 0.0  ;;  %v13479_v21 = vmax.f32 %v4745_v51, %v12998_v10  ;;  %v15340_v26 = vld [vmem:[#allocation15_spill] sm:$0xff]  ;;  %v13487_v1 = vpop.eup %8360 }
 0xbcd   :  { %15336 = vst [vmem:[#allocation98_spill] sm:$0xff] %v13468_v22  ;;  %6464 = vrot.lane.b32.xlu1 %v15338_v47, %s8567_s9  ;;  %v13481_v30 = vmul.f32 0.35355338, %v4487_v28  ;;  %v15341_v20 = vsub.f32 %v15340_v26, %v11944_v25  ;;  %v5129_v42 = vsel %vm4661_vm1, %v13474_v41, 0.0  ;;  %v5310_v2 = vmul.f32 %v13157_v36, %v13464_v31  ;;  %v13495_v13 = vpop.eup %8362 }
 0xbce   :  { %v4760_v9 = vmax.f32 %v4758_v61, %v4759_v63  ;;  %15343 = vst [vmem:[#allocation80_spill] sm:$0xff] %v13495_v13  ;;  %v5125_v53 = vadd.f32 %v5124_v8, %v5123_v7  ;;  %8374 = vpow2.f32 %v5074_v39  ;;  %v5130_v24 = vadd.f32 %v5129_v42, %v5128_v27  ;;  %v13499_v44 = vpop.eup %8364  ;;  %v15345_v7 = vld [vmem:[#allocation19_spill] sm:$0xff] }
 0xbcf   :  { %15339 = vst [vmem:[#allocation77_spill] sm:$0xff] %v13481_v30  ;;  %6466 = vrot.lane.b32.xlu0 %v15341_v20, %s8567_s9  ;;  %v4853_v51 = vrot.slane %v13479_v21, %v15279_v37  ;;  %15344 = vst [vmem:[#allocation82_spill] sm:$0xff] %v13499_v44  ;;  %v5131_v28 = vsel %vm4661_vm1, %v13487_v1, 0.0  ;;  %v5133_v14 = vsel %vm4661_vm1, %v13495_v13, 0.0  ;;  %v13507_v36 = vsel %vm4661_vm1, %v13468_v22, -inf  ;;  %7837 = vmatprep.mubr.msk.f32.mxu1 %vm4661_vm1, %v5310_v2  ;;  %v13514_v61 = vpop.eup %8366  ;;  %v15348_v20 = vld [vmem:[#allocation53_spill] sm:$0xff]  ;;  %v13537_v22 = vpop.permute.xlu0 %6482 }
 0xbd0   :  { %v4761_v63 = vrot.slane %v4760_v9, 4  ;;  %v15346_v39 = vsub.f32 %v15345_v7, %v11944_v25  ;;  %15347 = vst [vmem:[#allocation97_spill] sm:$0xff] %v13514_v61  ;;  %v5126_v47 = vrot.slane %v5125_v53, 1  ;;  %v5132_v8 = vadd.f32 %v5131_v28, %v5130_v24  ;;  %v13523_v2 = vpop.eup %8368 }
 0xbd1   :  { %v4894_v27 = vsub.f32 %v13154_v15, %v4853_v51  ;;  %v4770_v26 = vsel %vm4661_vm1, %v13481_v30, -inf  ;;  %v15349_v42 = vsub.f32 %v15348_v20, %v11944_v25  ;;  %15350 = vst [vmem:[#allocation86_spill] sm:$0xff] %v13523_v2  ;;  %v5135_v7 = vsel %vm4661_vm1, %v13499_v44, 0.0  ;;  %v13530_v15 = vpop.permute.xlu1 %6480  ;;  %v13532_v28 = vpop.eup %8370 }
 0xbd2   :  { %6376 = vrot.lane.b32.xlu1 %v15346_v39, %s8567_s9  ;;  %v4895_v39 = vsub.f32 %v13144_v43, %v4853_v51  ;;  %v4896_v50 = vsub.f32 %v13196_v34, %v4853_v51  ;;  %v4897_v24 = vsub.f32 %v13183_v46, %v4853_v51  ;;  %v5127_v55 = vadd.f32 %v5126_v47, %v5125_v53  ;;  %v15351_v53 = vld [vmem:[#allocation30_spill] sm:$0xff] }
 0xbd3   :  { %6378 = vrot.lane.b32.xlu0 %v15349_v42, %s8567_s9  ;;  %v5134_v62 = vadd.f32 %v5133_v14, %v5132_v8  ;;  %v5137_v20 = vsel %vm4661_vm1, %v13514_v61, 0.0  ;;  %v4898_v42 = vsub.f32 %v13264_v11, %v4853_v51  ;;  %v8373_v30 = vpop.eup %8372  ;;  %v5139_v43 = vsel %vm4661_vm1, %v13523_v2, 0.0  ;;  %v15353_v61 = vld [vmem:[#allocation49_spill] sm:$0xff] }
 0xbd4   :  { %v4899_v34 = vsub.f32 %v13243_v12, %v4853_v51  ;;  %v4900_v46 = vsub.f32 %v13279_v33, %v4853_v51  ;;  %v4901_v40 = vsub.f32 %v13277_v17, %v4853_v51  ;;  %v15352_v14 = vsub.f32 %v15351_v53, %v11944_v25 }
 0xbd5   :  { %v5255_v47 = vadd.f32 %v8373_v30, %v5127_v55  ;;  %v5136_v8 = vadd.f32 %v5135_v7, %v5134_v62  ;;  %v4982_v11 = vmul.f32 1.442695, %v4894_v27  ;;  %v4984_v35 = vmul.f32 1.442695, %v4895_v39  ;;  %v6333_v51 = vpop.permute.xlu1 %6332  ;;  %v6335_v55 = vpop.permute.xlu0 %6334 }
 0xbd6   :  { %6436 = vrot.lane.b32.xlu1 %v15352_v14, %s8567_s9  ;;  %v15354_v44 = vsub.f32 %v15353_v61, %v11944_v25  ;;  %v5141_v12 = vsel %vm4661_vm1, %v13532_v28, 0.0  ;;  %v4986_v33 = vmul.f32 1.442695, %v4896_v50  ;;  %v4988_v2 = vmul.f32 1.442695, %v4897_v24 }
 0xbd7   :  { %v4762_v17 = vmax.f32 %v4760_v9, %v4761_v63  ;;  %8376 = vrcp.f32 %v5255_v47  ;;  %v5138_v13 = vadd.f32 %v5137_v20, %v5136_v8  ;;  %v4990_v53 = vmul.f32 1.442695, %v4898_v42  ;;  %v15362_v8 = vld [vmem:[#allocation22_spill] sm:$0xff] }
 0xbd8   :  { %6438 = vrot.lane.b32.xlu0 %v15354_v44, %s8567_s9  ;;  %v4992_v14 = vmul.f32 1.442695, %v4899_v34  ;;  %8378 = vpow2.f32 %v4982_v11  ;;  %v4994_v62 = vmul.f32 1.442695, %v4900_v46  ;;  %v4996_v30 = vmul.f32 1.442695, %v4901_v40  ;;  %v13558_v61 = vpop.eup %8374 }
 0xbd9   :  { %v4763_v27 = vrot.slane %v4762_v17, 2  ;;  %v15355_v44 = vsub.f32 %v12707_v57, %v11944_v25  ;;  %v5140_v50 = vadd.f32 %v5139_v43, %v5138_v13  ;;  %8380 = vpow2.f32 %v4984_v35  ;;  %v15358_v57 = vld [vmem:[#allocation62_spill] sm:$0xff]  ;;  %v15359_v13 = vld [vmem:[#allocation55_spill] sm:$0xff]  ;;  %v6393_v20 = vpop.permute.xlu1 %6392  ;;  %v7785_v43 = vpop.f32.mrb[56].mxu1 }
 0xbda   :  { %v15356_v9 = vmax.f32 %v13454_v18, %v13450_v59  ;;  %v5311_v7 = vmul.f32 %v13165_v32, %v13464_v31  ;;  %v15357_v40 = vsub.f32 %v13169_v38, %v11944_v25  ;;  %8382 = vpow2.f32 %v4986_v33  ;;  %v15360_v32 = vld [vmem:[#allocation91_spill] sm:$0xff]  ;;  %v15361_v18 = vld [vmem:[#allocation33_spill] sm:$0xff] }
 0xbdb   :  { %6496 = vrot.lane.b32.xlu1 %v15355_v44, %s8567_s9  ;;  %v4764_v39 = vmax.f32 %v4762_v17, %v4763_v27  ;;  %v5312_v24 = vmul.f32 %v15358_v57, %v13464_v31  ;;  %v5313_v35 = vmul.f32 %v15359_v13, %v13464_v31  ;;  %v5142_v42 = vadd.f32 %v5141_v12, %v5140_v50 }
 0xbdc   :  { %v4771_v63 = vmax.f32 %v15356_v9, %v4770_v26  ;;  %6498 = vrot.lane.b32.xlu0 %v15357_v40, %s8567_s9  ;;  %8384 = vpow2.f32 %v4988_v2  ;;  %7838 = vmatmul.mubr.msk.f32.vlgmr.msra.gmra.mrb[76].mxu1 %vm4661_vm1, %v5311_v7  ;;  %v5314_v59 = vmul.f32 %v15360_v32, %v13464_v31  ;;  %v5315_v38 = vmul.f32 %v15361_v18, %v13464_v31  ;;  %v6395_v26 = vpop.permute.xlu0 %6394  ;;  %v4497_v2 = vpop.f32.mrb[57].mxu1 }
 0xbdd   :  { %8386 = vpow2.f32 %v4990_v53  ;;  %v4765_v34 = vrot.slane %v4764_v39, 1  ;;  %7840 = vmatprep.mubr.msk.f32.mxu1 %vm4661_vm1, %v5312_v24  ;;  %v5316_v46 = vmul.f32 %v13228_v52, %v13464_v31  ;;  %v13581_v47 = vmul.f32 0.35355338, %v7785_v43  ;;  %v15364_v53 = vld [vmem:[#allocation20_spill] sm:$0xff]  ;;  %v6453_v9 = vpop.permute.xlu1 %6452 }
 0xbde   :  { %v15363_v11 = vsub.f32 %v15362_v8, %v11944_v25  ;;  %v5143_v12 = vrot.slane %v5142_v42, 4  ;;  %8388 = vpow2.f32 %v4992_v14  ;;  %v13587_v33 = vmul.f32 0.35355338, %v4497_v2 }
 0xbdf   :  { %v4773_v17 = vmax.f32 %v4771_v63, %v13507_v36  ;;  %v15365_v27 = vsub.f32 %v15364_v53, %v11944_v25  ;;  %8390 = vpow2.f32 %v4994_v62  ;;  %v5065_v52 = vsub.f32 %v12998_v10, %v13479_v21 }
 0xbe0   :  { %6408 = vrot.lane.b32.xlu1 %v15363_v11, %s8567_s9  ;;  %v4766_v44 = vmax.f32 %v4764_v39, %v4765_v34  ;;  %v5317_v50 = vmul.f32 %v13238_v60, %v13464_v31  ;;  %v5144_v7 = vadd.f32 %v5143_v12, %v5142_v42  ;;  %8392 = vpow2.f32 %v4996_v30  ;;  %7841 = vmatmul.mubr.msk.f32.gmra.mrb[78].mxu1 %vm4661_vm1, %v5313_v35  ;;  %v6455_v14 = vpop.permute.xlu0 %6454  ;;  %v15366_v60 = vld [vmem:[#allocation112_spill] sm:$0xff] }
 0xbe1   :  { %6410 = vrot.lane.b32.xlu0 %v15365_v27, %s8567_s9  ;;  %v4774_v36 = vsel %vm4661_vm1, %v13587_v33, -inf  ;;  %v13602_v63 = vsel %vm6508_vm3, %v6333_v51, %v6335_v55  ;;  %7843 = vmatprep.mubr.msk.f32.mxu1 %vm4661_vm1, %v5314_v59  ;;  %v15367_v31 = vsub.f32 %v15366_v60, %v11944_v25  ;;  %v13615_v30 = vsel %vm6508_vm3, %v6393_v20, %v6395_v26  ;;  %v8377_v40 = vpop.eup %8376  ;;  %v15370_v20 = vld [vmem:[#allocation115_spill] sm:$0xff]  ;;  %v13645_v59 = vpop.permute.xlu1 %6272  ;;  %v15376_v60 = vld [vmem:[#allocation26_spill] sm:$0xff] }
 0xbe2   :  { %v13605_v62 = vmax.f32 %v4766_v44, %v12998_v10  ;;  %v13608_v21 = vmax.f32 %v4773_v17, %v4774_v36  ;;  %v5145_v39 = vrot.slane %v5144_v7, 2  ;;  %v13619_v51 = vsel %vm4661_vm1, %v13581_v47, -inf  ;;  %v15368_v10 = vld [vmem:[#allocation60_spill] sm:$0xff]  ;;  %v13633_v13 = vpop.eup %8378 }
 0xbe3   :  { %v15369_v55 = vsub.f32 %v15368_v10, %v11944_v25  ;;  %v13626_v57 = vsel %vm6508_vm3, %v6453_v9, %v6455_v14  ;;  %v13631_v24 = vsel %vm6508_vm3, %v13530_v15, %v13537_v22  ;;  %v6121_v35 = vsub.f32 %v13316_v45, %v11944_v25  ;;  %v13649_v22 = vpop.eup %8380  ;;  %v15371_v15 = vld [vmem:[#allocation27_spill] sm:$0xff] }
 0xbe4   :  { %6468 = vrot.lane.b32.xlu1 %v15367_v31, %s8567_s9  ;;  %v13639_v42 = vadd.f32 %v15370_v20, %v11930_v19  ;;  %v13643_v32 = vrot.slane %v13605_v62, %v15279_v37  ;;  %v4777_v18 = vmax.f32 %v13608_v21, %v13619_v51  ;;  %v6122_v26 = vsub.f32 %v15371_v15, %v11944_v25  ;;  %v13659_v34 = vpop.permute.xlu0 %6274  ;;  %v13661_v2 = vpop.eup %8382 }
 0xbe5   :  { %6470 = vrot.lane.b32.xlu0 %v15369_v55, %s8567_s9  ;;  %v13654_v45 = vrot.slane %v8377_v40, %v15279_v37  ;;  %v5146_v43 = vadd.f32 %v5145_v39, %v5144_v7  ;;  %v5149_v19 = vsel %vm4661_vm1, %v13633_v13, 0.0  ;;  %7844 = vmatmul.mubr.msk.f32.gmra.mrb[80].mxu1 %vm4661_vm1, %v5315_v38  ;;  %v5150_v8 = vsel %vm4661_vm1, %v13649_v22, 0.0  ;;  %v15372_v38 = vld [vmem:[#allocation17_spill] sm:$0xff] }
 0xbe6   :  { %v4902_v11 = vsub.f32 %v13285_v54, %v13643_v32  ;;  %v4903_v12 = vsub.f32 %v13283_v16, %v13643_v32  ;;  %v4904_v17 = vsub.f32 %v13325_v58, %v13643_v32  ;;  %7846 = vmatprep.mubr.msk.f32.mxu1 %vm4661_vm1, %v5316_v46  ;;  %v15373_v53 = vsub.f32 %v15372_v38, %v11944_v25  ;;  %v13676_v27 = vpop.eup %8384  ;;  %v15374_v16 = vld [vmem:[#allocation44_spill] sm:$0xff] }
 0xbe7   :  { %v5147_v44 = vrot.slane %v5146_v43, 1  ;;  %v5076_v9 = vmul.f32 1.442695, %v5065_v52  ;;  %v5151_v7 = vadd.f32 %v5150_v8, %v5149_v19  ;;  %v4905_v54 = vsub.f32 %v13305_v5, %v13643_v32  ;;  %v13684_v58 = vpop.eup %8386  ;;  %v13694_v5 = vpop.permute.xlu1 %6304 }
 0xbe8   :  { %6440 = vrot.lane.b32.xlu1 %v15373_v53, %s8567_s9  ;;  %v15375_v36 = vsub.f32 %v15374_v16, %v11944_v25  ;;  %v5152_v46 = vsel %vm4661_vm1, %v13661_v2, 0.0  ;;  %v4906_v14 = vsub.f32 %v13412_v3, %v13643_v32  ;;  %v4907_v52 = vsub.f32 %v15376_v60, %v13643_v32  ;;  %v13696_v40 = vpop.eup %8388  ;;  %v13703_v3 = vpop.permute.xlu0 %6306  ;;  %v15377_v16 = vld [vmem:[#allocation64_spill] sm:$0xff] }
 0xbe9   :  { %v4908_v31 = vsub.f32 %v13418_v6, %v13643_v32  ;;  %v6123_v39 = vsub.f32 %v13639_v42, %v11944_v25  ;;  %v5148_v10 = vadd.f32 %v5147_v44, %v5146_v43  ;;  %v5153_v55 = vadd.f32 %v5152_v46, %v5151_v7  ;;  %7847 = vmatmul.mubr.msk.f32.gmra.mrb[82].mxu1 %vm4661_vm1, %v5317_v50  ;;  %v7788_v19 = vpop.f32.mrb[58].mxu1  ;;  %v13705_v8 = vpop.eup %8390 }
 0xbea   :  { %6442 = vrot.lane.b32.xlu0 %v15375_v36, %s8567_s9  ;;  %v4909_v20 = vsub.f32 %v13427_v56, %v13643_v32  ;;  %v5154_v6 = vsel %vm4661_vm1, %v13676_v27, 0.0  ;;  %v4998_v38 = vmul.f32 1.442695, %v4902_v11  ;;  %v5000_v53 = vmul.f32 1.442695, %v4903_v12  ;;  %v4507_v43 = vpop.f32.mrb[59].mxu1  ;;  %v13715_v50 = vpop.eup %8392 }
 0xbeb   :  { %v5318_v36 = vmul.f32 %v15377_v16, %v13654_v45  ;;  %v15378_v56 = vsub.f32 %v15342_v0, %v11944_v25  ;;  %v5256_v32 = vadd.f32 %v13558_v61, %v5148_v10  ;;  %8394 = vpow2.f32 %v5076_v9  ;;  %v6365_v0 = vpop.permute.xlu1 %6364 }
 0xbec   :  { %v5155_v44 = vadd.f32 %v5154_v6, %v5153_v55  ;;  %v5002_v7 = vmul.f32 1.442695, %v4904_v17  ;;  %v5156_v11 = vsel %vm4661_vm1, %v13684_v58, 0.0  ;;  %v5158_v12 = vsel %vm4661_vm1, %v13696_v40, 0.0  ;;  %v15379_v55 = vld [vmem:[#allocation48_spill] sm:$0xff] }
 0xbed   :  { %6500 = vrot.lane.b32.xlu1 %v15378_v56, %s8567_s9  ;;  %8396 = vpow2.f32 %v4998_v38  ;;  %v5004_v46 = vmul.f32 1.442695, %v4905_v54  ;;  %7849 = vmatprep.mubr.msk.f32.mxu1 %vm4661_vm1, %v5318_v36  ;;  %v5160_v61 = vsel %vm4661_vm1, %v13705_v8, 0.0  ;;  %v5162_v17 = vsel %vm4661_vm1, %v13715_v50, 0.0  ;;  %v15380_v54 = vld [vmem:[#allocation113_spill] sm:$0xff]  ;;  %v15382_v36 = vld [vmem:[#allocation68_spill] sm:$0xff] }
 0xbee   :  { %6502 = vrot.lane.b32.xlu0 %v6121_v35, %s8567_s9  ;;  %8398 = vrcp.f32 %v5256_v32  ;;  %v5157_v60 = vadd.f32 %v5156_v11, %v5155_v44  ;;  %v6367_v35 = vpop.permute.xlu0 %6366  ;;  %v5006_v9 = vmul.f32 1.442695, %v4906_v14  ;;  %v5008_v10 = vmul.f32 1.442695, %v4907_v52  ;;  %v15383_v32 = vld [vmem:[#allocation69_spill] sm:$0xff] }
 0xbef   :  { %8400 = vpow2.f32 %v5000_v53  ;;  %v5319_v6 = vmul.f32 %v15379_v55, %v13654_v45  ;;  %v15381_v38 = vsub.f32 %v15380_v54, %v11944_v25  ;;  %v5320_v56 = vmul.f32 %v15382_v36, %v13654_v45  ;;  %v15384_v53 = vld [vmem:[#allocation61_spill] sm:$0xff] }
 0xbf0   :  { %v5159_v16 = vadd.f32 %v5158_v12, %v5157_v60  ;;  %8402 = vpow2.f32 %v5002_v7  ;;  %v5321_v44 = vmul.f32 %v15383_v32, %v13654_v45  ;;  %v15385_v14 = vsub.f32 %v15384_v53, %v11944_v25  ;;  %v6425_v12 = vpop.permute.xlu1 %6424 }
 0xbf1   :  { %6472 = vrot.lane.b32.xlu1 %v15381_v38, %s8567_s9  ;;  %8404 = vpow2.f32 %v5004_v46  ;;  %7850 = vmatmul.mubr.msk.f32.gmra.mrb[84].mxu1 %vm4661_vm1, %v5319_v6  ;;  %v5322_v52 = vmul.f32 %v13360_v4, %v13654_v45  ;;  %v13745_v11 = vmul.f32 0.35355338, %v7788_v19  ;;  %v13747_v7 = vmul.f32 0.35355338, %v4507_v43  ;;  %v7791_v6 = vpop.f32.mrb[60].mxu1 }
 0xbf2   :  { %6474 = vrot.lane.b32.xlu0 %v15385_v14, %s8567_s9  ;;  %v5161_v60 = vadd.f32 %v5160_v61, %v5159_v16  ;;  %v5010_v55 = vmul.f32 1.442695, %v4908_v31  ;;  %7852 = vmatprep.mubr.msk.f32.mxu1 %vm4661_vm1, %v5320_v56  ;;  %v5323_v54 = vmul.f32 %v13371_v29, %v13654_v45  ;;  %v5324_v46 = vmul.f32 %v13382_v49, %v13654_v45  ;;  %v6427_v38 = vpop.permute.xlu0 %6426  ;;  %v4517_v43 = vpop.f32.mrb[61].mxu1 }
 0xbf3   :  { %8406 = vpow2.f32 %v5006_v9  ;;  %v5012_v36 = vmul.f32 1.442695, %v4909_v20  ;;  %v4778_v4 = vsel %vm4661_vm1, %v13747_v7, -inf  ;;  %v5325_v19 = vmul.f32 %v13389_v23, %v13654_v45 }
 0xbf4   :  { %v5163_v29 = vadd.f32 %v5162_v17, %v5161_v60  ;;  %8408 = vpow2.f32 %v5008_v10  ;;  %v4779_v49 = vmax.f32 %v4777_v18, %v4778_v4  ;;  %v13765_v31 = vmul.f32 0.35355338, %v7791_v6 }
 0xbf5   :  { %6504 = vrot.lane.b32.xlu1 %v6122_v26, %s8567_s9  ;;  %7853 = vmatmul.mubr.msk.f32.gmra.mrb[86].mxu1 %vm4661_vm1, %v5321_v44  ;;  %v4780_v23 = vsel %vm4661_vm1, %v13745_v11, -inf  ;;  %v13774_v15 = vmul.f32 0.35355338, %v4517_v43  ;;  %v6485_v26 = vpop.permute.xlu1 %6484  ;;  %v13779_v21 = vsel %vm6508_vm3, %v13645_v59, %v13659_v34  ;;  %v13784_v51 = vsel %vm6508_vm3, %v13694_v5, %v13703_v3  ;;  %v13786_v25 = vpop.eup %8394 }
 0xbf6   :  { %6506 = vrot.lane.b32.xlu0 %v6123_v39, %s8567_s9  ;;  %v5164_v42 = vrot.slane %v5163_v29, 4  ;;  %8410 = vpow2.f32 %v5010_v55  ;;  %7855 = vmatprep.mubr.msk.f32.mxu1 %vm4661_vm1, %v5322_v52  ;;  %v4781_v18 = vmax.f32 %v4779_v49, %v4780_v23  ;;  %v13791_v45 = vsel %vm4661_vm1, %v13765_v31, -inf  ;;  %v6487_v39 = vpop.permute.xlu0 %6486  ;;  %v15387_v23 = vld [vmem:[#allocation82_spill] sm:$0xff] }
 0xbf7   :  { %v13793_v20 = vpop.eup %8396  ;;  %v13797_v59 = vsel %vm4661_vm1, %v13774_v15, -inf  ;;  %v13800_v34 = vsel %vm6508_vm3, %v6365_v0, %v6367_v35  ;;  %v13803_v5 = vsel %vm6508_vm3, %v6425_v12, %v6427_v38  ;;  %v13806_v3 = vsel %vm6508_vm3, %v6485_v26, %v6487_v39 }
 0xbf8   :  { %v8399_v61 = vpop.eup %8398  ;;  %v5165_v17 = vadd.f32 %v5164_v42, %v5163_v29  ;;  %v5170_v9 = vsel %vm4661_vm1, %v13793_v20, 0.0  ;;  %v4782_v10 = vrot.slane %v4781_v18, 4  ;;  %8412 = vpow2.f32 %v5012_v36 }
 0xbf9   :  { %v13812_v56 = vpop.eup %8400  ;;  %v5289_v0 = vrot.slane %v8399_v61, %v15279_v37  ;;  %7856 = vmatmul.mubr.msk.f32.gmra.mrb[88].mxu1 %vm4661_vm1, %v5323_v54  ;;  %v6337_v35 = vpop.permute.xlu1 %6336 }
 0xbfa   :  { %v13816_v32 = vpop.eup %8402  ;;  %v5166_v44 = vrot.slane %v5165_v17, 2  ;;  %v5171_v53 = vsel %vm4661_vm1, %v13812_v56, 0.0  ;;  %v4783_v14 = vmax.f32 %v4781_v18, %v4782_v10  ;;  %7858 = vmatprep.mubr.msk.f32.mxu1 %vm4661_vm1, %v5324_v46  ;;  %v6339_v52 = vpop.permute.xlu0 %6338  ;;  %v13833_v46 = vld [vmem:[%s14627_s11] sm:$0x1] }
 0xbfb   :  { %v13821_v12 = vpop.eup %8404  ;;  %v5172_v60 = vadd.f32 %v5171_v53, %v5170_v9  ;;  %v5326_v55 = vmul.f32 %v13461_v48, %v5289_v0  ;;  %v5327_v38 = vmul.f32 %v13474_v41, %v5289_v0  ;;  %v5173_v54 = vsel %vm4661_vm1, %v13816_v32, 0.0  ;;  %v15386_v41 = vld [vmem:[#allocation80_spill] sm:$0xff] }
 0xbfc   :  { %v5167_v6 = vadd.f32 %v5166_v44, %v5165_v17  ;;  %v4784_v36 = vrot.slane %v4783_v14, 2  ;;  %v5328_v4 = vmul.f32 %v13487_v1, %v5289_v0  ;;  %v5066_v29 = vsub.f32 %v13833_v46, %v13605_v62  ;;  %v15388_v17 = vld [vmem:[#allocation97_spill] sm:$0xff]  ;;  %v15389_v44 = vld [vmem:[#allocation86_spill] sm:$0xff] }
 0xbfd   :  { %v13828_v43 = vpop.eup %8406  ;;  %v5174_v48 = vadd.f32 %v5173_v54, %v5172_v60  ;;  %7859 = vmatmul.mubr.msk.f32.gmra.mrb[90].mxu1 %vm4661_vm1, %v5325_v19  ;;  %v5329_v49 = vmul.f32 %v15386_v41, %v5289_v0  ;;  %v5330_v26 = vmul.f32 %v15387_v23, %v5289_v0  ;;  %v6397_v42 = vpop.permute.xlu1 %6396  ;;  %v5175_v39 = vsel %vm4661_vm1, %v13821_v12, 0.0 }
 0xbfe   :  { %v13840_v18 = vpop.eup %8408  ;;  %v5168_v1 = vrot.slane %v5167_v6, 1  ;;  %v4785_v61 = vmax.f32 %v4783_v14, %v4784_v36  ;;  %7861 = vmatprep.mubr.msk.f32.mxu1 %vm4661_vm1, %v5326_v55  ;;  %v5331_v9 = vmul.f32 %v15388_v17, %v5289_v0  ;;  %v6399_v62 = vpop.permute.xlu0 %6398  ;;  %v5332_v19 = vmul.f32 %v15389_v44, %v5289_v0 }
 0xbff   :  { %v5176_v10 = vadd.f32 %v5175_v39, %v5174_v48  ;;  %v5333_v53 = vmul.f32 %v13532_v28, %v5289_v0  ;;  %v5177_v41 = vsel %vm4661_vm1, %v13828_v43, 0.0  ;;  %v13853_v16 = vsel %vm6508_vm3, %v6337_v35, %v6339_v52  ;;  %v7794_v39 = vpop.f32.mrb[62].mxu1 }
 0xc00   :  { %v13848_v60 = vpop.eup %8410  ;;  %v5169_v54 = vadd.f32 %v5168_v1, %v5167_v6  ;;  %v4786_v23 = vrot.slane %v4785_v61, 1  ;;  %v13857_v36 = vsel %vm6508_vm3, %v6397_v42, %v6399_v62  ;;  %v5078_v28 = vmul.f32 1.442695, %v5066_v29  ;;  %v4527_v17 = vpop.f32.mrb[63].mxu1 }
 0xc01   :  { %v5178_v14 = vadd.f32 %v5177_v41, %v5176_v10  ;;  %7862 = vmatmul.mubr.msk.f32.gmra.mrb[92].mxu1 %vm4661_vm1, %v5327_v38  ;;  %v6457_v55 = vpop.permute.xlu1 %6456  ;;  %v5179_v0 = vsel %vm4661_vm1, %v13840_v18, 0.0  ;;  %v13873_v42 = vmul.f32 0.35355338, %v4527_v17 }
 0xc02   :  { %v5257_v48 = vadd.f32 %v13786_v25, %v5169_v54  ;;  %v4787_v6 = vmax.f32 %v4785_v61, %v4786_v23  ;;  %7864 = vmatprep.mubr.msk.f32.mxu1 %vm4661_vm1, %v5328_v4  ;;  %v6459_v1 = vpop.permute.xlu0 %6458  ;;  %v13863_v35 = vpop.eup %8412  ;;  %v5181_v25 = vsel %vm4661_vm1, %v13848_v60, 0.0  ;;  %v13883_v23 = vmul.f32 0.35355338, %v7794_v39 }
 0xc03   :  { %v5180_v52 = vadd.f32 %v5179_v0, %v5178_v14  ;;  %v13866_v38 = vsel %vm6508_vm3, %v6457_v55, %v6459_v1  ;;  %v5183_v62 = vsel %vm4661_vm1, %v13863_v35, 0.0  ;;  %v4791_v44 = vsel %vm4661_vm1, %v13873_v42, -inf  ;;  %v15392_v0 = vld [vmem:[#allocation65_spill] sm:$0xff] }
 0xc04   :  { %8414 = vrcp.f32 %v5257_v48  ;;  %v13871_v29 = vmax.f32 %v4787_v6, %v13833_v46  ;;  %v15391_v48 = vld [vmem:[#allocation72_spill] sm:$0xff]  ;;  %v15393_v1 = vld [vmem:[#allocation77_spill] sm:$0xff] }
 0xc05   :  { %v5182_v61 = vadd.f32 %v5181_v25, %v5180_v52  ;;  %7865 = vmatmul.mubr.msk.f32.gmra.mrb[94].mxu1 %vm4661_vm1, %v5329_v49  ;;  %v6277_v4 = vpop.permute.xlu1 %6276  ;;  %8416 = vpow2.f32 %v5078_v28  ;;  %v15390_v49 = vmax.f32 %v13797_v59, %v13791_v45  ;;  %v15394_v52 = vld [vmem:[#allocation98_spill] sm:$0xff] }
 0xc06   :  { %v4861_v10 = vrot.slane %v13871_v29, %v15279_v37  ;;  %7867 = vmatprep.mubr.msk.f32.mxu1 %vm4661_vm1, %v5330_v26  ;;  %v6279_v54 = vpop.permute.xlu0 %6278 }
 0xc07   :  { %v5184_v41 = vadd.f32 %v5183_v62, %v5182_v61  ;;  %v4792_v14 = vmax.f32 %v15390_v49, %v4791_v44  ;;  %v13889_v55 = vsel %vm6508_vm3, %v6277_v4, %v6279_v54 }
 0xc08   :  { %v4910_v28 = vsub.f32 %v15391_v48, %v4861_v10  ;;  %v4911_v6 = vsub.f32 %v15392_v0, %v4861_v10  ;;  %v4912_v26 = vsub.f32 %v15393_v1, %v4861_v10  ;;  %v4913_v17 = vsub.f32 %v15394_v52, %v4861_v10 }
 0xc09   :  { %v5185_v25 = vrot.slane %v5184_v41, 4  ;;  %v4914_v61 = vsub.f32 %v13587_v33, %v4861_v10  ;;  %v4915_v39 = vsub.f32 %v13581_v47, %v4861_v10  ;;  %v4916_v62 = vsub.f32 %v13747_v7, %v4861_v10  ;;  %7868 = vmatmul.mubr.msk.f32.gmra.mrb[96].mxu1 %vm4661_vm1, %v5331_v9  ;;  %v6309_v45 = vpop.permute.xlu1 %6308  ;;  %v7797_v7 = vpop.f32.mrb[64].mxu1 }
 0xc0a   :  { %v4917_v59 = vsub.f32 %v13745_v11, %v4861_v10  ;;  %v5014_v4 = vmul.f32 1.442695, %v4910_v28  ;;  %v5016_v44 = vmul.f32 1.442695, %v4911_v6  ;;  %v5018_v54 = vmul.f32 1.442695, %v4912_v26  ;;  %7870 = vmatprep.mubr.msk.f32.mxu1 %vm4661_vm1, %v5332_v19  ;;  %v6311_v49 = vpop.permute.xlu0 %6310 }
 0xc0b   :  { %v5186_v48 = vadd.f32 %v5185_v25, %v5184_v41  ;;  %v5020_v0 = vmul.f32 1.442695, %v4913_v17  ;;  %v5022_v1 = vmul.f32 1.442695, %v4914_v61  ;;  %v4793_v47 = vsel %vm4661_vm1, %v13883_v23, -inf  ;;  %v4537_v41 = vpop.f32.mrb[65].mxu1 }
 0xc0c   :  { %8418 = vpow2.f32 %v5014_v4  ;;  %v4794_v9 = vmax.f32 %v4792_v14, %v4793_v47  ;;  %v13905_v10 = vsel %vm6508_vm3, %v6309_v45, %v6311_v49  ;;  %v5024_v19 = vmul.f32 1.442695, %v4915_v39 }
 0xc0d   :  { %v5187_v33 = vrot.slane %v5186_v48, 2  ;;  %8420 = vpow2.f32 %v5016_v44  ;;  %7871 = vmatmul.mubr.msk.f32.gmra.mrb[98].mxu1 %vm4661_vm1, %v5333_v53  ;;  %v6369_v11 = vpop.permute.xlu1 %6368  ;;  %v13908_v17 = vmul.f32 0.35355338, %v4537_v41  ;;  %v5026_v61 = vmul.f32 1.442695, %v4916_v62 }
 0xc0e   :  { %v8415_v28 = vpop.eup %8414  ;;  %8422 = vpow2.f32 %v5018_v54  ;;  %v6371_v6 = vpop.permute.xlu0 %6370  ;;  %v13910_v53 = vmul.f32 0.35355338, %v7797_v7  ;;  %v5028_v54 = vmul.f32 1.442695, %v4917_v59 }
 0xc0f   :  { %v5293_v26 = vrot.slane %v8415_v28, %v15279_v37  ;;  %v5188_v52 = vadd.f32 %v5187_v33, %v5186_v48  ;;  %8424 = vpow2.f32 %v5020_v0  ;;  %v8417_v25 = vpop.eup %8416  ;;  %v13913_v14 = vsel %vm6508_vm3, %v6369_v11, %v6371_v6 }
 0xc10   :  { %8426 = vpow2.f32 %v5022_v1  ;;  %v4795_v1 = vsel %vm4661_vm1, %v13908_v17, -inf }
 0xc11   :  { %v5189_v45 = vrot.slane %v5188_v52, 1  ;;  %v5334_v4 = vmul.f32 %v13633_v13, %v5293_v26  ;;  %v5335_v39 = vmul.f32 %v13649_v22, %v5293_v26  ;;  %v6429_v44 = vpop.permute.xlu1 %6428  ;;  %v5336_v49 = vmul.f32 %v13661_v2, %v5293_v26 }
 0xc12   :  { %v5337_v48 = vmul.f32 %v13676_v27, %v5293_v26  ;;  %v5338_v0 = vmul.f32 %v13684_v58, %v5293_v26  ;;  %v6431_v62 = vpop.permute.xlu0 %6430  ;;  %8428 = vpow2.f32 %v5024_v19  ;;  %v5339_v13 = vmul.f32 %v13696_v40, %v5293_v26 }
 0xc13   :  { %v5190_v47 = vadd.f32 %v5189_v45, %v5188_v52  ;;  %7873 = vmatprep.mubr.msk.f32.mxu1 %vm4661_vm1, %v5334_v4  ;;  %v4796_v22 = vmax.f32 %v4794_v9, %v4795_v1  ;;  %v5340_v59 = vmul.f32 %v13705_v8, %v5293_v26  ;;  %v5341_v2 = vmul.f32 %v13715_v50, %v5293_v26  ;;  %v7800_v45 = vpop.f32.mrb[66].mxu1 }
 0xc14   :  { %7874 = vmatmul.mubr.msk.f32.gmra.mrb[100].mxu1 %vm4661_vm1, %v5335_v39  ;;  %8430 = vpow2.f32 %v5026_v61  ;;  %v4797_v58 = vsel %vm4661_vm1, %v13910_v53, -inf  ;;  %v13931_v7 = vsel %vm6508_vm3, %v6429_v44, %v6431_v62  ;;  %v4547_v44 = vpop.f32.mrb[67].mxu1 }
 0xc15   :  { %v5258_v27 = vadd.f32 %v8417_v25, %v5190_v47  ;;  %7876 = vmatprep.mubr.msk.f32.mxu1 %vm4661_vm1, %v5336_v49  ;;  %v6489_v33 = vpop.permute.xlu1 %6488  ;;  %8432 = vpow2.f32 %v5028_v54  ;;  %v4798_v9 = vmax.f32 %v4796_v22, %v4797_v58 }
 0xc16   :  { %v13933_v11 = vpop.eup %8418  ;;  %v6491_v40 = vpop.permute.xlu0 %6490 }
 0xc17   :  { %v13935_v28 = vpop.eup %8420  ;;  %8434 = vrcp.f32 %v5258_v27  ;;  %v5191_v8 = vsel %vm4661_vm1, %v13933_v11, 0.0  ;;  %v13940_v50 = vsel %vm6508_vm3, %v6489_v33, %v6491_v40 }
 0xc18   :  { %v13942_v19 = vpop.eup %8422  ;;  %v5192_v41 = vsel %vm4661_vm1, %v13935_v28, 0.0  ;;  %7877 = vmatmul.mubr.msk.f32.gmra.mrb[102].mxu1 %vm4661_vm1, %v5337_v48  ;;  %v13960_v48 = vmul.f32 0.35355338, %v7800_v45 }
 0xc19   :  { %v13947_v6 = vpop.eup %8424  ;;  %v5193_v26 = vadd.f32 %v5192_v41, %v5191_v8  ;;  %7879 = vmatprep.mubr.msk.f32.mxu1 %vm4661_vm1, %v5338_v0  ;;  %v6341_v52 = vpop.permute.xlu1 %6340  ;;  %v5194_v25 = vsel %vm4661_vm1, %v13942_v19, 0.0  ;;  %v13962_v0 = vmul.f32 0.35355338, %v4547_v44 }
 0xc1a   :  { %v6343_v61 = vpop.permute.xlu0 %6342  ;;  %v13952_v4 = vpop.eup %8426  ;;  %v5196_v49 = vsel %vm4661_vm1, %v13947_v6, 0.0 }
 0xc1b   :  { %v5195_v39 = vadd.f32 %v5194_v25, %v5193_v26  ;;  %v13955_v54 = vsel %vm6508_vm3, %v6341_v52, %v6343_v61  ;;  %v5198_v22 = vsel %vm4661_vm1, %v13952_v4, 0.0  ;;  %v4799_v27 = vsel %vm4661_vm1, %v13962_v0, -inf }
 0xc1c   :  { %7880 = vmatmul.mubr.msk.f32.gmra.mrb[104].mxu1 %vm4661_vm1, %v5339_v13  ;;  %v13964_v62 = vpop.eup %8428  ;;  %v5067_v13 = vsub.f32 %v13833_v46, %v13871_v29  ;;  %v4800_v8 = vmax.f32 %v4798_v9, %v4799_v27  ;;  %v4801_v52 = vsel %vm4661_vm1, %v13960_v48, -inf }
 0xc1d   :  { %v5197_v47 = vadd.f32 %v5196_v49, %v5195_v39  ;;  %7882 = vmatprep.mubr.msk.f32.mxu1 %vm4661_vm1, %v5340_v59  ;;  %v6401_v1 = vpop.permute.xlu1 %6400  ;;  %v5200_v59 = vsel %vm4661_vm1, %v13964_v62, 0.0 }
 0xc1e   :  { %v6403_v58 = vpop.permute.xlu0 %6402  ;;  %v13971_v33 = vpop.eup %8430  ;;  %v4802_v45 = vmax.f32 %v4800_v8, %v4801_v52  ;;  %v5080_v39 = vmul.f32 1.442695, %v5067_v13 }
 0xc1f   :  { %v5199_v40 = vadd.f32 %v5198_v22, %v5197_v47  ;;  %v13976_v41 = vsel %vm6508_vm3, %v6401_v1, %v6403_v58  ;;  %v13978_v26 = vpop.eup %8432  ;;  %v5202_v9 = vsel %vm4661_vm1, %v13971_v33, 0.0 }
 0xc20   :  { %7883 = vmatmul.mubr.msk.f32.gmra.mrb[106].mxu1 %vm4661_vm1, %v5341_v2  ;;  %v5204_v49 = vsel %vm4661_vm1, %v13978_v26, 0.0  ;;  %v4803_v47 = vrot.slane %v4802_v45, 4  ;;  %8436 = vpow2.f32 %v5080_v39 }
 0xc21   :  { %v8435_v25 = vpop.eup %8434  ;;  %v5201_v61 = vadd.f32 %v5200_v59, %v5199_v40 }
 0xc22   :  { %v5297_v29 = vrot.slane %v8435_v25, %v15279_v37  ;;  %v4804_v8 = vmax.f32 %v4802_v45, %v4803_v47 }
 0xc23   :  { %v5203_v44 = vadd.f32 %v5202_v9, %v5201_v61 }
 0xc24   :  { %v5342_v1 = vmul.f32 %v13793_v20, %v5297_v29  ;;  %v5343_v2 = vmul.f32 %v13812_v56, %v5297_v29  ;;  %v5344_v22 = vmul.f32 %v13816_v32, %v5297_v29  ;;  %v5345_v27 = vmul.f32 %v13821_v12, %v5297_v29 }
 0xc25   :  { %v5205_v58 = vadd.f32 %v5204_v49, %v5203_v44  ;;  %v5346_v40 = vmul.f32 %v13828_v43, %v5297_v29  ;;  %v5347_v59 = vmul.f32 %v13840_v18, %v5297_v29  ;;  %v5348_v13 = vmul.f32 %v13848_v60, %v5297_v29 }
 0xc26   :  { %7885 = vmatprep.mubr.msk.f32.mxu1 %vm4661_vm1, %v5342_v1  ;;  %v5349_v52 = vmul.f32 %v13863_v35, %v5297_v29  ;;  %v4805_v20 = vrot.slane %v4804_v8, 2 }
 0xc27   :  { %v5206_v25 = vrot.slane %v5205_v58, 4  ;;  %7886 = vmatmul.mubr.msk.f32.gmra.mrb[108].mxu1 %vm4661_vm1, %v5343_v2 }
 0xc28   :  { %7888 = vmatprep.mubr.msk.f32.mxu1 %vm4661_vm1, %v5344_v22  ;;  %v4806_v32 = vmax.f32 %v4804_v8, %v4805_v20 }
 0xc29   :  { %v5207_v56 = vadd.f32 %v5206_v25, %v5205_v58 }
 0xc2a   :  { %v4807_v43 = vrot.slane %v4806_v32, 1  ;;  %v8437_v9 = vpop.eup %8436 }
 0xc2b   :  { %v5208_v12 = vrot.slane %v5207_v56, 2  ;;  %7889 = vmatmul.mubr.msk.f32.gmra.mrb[110].mxu1 %vm4661_vm1, %v5345_v27 }
 0xc2c   :  { %7891 = vmatprep.mubr.msk.f32.mxu1 %vm4661_vm1, %v5346_v40  ;;  %v4808_v61 = vmax.f32 %v4806_v32, %v4807_v43 }
 0xc2d   :  { %v5209_v18 = vadd.f32 %v5208_v12, %v5207_v56 }
 0xc2e   :  { %v14004_v35 = vmax.f32 %v4808_v61, %v13833_v46 }
 0xc2f   :  { %v5210_v60 = vrot.slane %v5209_v18, 1  ;;  %7892 = vmatmul.mubr.msk.f32.gmra.mrb[112].mxu1 %vm4661_vm1, %v5347_v59 }
 0xc30   :  { %7894 = vmatprep.mubr.msk.f32.mxu1 %vm4661_vm1, %v5348_v13  ;;  %v4865_v29 = vrot.slane %v14004_v35, %v15279_v37 }
 0xc31   :  { %v5211_v45 = vadd.f32 %v5210_v60, %v5209_v18 }
 0xc32   :  { %v4918_v44 = vsub.f32 %v13774_v15, %v4865_v29  ;;  %v4919_v49 = vsub.f32 %v13765_v31, %v4865_v29  ;;  %v4920_v47 = vsub.f32 %v13873_v42, %v4865_v29  ;;  %v4921_v1 = vsub.f32 %v13883_v23, %v4865_v29  ;;  %v7803_v42 = vpop.f32.mrb[68].mxu1  ;;  %v6895_v23 = vld [vmem:[%s14630_s14] sm:$0xff] }
 0xc33   :  { %v5259_v39 = vadd.f32 %v8437_v9, %v5211_v45  ;;  %7895 = vmatmul.mubr.msk.f32.gmra.mrb[114].mxu1 %vm4661_vm1, %v5349_v52  ;;  %v4922_v2 = vsub.f32 %v13908_v17, %v4865_v29  ;;  %v4923_v22 = vsub.f32 %v13910_v53, %v4865_v29  ;;  %v4924_v27 = vsub.f32 %v13962_v0, %v4865_v29  ;;  %v6896_v17 = vld [vmem:[%s14630_s14 + $0x8] sm:$0xff] }
 0xc34   :  { %v4925_v58 = vsub.f32 %v13960_v48, %v4865_v29  ;;  %v5030_v40 = vmul.f32 1.442695, %v4918_v44  ;;  %v5032_v8 = vmul.f32 1.442695, %v4919_v49  ;;  %v5034_v15 = vmul.f32 1.442695, %v4920_v47 }
 0xc35   :  { %8438 = vrcp.f32 %v5259_v39  ;;  %v5036_v59 = vmul.f32 1.442695, %v4921_v1  ;;  %v5038_v31 = vmul.f32 1.442695, %v4922_v2  ;;  %v14025_v53 = vmul.f32 0.35355338, %v7803_v42 }
 0xc36   :  { %8440 = vpow2.f32 %v5030_v40  ;;  %v4557_v48 = vpop.f32.mrb[69].mxu1  ;;  %v8568_v0 = vmov 0.0|0.0   ;;  %v8045_v13 = vpack.c.bf16 %v6896_v17, %v6895_v23  ;;  %v5040_v52 = vmul.f32 1.442695, %v4923_v22 }
 0xc37   :  { %8442 = vpow2.f32 %v5032_v8  ;;  %8044 = vmatprep.subr.bf16.mxu0 %v8568_v0  ;;  %v14028_v25 = vmul.f32 0.35355338, %v4557_v48  ;;  %v7806_v20 = vpop.f32.mrb[70].mxu1  ;;  %v5042_v56 = vmul.f32 1.442695, %v4924_v27  ;;  %v4810_v32 = vsel %vm4661_vm1, %v14025_v53, -inf }
 0xc38   :  { %8444 = vpow2.f32 %v5034_v15  ;;  %v4567_v12 = vpop.f32.mrb[71].mxu1  ;;  %8046 = vmatpush3.bf16.msra.mxu0 %v8045_v13  ;;  %v14034_v18 = vmul.f32 0.35355338, %v7806_v20  ;;  %v5044_v60 = vmul.f32 1.442695, %v4925_v58 }
 0xc39   :  { %8446 = vpow2.f32 %v5036_v59  ;;  %v4809_v43 = vsel %vm4661_vm1, %v14028_v25, -inf  ;;  %v14036_v61 = vmul.f32 0.35355338, %v4567_v12  ;;  %8047 = vmatprep.subr.bf16.mxu0 %v8568_v0  ;;  %v7809_v9 = vpop.f32.mrb[72].mxu1 }
 0xc3a   :  { %8448 = vpow2.f32 %v5038_v31  ;;  %v4811_v45 = vmax.f32 %v4809_v43, %v4810_v32  ;;  %v4577_v49 = vpop.f32.mrb[73].mxu1  ;;  %v4814_v1 = vsel %vm4661_vm1, %v14034_v18, -inf  ;;  %v14044_v2 = vmul.f32 0.35355338, %v7809_v9 }
 0xc3b   :  { %8450 = vpow2.f32 %v5040_v52  ;;  %v4812_v29 = vsel %vm4661_vm1, %v14036_v61, -inf  ;;  %v14046_v22 = vmul.f32 0.35355338, %v4577_v49 }
 0xc3c   :  { %8452 = vpow2.f32 %v5042_v56  ;;  %v4813_v44 = vmax.f32 %v4811_v45, %v4812_v29 }
 0xc3d   :  { %8454 = vpow2.f32 %v5044_v60  ;;  %v4816_v59 = vsel %vm4661_vm1, %v14046_v22, -inf  ;;  %v7812_v45 = vpop.f32.mrb[74].mxu1 }
 0xc3e   :  { %v4815_v58 = vmax.f32 %v4813_v44, %v4814_v1 }
 0xc3f   :  { %v8439_v39 = vpop.eup %8438 }
 0xc40   :  { %v5301_v47 = vrot.slane %v8439_v39, %v15279_v37  ;;  %v14048_v27 = vpop.eup %8440  ;;  %v4817_v17 = vmax.f32 %v4815_v58, %v4816_v59  ;;  %v14083_v39 = vmul.f32 0.35355338, %v7812_v45  ;;  %v5068_v58 = vsub.f32 %v13833_v46, %v14004_v35 }
 0xc41   :  { %v14050_v40 = vpop.eup %8442  ;;  %v5212_v8 = vsel %vm4661_vm1, %v14048_v27, 0.0 }
 0xc42   :  { %v5350_v15 = vmul.f32 %v13933_v11, %v5301_v47  ;;  %v5351_v31 = vmul.f32 %v13935_v28, %v5301_v47  ;;  %v14058_v42 = vpop.eup %8444  ;;  %v5213_v23 = vsel %vm4661_vm1, %v14050_v40, 0.0  ;;  %v5352_v48 = vmul.f32 %v13942_v19, %v5301_v47 }
 0xc43   :  { %v5353_v13 = vmul.f32 %v13947_v6, %v5301_v47  ;;  %v14064_v52 = vpop.eup %8446  ;;  %v5214_v20 = vadd.f32 %v5213_v23, %v5212_v8  ;;  %v4818_v11 = vsel %vm4661_vm1, %v14044_v2, -inf  ;;  %v5354_v28 = vmul.f32 %v13952_v4, %v5301_v47 }
 0xc44   :  { %7897 = vmatprep.mubr.msk.f32.mxu1 %vm4661_vm1, %v5350_v15  ;;  %v5355_v56 = vmul.f32 %v13964_v62, %v5301_v47  ;;  %v5215_v32 = vsel %vm4661_vm1, %v14058_v42, 0.0  ;;  %v4819_v19 = vmax.f32 %v4817_v17, %v4818_v11  ;;  %v5356_v6 = vmul.f32 %v13971_v33, %v5301_v47  ;;  %v14076_v43 = vpop.eup %8448  ;;  %v4587_v62 = vpop.f32.mrb[75].mxu1 }
 0xc45   :  { %7898 = vmatmul.mubr.msk.f32.gmra.mrb[116].mxu1 %vm4661_vm1, %v5351_v31  ;;  %v5357_v12 = vmul.f32 %v13978_v26, %v5301_v47  ;;  %v5216_v60 = vadd.f32 %v5215_v32, %v5214_v20  ;;  %v5217_v4 = vsel %vm4661_vm1, %v14064_v52, 0.0  ;;  %v14081_v29 = vpop.eup %8450  ;;  %v4658_v44 = vmul.f32 0.35355338, %v4587_v62 }
 0xc46   :  { %7900 = vmatprep.mubr.msk.f32.mxu1 %vm4661_vm1, %v5352_v48  ;;  %v14085_v49 = vpop.eup %8452  ;;  %v5219_v33 = vsel %vm4661_vm1, %v14076_v43, 0.0  ;;  %v5221_v8 = vsel %vm4661_vm1, %v14081_v29, 0.0  ;;  %v4822_v31 = vsel %vm4661_vm1, %v14083_v39, -inf }
 0xc47   :  { %v5218_v9 = vadd.f32 %v5217_v4, %v5216_v60  ;;  %v4820_v47 = vsel %vm4661_vm1, %v4658_v44, -inf  ;;  %v14092_v1 = vpop.eup %8454  ;;  %v5223_v23 = vsel %vm4661_vm1, %v14085_v49, 0.0 }
 0xc48   :  { %v4821_v15 = vmax.f32 %v4819_v19, %v4820_v47  ;;  %v5225_v35 = vsel %vm4661_vm1, %v14092_v1, 0.0 }
 0xc49   :  { %7901 = vmatmul.mubr.msk.f32.gmra.mrb[118].mxu1 %vm4661_vm1, %v5353_v13  ;;  %v5220_v26 = vadd.f32 %v5219_v33, %v5218_v9  ;;  %v5082_v13 = vmul.f32 1.442695, %v5068_v58 }
 0xc4a   :  { %7903 = vmatprep.mubr.msk.f32.mxu1 %vm4661_vm1, %v5354_v28  ;;  %v4823_v17 = vmax.f32 %v4821_v15, %v4822_v31 }
 0xc4b   :  { %v5222_v59 = vadd.f32 %v5221_v8, %v5220_v26  ;;  %8456 = vpow2.f32 %v5082_v13 }
 0xc4c   :  { %v4824_v20 = vrot.slane %v4823_v17, 4 }
 0xc4d   :  { %7904 = vmatmul.mubr.msk.f32.gmra.mrb[120].mxu1 %vm4661_vm1, %v5355_v56  ;;  %v5224_v48 = vadd.f32 %v5223_v23, %v5222_v59 }
 0xc4e   :  { %7906 = vmatprep.mubr.msk.f32.mxu1 %vm4661_vm1, %v5356_v6  ;;  %v4825_v28 = vmax.f32 %v4823_v17, %v4824_v20 }
 0xc4f   :  { %v5226_v11 = vadd.f32 %v5225_v35, %v5224_v48 }
 0xc50   :  { %v4826_v19 = vrot.slane %v4825_v28, 2 }
 0xc51   :  { %7907 = vmatmul.mubr.msk.f32.gmra.mrb[122].mxu1 %vm4661_vm1, %v5357_v12  ;;  %v5227_v32 = vrot.slane %v5226_v11, 4 }
 0xc52   :  { %v4827_v45 = vmax.f32 %v4825_v28, %v4826_v19 }
 0xc53   :  { %v5228_v60 = vadd.f32 %v5227_v32, %v5226_v11 }
 0xc54   :  { %v4828_v62 = vrot.slane %v4827_v45, 1 }
 0xc55   :  { %v5229_v4 = vrot.slane %v5228_v60, 2  ;;  %v8457_v47 = vpop.eup %8456 }
 0xc56   :  { %v4829_v9 = vmax.f32 %v4827_v45, %v4828_v62 }
 0xc57   :  { %v5230_v56 = vadd.f32 %v5229_v4, %v5228_v60 }
 0xc58   :  { %v14108_v6 = vmax.f32 %v4829_v9, %v13833_v46 }
 0xc59   :  { %v5231_v33 = vrot.slane %v5230_v56, 1 }
 0xc5a   :  { %v4869_v58 = vrot.slane %v14108_v6, %v15279_v37 }
 0xc5b   :  { %v5232_v26 = vadd.f32 %v5231_v33, %v5230_v56 }
 0xc5c   :  { %v4926_v12 = vsub.f32 %v14028_v25, %v4869_v58  ;;  %v4927_v15 = vsub.f32 %v14025_v53, %v4869_v58  ;;  %v4928_v59 = vsub.f32 %v14036_v61, %v4869_v58  ;;  %v4929_v31 = vsub.f32 %v14034_v18, %v4869_v58  ;;  %v6897_v53 = vld [vmem:[%s14630_s14 + $0x10] sm:$0xff]  ;;  %v6898_v18 = vld [vmem:[%s14630_s14 + $0x18] sm:$0xff] }
 0xc5d   :  { %v5260_v8 = vadd.f32 %v8457_v47, %v5232_v26  ;;  %v4930_v23 = vsub.f32 %v14046_v22, %v4869_v58  ;;  %v4931_v17 = vsub.f32 %v14044_v2, %v4869_v58  ;;  %v4932_v48 = vsub.f32 %v4658_v44, %v4869_v58 }
 0xc5e   :  { %v4933_v13 = vsub.f32 %v14083_v39, %v4869_v58  ;;  %v5046_v35 = vmul.f32 1.442695, %v4926_v12  ;;  %v5048_v20 = vmul.f32 1.442695, %v4927_v15  ;;  %v5050_v11 = vmul.f32 1.442695, %v4928_v59 }
 0xc5f   :  { %8458 = vrcp.f32 %v5260_v8  ;;  %v5052_v28 = vmul.f32 1.442695, %v4929_v31  ;;  %v5054_v25 = vmul.f32 1.442695, %v4930_v23  ;;  %v5056_v61 = vmul.f32 1.442695, %v4931_v17 }
 0xc60   :  { %8460 = vpow2.f32 %v5046_v35  ;;  %v8048_v2 = vpack.c.bf16 %v6898_v18, %v6897_v53  ;;  %v5058_v22 = vmul.f32 1.442695, %v4932_v48  ;;  %v5060_v39 = vmul.f32 1.442695, %v4933_v13 }
 0xc61   :  { %8462 = vpow2.f32 %v5048_v20  ;;  %v5069_v17 = vsub.f32 %v13833_v46, %v14108_v6 }
 0xc62   :  { %8464 = vpow2.f32 %v5050_v11  ;;  %8049 = vmatpush3.bf16.msra.mxu0 %v8048_v2 }
 0xc63   :  { %8466 = vpow2.f32 %v5052_v28  ;;  %8050 = vmatprep.subr.bf16.mxu0 %v8568_v0  ;;  %v5084_v11 = vmul.f32 1.442695, %v5069_v17  ;;  %v14183_v17 = vpop.permute.xlu1 %6460 }
 0xc64   :  { %8468 = vpow2.f32 %v5054_v25 }
 0xc65   :  { %8470 = vpow2.f32 %v5056_v61 }
 0xc66   :  { %8472 = vpow2.f32 %v5058_v22 }
 0xc67   :  { %8474 = vpow2.f32 %v5060_v39 }
 0xc68   :  { %8476 = vpow2.f32 %v5084_v11 }
 0xc69   :  { %v8459_v44 = vpop.eup %8458 }
 0xc6a   :  { %v5305_v32 = vrot.slane %v8459_v44, %v15279_v37  ;;  %v8461_v19 = vpop.eup %8460 }
 0xc6b   :  { %v8463_v56 = vpop.eup %8462  ;;  %v5233_v9 = vsel %vm4661_vm1, %v8461_v19, 0.0 }
 0xc6c   :  { %v5358_v60 = vmul.f32 %v14048_v27, %v5305_v32  ;;  %v5359_v45 = vmul.f32 %v14050_v40, %v5305_v32  ;;  %v5360_v4 = vmul.f32 %v14058_v42, %v5305_v32  ;;  %v5361_v62 = vmul.f32 %v14064_v52, %v5305_v32  ;;  %v8465_v58 = vpop.eup %8464 }
 0xc6d   :  { %v5362_v33 = vmul.f32 %v14076_v43, %v5305_v32  ;;  %v5363_v26 = vmul.f32 %v14081_v29, %v5305_v32  ;;  %v5364_v47 = vmul.f32 %v14085_v49, %v5305_v32  ;;  %v5234_v8 = vsel %vm4661_vm1, %v8463_v56, 0.0  ;;  %v8467_v40 = vpop.eup %8466 }
 0xc6e   :  { %7909 = vmatprep.mubr.msk.f32.mxu1 %vm4661_vm1, %v5358_v60  ;;  %v5365_v27 = vmul.f32 %v14092_v1, %v5305_v32  ;;  %v5235_v42 = vadd.f32 %v5234_v8, %v5233_v9  ;;  %v5236_v52 = vsel %vm4661_vm1, %v8465_v58, 0.0  ;;  %v8469_v43 = vpop.eup %8468  ;;  %v5238_v29 = vsel %vm4661_vm1, %v8467_v40, 0.0  ;;  %v6899_v8 = vld [vmem:[%s14630_s14 + $0x20] sm:$0xff] }
 0xc6f   :  { %7910 = vmatmul.mubr.msk.f32.gmra.mrb[124].mxu1 %vm4661_vm1, %v5359_v45  ;;  %v8471_v49 = vpop.eup %8470  ;;  %v5240_v31 = vsel %vm4661_vm1, %v8469_v43, 0.0 }
 0xc70   :  { %7912 = vmatprep.mubr.msk.f32.mxu1 %vm4661_vm1, %v5360_v4  ;;  %v5237_v12 = vadd.f32 %v5236_v52, %v5235_v42  ;;  %v8473_v59 = vpop.eup %8472  ;;  %v5242_v48 = vsel %vm4661_vm1, %v8471_v49, 0.0  ;;  %v15395_v42 = vmov 0.0  }
 0xc71   :  { %v8475_v1 = vpop.eup %8474  ;;  %v5244_v35 = vsel %vm4661_vm1, %v8473_v59, 0.0  ;;  %7957 = vmatprep.mubr.msk.f32.mxu0 %vm8569_vm7, %v15395_v42 }
 0xc72   :  { %v5239_v15 = vadd.f32 %v5238_v29, %v5237_v12  ;;  %v5246_v28 = vsel %vm4661_vm1, %v8475_v1, 0.0  ;;  %v8477_v22 = vpop.eup %8476  ;;  %v15397_v12 = vld [vmem:[#allocation37_spill] sm:$0xff] }
 0xc73   :  { %7913 = vmatmul.mubr.msk.f32.gmra.mrb[126].mxu1 %vm4661_vm1, %v5361_v62 }
 0xc74   :  { %7915 = vmatprep.mubr.msk.f32.mxu1 %vm4661_vm1, %v5362_v33  ;;  %v5241_v23 = vadd.f32 %v5240_v31, %v5239_v15  ;;  %v15399_v31 = vld [vmem:[#allocation35_spill] sm:$0xff] }
 0xc76   :  { %v5243_v13 = vadd.f32 %v5242_v48, %v5241_v23 }
 0xc77   :  { %7916 = vmatmul.mubr.msk.f32.gmra.mrb[128].mxu1 %vm4661_vm1, %v5363_v26 }
 0xc78   :  { %7918 = vmatprep.mubr.msk.f32.mxu1 %vm4661_vm1, %v5364_v47  ;;  %v5245_v20 = vadd.f32 %v5244_v35, %v5243_v13  ;;  %v14186_v13 = vpop.permute.xlu0 %6462 }
 0xc7a   :  { %v5247_v25 = vadd.f32 %v5246_v28, %v5245_v20  ;;  %v15400_v28 = vld [vmem:[#allocation39_spill] sm:$0xff] }
 0xc7b   :  { %7919 = vmatmul.mubr.msk.f32.gmra.mrb[130].mxu1 %vm4661_vm1, %v5365_v27  ;;  %v6900_v27 = vld [vmem:[%s14630_s14 + $0x28] sm:$0xff] }
 0xc7c   :  { %v5248_v53 = vrot.slane %v5247_v25, 4 }
 0xc7e   :  { %v5249_v18 = vadd.f32 %v5248_v53, %v5247_v25  ;;  %v15401_v25 = vld [vmem:[#allocation45_spill] sm:$0xff] }
 0xc7f   :  { %v6512_v53 = vsel %vm6508_vm3, %v15401_v25, %v15400_v28  ;;  %v15408_v28 = vld [vmem:[#allocation51_spill] sm:$0xff] }
 0xc80   :  { %v5250_v46 = vrot.slane %v5249_v18, 2 }
 0xc82   :  { %v5251_v6 = vadd.f32 %v5250_v46, %v5249_v18  ;;  %v15402_v46 = vld [vmem:[#allocation9_spill] sm:$0xff] }
 0xc84   :  { %v5252_v61 = vrot.slane %v5251_v6, 1 }
 0xc86   :  { %v5253_v2 = vadd.f32 %v5252_v61, %v5251_v6  ;;  %v15403_v6 = vld [vmem:[#allocation21_spill] sm:$0xff] }
 0xc87   :  { %v6511_v61 = vsel %vm6508_vm3, %v15403_v6, %v15402_v46 }
 0xc88   :  { %v5261_v39 = vadd.f32 %v8477_v22, %v5253_v2 }
 0xc8a   :  { %8478 = vrcp.f32 %v5261_v39 }
 0xc94   :  { %v8479_v44 = vpop.eup %8478 }
 0xc95   :  { %v5309_v32 = vrot.slane %v8479_v44, %v15279_v37 }
 0xc97   :  { %v5366_v60 = vmul.f32 %v8461_v19, %v5309_v32  ;;  %v5367_v45 = vmul.f32 %v8463_v56, %v5309_v32  ;;  %v5368_v4 = vmul.f32 %v8465_v58, %v5309_v32  ;;  %v5369_v62 = vmul.f32 %v8467_v40, %v5309_v32  ;;  %v6901_v56 = vld [vmem:[%s14630_s14 + $0x30] sm:$0xff]  ;;  %v6902_v58 = vld [vmem:[%s14630_s14 + $0x38] sm:$0xff] }
 0xc98   :  { %v5370_v9 = vmul.f32 %v8469_v43, %v5309_v32  ;;  %v5371_v33 = vmul.f32 %v8471_v49, %v5309_v32  ;;  %v5372_v26 = vmul.f32 %v8473_v59, %v5309_v32  ;;  %v5373_v47 = vmul.f32 %v8475_v1, %v5309_v32  ;;  %v15396_v43 = vld [vmem:[#allocation8_spill] sm:$0xff] }
 0xc99   :  { %7921 = vmatprep.mubr.msk.f32.mxu1 %vm4661_vm1, %v5366_v60  ;;  %v8051_v19 = vpack.c.bf16 %v6900_v27, %v6899_v8  ;;  %v8054_v40 = vpack.c.bf16 %v6902_v58, %v6901_v56  ;;  %v6510_v29 = vsel %vm6508_vm3, %v15397_v12, %v15396_v43  ;;  %v15398_v59 = vld [vmem:[#allocation24_spill] sm:$0xff] }
 0xc9a   :  { %7922 = vmatmul.mubr.msk.f32.gmra.mrb[132].mxu1 %vm4661_vm1, %v5367_v45  ;;  %v6509_v1 = vsel %vm6508_vm3, %v15399_v31, %v15398_v59  ;;  %v15405_v31 = vld [vmem:[#allocation40_spill] sm:$0xff] }
 0xc9b   :  { %7924 = vmatprep.mubr.msk.f32.mxu1 %vm4661_vm1, %v5368_v4  ;;  %8052 = vmatpush3.bf16.msra.mxu0 %v8051_v19  ;;  %v6281_v4 = vpop.permute.xlu1 %6280 }
 0xc9c   :  { %8053 = vmatprep.subr.bf16.mxu0 %v8568_v0 }
 0xc9e   :  { %7925 = vmatmul.mubr.msk.f32.gmra.mrb[134].mxu1 %vm4661_vm1, %v5369_v62  ;;  %v6283_v62 = vpop.permute.xlu0 %6282 }
 0xc9f   :  { %7927 = vmatprep.mubr.msk.f32.mxu1 %vm4661_vm1, %v5370_v9  ;;  %8055 = vmatpush3.bf16.msra.mxu0 %v8054_v40  ;;  %v6516_v56 = vsel %vm6508_vm3, %v6281_v4, %v6283_v62  ;;  %v15412_v4 = vld [vmem:[#allocation56_spill] sm:$0xff] }
 0xca0   :  { %8056 = vmatprep.subr.bf16.mxu0 %v8568_v0 }
 0xca2   :  { %7928 = vmatmul.mubr.msk.f32.gmra.mrb[136].mxu1 %vm4661_vm1, %v5371_v33  ;;  %v15404_v33 = vld [vmem:[#allocation43_spill] sm:$0xff] }
 0xca3   :  { %7930 = vmatprep.mubr.msk.f32.mxu1 %vm4661_vm1, %v5372_v26 }
 0xca6   :  { %7931 = vmatmul.mubr.msk.f32.gmra.mrb[138].mxu1 %vm4661_vm1, %v5373_v47 }
 0xca7   :  { %7126 = vmatprep.mubr.f32.mxu1 %v15395_v42 }
 0xcaf   :  { %v7839_v52 = vpop.f32.mrb[76].mxu1 }
 0xcb0   :  { %v6638_v49 = vmul.f32 %v7839_v52, %v6510_v29  ;;  %v5668_v15 = vpop.f32.mrb[77].mxu1 }
 0xcb1   :  { %v6637_v23 = vmul.f32 %v6509_v1, %v5668_v15  ;;  %v15406_v1 = vld [vmem:[#allocation46_spill] sm:$0xff] }
 0xcb2   :  { %v6702_v48 = vsel %vm2285_vm0, %v6638_v49, 0.0 }
 0xcb3   :  { %v6701_v35 = vsel %vm2285_vm0, %v6637_v23, 0.0  ;;  %v7842_v20 = vpop.f32.mrb[78].mxu1  ;;  %v6518_v23 = vsel %vm6508_vm3, %v15406_v1, %v15405_v31 }
 0xcb4   :  { %v6703_v11 = vadd.f32 %v6702_v48, %v6701_v35  ;;  %v5678_v18 = vpop.f32.mrb[79].mxu1  ;;  %v6640_v2 = vmul.f32 %v7842_v20, %v6512_v53  ;;  %v6313_v48 = vpop.permute.xlu1 %6312 }
 0xcb5   :  { %v6639_v22 = vmul.f32 %v6511_v61, %v5678_v18  ;;  %v6903_v61 = vld [vmem:[%s14630_s14 + $0x40] sm:$0xff] }
 0xcb6   :  { %v6706_v9 = vsel %vm2285_vm0, %v6640_v2, 0.0  ;;  %v6904_v2 = vld [vmem:[%s14630_s14 + $0x48] sm:$0xff] }
 0xcb7   :  { %v6704_v39 = vsel %vm2285_vm0, %v6639_v22, 0.0 }
 0xcb8   :  { %v7845_v44 = vpop.f32.mrb[80].mxu1  ;;  %v6705_v32 = vadd.f32 %v6704_v39, %v6703_v11  ;;  %v15407_v11 = vld [vmem:[#allocation36_spill] sm:$0xff]  ;;  %v15409_v39 = vld [vmem:[#allocation93_spill] sm:$0xff] }
 0xcb9   :  { %v6642_v60 = vmul.f32 %v7845_v44, %v13779_v21  ;;  %v5688_v45 = vpop.f32.mrb[81].mxu1  ;;  %v6517_v25 = vsel %vm6508_vm3, %v15408_v28, %v15407_v11  ;;  %v15410_v44 = vld [vmem:[#allocation107_spill] sm:$0xff] }
 0xcba   :  { %v6641_v26 = vmul.f32 %v15404_v33, %v5688_v45  ;;  %v6707_v47 = vadd.f32 %v6706_v9, %v6705_v32  ;;  %v6520_v32 = vsel %vm6508_vm3, %v15410_v44, %v15409_v39  ;;  %v15411_v45 = vld [vmem:[#allocation12_spill] sm:$0xff]  ;;  %v8057_v9 = vpack.c.bf16 %v6904_v2, %v6903_v61  ;;  %v15415_v61 = vld [vmem:[#allocation23_spill] sm:$0xff]  ;;  %v15417_v44 = vld [vmem:[#allocation74_spill] sm:$0xff] }
 0xcbb   :  { %v6710_v40 = vsel %vm2285_vm0, %v6642_v60, 0.0  ;;  %v6519_v62 = vsel %vm6508_vm3, %v15412_v4, %v15411_v45 }
 0xcbc   :  { %v6708_v8 = vsel %vm2285_vm0, %v6641_v26, 0.0  ;;  %v7848_v27 = vpop.f32.mrb[82].mxu1  ;;  %8058 = vmatpush3.bf16.msra.mxu0 %v8057_v9 }
 0xcbd   :  { %v6709_v19 = vadd.f32 %v6708_v8, %v6707_v47  ;;  %v5698_v58 = vpop.f32.mrb[83].mxu1  ;;  %v6644_v52 = vmul.f32 %v7848_v27, %v6516_v56  ;;  %v14225_v47 = vpop.permute.xlu1 %6372  ;;  %8059 = vmatprep.subr.bf16.mxu0 %v8568_v0 }
 0xcbe   :  { %v6643_v21 = vmul.f32 %v13889_v55, %v5698_v58  ;;  %v6315_v55 = vpop.permute.xlu0 %6314 }
 0xcbf   :  { %v6711_v43 = vadd.f32 %v6710_v40, %v6709_v19  ;;  %v6714_v49 = vsel %vm2285_vm0, %v6644_v52, 0.0 }
 0xcc0   :  { %v6712_v12 = vsel %vm2285_vm0, %v6643_v21, 0.0  ;;  %v15413_v21 = vld [vmem:[#allocation92_spill] sm:$0xff] }
 0xcc1   :  { %v6713_v29 = vadd.f32 %v6712_v12, %v6711_v43  ;;  %v14235_v31 = vpop.permute.xlu1 %6432 }
 0xcc2   :  { %v14227_v8 = vpop.permute.xlu0 %6374 }
 0xcc3   :  { %v6715_v15 = vadd.f32 %v6714_v49, %v6713_v29 }
 0xcc4   :  { %v7851_v59 = vpop.f32.mrb[84].mxu1 }
 0xcc5   :  { %v6646_v35 = vmul.f32 %v7851_v59, %v6518_v23  ;;  %v5708_v20 = vpop.f32.mrb[85].mxu1  ;;  %v6716_v12 = vrot.slane %v6715_v15, 4  ;;  %v6524_v23 = vsel %vm6508_vm3, %v6313_v48, %v6315_v55  ;;  %v15416_v55 = vld [vmem:[#allocation50_spill] sm:$0xff] }
 0xcc6   :  { %v6645_v53 = vmul.f32 %v6517_v25, %v5708_v20  ;;  %v14238_v20 = vpop.permute.xlu0 %6434 }
 0xcc7   :  { %v6723_v18 = vsel %vm2285_vm0, %v6646_v35, 0.0  ;;  %v6717_v25 = vadd.f32 %v6716_v12, %v6715_v15 }
 0xcc8   :  { %v6722_v46 = vsel %vm2285_vm0, %v6645_v53, 0.0  ;;  %v7854_v6 = vpop.f32.mrb[86].mxu1 }
 0xcc9   :  { %v6724_v22 = vadd.f32 %v6723_v18, %v6722_v46  ;;  %v5718_v60 = vpop.f32.mrb[87].mxu1  ;;  %v6648_v33 = vmul.f32 %v7854_v6, %v6520_v32  ;;  %v15414_v6 = vld [vmem:[#allocation7_spill] sm:$0xff]  ;;  %v6525_v32 = vsel %vm6508_vm3, %v15417_v44, %v15416_v55  ;;  %v6718_v15 = vrot.slane %v6717_v25, 2 }
 0xcca   :  { %v6647_v26 = vmul.f32 %v6519_v62, %v5718_v60  ;;  %v6526_v2 = vsel %vm6508_vm3, %v15415_v61, %v15414_v6  ;;  %v14253_v9 = vpop.permute.xlu0 %6494 }
 0xccb   :  { %v6727_v52 = vsel %vm2285_vm0, %v6648_v33, 0.0 }
 0xccc   :  { %v6725_v27 = vsel %vm2285_vm0, %v6647_v26, 0.0  ;;  %v7857_v19 = vpop.f32.mrb[88].mxu1 }
 0xccd   :  { %v6726_v56 = vadd.f32 %v6725_v27, %v6724_v22  ;;  %v6650_v58 = vmul.f32 %v7857_v19, %v13784_v51  ;;  %v5728_v40 = vpop.f32.mrb[89].mxu1 }
 0xcce   :  { %v6649_v43 = vmul.f32 %v15413_v21, %v5728_v40  ;;  %v15420_v21 = vld [vmem:[#allocation57_spill] sm:$0xff] }
 0xccf   :  { %v6728_v29 = vadd.f32 %v6727_v52, %v6726_v56  ;;  %v6731_v51 = vsel %vm2285_vm0, %v6650_v58, 0.0  ;;  %v15418_v56 = vld [vmem:[#allocation5_spill] sm:$0xff]  ;;  %v15419_v52 = vld [vmem:[#allocation84_spill] sm:$0xff] }
 0xcd0   :  { %v6729_v49 = vsel %vm2285_vm0, %v6649_v43, 0.0  ;;  %v7860_v59 = vpop.f32.mrb[90].mxu1  ;;  %v6527_v43 = vsel %vm6508_vm3, %v15420_v21, %v15419_v52  ;;  %v15421_v21 = vld [vmem:[#allocation59_spill] sm:$0xff] }
 0xcd1   :  { %v6730_v1 = vadd.f32 %v6729_v49, %v6728_v29  ;;  %v5738_v35 = vpop.f32.mrb[91].mxu1  ;;  %v6652_v11 = vmul.f32 %v7860_v59, %v6524_v23  ;;  %v6719_v29 = vadd.f32 %v6718_v15, %v6717_v25 }
 0xcd2   :  { %v6651_v28 = vmul.f32 %v13905_v10, %v5738_v35  ;;  %v14250_v10 = vpop.permute.xlu1 %6492 }
 0xcd3   :  { %v6732_v53 = vadd.f32 %v6731_v51, %v6730_v1  ;;  %v6735_v60 = vsel %vm2285_vm0, %v6652_v11, 0.0  ;;  %v6720_v6 = vrot.slane %v6719_v29, 1 }
 0xcd4   :  { %v6733_v18 = vsel %vm2285_vm0, %v6651_v28, 0.0  ;;  %v7863_v46 = vpop.f32.mrb[92].mxu1 }
 0xcd5   :  { %v6734_v22 = vadd.f32 %v6733_v18, %v6732_v53  ;;  %v6654_v39 = vmul.f32 %v7863_v46, %v6526_v2  ;;  %v5748_v48 = vpop.f32.mrb[93].mxu1  ;;  %v6347_v53 = vpop.permute.xlu0 %6346 }
 0xcd6   :  { %v6653_v45 = vmul.f32 %v6525_v32, %v5748_v48  ;;  %v6345_v28 = vpop.permute.xlu1 %6344 }
 0xcd7   :  { %v6736_v4 = vadd.f32 %v6735_v60, %v6734_v22  ;;  %v6744_v62 = vsel %vm2285_vm0, %v6654_v39, 0.0  ;;  %v6532_v55 = vsel %vm6508_vm3, %v6345_v28, %v6347_v53 }
 0xcd8   :  { %v6743_v33 = vsel %vm2285_vm0, %v6653_v45, 0.0  ;;  %v7866_v26 = vpop.f32.mrb[94].mxu1  ;;  %v6721_v45 = vadd.f32 %v6720_v6, %v6719_v29 }
 0xcd9   :  { %v6737_v27 = vrot.slane %v6736_v4, 4  ;;  %v6745_v19 = vadd.f32 %v6744_v62, %v6743_v33  ;;  %v6656_v58 = vmul.f32 %v7866_v26, %v15418_v56  ;;  %v5758_v40 = vpop.f32.mrb[95].mxu1  ;;  %v6905_v33 = vld [vmem:[%s14630_s14 + $0x50] sm:$0xff]  ;;  %v6906_v26 = vld [vmem:[%s14630_s14 + $0x58] sm:$0xff] }
 0xcda   :  { %v6655_v12 = vmul.f32 %v6527_v43, %v5758_v40  ;;  %v15422_v43 = vld [vmem:[#allocation18_spill] sm:$0xff] }
 0xcdb   :  { %v6738_v49 = vadd.f32 %v6737_v27, %v6736_v4  ;;  %v6748_v18 = vsel %vm2285_vm0, %v6656_v58, 0.0  ;;  %v14268_v4 = vpop.permute.xlu1 %6404  ;;  %v14277_v27 = vpop.permute.xlu0 %6406 }
 0xcdc   :  { %v6746_v59 = vsel %vm2285_vm0, %v6655_v12, 0.0  ;;  %v7869_v1 = vpop.f32.mrb[96].mxu1  ;;  %v6534_v12 = vsel %vm6508_vm3, %v15422_v43, %v15421_v21 }
 0xcdd   :  { %v6739_v23 = vrot.slane %v6738_v49, 2  ;;  %v6747_v35 = vadd.f32 %v6746_v59, %v6745_v19  ;;  %v6658_v51 = vmul.f32 %v7869_v1, %v13853_v16  ;;  %v5768_v11 = vpop.f32.mrb[97].mxu1  ;;  %v15423_v59 = vld [vmem:[#allocation41_spill] sm:$0xff]  ;;  %v15424_v1 = vld [vmem:[#allocation63_spill] sm:$0xff] }
 0xcde   :  { %v6657_v46 = vmul.f32 %v13602_v63, %v5768_v11 }
 0xcdf   :  { %v6740_v61 = vadd.f32 %v6739_v23, %v6738_v49  ;;  %v6749_v2 = vadd.f32 %v6748_v18, %v6747_v35  ;;  %v6752_v16 = vsel %vm2285_vm0, %v6658_v51, 0.0  ;;  %v6533_v23 = vsel %vm6508_vm3, %v15424_v1, %v15423_v59  ;;  %v14287_v11 = vpop.permute.xlu1 %6464  ;;  %v14290_v53 = vpop.permute.xlu0 %6466 }
 0xce0   :  { %v6750_v25 = vsel %vm2285_vm0, %v6657_v46, 0.0  ;;  %v7872_v22 = vpop.f32.mrb[98].mxu1 }
 0xce1   :  { %v6741_v39 = vrot.slane %v6740_v61, 1  ;;  %v6751_v48 = vadd.f32 %v6750_v25, %v6749_v2  ;;  %v5778_v44 = vpop.f32.mrb[99].mxu1  ;;  %v6660_v32 = vmul.f32 %v7872_v22, %v6532_v55  ;;  %v15425_v2 = vld [vmem:[#allocation75_spill] sm:$0xff] }
 0xce2   :  { %v6659_v60 = vmul.f32 %v13955_v54, %v5778_v44  ;;  %v8060_v54 = vpack.c.bf16 %v6906_v26, %v6905_v33 }
 0xce3   :  { %v6742_v15 = vadd.f32 %v6741_v39, %v6740_v61  ;;  %v6753_v63 = vadd.f32 %v6752_v16, %v6751_v48  ;;  %v6756_v58 = vsel %vm2285_vm0, %v6660_v32, 0.0  ;;  %v15426_v39 = vld [vmem:[#allocation94_spill] sm:$0xff]  ;;  %v15427_v48 = vld [vmem:[#allocation108_spill] sm:$0xff]  ;;  %v6377_v33 = vpop.permute.xlu1 %6376  ;;  %v6379_v26 = vpop.permute.xlu0 %6378 }
 0xce4   :  { %v6754_v62 = vsel %vm2285_vm0, %v6659_v60, 0.0  ;;  %8061 = vmatpush3.bf16.msra.mxu0 %v8060_v54  ;;  %v6535_v55 = vsel %vm6508_vm3, %v15427_v48, %v15426_v39  ;;  %v15430_v39 = vld [vmem:[#allocation76_spill] sm:$0xff]  ;;  %v15431_v48 = vld [vmem:[#allocation38_spill] sm:$0xff] }
 0xce5   :  { %v6879_v19 = vsel %vm6878_vm4, %v6742_v15, %v6721_v45  ;;  %v6755_v56 = vadd.f32 %v6754_v62, %v6753_v63  ;;  %8086 = vmatprep.subr.bf16.mxu0 %v8568_v0 }
 0xce7   :  { %v6757_v40 = vadd.f32 %v6756_v58, %v6755_v56  ;;  %v7875_v52 = vpop.f32.mrb[100].mxu1 }
 0xce8   :  { %v6662_v29 = vmul.f32 %v7875_v52, %v6534_v12  ;;  %v5788_v49 = vpop.f32.mrb[101].mxu1 }
 0xce9   :  { %v6758_v35 = vrot.slane %v6757_v40, 4  ;;  %v6661_v51 = vmul.f32 %v6533_v23, %v5788_v49 }
 0xcea   :  { %v6765_v28 = vsel %vm2285_vm0, %v6662_v29, 0.0  ;;  %v6540_v29 = vsel %vm6508_vm3, %v6377_v33, %v6379_v26 }
 0xceb   :  { %v6759_v18 = vadd.f32 %v6758_v35, %v6757_v40  ;;  %v6764_v46 = vsel %vm2285_vm0, %v6661_v51, 0.0  ;;  %v7878_v6 = vpop.f32.mrb[102].mxu1  ;;  %v14307_v51 = vpop.permute.xlu1 %6436 }
 0xcec   :  { %v6766_v61 = vadd.f32 %v6765_v28, %v6764_v46  ;;  %v6664_v25 = vmul.f32 %v7878_v6, %v15425_v2  ;;  %v5798_v22 = vpop.f32.mrb[103].mxu1 }
 0xced   :  { %v6760_v44 = vrot.slane %v6759_v18, 2  ;;  %v6663_v16 = vmul.f32 %v6535_v55, %v5798_v22  ;;  %v15429_v22 = vld [vmem:[#allocation90_spill] sm:$0xff]  ;;  %v6541_v55 = vsel %vm6508_vm3, %v15431_v48, %v15430_v39 }
 0xcee   :  { %v6769_v54 = vsel %vm2285_vm0, %v6664_v25, 0.0  ;;  %v15428_v25 = vld [vmem:[#allocation105_spill] sm:$0xff] }
 0xcef   :  { %v6761_v32 = vadd.f32 %v6760_v44, %v6759_v18  ;;  %v6767_v60 = vsel %vm2285_vm0, %v6663_v16, 0.0  ;;  %v7881_v45 = vpop.f32.mrb[104].mxu1  ;;  %v14310_v18 = vpop.permute.xlu0 %6438 }
 0xcf0   :  { %v6768_v15 = vadd.f32 %v6767_v60, %v6766_v61  ;;  %v6666_v63 = vmul.f32 %v7881_v45, %v13913_v14  ;;  %v5808_v62 = vpop.f32.mrb[105].mxu1  ;;  %v6539_v14 = vsel %vm6508_vm3, %v14225_v47, %v14227_v8  ;;  %v6542_v47 = vsel %vm6508_vm3, %v15429_v22, %v15428_v25 }
 0xcf1   :  { %v6762_v56 = vrot.slane %v6761_v32, 1  ;;  %v6665_v58 = vmul.f32 %v13800_v34, %v5808_v62 }
 0xcf2   :  { %v6770_v40 = vadd.f32 %v6769_v54, %v6768_v15  ;;  %v6773_v1 = vsel %vm2285_vm0, %v6666_v63, 0.0 }
 0xcf3   :  { %v6763_v52 = vadd.f32 %v6762_v56, %v6761_v32  ;;  %v6771_v21 = vsel %vm2285_vm0, %v6665_v58, 0.0  ;;  %v7884_v43 = vpop.f32.mrb[106].mxu1  ;;  %v14319_v32 = vpop.permute.xlu1 %6496  ;;  %v15432_v58 = vld [vmem:[#allocation109_spill] sm:$0xff] }
 0xcf4   :  { %v6772_v12 = vadd.f32 %v6771_v21, %v6770_v40  ;;  %v5818_v49 = vpop.f32.mrb[107].mxu1  ;;  %v6668_v23 = vmul.f32 %v7884_v43, %v6540_v29  ;;  %v14322_v45 = vpop.permute.xlu0 %6498 }
 0xcf5   :  { %v6881_v59 = vsel %vm6880_vm5, %v6763_v52, %v6879_v19  ;;  %v6667_v35 = vmul.f32 %v6539_v14, %v5818_v49 }
 0xcf6   :  { %v6774_v34 = vadd.f32 %v6773_v1, %v6772_v12  ;;  %v6777_v6 = vsel %vm2285_vm0, %v6668_v23, 0.0 }
 0xcf7   :  { %v6775_v28 = vsel %vm2285_vm0, %v6667_v35, 0.0  ;;  %v6409_v14 = vpop.permute.xlu1 %6408 }
 0xcf8   :  { %v6776_v46 = vadd.f32 %v6775_v28, %v6774_v34  ;;  %v6411_v1 = vpop.permute.xlu0 %6410 }
 0xcfa   :  { %v6778_v61 = vadd.f32 %v6777_v6, %v6776_v46  ;;  %v7887_v2 = vpop.f32.mrb[108].mxu1 }
 0xcfb   :  { %v6670_v8 = vmul.f32 %v7887_v2, %v6542_v47  ;;  %v5828_v19 = vpop.f32.mrb[109].mxu1  ;;  %v6548_v2 = vsel %vm6508_vm3, %v6409_v14, %v6411_v1  ;;  %v15435_v14 = vld [vmem:[#allocation96_spill] sm:$0xff] }
 0xcfc   :  { %v6779_v44 = vrot.slane %v6778_v61, 4  ;;  %v6669_v16 = vmul.f32 %v6541_v55, %v5828_v19 }
 0xcfd   :  { %v6786_v60 = vsel %vm2285_vm0, %v6670_v8, 0.0 }
 0xcfe   :  { %v6780_v15 = vadd.f32 %v6779_v44, %v6778_v61  ;;  %v6785_v63 = vsel %vm2285_vm0, %v6669_v16, 0.0  ;;  %v7890_v62 = vpop.f32.mrb[110].mxu1 }
 0xcff   :  { %v6787_v33 = vadd.f32 %v6786_v60, %v6785_v63  ;;  %v6672_v26 = vmul.f32 %v7890_v62, %v13615_v30  ;;  %v5838_v56 = vpop.f32.mrb[111].mxu1  ;;  %v15433_v62 = vld [vmem:[#allocation95_spill] sm:$0xff] }
 0xd00   :  { %v6781_v54 = vrot.slane %v6780_v15, 2  ;;  %v6671_v40 = vmul.f32 %v15432_v58, %v5838_v56  ;;  %v15434_v56 = vld [vmem:[#allocation78_spill] sm:$0xff]  ;;  %v14342_v58 = vpop.permute.xlu1 %6468 }
 0xd01   :  { %v6790_v35 = vsel %vm2285_vm0, %v6672_v26, 0.0 }
 0xd02   :  { %v6782_v52 = vadd.f32 %v6781_v54, %v6780_v15  ;;  %v6788_v21 = vsel %vm2285_vm0, %v6671_v40, 0.0  ;;  %v7893_v43 = vpop.f32.mrb[112].mxu1 }
 0xd03   :  { %v6789_v12 = vadd.f32 %v6788_v21, %v6787_v33  ;;  %v6674_v29 = vmul.f32 %v7893_v43, %v13976_v41  ;;  %v5848_v49 = vpop.f32.mrb[113].mxu1  ;;  %v6547_v41 = vsel %vm6508_vm3, %v14268_v4, %v14277_v27  ;;  %v14345_v21 = vpop.permute.xlu0 %6470 }
 0xd04   :  { %v6783_v23 = vrot.slane %v6782_v52, 1  ;;  %v6673_v34 = vmul.f32 %v13857_v36, %v5848_v49 }
 0xd05   :  { %v6791_v30 = vadd.f32 %v6790_v35, %v6789_v12  ;;  %v6794_v47 = vsel %vm2285_vm0, %v6674_v29, 0.0 }
 0xd06   :  { %v6784_v28 = vadd.f32 %v6783_v23, %v6782_v52  ;;  %v6792_v46 = vsel %vm2285_vm0, %v6673_v34, 0.0  ;;  %v7896_v6 = vpop.f32.mrb[114].mxu1 }
 0xd07   :  { %v6793_v61 = vadd.f32 %v6792_v46, %v6791_v30  ;;  %v5858_v25 = vpop.f32.mrb[115].mxu1  ;;  %v6676_v8 = vmul.f32 %v7896_v6, %v6548_v2  ;;  %v6554_v30 = vsel %vm6508_vm3, %v14235_v31, %v14238_v20  ;;  %v6441_v46 = vpop.permute.xlu1 %6440  ;;  %v6555_v31 = vsel %vm6508_vm3, %v14307_v51, %v14310_v18  ;;  %v15436_v18 = vld [vmem:[#allocation32_spill] sm:$0xff] }
 0xd08   :  { %v6883_v22 = vsel %vm6882_vm6, %v6784_v28, %v6881_v59  ;;  %v6675_v19 = vmul.f32 %v6547_v41, %v5858_v25  ;;  %v6443_v6 = vpop.permute.xlu0 %6442 }
 0xd09   :  { %v6795_v36 = vadd.f32 %v6794_v47, %v6793_v61  ;;  %v6798_v55 = vsel %vm2285_vm0, %v6676_v8, 0.0  ;;  %v6556_v8 = vsel %vm6508_vm3, %v6441_v46, %v6443_v6  ;;  %v6561_v46 = vsel %vm6508_vm3, %v14183_v17, %v14186_v13 }
 0xd0a   :  { %v6796_v39 = vsel %vm2285_vm0, %v6675_v19, 0.0 }
 0xd0b   :  { %v6797_v48 = vadd.f32 %v6796_v39, %v6795_v36 }
 0xd0d   :  { %v6799_v44 = vadd.f32 %v6798_v55, %v6797_v48 }
 0xd0f   :  { %v6800_v16 = vrot.slane %v6799_v44, 4 }
 0xd11   :  { %v6801_v60 = vadd.f32 %v6800_v16, %v6799_v44 }
 0xd13   :  { %v6802_v15 = vrot.slane %v6801_v60, 2 }
 0xd15   :  { %v6803_v63 = vadd.f32 %v6802_v15, %v6801_v60 }
 0xd17   :  { %v6804_v4 = vrot.slane %v6803_v63, 1 }
 0xd18   :  { %v7899_v27 = vpop.f32.mrb[116].mxu1 }
 0xd19   :  { %v6805_v59 = vadd.f32 %v6804_v4, %v6803_v63  ;;  %v6678_v33 = vmul.f32 %v7899_v27, %v15433_v62  ;;  %v5868_v26 = vpop.f32.mrb[117].mxu1 }
 0xd1a   :  { %v6677_v54 = vmul.f32 %v15434_v56, %v5868_v26  ;;  %v15437_v56 = vld [vmem:[#allocation54_spill] sm:$0xff] }
 0xd1b   :  { %v6885_v40 = vsel %vm6884_vm8, %v6805_v59, %v6883_v22  ;;  %v6807_v52 = vsel %vm2285_vm0, %v6678_v33, 0.0 }
 0xd1c   :  { %v6806_v42 = vsel %vm2285_vm0, %v6677_v54, 0.0  ;;  %v7902_v43 = vpop.f32.mrb[118].mxu1 }
 0xd1d   :  { %v6808_v12 = vadd.f32 %v6807_v52, %v6806_v42  ;;  %v6680_v29 = vmul.f32 %v7902_v43, %v13803_v5  ;;  %v5878_v49 = vpop.f32.mrb[119].mxu1  ;;  %v14366_v52 = vpop.permute.xlu1 %6500 }
 0xd1e   :  { %v6679_v1 = vmul.f32 %v15435_v14, %v5878_v49  ;;  %v14369_v43 = vpop.permute.xlu0 %6502 }
 0xd1f   :  { %v6811_v61 = vsel %vm2285_vm0, %v6680_v29, 0.0 }
 0xd20   :  { %v6809_v23 = vsel %vm2285_vm0, %v6679_v1, 0.0  ;;  %v7905_v35 = vpop.f32.mrb[120].mxu1 }
 0xd21   :  { %v6810_v34 = vadd.f32 %v6809_v23, %v6808_v12  ;;  %v5888_v28 = vpop.f32.mrb[121].mxu1  ;;  %v6682_v2 = vmul.f32 %v7905_v35, %v6554_v30  ;;  %v6562_v30 = vsel %vm6508_vm3, %v14287_v11, %v14290_v53  ;;  %v6473_v6 = vpop.permute.xlu1 %6472  ;;  %v6563_v11 = vsel %vm6508_vm3, %v14342_v58, %v14345_v21 }
 0xd22   :  { %v6681_v25 = vmul.f32 %v13931_v7, %v5888_v28 }
 0xd23   :  { %v6812_v5 = vadd.f32 %v6811_v61, %v6810_v34  ;;  %v6815_v20 = vsel %vm2285_vm0, %v6682_v2, 0.0  ;;  %v6475_v61 = vpop.permute.xlu0 %6474 }
 0xd24   :  { %v6813_v41 = vsel %vm2285_vm0, %v6681_v25, 0.0  ;;  %v7908_v22 = vpop.f32.mrb[122].mxu1 }
 0xd25   :  { %v6814_v47 = vadd.f32 %v6813_v41, %v6812_v5  ;;  %v5898_v19 = vpop.f32.mrb[123].mxu1  ;;  %v6684_v36 = vmul.f32 %v7908_v22, %v6556_v8 }
 0xd26   :  { %v6683_v39 = vmul.f32 %v6555_v31, %v5898_v19 }
 0xd27   :  { %v6816_v48 = vadd.f32 %v6815_v20, %v6814_v47  ;;  %v6819_v44 = vsel %vm2285_vm0, %v6684_v36, 0.0  ;;  %v6564_v47 = vsel %vm6508_vm3, %v6473_v6, %v6475_v61 }
 0xd28   :  { %v6817_v55 = vsel %vm2285_vm0, %v6683_v39, 0.0 }
 0xd29   :  { %v6818_v7 = vadd.f32 %v6817_v55, %v6816_v48 }
 0xd2b   :  { %v6820_v16 = vadd.f32 %v6819_v44, %v6818_v7 }
 0xd2d   :  { %v6821_v60 = vrot.slane %v6820_v16, 4 }
 0xd2f   :  { %v6822_v15 = vadd.f32 %v6821_v60, %v6820_v16 }
 0xd31   :  { %v6823_v63 = vrot.slane %v6822_v15, 2 }
 0xd33   :  { %v6824_v4 = vadd.f32 %v6823_v63, %v6822_v15 }
 0xd35   :  { %v6825_v27 = vrot.slane %v6824_v4, 1 }
 0xd37   :  { %v6826_v59 = vadd.f32 %v6825_v27, %v6824_v4  ;;  %v15438_v4 = vld [vmem:[#allocation66_spill] sm:$0xff] }
 0xd39   :  { %v6887_v62 = vsel %vm6886_vm9, %v6826_v59, %v6885_v40 }
 0xd42   :  { %v7911_v51 = vpop.f32.mrb[124].mxu1 }
 0xd43   :  { %v6686_v33 = vmul.f32 %v7911_v51, %v15436_v18  ;;  %v5908_v26 = vpop.f32.mrb[125].mxu1 }
 0xd44   :  { %v6685_v54 = vmul.f32 %v15437_v56, %v5908_v26 }
 0xd45   :  { %v6828_v42 = vsel %vm2285_vm0, %v6686_v33, 0.0 }
 0xd46   :  { %v6827_v12 = vsel %vm2285_vm0, %v6685_v54, 0.0  ;;  %v7914_v29 = vpop.f32.mrb[126].mxu1 }
 0xd47   :  { %v6829_v49 = vadd.f32 %v6828_v42, %v6827_v12  ;;  %v6688_v14 = vmul.f32 %v7914_v29, %v13866_v38  ;;  %v5918_v1 = vpop.f32.mrb[127].mxu1 }
 0xd48   :  { %v6687_v40 = vmul.f32 %v13626_v57, %v5918_v1  ;;  %v6507_v1 = vpop.permute.xlu0 %6506 }
 0xd49   :  { %v6832_v38 = vsel %vm2285_vm0, %v6688_v14, 0.0  ;;  %v6505_v14 = vpop.permute.xlu1 %6504 }
 0xd4a   :  { %v6830_v23 = vsel %vm2285_vm0, %v6687_v40, 0.0  ;;  %v7917_v35 = vpop.f32.mrb[128].mxu1 }
 0xd4b   :  { %v6831_v34 = vadd.f32 %v6830_v23, %v6829_v49  ;;  %v5928_v28 = vpop.f32.mrb[129].mxu1  ;;  %v6690_v2 = vmul.f32 %v7917_v35, %v6562_v30  ;;  %v6569_v49 = vsel %vm6508_vm3, %v14250_v10, %v14253_v9 }
 0xd4c   :  { %v6689_v25 = vmul.f32 %v6561_v46, %v5928_v28  ;;  %v6572_v28 = vsel %vm6508_vm3, %v6505_v14, %v6507_v1  ;;  %v7039_v1 = vld [vmem:[%s14634_s18 + $0x80] sm:$0xff] }
 0xd4d   :  { %v6833_v57 = vadd.f32 %v6832_v38, %v6831_v34  ;;  %v6836_v17 = vsel %vm2285_vm0, %v6690_v2, 0.0 }
 0xd4e   :  { %v6834_v5 = vsel %vm2285_vm0, %v6689_v25, 0.0  ;;  %v7920_v41 = vpop.f32.mrb[130].mxu1 }
 0xd4f   :  { %v6835_v22 = vadd.f32 %v6834_v5, %v6833_v57  ;;  %v5938_v8 = vpop.f32.mrb[131].mxu1  ;;  %v6692_v13 = vmul.f32 %v7920_v41, %v6564_v47 }
 0xd50   :  { %v6691_v53 = vmul.f32 %v6563_v11, %v5938_v8 }
 0xd51   :  { %v6837_v19 = vadd.f32 %v6836_v17, %v6835_v22  ;;  %v6840_v36 = vsel %vm2285_vm0, %v6692_v13, 0.0  ;;  %v7520_v17 = vld [vmem:[%s14631_s15] ss:$0 sm:$0xff] }
 0xd52   :  { %v6838_v31 = vsel %vm2285_vm0, %v6691_v53, 0.0  ;;  %v7522_v13 = vld [vmem:[%s14629_s13] ss:$0 sm:$0xff] }
 0xd53   :  { %v6839_v20 = vadd.f32 %v6838_v31, %v6837_v19 }
 0xd55   :  { %v6841_v39 = vadd.f32 %v6840_v36, %v6839_v20 }
 0xd57   :  { %v6842_v48 = vrot.slane %v6841_v39, 4 }
 0xd59   :  { %v6843_v55 = vadd.f32 %v6842_v48, %v6841_v39  ;;  %v7024_v39 = vld [vmem:[%s14634_s18 + $0x8] sm:$0xff]  ;;  %v7026_v48 = vld [vmem:[%s14634_s18 + $0x18] sm:$0xff] }
 0xd5b   :  { %v6844_v7 = vrot.slane %v6843_v55, 2 }
 0xd5d   :  { %v6845_v44 = vadd.f32 %v6844_v7, %v6843_v55  ;;  %v7023_v55 = vld [vmem:[%s14634_s18] sm:$0xff]  ;;  %v8062_v7 = vpack.c.bf16 %v7026_v48, %v7024_v39 }
 0xd5e   :  { %v7197_v48 = vld [vmem:[%s14636_s20 + $0x40] sm:$0xff] }
 0xd5f   :  { %v6846_v16 = vrot.slane %v6845_v44, 1  ;;  %8063 = vmatprep.subr.bf16.mxu1 %v8062_v7 }
 0xd61   :  { %v6847_v60 = vadd.f32 %v6846_v16, %v6845_v44  ;;  %v7025_v44 = vld [vmem:[%s14634_s18 + $0x10] sm:$0xff]  ;;  %v7028_v16 = vld [vmem:[%s14634_s18 + $0x28] sm:$0xff] }
 0xd63   :  { %v6889_v15 = vsel %vm6888_vm10, %v6847_v60, %v6887_v62  ;;  %v7030_v60 = vld [vmem:[%s14634_s18 + $0x38] sm:$0xff] }
 0xd6d   :  { %v7923_v58 = vpop.f32.mrb[132].mxu1 }
 0xd6e   :  { %v6694_v21 = vmul.f32 %v7923_v58, %v13631_v24  ;;  %v5948_v63 = vpop.f32.mrb[133].mxu1  ;;  %v6570_v24 = vsel %vm6508_vm3, %v14319_v32, %v14322_v45  ;;  %v6571_v32 = vsel %vm6508_vm3, %v14366_v52, %v14369_v43  ;;  %v8536_v52 = vld [vmem:[%s14628_s12] ss:$0 sm:$0xff]  ;;  %v8066_v58 = vpack.c.bf16 %v7030_v60, %v7028_v16  ;;  %v7200_v16 = vld [vmem:[%s14636_s20 + $0x58] sm:$0xff]  ;;  %s8570_s12 = smov [#allocation2]  }
 0xd6f   :  { %v6693_v27 = vmul.f32 %v15438_v4, %v5948_v63  ;;  %v7029_v63 = vld [vmem:[%s14634_s18 + $0x30] sm:$0xff]  ;;  %v7032_v4 = vld [vmem:[%s14634_s18 + $0x48] sm:$0xff]  ;;  %s7302_s9 = sshll.u32 %s8570_s12, 4  ;;  %s7303_s9 = int_to_ptr.vmem [resolvable:$true] %s7302_s9 }
 0xd70   :  { %v6849_v59 = vsel %vm2285_vm0, %v6694_v21, 0.0  ;;  %v7027_v21 = vld [vmem:[%s14634_s18 + $0x20] sm:$0xff]  ;;  %s8537_s27 = scalar_lea.vmem %s7303_s9, 128  ;;  %p8542_p1 = scmp.lt.s32.totalorder %s7303_s9, %s7303_s9 }
 0xd71   :  { %v6848_v51 = vsel %vm2285_vm0, %v6693_v27, 0.0  ;;  %v7926_v18 = vpop.f32.mrb[134].mxu1  ;;  %v7034_v27 = vld [vmem:[%s14634_s18 + $0x58] sm:$0xff]  ;;  %p8538_p0 = scmp.ne.s32.totalorder %s7303_s9, %s8537_s27  ;;  %p8543_p2 = scmp.lt.s32.totalorder %s8537_s27, %s8537_s27 }
 0xd72   :  { %v6850_v33 = vadd.f32 %v6849_v59, %v6848_v51  ;;  %v6696_v26 = vmul.f32 %v7926_v18, %v13940_v50  ;;  %v5958_v56 = vpop.f32.mrb[135].mxu1  ;;  %v8068_v59 = vpack.c.bf16 %v7029_v63, %v7027_v21  ;;  %v8070_v51 = vpack.c.bf16 %v7034_v27, %v7032_v4  ;;  %v7031_v18 = vld [vmem:[%s14634_s18 + $0x40] sm:$0xff]  ;;  %v7203_v63 = vld [vmem:[%s14636_s20 + $0x70] sm:$0xff]  ;;  %v7204_v4 = vld [vmem:[%s14636_s20 + $0x78] sm:$0xff] }
 0xd73   :  { %v6695_v54 = vmul.f32 %v13806_v3, %v5958_v56  ;;  %v7038_v56 = vld [vmem:[%s14634_s18 + $0x78] sm:$0xff]  ;;  %v8108_v27 = vpack.c.bf16 %v7204_v4, %v7203_v63  ;;  %p8544_p3 = por %p8543_p2, %p8542_p1 }
 0xd74   :  { %v6853_v50 = vsel %vm2285_vm0, %v6696_v26, 0.0  ;;  %v7036_v26 = vld [vmem:[%s14634_s18 + $0x68] sm:$0xff] }
 0xd75   :  { %v6851_v42 = vsel %vm2285_vm0, %v6695_v54, 0.0  ;;  %v7929_v62 = vpop.f32.mrb[136].mxu1  ;;  %p8545_p4 = pnand %p8544_p3, %p8538_p0 }
 0xd76   :  { %v6852_v12 = vadd.f32 %v6851_v42, %v6850_v33  ;;  %v5968_v29 = vpop.f32.mrb[137].mxu1  ;;  %v6698_v40 = vmul.f32 %v7929_v62, %v6570_v24  ;;  %v7033_v33 = vld [vmem:[%s14634_s18 + $0x50] sm:$0xff]  ;;  %v8074_v42 = vpack.c.bf16 %v7038_v56, %v7036_v26  ;;  %v7035_v62 = vld [vmem:[%s14634_s18 + $0x60] sm:$0xff]  ;;  %v7040_v24 = vld [vmem:[%s14634_s18 + $0x88] sm:$0xff] }
 0xd77   :  { %v6697_v23 = vmul.f32 %v6569_v49, %v5968_v29  ;;  %v8072_v54 = vpack.c.bf16 %v7033_v33, %v7031_v18  ;;  %v7042_v29 = vld [vmem:[%s14634_s18 + $0x98] sm:$0xff]  ;;  %v7207_v33 = vld [vmem:[%s14636_s20 + $0x90] sm:$0xff] }
 0xd78   :  { %v6854_v3 = vadd.f32 %v6853_v50, %v6852_v12  ;;  %v6857_v10 = vsel %vm2285_vm0, %v6698_v40, 0.0  ;;  %v7037_v12 = vld [vmem:[%s14634_s18 + $0x70] sm:$0xff]  ;;  %v8078_v14 = vpack.c.bf16 %v7042_v29, %v7040_v24  ;;  %v7044_v40 = vld [vmem:[%s14634_s18 + $0xa8] sm:$0xff]  ;;  %v7208_v26 = vld [vmem:[%s14636_s20 + $0x98] sm:$0xff] }
 0xd79   :  { %v6855_v35 = vsel %vm2285_vm0, %v6697_v23, 0.0  ;;  %v7932_v34 = vpop.f32.mrb[138].mxu1  ;;  %v8076_v49 = vpack.c.bf16 %v7037_v12, %v7035_v62  ;;  %v7041_v50 = vld [vmem:[%s14634_s18 + $0x90] sm:$0xff]  ;;  %v7046_v23 = vld [vmem:[%s14634_s18 + $0xb8] sm:$0xff]  ;;  %v8114_v56 = vpack.c.bf16 %v7208_v26, %v7207_v33 }
 0xd7a   :  { %v6856_v30 = vadd.f32 %v6855_v35, %v6854_v3  ;;  %v5978_v46 = vpop.f32.mrb[139].mxu1  ;;  %v6700_v9 = vmul.f32 %v7932_v34, %v6572_v28  ;;  %v8080_v3 = vpack.c.bf16 %v7041_v50, %v7039_v1  ;;  %v8082_v35 = vpack.c.bf16 %v7046_v23, %v7044_v40  ;;  %v7211_v12 = vld [vmem:[%s14636_s20 + $0xb0] sm:$0xff]  ;;  %v7212_v24 = vld [vmem:[%s14636_s20 + $0xb8] sm:$0xff] }
 0xd7b   :  { %v6699_v45 = vmul.f32 %v6571_v32, %v5978_v46  ;;  %v8120_v29 = vpack.c.bf16 %v7212_v24, %v7211_v12  ;;  %v15439_v1 = vld [vmem:[#allocation11_spill] sm:$0xff]  ;;  %v7526_v12 = vld [vmem:[%s14637_s21] ss:$0 sm:$0xff] }
 0xd7c   :  { %v6858_v6 = vadd.f32 %v6857_v10, %v6856_v30  ;;  %v6861_v2 = vsel %vm2285_vm0, %v6700_v9, 0.0  ;;  %v7043_v10 = vld [vmem:[%s14634_s18 + $0xa0] sm:$0xff]  ;;  %v7045_v9 = vld [vmem:[%s14634_s18 + $0xb0] sm:$0xff] }
 0xd7d   :  { %v6859_v61 = vsel %vm2285_vm0, %v6699_v45, 0.0  ;;  %v8084_v45 = vpack.c.bf16 %v7045_v9, %v7043_v10 }
 0xd7e   :  { %v6860_v38 = vadd.f32 %v6859_v61, %v6858_v6 }
 0xd80   :  { %v6862_v25 = vadd.f32 %v6861_v2, %v6860_v38 }
 0xd82   :  { %v6863_v57 = vrot.slane %v6862_v25, 4 }
 0xd84   :  { %v6864_v5 = vadd.f32 %v6863_v57, %v6862_v25  ;;  %v7523_v25 = vld [vmem:[%s14632_s16] ss:$0 sm:$0xff] }
 0xd86   :  { %v6865_v41 = vrot.slane %v6864_v5, 2 }
 0xd88   :  { %v6866_v22 = vadd.f32 %v6865_v41, %v6864_v5  ;;  %v7524_v5 = vld [vmem:[%s14633_s17] ss:$0 sm:$0xff] }
 0xd8a   :  { %v6867_v47 = vrot.slane %v6866_v22, 1 }
 0xd8c   :  { %v6868_v8 = vadd.f32 %v6867_v47, %v6866_v22  ;;  %v7189_v47 = vld [vmem:[%s14636_s20] sm:$0xff] }
 0xd8e   :  { %v6891_v11 = vsel %vm6890_vm11, %v6868_v8, %v6889_v15  ;;  %v8064_v15 = vpack.c.bf16 %v7025_v44, %v7023_v55  ;;  %v7190_v8 = vld [vmem:[%s14636_s20 + $0x8] sm:$0xff]  ;;  %v7199_v44 = vld [vmem:[%s14636_s20 + $0x50] sm:$0xff] }
 0xd8f   :  { %v6893_v43 = vadd.f32 %v8536_v52, %v6891_v11  ;;  %v8087_v11 = vpack.c.bf16 %v7190_v8, %v7189_v47  ;;  %v7191_v52 = vld [vmem:[%s14636_s20 + $0x10] sm:$0xff]  ;;  %v7198_v55 = vld [vmem:[%s14636_s20 + $0x48] sm:$0xff]  ;;  %v8102_v60 = vpack.c.bf16 %v7200_v16, %v7199_v44 }
 0xd90   :  { %8065 = vmatpush1.bf16.msra.mxu1 %v8064_v15  ;;  %v8099_v7 = vpack.c.bf16 %v7198_v55, %v7197_v48  ;;  %v7201_v15 = vld [vmem:[%s14636_s20 + $0x60] sm:$0xff] }
 0xd91   :  { %7958 = vmatmul.mubr.msk.f32.vlgmr.msra.gmra.mrb[116].mxu0 %vm2285_vm0, %v6893_v43  ;;  %8067 = vmatprep.subr.bf16.mxu1 %v8066_v58  ;;  %v7192_v43 = vld [vmem:[%s14636_s20 + $0x18] sm:$0xff]  ;;  %v7202_v58 = vld [vmem:[%s14636_s20 + $0x68] sm:$0xff] }
 0xd92   :  { %8088 = vmatpush1.bf16.msra.mxu0 %v8087_v11  ;;  %v8105_v21 = vpack.c.bf16 %v7202_v58, %v7201_v15 }
 0xd93   :  { %8089 = vmatprep.subr.bf16.mxu0 %v8568_v0 }
 0xd94   :  { %8069 = vmatpush1.bf16.msra.mxu1 %v8068_v59  ;;  %v7205_v59 = vld [vmem:[%s14636_s20 + $0x80] sm:$0xff] }
 0xd95   :  { %8071 = vmatprep.subr.bf16.mxu1 %v8070_v51  ;;  %v7206_v51 = vld [vmem:[%s14636_s20 + $0x88] sm:$0xff] }
 0xd96   :  { %v8111_v18 = vpack.c.bf16 %v7206_v51, %v7205_v59 }
 0xd98   :  { %8073 = vmatpush1.bf16.msra.mxu1 %v8072_v54  ;;  %v7209_v54 = vld [vmem:[%s14636_s20 + $0xa0] sm:$0xff] }
 0xd99   :  { %8075 = vmatprep.subr.bf16.mxu1 %v8074_v42  ;;  %v7210_v42 = vld [vmem:[%s14636_s20 + $0xa8] sm:$0xff] }
 0xd9a   :  { %v8117_v62 = vpack.c.bf16 %v7210_v42, %v7209_v54 }
 0xd9c   :  { %8077 = vmatpush1.bf16.msra.mxu1 %v8076_v49  ;;  %v7047_v49 = vld [vmem:[%s14635_s19] sm:$0x3] }
 0xd9d   :  { %8079 = vmatprep.subr.bf16.mxu1 %v8078_v14  ;;  %v7052_v14 = vrot.slane %v7047_v49, %v15279_v37  ;;  %v7056_v50 = vrot.slane %v7047_v49, %v15439_v1 }
 0xda0   :  { %8081 = vmatpush1.bf16.msra.mxu1 %v8080_v3 }
 0xda1   :  { %8083 = vmatprep.subr.bf16.mxu1 %v8082_v35 }
 0xda4   :  { %8085 = vmatpush1.bf16.msra.mxu1 %v8084_v45 }
 0xe64   :  { %v6983_v53 = vpop.f32.mrb[116].mxu0 }
 0xe65   :  { %v6984_v19 = vadd.f32 %v7520_v17, %v6983_v53  ;;  %v7959_v31 = vpop.f32.mrb[117].mxu0  ;;  %v8090_v17 = vpack.c.bf16 %v7192_v43, %v7191_v52  ;;  %v7194_v53 = vld [vmem:[%s14636_s20 + $0x28] sm:$0xff] }
 0xe66   :  { %v7195_v31 = vld [vmem:[%s14636_s20 + $0x30] sm:$0xff] }
 0xe67   :  { %v14422_v20 = vadd.f32 %v7522_v13, %v6984_v19  ;;  %8091 = vmatpush1.bf16.msra.mxu0 %v8090_v17  ;;  %v7193_v13 = vld [vmem:[%s14636_s20 + $0x20] sm:$0xff] }
 0xe68   :  { %8092 = vmatprep.subr.bf16.mxu0 %v8568_v0  ;;  %v8093_v19 = vpack.c.bf16 %v7194_v53, %v7193_v13 }
 0xe69   :  { %v6996_v36 = vsel %vm2285_vm0, %v14422_v20, 0.0 }
 0xe6a   :  { %6997 = vadd.xlane.f32.xlu1 %v6996_v36  ;;  %v7196_v36 = vld [vmem:[%s14636_s20 + $0x38] sm:$0xff] }
 0xe6b   :  { %8094 = vmatpush1.bf16.msra.mxu0 %v8093_v19  ;;  %v8096_v39 = vpack.c.bf16 %v7196_v36, %v7195_v31 }
 0xe6c   :  { %8095 = vmatprep.subr.bf16.mxu0 %v8568_v0 }
 0xe6f   :  { %8097 = vmatpush1.bf16.msra.mxu0 %v8096_v39 }
 0xe70   :  { %8098 = vmatprep.subr.bf16.mxu0 %v8568_v0 }
 0xe73   :  { %8100 = vmatpush1.bf16.msra.mxu0 %v8099_v7 }
 0xe74   :  { %8101 = vmatprep.subr.bf16.mxu0 %v8568_v0 }
 0xe77   :  { %8103 = vmatpush1.bf16.msra.mxu0 %v8102_v60 }
 0xe78   :  { %8104 = vmatprep.subr.bf16.mxu0 %v8568_v0 }
 0xe7b   :  { %8106 = vmatpush1.bf16.msra.mxu0 %v8105_v21 }
 0xe7c   :  { %8107 = vmatprep.subr.bf16.mxu0 %v8568_v0 }
 0xe7f   :  { %8109 = vmatpush1.bf16.msra.mxu0 %v8108_v27 }
 0xe80   :  { %8110 = vmatprep.subr.bf16.mxu0 %v8568_v0 }
 0xe83   :  { %8112 = vmatpush1.bf16.msra.mxu0 %v8111_v18 }
 0xe84   :  { %8113 = vmatprep.subr.bf16.mxu0 %v8568_v0 }
 0xe87   :  { %8115 = vmatpush1.bf16.msra.mxu0 %v8114_v56 }
 0xe88   :  { %8116 = vmatprep.subr.bf16.mxu0 %v8568_v0 }
 0xe8b   :  { %8118 = vmatpush1.bf16.msra.mxu0 %v8117_v62 }
 0xe8c   :  { %8119 = vmatprep.subr.bf16.mxu0 %v8568_v0 }
 0xe8f   :  { %8121 = vmatpush1.bf16.msra.mxu0 %v8120_v29 }
 0xef7   :  { %v6998_v34 = vpop.xlane.xlu1 %6997 }
 0xef8   :  { %v6999_v30 = vmul.f32 0.010416667, %v6998_v34 }
 0xefa   :  { %v7000_v28 = vsub.f32 %v14422_v20, %v6999_v30 }
 0xefc   :  { %v7001_v46 = vmul.f32 %v7000_v28, %v7000_v28 }
 0xefe   :  { %v7002_v32 = vsel %vm2285_vm0, %v7001_v46, 0.0 }
 0xeff   :  { %7003 = vadd.xlane.f32.xlu0 %v7002_v32 }
 0xf8c   :  { %v7004_v6 = vpop.xlane.xlu0 %7003 }
 0xf8d   :  { %v7005_v61 = vmul.f32 0.010416667, %v7004_v6 }
 0xf8f   :  { %v7006_v38 = vadd.f32 1e-06, %v7005_v61 }
 0xf91   :  { %8480 = vrsqrt.f32 %v7006_v38 }
 0xf9b   :  { %v8481_v2 = vpop.eup %8480 }
 0xf9c   :  { %v7008_v57 = vmul.f32 %v8481_v2, %v7000_v28 }
 0xf9e   :  { %v7015_v41 = vmul.f32 %v7523_v25, %v7008_v57 }
 0xfa0   :  { %v7022_v22 = vadd.f32 %v7524_v5, %v7015_v41 }
 0xfa2   :  { %7525 = vmatmul.mubr.msk.f32.vlgmr.msra.gmra.mrb[140].mxu1 %vm2285_vm0, %v7022_v22 }
0x1075   :  { %v7128_v40 = vpop.f32.mrb[140].mxu1 }
0x1076   :  { %v7129_v23 = vadd.f32 %v7128_v40, %v7052_v14  ;;  %v7130_v3 = vpop.f32.mrb[141].mxu1 }
0x1077   :  { %v7131_v35 = vadd.f32 %v7130_v3, %v7056_v50 }
0x1078   :  { %v7135_v34 = vmul.f32 0.70710677, %v7129_v23  ;;  %v7133_v54 = vmul.f32 0.5, %v7129_v23 }
0x1079   :  { %v7136_v30 = vmul.f32 0.70710677, %v7131_v35  ;;  %v7134_v26 = vmul.f32 0.5, %v7131_v35 }
0x107a   :  { %vm7137_vm12 = vcmp.ge.f32.partialorder %v7135_v34, 0.0  ;;  %v7139_v28 = vsub.f32 0.0, %v7135_v34 }
0x107b   :  { %vm7138_vm13 = vcmp.ge.f32.partialorder %v7136_v30, 0.0  ;;  %v7140_v46 = vsub.f32 0.0, %v7136_v30 }
0x107c   :  { %v7141_v0 = vsel %vm7137_vm12, %v7135_v34, %v7139_v28 }
0x107d   :  { %v7143_v32 = vmul.f32 0.3275911, %v7141_v0  ;;  %v7142_v10 = vsel %vm7138_vm13, %v7136_v30, %v7140_v46  ;;  %v7169_v6 = vsub.f32 0.0, %v7141_v0 }
0x107e   :  { %v7144_v9 = vmul.f32 0.3275911, %v7142_v10  ;;  %v7170_v61 = vsub.f32 0.0, %v7142_v10 }
0x107f   :  { %v7145_v45 = vadd.f32 1.0, %v7143_v32  ;;  %v7171_v2 = vmul.f32 %v7169_v6, %v7141_v0 }
0x1080   :  { %v7146_v37 = vadd.f32 1.0, %v7144_v9  ;;  %v7172_v5 = vmul.f32 %v7170_v61, %v7142_v10 }
0x1081   :  { %8482 = vrcp.f32 %v7145_v45  ;;  %v7173_v47 = vmul.f32 1.442695, %v7171_v2 }
0x1082   :  { %8484 = vrcp.f32 %v7146_v37  ;;  %v7175_v52 = vmul.f32 1.442695, %v7172_v5 }
0x1083   :  { %8486 = vpow2.f32 %v7173_v47 }
0x1084   :  { %8488 = vpow2.f32 %v7175_v52 }
0x108b   :  { %v8483_v38 = vpop.eup %8482 }
0x108c   :  { %v8485_v25 = vpop.eup %8484  ;;  %v7151_v57 = vmul.f32 1.0614054, %v8483_v38 }
0x108d   :  { %v7152_v41 = vmul.f32 1.0614054, %v8485_v25  ;;  %v8487_v16 = vpop.eup %8486 }
0x108e   :  { %v7153_v22 = vadd.f32 -1.4531521, %v7151_v57  ;;  %v8489_v15 = vpop.eup %8488 }
0x108f   :  { %v7154_v8 = vadd.f32 -1.4531521, %v7152_v41 }
0x1090   :  { %v7155_v11 = vmul.f32 %v8483_v38, %v7153_v22 }
0x1091   :  { %v7156_v43 = vmul.f32 %v8485_v25, %v7154_v8 }
0x1092   :  { %v7157_v17 = vadd.f32 1.4214138, %v7155_v11 }
0x1093   :  { %v7158_v13 = vadd.f32 1.4214138, %v7156_v43 }
0x1094   :  { %v7159_v53 = vmul.f32 %v8483_v38, %v7157_v17 }
0x1095   :  { %v7160_v19 = vmul.f32 %v8485_v25, %v7158_v13 }
0x1096   :  { %v7161_v31 = vadd.f32 -0.28449672, %v7159_v53 }
0x1097   :  { %v7162_v36 = vadd.f32 -0.28449672, %v7160_v19 }
0x1098   :  { %v7163_v39 = vmul.f32 %v8483_v38, %v7161_v31 }
0x1099   :  { %v7164_v48 = vmul.f32 %v8485_v25, %v7162_v36 }
0x109a   :  { %v7165_v55 = vadd.f32 0.2548296, %v7163_v39 }
0x109b   :  { %v7166_v7 = vadd.f32 0.2548296, %v7164_v48 }
0x109c   :  { %v7167_v44 = vmul.f32 %v8483_v38, %v7165_v55 }
0x109d   :  { %v7168_v60 = vmul.f32 %v8485_v25, %v7166_v7 }
0x109e   :  { %v7177_v58 = vmul.f32 %v8487_v16, %v7167_v44 }
0x109f   :  { %v7178_v21 = vmul.f32 %v8489_v15, %v7168_v60 }
0x10a0   :  { %v7179_v63 = vsub.f32 1.0, %v7177_v58 }
0x10a1   :  { %v7180_v4 = vsub.f32 1.0, %v7178_v21 }
0x10a2   :  { %v7181_v27 = vsub.f32 0.0, %v7179_v63 }
0x10a3   :  { %v7182_v59 = vsub.f32 0.0, %v7180_v4 }
0x10a4   :  { %v7183_v51 = vsel %vm7137_vm12, %v7179_v63, %v7181_v27 }
0x10a5   :  { %v7185_v18 = vadd.f32 1.0, %v7183_v51  ;;  %v7184_v33 = vsel %vm7138_vm13, %v7180_v4, %v7182_v59 }
0x10a6   :  { %v7186_v56 = vadd.f32 1.0, %v7184_v33 }
0x10a7   :  { %v7187_v62 = vmul.f32 %v7185_v18, %v7133_v54 }
0x10a8   :  { %v7188_v42 = vmul.f32 %v7186_v56, %v7134_v26 }
0x10aa   :  { %7527 = vmatprep.mubr.msk.f32.mxu0 %vm7220_vm14, %v7188_v42 }
0x10ab   :  { %7289 = vmatmul.mubr.f32.vlgmr.msra.gmra.mrb[118].mxu0 %v7187_v62 }
0x117e   :  { %v7290_v24 = vpop.f32.mrb[118].mxu0 }
0x117f   :  { %v7291_v29 = vadd.f32 %v7526_v12, %v7290_v24  ;;  %v7292_v49 = vpop.f32.mrb[119].mxu0 }
0x1181   :  { %v7294_v14 = vadd.f32 %v7291_v29, %v14422_v20 }
0x1183   :  { %7295 = vst.msk [vmem:[#allocation2] sm:$0xff] %vm2285_vm0, %v7294_v14 }
0x1184   :  { %8548 = shalt.err (!%p8545_p4)
}
0x1185   :  { %s8549_s21 = scalar_lea.hbm %s14638_s22, 128 }
0x1186   :  { %p8550_p5 = scmp.ne.s32.totalorder %s14638_s22, %s8549_s21  ;;  %p8553_p6 = scmp.lt.u32.totalorder %s8549_s21, %s14638_s22 }
0x1188   :  { %p8555_p7 = pnand %p8553_p6, %p8550_p5 }
0x118a   :  { %8558 = shalt.err (!%p8555_p7)
}
0x118b   :  { %7305 = dma.vmem_to_hbm [thread:$0]  %s7303_s9, 128, %s14638_s22, [#allocation3]  }
0x118c   :  { %8559 = dma.done.wait [#allocation3], 128  }
0x118d   :  { %8560 = vsyncadd [#allocation3], 4294967168 }
0x118e   :  { %7309 = vsyncpa [#allocation3], 1 }

</bundles_post_ra>
